<compile_context>
chip_gen: v5e
topology: v5e:2x2
jax: 0.10.0
libtpu: 0.0.40
codegen_flags: <defaults>
</compile_context>

<pallas_src>
import math

import jax
import jax.numpy as jnp
from jax.experimental import pallas as pl
from jax.experimental.pallas import tpu as pltpu

# ----------------------- small config consistent with the module ---------------
B = 2               # batch
L = 8               # sequence length
VOCAB = 100         # toy vocab for the synthetic BERT encoder
MAX_POS = 64
ENC_DIM = 32        # encoder_embed_dim ('tiny' = 128 in reference; scaled down)
ENC_HEADS = 4
ENC_DEPTH = 2
ENC_FFN = 4 * ENC_DIM
NUM_SYMBOLS = 24    # self.num_symbols (kept exact; even -> complex pairs)
DEC_DIM = 64        # decoder_embed_dim (512 in reference; scaled down)
DEC_HEADS = 4
DEC_DEPTH = 2       # decoder_depth (8 in reference; scaled down)
DEC_FFN = 4 * DEC_DIM
TEXTR_NUMCLASS = 48 # head output classes (scaled down)
HEAD_PAD = 128      # lane-dense padded head output width (sliced back in glue)
SLAB_W = 256        # lane width of the packed weight slab (covers widest weight)


# ============================ weight slab packing (glue) ========================

class _SlabPacker:
    """Packs weights / bias rows into one lane-dense [rows, SLAB_W] f32 slab.

    Every entry starts at an 8-aligned row offset and at lane 0, so in-kernel
    static slices are aligned views of a single VMEM operand."""

    def __init__(self, width):
        self.width = width
        self.parts = []
        self.index = {}     # name -> (row_offset, rows, cols)   (static Python ints)
        self.row = 0

    def add(self, name, arr):
        arr = jnp.asarray(arr, jnp.float32)
        if arr.ndim == 1:
            arr = arr[None, :]
        r, c = arr.shape
        rpad = (-r) % 8
        part = jnp.pad(arr, ((0, rpad), (0, self.width - c)))
        self.index[name] = (self.row, r, c)
        self.parts.append(part)
        self.row += r + rpad

    def finalize(self):
        return jnp.concatenate(self.parts, axis=0), self.index


def _pack_net(net):
    pk = _SlabPacker(SLAB_W)
    bert = net["bert"]
    pk.add("emb_ln_g", bert["emb_ln_g"]); pk.add("emb_ln_b", bert["emb_ln_b"])

    dh_e = ENC_DIM // ENC_HEADS
    sc_e = 1.0 / math.sqrt(dh_e)
    for i, lp in enumerate(bert["layers"]):
        p = f"e{i}."
        # Fold 1/sqrt(dh) into Q columns + Q bias at pack time.
        wqkv = jnp.concatenate(
            [lp["wqkv"][:, :ENC_DIM] * sc_e, lp["wqkv"][:, ENC_DIM:]], axis=1)
        pk.add(p + "wqkv", wqkv)
        pk.add(p + "qb", (lp["bqkv"][0, :ENC_DIM] * sc_e).reshape(ENC_HEADS, dh_e))
        pk.add(p + "wo", lp["wo"])
        # V-bias folded into output-projection bias (softmax rows sum to 1);
        # K-bias dropped (softmax is invariant to a per-row constant shift).
        pk.add(p + "bo", lp["bo"] + lp["bqkv"][:, 2 * ENC_DIM:] @ lp["wo"])
        pk.add(p + "ln1_g", lp["ln1_g"]); pk.add(p + "ln1_b", lp["ln1_b"])
        pk.add(p + "wi", lp["w_inter"]); pk.add(p + "bi", lp["b_inter"])
        pk.add(p + "wf", lp["w_out"]);   pk.add(p + "bf", lp["b_out"])
        pk.add(p + "ln2_g", lp["ln2_g"]); pk.add(p + "ln2_b", lp["ln2_b"])

    pk.add("enc2ch_w", net["enc2ch_w"]); pk.add("enc2ch_b", net["enc2ch_b"])
    pk.add("ch2dec_w", net["ch2dec_w"]); pk.add("ch2dec_b", net["ch2dec_b"])

    dh_d = DEC_DIM // DEC_HEADS
    sc_d = 1.0 / math.sqrt(dh_d)
    for i, lp in enumerate(net["decoder"]):
        p = f"d{i}."
        swqkv = jnp.concatenate(
            [lp["self_wqkv"][:, :DEC_DIM] * sc_d, lp["self_wqkv"][:, DEC_DIM:]], axis=1)
        pk.add(p + "s_wqkv", swqkv)
        pk.add(p + "s_qb", (lp["self_bqkv"][0, :DEC_DIM] * sc_d).reshape(DEC_HEADS, dh_d))
        pk.add(p + "s_wo", lp["self_wo"])
        pk.add(p + "s_bo", lp["self_bo"] + lp["self_bqkv"][:, 2 * DEC_DIM:] @ lp["self_wo"])

        cwqkv = jnp.concatenate([lp["cross_wq"] * sc_d, lp["cross_wkv"]], axis=1)
        pk.add(p + "c_wqkv", cwqkv)
        pk.add(p + "c_qb", (lp["cross_bq"][0] * sc_d).reshape(DEC_HEADS, dh_d))
        pk.add(p + "c_wo", lp["cross_wo"])
        pk.add(p + "c_bo", lp["cross_bo"] + lp["cross_bkv"][:, DEC_DIM:] @ lp["cross_wo"])

        pk.add(p + "ln1_g", lp["ln1_g"]); pk.add(p + "ln1_b", lp["ln1_b"])
        pk.add(p + "ln2_g", lp["ln2_g"]); pk.add(p + "ln2_b", lp["ln2_b"])
        pk.add(p + "w1", lp["w1"]); pk.add(p + "b1", lp["b1"])
        pk.add(p + "w2", lp["w2"]); pk.add(p + "b2", lp["b2"])
        pk.add(p + "ln3_g", lp["ln3_g"]); pk.add(p + "ln3_b", lp["ln3_b"])

    pk.add("head_w", net["head_w"]); pk.add("head_b", net["head_b"])
    return pk.finalize()


# ============================ single fused Pallas kernel ========================

def _make_kernel(idx, seqlen):
    def kernel(x_ref, noise_ref, slab_ref, out_ref):

        def rd(name):                     # lane-0-aligned static view of the slab
            r, nr, nc = idx[name]
            return slab_ref[r:r + nr, :nc]

        def ln(x, g, b, eps):
            mu = jnp.mean(x, axis=-1, keepdims=True)
            var = jnp.mean(jnp.square(x - mu), axis=-1, keepdims=True)
            return (x - mu) * jax.lax.rsqrt(var + eps) * rd(g) + rd(b)

        def dense(x, wname, bname, act=None):
            y = jnp.dot(x, rd(wname), preferred_element_type=jnp.float32) + rd(bname)
            if act == "relu":
                y = jnp.maximum(y, 0.0)
            elif act == "gelu":
                # TODO(synk): BERT reference uses erf-gelu; tanh approximation kept
                # for Mosaic-lowering safety (small numeric drift).
                y = jax.nn.gelu(y)
            return y

        def attention(xq, xkv, wname, qbname, woname, boname, heads, dim):
            # Per-head Q/K/V via weight-side slices -> every matmul output is
            # lane-0-aligned; one fused output projection per block.
            dh = dim // heads
            wqkv = rd(wname)              # [d_in, 3*dim], Q columns pre-scaled
            qb = rd(qbname)               # [heads, dh], pre-scaled Q bias rows
            outs = []
            for h in range(heads):
                wq = wqkv[:, h * dh:(h + 1) * dh]
                wk = wqkv[:, dim + h * dh:dim + (h + 1) * dh]
                wv = wqkv[:, 2 * dim + h * dh:2 * dim + (h + 1) * dh]
                q = jnp.dot(xq, wq, preferred_element_type=jnp.float32) + qb[h:h + 1, :]
                k = jnp.dot(xkv, wk, preferred_element_type=jnp.float32)
                v = jnp.dot(xkv, wv, preferred_element_type=jnp.float32)
                s = jax.lax.dot_general(q, k, (((1,), (1,)), ((), ())),
                                        preferred_element_type=jnp.float32)
                s = s - jnp.max(s, axis=-1, keepdims=True)
                e = jnp.exp(s)
                p = e * pl.reciprocal(jnp.sum(e, axis=-1, keepdims=True), approx=True)
                outs.append(jnp.dot(p, v, preferred_element_type=jnp.float32))
            o = jnp.concatenate(outs, axis=-1)                           # [M, dim]
            return jnp.dot(o, rd(woname),
                           preferred_element_type=jnp.float32) + rd(boname)

        # ---------------- BERT-style text encoder (post-LN, eps=1e-12) --------
        x = ln(x_ref[...], "emb_ln_g", "emb_ln_b", 1e-12)
        for i in range(ENC_DEPTH):
            p = f"e{i}."
            a = attention(x, x, p + "wqkv", p + "qb", p + "wo", p + "bo",
                          ENC_HEADS, ENC_DIM)
            x = ln(x + a, p + "ln1_g", p + "ln1_b", 1e-12)
            h = dense(x, p + "wi", p + "bi", act="gelu")
            h = dense(h, p + "wf", p + "bf")
            x = ln(x + h, p + "ln2_g", p + "ln2_b", 1e-12)

        # ---------------- encoder_to_channel + power_norm_batchwise -----------
        # One grid program == one batch element, so the per-batch power reduce is
        # a single full-tile reduction (no per-batch loop / masking).
        xc = dense(x, "enc2ch_w", "enc2ch_b")                 # [L, NUM_SYMBOLS]
        pw = jnp.sum(xc * xc, keepdims=True) * (2.0 / (seqlen * NUM_SYMBOLS))
        xn = xc * jax.lax.rsqrt(pw)

        # ---------------- Rayleigh channel (collapsed) -------------------------
        # (x@H + n)@H^-1 == x + n@H^-1; n@H^-1 is precomputed in glue.
        rx = xn + noise_ref[...]

        # ---------------- channel_to_decoder + transformer decoder ------------
        xd = dense(rx, "ch2dec_w", "ch2dec_b")                # [L, DEC_DIM]
        mem = xd                                              # decoder(x, x, ...)
        for i in range(DEC_DEPTH):
            p = f"d{i}."
            a = attention(xd, xd, p + "s_wqkv", p + "s_qb", p + "s_wo", p + "s_bo",
                          DEC_HEADS, DEC_DIM)
            xd = ln(xd + a, p + "ln1_g", p + "ln1_b", 1e-6)
            c = attention(xd, mem, p + "c_wqkv", p + "c_qb", p + "c_wo", p + "c_bo",
                          DEC_HEADS, DEC_DIM)
            xd = ln(xd + c, p + "ln2_g", p + "ln2_b", 1e-6)
            h = dense(xd, p + "w1", p + "b1", act="relu")
            h = dense(h, p + "w2", p + "b2")
            xd = ln(xd + h, p + "ln3_g", p + "ln3_b", 1e-6)

        # ---------------- head (lane-dense 128-wide slab; sliced back in glue) -
        out_ref[...] = dense(xd, "head_w", "head_b").astype(out_ref.dtype)

    return kernel


# =============================== forward (glue + kernel) ========================

def tdeepsc_textr_forward(params, input_ids, channel_key, test_snr=12.0):
    emb = params["embed"]
    net = params["net"]
    bsz, slen = input_ids.shape

    # Embedding gather stays in JAX glue (data-dependent gather).
    x = (jnp.take(emb["word_emb"], input_ids, axis=0)
         + emb["pos_emb"][:slen][None, :, :]
         + emb["type_emb"][0][None, None, :])
    x = x.reshape(bsz * slen, ENC_DIM).astype(jnp.float32)

    # eval-mode noise std = 10 ** (-test_snr / 20); Rayleigh channel collapsed:
    # (Tx@H + n)@H^-1 == Tx + n@H^-1, so only n@H^-1 needs to reach the kernel.
    noise_std = 10.0 ** (-jnp.asarray(test_snr, jnp.float32) / 20.0)
    kh, kn = jax.random.split(channel_key)
    hri = jax.random.normal(kh, (2,), jnp.float32) * jnp.float32(math.sqrt(0.5))
    hr, hi = hri[0], hri[1]
    h2inv = (jnp.stack([jnp.stack([hr, hi]), jnp.stack([-hi, hr])])
             / (hr * hr + hi * hi))
    noise = jax.random.normal(kn, (bsz * slen, NUM_SYMBOLS), jnp.float32) * noise_std
    noise_eff = (noise.reshape(bsz * slen, NUM_SYMBOLS // 2, 2) @ h2inv
                 ).reshape(bsz * slen, NUM_SYMBOLS)

    # Pack every weight/bias into ONE lane-dense VMEM slab (static offset index).
    slab, idx = _pack_net(net)

    out = pl.pallas_call(
        _make_kernel(idx, slen),
        out_shape=jax.ShapeDtypeStruct((bsz * slen, HEAD_PAD), jnp.float32),
        grid=(bsz,),
        in_specs=[
            pl.BlockSpec((slen, ENC_DIM), lambda b: (b, 0)),        # x rows
            pl.BlockSpec((slen, NUM_SYMBOLS), lambda b: (b, 0)),    # noise rows
            pl.BlockSpec(slab.shape, lambda b: (0, 0)),             # resident slab
        ],
        out_specs=pl.BlockSpec((slen, HEAD_PAD), lambda b: (b, 0)),
        compiler_params=pltpu.CompilerParams(
            dimension_semantics=("parallel",)),                     # 2 TCs on v7x
    )(x, noise_eff, slab)

    # TODO(synk): query_embedd.weight.repeat(...) in the reference forward is dead
    # code (never consumed) -> omitted.
    return out[:, :TEXTR_NUMCLASS].reshape(bsz, slen, TEXTR_NUMCLASS)


# ============================== deterministic init ==============================

def _xavier(key, din, dout):
    limit = math.sqrt(6.0 / (din + dout))          # xavier-uniform
    return jax.random.uniform(key, (din, dout), jnp.float32, -limit, limit)


def init_params(key):
    keys = iter(jax.random.split(key, 256))
    ones2 = lambda n: jnp.ones((1, n), jnp.float32)
    zeros2 = lambda n: jnp.zeros((1, n), jnp.float32)

    def fused_proj(d_in, d_out, n_proj):
        w = jnp.concatenate([_xavier(next(keys), d_in, d_out) for _ in range(n_proj)],
                            axis=1)
        return w, zeros2(d_out * n_proj)

    bert_layers = []
    for _ in range(ENC_DEPTH):
        wqkv, bqkv = fused_proj(ENC_DIM, ENC_DIM, 3)
        bert_layers.append(dict(
            wqkv=wqkv, bqkv=bqkv,
            wo=_xavier(next(keys), ENC_DIM, ENC_DIM), bo=zeros2(ENC_DIM),
            ln1_g=ones2(ENC_DIM), ln1_b=zeros2(ENC_DIM),
            w_inter=_xavier(next(keys), ENC_DIM, ENC_FFN), b_inter=zeros2(ENC_FFN),
            w_out=_xavier(next(keys), ENC_FFN, ENC_DIM), b_out=zeros2(ENC_DIM),
            ln2_g=ones2(ENC_DIM), ln2_b=zeros2(ENC_DIM)))

    dec_layers = []
    for _ in range(DEC_DEPTH):
        s_wqkv, s_bqkv = fused_proj(DEC_DIM, DEC_DIM, 3)
        c_wkv, c_bkv = fused_proj(DEC_DIM, DEC_DIM, 2)
        dec_layers.append(dict(
            self_wqkv=s_wqkv, self_bqkv=s_bqkv,
            self_wo=_xavier(next(keys), DEC_DIM, DEC_DIM), self_bo=zeros2(DEC_DIM),
            cross_wq=_xavier(next(keys), DEC_DIM, DEC_DIM), cross_bq=zeros2(DEC_DIM),
            cross_wkv=c_wkv, cross_bkv=c_bkv,
            cross_wo=_xavier(next(keys), DEC_DIM, DEC_DIM), cross_bo=zeros2(DEC_DIM),
            ln1_g=ones2(DEC_DIM), ln1_b=zeros2(DEC_DIM),
            ln2_g=ones2(DEC_DIM), ln2_b=zeros2(DEC_DIM),
            ln3_g=ones2(DEC_DIM), ln3_b=zeros2(DEC_DIM),
            w1=_xavier(next(keys), DEC_DIM, DEC_FFN), b1=zeros2(DEC_FFN),
            w2=_xavier(next(keys), DEC_FFN, DEC_DIM), b2=zeros2(DEC_DIM)))

    head_w = _xavier(next(keys), DEC_DIM, TEXTR_NUMCLASS)
    head_w = jnp.concatenate(
        [head_w, jnp.zeros((DEC_DIM, HEAD_PAD - TEXTR_NUMCLASS), jnp.float32)], axis=1)

    net = dict(
        bert=dict(emb_ln_g=ones2(ENC_DIM), emb_ln_b=zeros2(ENC_DIM),
                  layers=bert_layers),
        enc2ch_w=_xavier(next(keys), ENC_DIM, NUM_SYMBOLS),
        enc2ch_b=zeros2(NUM_SYMBOLS),
        ch2dec_w=_xavier(next(keys), NUM_SYMBOLS, DEC_DIM),
        ch2dec_b=zeros2(DEC_DIM),
        decoder=dec_layers,
        head_w=head_w, head_b=zeros2(HEAD_PAD))

    embed = dict(
        word_emb=jax.random.normal(next(keys), (VOCAB, ENC_DIM), jnp.float32) * 0.02,
        pos_emb=jax.random.normal(next(keys), (MAX_POS, ENC_DIM), jnp.float32) * 0.02,
        type_emb=jax.random.normal(next(keys), (2, ENC_DIM), jnp.float32) * 0.02)

    return dict(embed=embed, net=net)


# ===================================== main =====================================

if __name__ == "__main__":
    root = jax.random.PRNGKey(0)
    k_params, k_text, k_channel = jax.random.split(root, 3)

    params = init_params(k_params)
    input_ids = jax.random.randint(k_text, (B, L), 0, VOCAB, dtype=jnp.int32)

    fwd = jax.jit(tdeepsc_textr_forward)
    out = fwd(params, input_ids, k_channel, 12.0)
    out = jax.block_until_ready(out)

    assert out.shape == (B, L, TEXTR_NUMCLASS), out.shape
    assert bool(jnp.all(jnp.isfinite(out)))
    print("KERNEL_OK")
</pallas_src>

<mosaic_0001>
module attributes {stable_mosaic.version = 11 : i64} {
  func.func @kernel(%arg0: i32, %arg1: memref<8x32xf32, #tpu.memory_space<vmem>>, %arg2: memref<8x24xf32, #tpu.memory_space<vmem>>, %arg3: memref<2080x256xf32, #tpu.memory_space<vmem>>, %arg4: memref<8x128xf32, #tpu.memory_space<vmem>>) attributes {dimension_semantics = [#tpu.dimension_semantics<parallel>], iteration_bounds = array<i64: 2>, scalar_prefetch = 0 : i64, scratch_operands = 0 : i64, tpu.core_type = #tpu.core_type<tc>, window_params = [{transform_indices = @transform_0, window_bounds = array<i64: 8, 32>}, {transform_indices = @transform_1, window_bounds = array<i64: 8, 24>}, {pipeline_mode = #tpu.pipeline_mode<synchronous>, transform_indices = @transform_2, window_bounds = array<i64: 2080, 256>}, {transform_indices = @transform_3, window_bounds = array<i64: 8, 128>}]} {
    %c0 = arith.constant 0 : index
    %c0_0 = arith.constant 0 : index
    %0 = vector.load %arg1[%c0, %c0_0] : memref<8x32xf32, #tpu.memory_space<vmem>>, vector<8x32xf32>
    %cst = arith.constant dense<0.000000e+00> : vector<8xf32>
    %1 = vector.multi_reduction <add>, %0, %cst [1] : vector<8x32xf32> to vector<8xf32>
    %2 = vector.shape_cast %1 : vector<8xf32> to vector<8x1xf32>
    %cst_1 = arith.constant 3.200000e+01 : f32
    %3 = vector.broadcast %cst_1 : f32 to vector<8x1xf32>
    %4 = arith.divf %2, %3 : vector<8x1xf32>
    %5 = vector.broadcast %4 : vector<8x1xf32> to vector<8x32xf32>
    %6 = arith.subf %0, %5 : vector<8x32xf32>
    %7 = arith.mulf %6, %6 : vector<8x32xf32>
    %cst_2 = arith.constant dense<0.000000e+00> : vector<8xf32>
    %8 = vector.multi_reduction <add>, %7, %cst_2 [1] : vector<8x32xf32> to vector<8xf32>
    %9 = vector.shape_cast %8 : vector<8xf32> to vector<8x1xf32>
    %cst_3 = arith.constant 3.200000e+01 : f32
    %10 = vector.broadcast %cst_3 : f32 to vector<8x1xf32>
    %11 = arith.divf %9, %10 : vector<8x1xf32>
    %12 = vector.broadcast %4 : vector<8x1xf32> to vector<8x32xf32>
    %13 = arith.subf %0, %12 : vector<8x32xf32>
    %cst_4 = arith.constant 9.99999996E-13 : f32
    %14 = vector.broadcast %cst_4 : f32 to vector<8x1xf32>
    %15 = arith.addf %11, %14 : vector<8x1xf32>
    %16 = math.rsqrt %15 : vector<8x1xf32>
    %17 = vector.broadcast %16 : vector<8x1xf32> to vector<8x32xf32>
    %18 = arith.mulf %13, %17 : vector<8x32xf32>
    %c0_5 = arith.constant 0 : index
    %c0_6 = arith.constant 0 : index
    %19 = vector.load %arg3[%c0_5, %c0_6] : memref<2080x256xf32, #tpu.memory_space<vmem>>, vector<1x32xf32>
    %20 = vector.broadcast %19 : vector<1x32xf32> to vector<8x32xf32>
    %21 = arith.mulf %18, %20 : vector<8x32xf32>
    %c8 = arith.constant 8 : index
    %c0_7 = arith.constant 0 : index
    %22 = vector.load %arg3[%c8, %c0_7] : memref<2080x256xf32, #tpu.memory_space<vmem>>, vector<1x32xf32>
    %23 = vector.broadcast %22 : vector<1x32xf32> to vector<8x32xf32>
    %24 = arith.addf %21, %23 : vector<8x32xf32>
    %c16 = arith.constant 16 : index
    %c0_8 = arith.constant 0 : index
    %25 = vector.load %arg3[%c16, %c0_8] : memref<2080x256xf32, #tpu.memory_space<vmem>>, vector<32x96xf32>
    %c48 = arith.constant 48 : index
    %c0_9 = arith.constant 0 : index
    %26 = vector.load %arg3[%c48, %c0_9] : memref<2080x256xf32, #tpu.memory_space<vmem>>, vector<4x8xf32>
    %27 = vector.extract_strided_slice %25 {offsets = [0, 0], sizes = [32, 8], strides = [1, 1]} : vector<32x96xf32> to vector<32x8xf32>
    %28 = vector.extract_strided_slice %25 {offsets = [0, 32], sizes = [32, 8], strides = [1, 1]} : vector<32x96xf32> to vector<32x8xf32>
    %29 = vector.extract_strided_slice %25 {offsets = [0, 64], sizes = [32, 8], strides = [1, 1]} : vector<32x96xf32> to vector<32x8xf32>
    %cst_10 = arith.constant dense<0.000000e+00> : vector<8x8xf32>
    %30 = tpu.matmul %24, %27, %cst_10 {dimension_numbers = #tpu.dot_dimension_numbers<[1], [0], [0], [1], [0, 0, 1, 1], [], []>} : vector<8x32xf32>, vector<32x8xf32>, vector<8x8xf32> -> vector<8x8xf32>
    %31 = vector.extract_strided_slice %26 {offsets = [0, 0], sizes = [1, 8], strides = [1, 1]} : vector<4x8xf32> to vector<1x8xf32>
    %32 = vector.broadcast %31 : vector<1x8xf32> to vector<8x8xf32>
    %33 = arith.addf %30, %32 : vector<8x8xf32>
    %cst_11 = arith.constant dense<0.000000e+00> : vector<8x8xf32>
    %34 = tpu.matmul %24, %28, %cst_11 {dimension_numbers = #tpu.dot_dimension_numbers<[1], [0], [0], [1], [0, 0, 1, 1], [], []>} : vector<8x32xf32>, vector<32x8xf32>, vector<8x8xf32> -> vector<8x8xf32>
    %cst_12 = arith.constant dense<0.000000e+00> : vector<8x8xf32>
    %35 = tpu.matmul %24, %29, %cst_12 {dimension_numbers = #tpu.dot_dimension_numbers<[1], [0], [0], [1], [0, 0, 1, 1], [], []>} : vector<8x32xf32>, vector<32x8xf32>, vector<8x8xf32> -> vector<8x8xf32>
    %cst_13 = arith.constant dense<0.000000e+00> : vector<8x8xf32>
    %36 = tpu.matmul %33, %34, %cst_13 {dimension_numbers = #tpu.dot_dimension_numbers<[1], [1], [0], [0], [0, 0, 1, 0], [], []>} : vector<8x8xf32>, vector<8x8xf32>, vector<8x8xf32> -> vector<8x8xf32>
    %cst_14 = arith.constant dense<0xFF800000> : vector<8xf32>
    %37 = vector.multi_reduction <maximumf>, %36, %cst_14 [1] : vector<8x8xf32> to vector<8xf32>
    %38 = vector.shape_cast %37 : vector<8xf32> to vector<8x1xf32>
    %39 = vector.broadcast %38 : vector<8x1xf32> to vector<8x8xf32>
    %40 = arith.subf %36, %39 : vector<8x8xf32>
    %41 = math.exp %40 : vector<8x8xf32>
    %cst_15 = arith.constant dense<0.000000e+00> : vector<8xf32>
    %42 = vector.multi_reduction <add>, %41, %cst_15 [1] : vector<8x8xf32> to vector<8xf32>
    %43 = vector.shape_cast %42 : vector<8xf32> to vector<8x1xf32>
    %44 = tpu.reciprocal %43 {approx = true} : vector<8x1xf32> -> vector<8x1xf32>
    %45 = vector.broadcast %44 : vector<8x1xf32> to vector<8x8xf32>
    %46 = arith.mulf %41, %45 : vector<8x8xf32>
    %cst_16 = arith.constant dense<0.000000e+00> : vector<8x8xf32>
    %47 = tpu.matmul %46, %35, %cst_16 {dimension_numbers = #tpu.dot_dimension_numbers<[1], [0], [0], [1], [0, 0, 1, 1], [], []>} : vector<8x8xf32>, vector<8x8xf32>, vector<8x8xf32> -> vector<8x8xf32>
    %48 = vector.extract_strided_slice %25 {offsets = [0, 8], sizes = [32, 8], strides = [1, 1]} : vector<32x96xf32> to vector<32x8xf32>
    %49 = vector.extract_strided_slice %25 {offsets = [0, 40], sizes = [32, 8], strides = [1, 1]} : vector<32x96xf32> to vector<32x8xf32>
    %50 = vector.extract_strided_slice %25 {offsets = [0, 72], sizes = [32, 8], strides = [1, 1]} : vector<32x96xf32> to vector<32x8xf32>
    %cst_17 = arith.constant dense<0.000000e+00> : vector<8x8xf32>
    %51 = tpu.matmul %24, %48, %cst_17 {dimension_numbers = #tpu.dot_dimension_numbers<[1], [0], [0], [1], [0, 0, 1, 1], [], []>} : vector<8x32xf32>, vector<32x8xf32>, vector<8x8xf32> -> vector<8x8xf32>
    %52 = vector.extract_strided_slice %26 {offsets = [1, 0], sizes = [1, 8], strides = [1, 1]} : vector<4x8xf32> to vector<1x8xf32>
    %53 = vector.broadcast %52 : vector<1x8xf32> to vector<8x8xf32>
    %54 = arith.addf %51, %53 : vector<8x8xf32>
    %cst_18 = arith.constant dense<0.000000e+00> : vector<8x8xf32>
    %55 = tpu.matmul %24, %49, %cst_18 {dimension_numbers = #tpu.dot_dimension_numbers<[1], [0], [0], [1], [0, 0, 1, 1], [], []>} : vector<8x32xf32>, vector<32x8xf32>, vector<8x8xf32> -> vector<8x8xf32>
    %cst_19 = arith.constant dense<0.000000e+00> : vector<8x8xf32>
    %56 = tpu.matmul %24, %50, %cst_19 {dimension_numbers = #tpu.dot_dimension_numbers<[1], [0], [0], [1], [0, 0, 1, 1], [], []>} : vector<8x32xf32>, vector<32x8xf32>, vector<8x8xf32> -> vector<8x8xf32>
    %cst_20 = arith.constant dense<0.000000e+00> : vector<8x8xf32>
    %57 = tpu.matmul %54, %55, %cst_20 {dimension_numbers = #tpu.dot_dimension_numbers<[1], [1], [0], [0], [0, 0, 1, 0], [], []>} : vector<8x8xf32>, vector<8x8xf32>, vector<8x8xf32> -> vector<8x8xf32>
    %cst_21 = arith.constant dense<0xFF800000> : vector<8xf32>
    %58 = vector.multi_reduction <maximumf>, %57, %cst_21 [1] : vector<8x8xf32> to vector<8xf32>
    %59 = vector.shape_cast %58 : vector<8xf32> to vector<8x1xf32>
    %60 = vector.broadcast %59 : vector<8x1xf32> to vector<8x8xf32>
    %61 = arith.subf %57, %60 : vector<8x8xf32>
    %62 = math.exp %61 : vector<8x8xf32>
    %cst_22 = arith.constant dense<0.000000e+00> : vector<8xf32>
    %63 = vector.multi_reduction <add>, %62, %cst_22 [1] : vector<8x8xf32> to vector<8xf32>
    %64 = vector.shape_cast %63 : vector<8xf32> to vector<8x1xf32>
    %65 = tpu.reciprocal %64 {approx = true} : vector<8x1xf32> -> vector<8x1xf32>
    %66 = vector.broadcast %65 : vector<8x1xf32> to vector<8x8xf32>
    %67 = arith.mulf %62, %66 : vector<8x8xf32>
    %cst_23 = arith.constant dense<0.000000e+00> : vector<8x8xf32>
    %68 = tpu.matmul %67, %56, %cst_23 {dimension_numbers = #tpu.dot_dimension_numbers<[1], [0], [0], [1], [0, 0, 1, 1], [], []>} : vector<8x8xf32>, vector<8x8xf32>, vector<8x8xf32> -> vector<8x8xf32>
    %69 = vector.extract_strided_slice %25 {offsets = [0, 16], sizes = [32, 8], strides = [1, 1]} : vector<32x96xf32> to vector<32x8xf32>
    %70 = vector.extract_strided_slice %25 {offsets = [0, 48], sizes = [32, 8], strides = [1, 1]} : vector<32x96xf32> to vector<32x8xf32>
    %71 = vector.extract_strided_slice %25 {offsets = [0, 80], sizes = [32, 8], strides = [1, 1]} : vector<32x96xf32> to vector<32x8xf32>
    %cst_24 = arith.constant dense<0.000000e+00> : vector<8x8xf32>
    %72 = tpu.matmul %24, %69, %cst_24 {dimension_numbers = #tpu.dot_dimension_numbers<[1], [0], [0], [1], [0, 0, 1, 1], [], []>} : vector<8x32xf32>, vector<32x8xf32>, vector<8x8xf32> -> vector<8x8xf32>
    %73 = vector.extract_strided_slice %26 {offsets = [2, 0], sizes = [1, 8], strides = [1, 1]} : vector<4x8xf32> to vector<1x8xf32>
    %74 = vector.broadcast %73 : vector<1x8xf32> to vector<8x8xf32>
    %75 = arith.addf %72, %74 : vector<8x8xf32>
    %cst_25 = arith.constant dense<0.000000e+00> : vector<8x8xf32>
    %76 = tpu.matmul %24, %70, %cst_25 {dimension_numbers = #tpu.dot_dimension_numbers<[1], [0], [0], [1], [0, 0, 1, 1], [], []>} : vector<8x32xf32>, vector<32x8xf32>, vector<8x8xf32> -> vector<8x8xf32>
    %cst_26 = arith.constant dense<0.000000e+00> : vector<8x8xf32>
    %77 = tpu.matmul %24, %71, %cst_26 {dimension_numbers = #tpu.dot_dimension_numbers<[1], [0], [0], [1], [0, 0, 1, 1], [], []>} : vector<8x32xf32>, vector<32x8xf32>, vector<8x8xf32> -> vector<8x8xf32>
    %cst_27 = arith.constant dense<0.000000e+00> : vector<8x8xf32>
    %78 = tpu.matmul %75, %76, %cst_27 {dimension_numbers = #tpu.dot_dimension_numbers<[1], [1], [0], [0], [0, 0, 1, 0], [], []>} : vector<8x8xf32>, vector<8x8xf32>, vector<8x8xf32> -> vector<8x8xf32>
    %cst_28 = arith.constant dense<0xFF800000> : vector<8xf32>
    %79 = vector.multi_reduction <maximumf>, %78, %cst_28 [1] : vector<8x8xf32> to vector<8xf32>
    %80 = vector.shape_cast %79 : vector<8xf32> to vector<8x1xf32>
    %81 = vector.broadcast %80 : vector<8x1xf32> to vector<8x8xf32>
    %82 = arith.subf %78, %81 : vector<8x8xf32>
    %83 = math.exp %82 : vector<8x8xf32>
    %cst_29 = arith.constant dense<0.000000e+00> : vector<8xf32>
    %84 = vector.multi_reduction <add>, %83, %cst_29 [1] : vector<8x8xf32> to vector<8xf32>
    %85 = vector.shape_cast %84 : vector<8xf32> to vector<8x1xf32>
    %86 = tpu.reciprocal %85 {approx = true} : vector<8x1xf32> -> vector<8x1xf32>
    %87 = vector.broadcast %86 : vector<8x1xf32> to vector<8x8xf32>
    %88 = arith.mulf %83, %87 : vector<8x8xf32>
    %cst_30 = arith.constant dense<0.000000e+00> : vector<8x8xf32>
    %89 = tpu.matmul %88, %77, %cst_30 {dimension_numbers = #tpu.dot_dimension_numbers<[1], [0], [0], [1], [0, 0, 1, 1], [], []>} : vector<8x8xf32>, vector<8x8xf32>, vector<8x8xf32> -> vector<8x8xf32>
    %90 = vector.extract_strided_slice %25 {offsets = [0, 24], sizes = [32, 8], strides = [1, 1]} : vector<32x96xf32> to vector<32x8xf32>
    %91 = vector.extract_strided_slice %25 {offsets = [0, 56], sizes = [32, 8], strides = [1, 1]} : vector<32x96xf32> to vector<32x8xf32>
    %92 = vector.extract_strided_slice %25 {offsets = [0, 88], sizes = [32, 8], strides = [1, 1]} : vector<32x96xf32> to vector<32x8xf32>
    %cst_31 = arith.constant dense<0.000000e+00> : vector<8x8xf32>
    %93 = tpu.matmul %24, %90, %cst_31 {dimension_numbers = #tpu.dot_dimension_numbers<[1], [0], [0], [1], [0, 0, 1, 1], [], []>} : vector<8x32xf32>, vector<32x8xf32>, vector<8x8xf32> -> vector<8x8xf32>
    %94 = vector.extract_strided_slice %26 {offsets = [3, 0], sizes = [1, 8], strides = [1, 1]} : vector<4x8xf32> to vector<1x8xf32>
    %95 = vector.broadcast %94 : vector<1x8xf32> to vector<8x8xf32>
    %96 = arith.addf %93, %95 : vector<8x8xf32>
    %cst_32 = arith.constant dense<0.000000e+00> : vector<8x8xf32>
    %97 = tpu.matmul %24, %91, %cst_32 {dimension_numbers = #tpu.dot_dimension_numbers<[1], [0], [0], [1], [0, 0, 1, 1], [], []>} : vector<8x32xf32>, vector<32x8xf32>, vector<8x8xf32> -> vector<8x8xf32>
    %cst_33 = arith.constant dense<0.000000e+00> : vector<8x8xf32>
    %98 = tpu.matmul %24, %92, %cst_33 {dimension_numbers = #tpu.dot_dimension_numbers<[1], [0], [0], [1], [0, 0, 1, 1], [], []>} : vector<8x32xf32>, vector<32x8xf32>, vector<8x8xf32> -> vector<8x8xf32>
    %cst_34 = arith.constant dense<0.000000e+00> : vector<8x8xf32>
    %99 = tpu.matmul %96, %97, %cst_34 {dimension_numbers = #tpu.dot_dimension_numbers<[1], [1], [0], [0], [0, 0, 1, 0], [], []>} : vector<8x8xf32>, vector<8x8xf32>, vector<8x8xf32> -> vector<8x8xf32>
    %cst_35 = arith.constant dense<0xFF800000> : vector<8xf32>
    %100 = vector.multi_reduction <maximumf>, %99, %cst_35 [1] : vector<8x8xf32> to vector<8xf32>
    %101 = vector.shape_cast %100 : vector<8xf32> to vector<8x1xf32>
    %102 = vector.broadcast %101 : vector<8x1xf32> to vector<8x8xf32>
    %103 = arith.subf %99, %102 : vector<8x8xf32>
    %104 = math.exp %103 : vector<8x8xf32>
    %cst_36 = arith.constant dense<0.000000e+00> : vector<8xf32>
    %105 = vector.multi_reduction <add>, %104, %cst_36 [1] : vector<8x8xf32> to vector<8xf32>
    %106 = vector.shape_cast %105 : vector<8xf32> to vector<8x1xf32>
    %107 = tpu.reciprocal %106 {approx = true} : vector<8x1xf32> -> vector<8x1xf32>
    %108 = vector.broadcast %107 : vector<8x1xf32> to vector<8x8xf32>
    %109 = arith.mulf %104, %108 : vector<8x8xf32>
    %cst_37 = arith.constant dense<0.000000e+00> : vector<8x8xf32>
    %110 = tpu.matmul %109, %98, %cst_37 {dimension_numbers = #tpu.dot_dimension_numbers<[1], [0], [0], [1], [0, 0, 1, 1], [], []>} : vector<8x8xf32>, vector<8x8xf32>, vector<8x8xf32> -> vector<8x8xf32>
    %111 = tpu.concatenate %47, %68, %89, %110 in 1 : vector<8x8xf32>, vector<8x8xf32>, vector<8x8xf32>, vector<8x8xf32> -> vector<8x32xf32>
    %c56 = arith.constant 56 : index
    %c0_38 = arith.constant 0 : index
    %112 = vector.load %arg3[%c56, %c0_38] : memref<2080x256xf32, #tpu.memory_space<vmem>>, vector<32x32xf32>
    %cst_39 = arith.constant dense<0.000000e+00> : vector<8x32xf32>
    %113 = tpu.matmul %111, %112, %cst_39 {dimension_numbers = #tpu.dot_dimension_numbers<[1], [0], [0], [1], [0, 0, 1, 1], [], []>} : vector<8x32xf32>, vector<32x32xf32>, vector<8x32xf32> -> vector<8x32xf32>
    %c88 = arith.constant 88 : index
    %c0_40 = arith.constant 0 : index
    %114 = vector.load %arg3[%c88, %c0_40] : memref<2080x256xf32, #tpu.memory_space<vmem>>, vector<1x32xf32>
    %115 = vector.broadcast %114 : vector<1x32xf32> to vector<8x32xf32>
    %116 = arith.addf %113, %115 : vector<8x32xf32>
    %117 = arith.addf %24, %116 : vector<8x32xf32>
    %cst_41 = arith.constant dense<0.000000e+00> : vector<8xf32>
    %118 = vector.multi_reduction <add>, %117, %cst_41 [1] : vector<8x32xf32> to vector<8xf32>
    %119 = vector.shape_cast %118 : vector<8xf32> to vector<8x1xf32>
    %cst_42 = arith.constant 3.200000e+01 : f32
    %120 = vector.broadcast %cst_42 : f32 to vector<8x1xf32>
    %121 = arith.divf %119, %120 : vector<8x1xf32>
    %122 = vector.broadcast %121 : vector<8x1xf32> to vector<8x32xf32>
    %123 = arith.subf %117, %122 : vector<8x32xf32>
    %124 = arith.mulf %123, %123 : vector<8x32xf32>
    %cst_43 = arith.constant dense<0.000000e+00> : vector<8xf32>
    %125 = vector.multi_reduction <add>, %124, %cst_43 [1] : vector<8x32xf32> to vector<8xf32>
    %126 = vector.shape_cast %125 : vector<8xf32> to vector<8x1xf32>
    %cst_44 = arith.constant 3.200000e+01 : f32
    %127 = vector.broadcast %cst_44 : f32 to vector<8x1xf32>
    %128 = arith.divf %126, %127 : vector<8x1xf32>
    %129 = vector.broadcast %121 : vector<8x1xf32> to vector<8x32xf32>
    %130 = arith.subf %117, %129 : vector<8x32xf32>
    %cst_45 = arith.constant 9.99999996E-13 : f32
    %131 = vector.broadcast %cst_45 : f32 to vector<8x1xf32>
    %132 = arith.addf %128, %131 : vector<8x1xf32>
    %133 = math.rsqrt %132 : vector<8x1xf32>
    %134 = vector.broadcast %133 : vector<8x1xf32> to vector<8x32xf32>
    %135 = arith.mulf %130, %134 : vector<8x32xf32>
    %c96 = arith.constant 96 : index
    %c0_46 = arith.constant 0 : index
    %136 = vector.load %arg3[%c96, %c0_46] : memref<2080x256xf32, #tpu.memory_space<vmem>>, vector<1x32xf32>
    %137 = vector.broadcast %136 : vector<1x32xf32> to vector<8x32xf32>
    %138 = arith.mulf %135, %137 : vector<8x32xf32>
    %c104 = arith.constant 104 : index
    %c0_47 = arith.constant 0 : index
    %139 = vector.load %arg3[%c104, %c0_47] : memref<2080x256xf32, #tpu.memory_space<vmem>>, vector<1x32xf32>
    %140 = vector.broadcast %139 : vector<1x32xf32> to vector<8x32xf32>
    %141 = arith.addf %138, %140 : vector<8x32xf32>
    %c112 = arith.constant 112 : index
    %c0_48 = arith.constant 0 : index
    %142 = vector.load %arg3[%c112, %c0_48] : memref<2080x256xf32, #tpu.memory_space<vmem>>, vector<32x128xf32>
    %cst_49 = arith.constant dense<0.000000e+00> : vector<8x128xf32>
    %143 = tpu.matmul %141, %142, %cst_49 {dimension_numbers = #tpu.dot_dimension_numbers<[1], [0], [0], [1], [0, 0, 1, 1], [], []>} : vector<8x32xf32>, vector<32x128xf32>, vector<8x128xf32> -> vector<8x128xf32>
    %c144 = arith.constant 144 : index
    %c0_50 = arith.constant 0 : index
    %144 = vector.load %arg3[%c144, %c0_50] : memref<2080x256xf32, #tpu.memory_space<vmem>>, vector<1x128xf32>
    %145 = vector.broadcast %144 : vector<1x128xf32> to vector<8x128xf32>
    %146 = arith.addf %143, %145 : vector<8x128xf32>
    %147 = arith.mulf %146, %146 : vector<8x128xf32>
    %148 = arith.mulf %146, %147 : vector<8x128xf32>
    %cst_51 = arith.constant 4.471500e-02 : f32
    %149 = vector.broadcast %cst_51 : f32 to vector<8x128xf32>
    %150 = arith.mulf %149, %148 : vector<8x128xf32>
    %151 = arith.addf %146, %150 : vector<8x128xf32>
    %cst_52 = arith.constant 0.797884583 : f32
    %152 = vector.broadcast %cst_52 : f32 to vector<8x128xf32>
    %153 = arith.mulf %152, %151 : vector<8x128xf32>
    %154 = math.tanh %153 : vector<8x128xf32>
    %cst_53 = arith.constant 1.000000e+00 : f32
    %155 = vector.broadcast %cst_53 : f32 to vector<8x128xf32>
    %156 = arith.addf %155, %154 : vector<8x128xf32>
    %cst_54 = arith.constant 5.000000e-01 : f32
    %157 = vector.broadcast %cst_54 : f32 to vector<8x128xf32>
    %158 = arith.mulf %157, %156 : vector<8x128xf32>
    %159 = arith.mulf %146, %158 : vector<8x128xf32>
    %c152 = arith.constant 152 : index
    %c0_55 = arith.constant 0 : index
    %160 = vector.load %arg3[%c152, %c0_55] : memref<2080x256xf32, #tpu.memory_space<vmem>>, vector<128x32xf32>
    %cst_56 = arith.constant dense<0.000000e+00> : vector<8x32xf32>
    %161 = tpu.matmul %159, %160, %cst_56 {dimension_numbers = #tpu.dot_dimension_numbers<[1], [0], [0], [1], [0, 0, 1, 1], [], []>} : vector<8x128xf32>, vector<128x32xf32>, vector<8x32xf32> -> vector<8x32xf32>
    %c280 = arith.constant 280 : index
    %c0_57 = arith.constant 0 : index
    %162 = vector.load %arg3[%c280, %c0_57] : memref<2080x256xf32, #tpu.memory_space<vmem>>, vector<1x32xf32>
    %163 = vector.broadcast %162 : vector<1x32xf32> to vector<8x32xf32>
    %164 = arith.addf %161, %163 : vector<8x32xf32>
    %165 = arith.addf %141, %164 : vector<8x32xf32>
    %cst_58 = arith.constant dense<0.000000e+00> : vector<8xf32>
    %166 = vector.multi_reduction <add>, %165, %cst_58 [1] : vector<8x32xf32> to vector<8xf32>
    %167 = vector.shape_cast %166 : vector<8xf32> to vector<8x1xf32>
    %cst_59 = arith.constant 3.200000e+01 : f32
    %168 = vector.broadcast %cst_59 : f32 to vector<8x1xf32>
    %169 = arith.divf %167, %168 : vector<8x1xf32>
    %170 = vector.broadcast %169 : vector<8x1xf32> to vector<8x32xf32>
    %171 = arith.subf %165, %170 : vector<8x32xf32>
    %172 = arith.mulf %171, %171 : vector<8x32xf32>
    %cst_60 = arith.constant dense<0.000000e+00> : vector<8xf32>
    %173 = vector.multi_reduction <add>, %172, %cst_60 [1] : vector<8x32xf32> to vector<8xf32>
    %174 = vector.shape_cast %173 : vector<8xf32> to vector<8x1xf32>
    %cst_61 = arith.constant 3.200000e+01 : f32
    %175 = vector.broadcast %cst_61 : f32 to vector<8x1xf32>
    %176 = arith.divf %174, %175 : vector<8x1xf32>
    %177 = vector.broadcast %169 : vector<8x1xf32> to vector<8x32xf32>
    %178 = arith.subf %165, %177 : vector<8x32xf32>
    %cst_62 = arith.constant 9.99999996E-13 : f32
    %179 = vector.broadcast %cst_62 : f32 to vector<8x1xf32>
    %180 = arith.addf %176, %179 : vector<8x1xf32>
    %181 = math.rsqrt %180 : vector<8x1xf32>
    %182 = vector.broadcast %181 : vector<8x1xf32> to vector<8x32xf32>
    %183 = arith.mulf %178, %182 : vector<8x32xf32>
    %c288 = arith.constant 288 : index
    %c0_63 = arith.constant 0 : index
    %184 = vector.load %arg3[%c288, %c0_63] : memref<2080x256xf32, #tpu.memory_space<vmem>>, vector<1x32xf32>
    %185 = vector.broadcast %184 : vector<1x32xf32> to vector<8x32xf32>
    %186 = arith.mulf %183, %185 : vector<8x32xf32>
    %c296 = arith.constant 296 : index
    %c0_64 = arith.constant 0 : index
    %187 = vector.load %arg3[%c296, %c0_64] : memref<2080x256xf32, #tpu.memory_space<vmem>>, vector<1x32xf32>
    %188 = vector.broadcast %187 : vector<1x32xf32> to vector<8x32xf32>
    %189 = arith.addf %186, %188 : vector<8x32xf32>
    %c304 = arith.constant 304 : index
    %c0_65 = arith.constant 0 : index
    %190 = vector.load %arg3[%c304, %c0_65] : memref<2080x256xf32, #tpu.memory_space<vmem>>, vector<32x96xf32>
    %c336 = arith.constant 336 : index
    %c0_66 = arith.constant 0 : index
    %191 = vector.load %arg3[%c336, %c0_66] : memref<2080x256xf32, #tpu.memory_space<vmem>>, vector<4x8xf32>
    %192 = vector.extract_strided_slice %190 {offsets = [0, 0], sizes = [32, 8], strides = [1, 1]} : vector<32x96xf32> to vector<32x8xf32>
    %193 = vector.extract_strided_slice %190 {offsets = [0, 32], sizes = [32, 8], strides = [1, 1]} : vector<32x96xf32> to vector<32x8xf32>
    %194 = vector.extract_strided_slice %190 {offsets = [0, 64], sizes = [32, 8], strides = [1, 1]} : vector<32x96xf32> to vector<32x8xf32>
    %cst_67 = arith.constant dense<0.000000e+00> : vector<8x8xf32>
    %195 = tpu.matmul %189, %192, %cst_67 {dimension_numbers = #tpu.dot_dimension_numbers<[1], [0], [0], [1], [0, 0, 1, 1], [], []>} : vector<8x32xf32>, vector<32x8xf32>, vector<8x8xf32> -> vector<8x8xf32>
    %196 = vector.extract_strided_slice %191 {offsets = [0, 0], sizes = [1, 8], strides = [1, 1]} : vector<4x8xf32> to vector<1x8xf32>
    %197 = vector.broadcast %196 : vector<1x8xf32> to vector<8x8xf32>
    %198 = arith.addf %195, %197 : vector<8x8xf32>
    %cst_68 = arith.constant dense<0.000000e+00> : vector<8x8xf32>
    %199 = tpu.matmul %189, %193, %cst_68 {dimension_numbers = #tpu.dot_dimension_numbers<[1], [0], [0], [1], [0, 0, 1, 1], [], []>} : vector<8x32xf32>, vector<32x8xf32>, vector<8x8xf32> -> vector<8x8xf32>
    %cst_69 = arith.constant dense<0.000000e+00> : vector<8x8xf32>
    %200 = tpu.matmul %189, %194, %cst_69 {dimension_numbers = #tpu.dot_dimension_numbers<[1], [0], [0], [1], [0, 0, 1, 1], [], []>} : vector<8x32xf32>, vector<32x8xf32>, vector<8x8xf32> -> vector<8x8xf32>
    %cst_70 = arith.constant dense<0.000000e+00> : vector<8x8xf32>
    %201 = tpu.matmul %198, %199, %cst_70 {dimension_numbers = #tpu.dot_dimension_numbers<[1], [1], [0], [0], [0, 0, 1, 0], [], []>} : vector<8x8xf32>, vector<8x8xf32>, vector<8x8xf32> -> vector<8x8xf32>
    %cst_71 = arith.constant dense<0xFF800000> : vector<8xf32>
    %202 = vector.multi_reduction <maximumf>, %201, %cst_71 [1] : vector<8x8xf32> to vector<8xf32>
    %203 = vector.shape_cast %202 : vector<8xf32> to vector<8x1xf32>
    %204 = vector.broadcast %203 : vector<8x1xf32> to vector<8x8xf32>
    %205 = arith.subf %201, %204 : vector<8x8xf32>
    %206 = math.exp %205 : vector<8x8xf32>
    %cst_72 = arith.constant dense<0.000000e+00> : vector<8xf32>
    %207 = vector.multi_reduction <add>, %206, %cst_72 [1] : vector<8x8xf32> to vector<8xf32>
    %208 = vector.shape_cast %207 : vector<8xf32> to vector<8x1xf32>
    %209 = tpu.reciprocal %208 {approx = true} : vector<8x1xf32> -> vector<8x1xf32>
    %210 = vector.broadcast %209 : vector<8x1xf32> to vector<8x8xf32>
    %211 = arith.mulf %206, %210 : vector<8x8xf32>
    %cst_73 = arith.constant dense<0.000000e+00> : vector<8x8xf32>
    %212 = tpu.matmul %211, %200, %cst_73 {dimension_numbers = #tpu.dot_dimension_numbers<[1], [0], [0], [1], [0, 0, 1, 1], [], []>} : vector<8x8xf32>, vector<8x8xf32>, vector<8x8xf32> -> vector<8x8xf32>
    %213 = vector.extract_strided_slice %190 {offsets = [0, 8], sizes = [32, 8], strides = [1, 1]} : vector<32x96xf32> to vector<32x8xf32>
    %214 = vector.extract_strided_slice %190 {offsets = [0, 40], sizes = [32, 8], strides = [1, 1]} : vector<32x96xf32> to vector<32x8xf32>
    %215 = vector.extract_strided_slice %190 {offsets = [0, 72], sizes = [32, 8], strides = [1, 1]} : vector<32x96xf32> to vector<32x8xf32>
    %cst_74 = arith.constant dense<0.000000e+00> : vector<8x8xf32>
    %216 = tpu.matmul %189, %213, %cst_74 {dimension_numbers = #tpu.dot_dimension_numbers<[1], [0], [0], [1], [0, 0, 1, 1], [], []>} : vector<8x32xf32>, vector<32x8xf32>, vector<8x8xf32> -> vector<8x8xf32>
    %217 = vector.extract_strided_slice %191 {offsets = [1, 0], sizes = [1, 8], strides = [1, 1]} : vector<4x8xf32> to vector<1x8xf32>
    %218 = vector.broadcast %217 : vector<1x8xf32> to vector<8x8xf32>
    %219 = arith.addf %216, %218 : vector<8x8xf32>
    %cst_75 = arith.constant dense<0.000000e+00> : vector<8x8xf32>
    %220 = tpu.matmul %189, %214, %cst_75 {dimension_numbers = #tpu.dot_dimension_numbers<[1], [0], [0], [1], [0, 0, 1, 1], [], []>} : vector<8x32xf32>, vector<32x8xf32>, vector<8x8xf32> -> vector<8x8xf32>
    %cst_76 = arith.constant dense<0.000000e+00> : vector<8x8xf32>
    %221 = tpu.matmul %189, %215, %cst_76 {dimension_numbers = #tpu.dot_dimension_numbers<[1], [0], [0], [1], [0, 0, 1, 1], [], []>} : vector<8x32xf32>, vector<32x8xf32>, vector<8x8xf32> -> vector<8x8xf32>
    %cst_77 = arith.constant dense<0.000000e+00> : vector<8x8xf32>
    %222 = tpu.matmul %219, %220, %cst_77 {dimension_numbers = #tpu.dot_dimension_numbers<[1], [1], [0], [0], [0, 0, 1, 0], [], []>} : vector<8x8xf32>, vector<8x8xf32>, vector<8x8xf32> -> vector<8x8xf32>
    %cst_78 = arith.constant dense<0xFF800000> : vector<8xf32>
    %223 = vector.multi_reduction <maximumf>, %222, %cst_78 [1] : vector<8x8xf32> to vector<8xf32>
    %224 = vector.shape_cast %223 : vector<8xf32> to vector<8x1xf32>
    %225 = vector.broadcast %224 : vector<8x1xf32> to vector<8x8xf32>
    %226 = arith.subf %222, %225 : vector<8x8xf32>
    %227 = math.exp %226 : vector<8x8xf32>
    %cst_79 = arith.constant dense<0.000000e+00> : vector<8xf32>
    %228 = vector.multi_reduction <add>, %227, %cst_79 [1] : vector<8x8xf32> to vector<8xf32>
    %229 = vector.shape_cast %228 : vector<8xf32> to vector<8x1xf32>
    %230 = tpu.reciprocal %229 {approx = true} : vector<8x1xf32> -> vector<8x1xf32>
    %231 = vector.broadcast %230 : vector<8x1xf32> to vector<8x8xf32>
    %232 = arith.mulf %227, %231 : vector<8x8xf32>
    %cst_80 = arith.constant dense<0.000000e+00> : vector<8x8xf32>
    %233 = tpu.matmul %232, %221, %cst_80 {dimension_numbers = #tpu.dot_dimension_numbers<[1], [0], [0], [1], [0, 0, 1, 1], [], []>} : vector<8x8xf32>, vector<8x8xf32>, vector<8x8xf32> -> vector<8x8xf32>
    %234 = vector.extract_strided_slice %190 {offsets = [0, 16], sizes = [32, 8], strides = [1, 1]} : vector<32x96xf32> to vector<32x8xf32>
    %235 = vector.extract_strided_slice %190 {offsets = [0, 48], sizes = [32, 8], strides = [1, 1]} : vector<32x96xf32> to vector<32x8xf32>
    %236 = vector.extract_strided_slice %190 {offsets = [0, 80], sizes = [32, 8], strides = [1, 1]} : vector<32x96xf32> to vector<32x8xf32>
    %cst_81 = arith.constant dense<0.000000e+00> : vector<8x8xf32>
    %237 = tpu.matmul %189, %234, %cst_81 {dimension_numbers = #tpu.dot_dimension_numbers<[1], [0], [0], [1], [0, 0, 1, 1], [], []>} : vector<8x32xf32>, vector<32x8xf32>, vector<8x8xf32> -> vector<8x8xf32>
    %238 = vector.extract_strided_slice %191 {offsets = [2, 0], sizes = [1, 8], strides = [1, 1]} : vector<4x8xf32> to vector<1x8xf32>
    %239 = vector.broadcast %238 : vector<1x8xf32> to vector<8x8xf32>
    %240 = arith.addf %237, %239 : vector<8x8xf32>
    %cst_82 = arith.constant dense<0.000000e+00> : vector<8x8xf32>
    %241 = tpu.matmul %189, %235, %cst_82 {dimension_numbers = #tpu.dot_dimension_numbers<[1], [0], [0], [1], [0, 0, 1, 1], [], []>} : vector<8x32xf32>, vector<32x8xf32>, vector<8x8xf32> -> vector<8x8xf32>
    %cst_83 = arith.constant dense<0.000000e+00> : vector<8x8xf32>
    %242 = tpu.matmul %189, %236, %cst_83 {dimension_numbers = #tpu.dot_dimension_numbers<[1], [0], [0], [1], [0, 0, 1, 1], [], []>} : vector<8x32xf32>, vector<32x8xf32>, vector<8x8xf32> -> vector<8x8xf32>
    %cst_84 = arith.constant dense<0.000000e+00> : vector<8x8xf32>
    %243 = tpu.matmul %240, %241, %cst_84 {dimension_numbers = #tpu.dot_dimension_numbers<[1], [1], [0], [0], [0, 0, 1, 0], [], []>} : vector<8x8xf32>, vector<8x8xf32>, vector<8x8xf32> -> vector<8x8xf32>
    %cst_85 = arith.constant dense<0xFF800000> : vector<8xf32>
    %244 = vector.multi_reduction <maximumf>, %243, %cst_85 [1] : vector<8x8xf32> to vector<8xf32>
    %245 = vector.shape_cast %244 : vector<8xf32> to vector<8x1xf32>
    %246 = vector.broadcast %245 : vector<8x1xf32> to vector<8x8xf32>
    %247 = arith.subf %243, %246 : vector<8x8xf32>
    %248 = math.exp %247 : vector<8x8xf32>
    %cst_86 = arith.constant dense<0.000000e+00> : vector<8xf32>
    %249 = vector.multi_reduction <add>, %248, %cst_86 [1] : vector<8x8xf32> to vector<8xf32>
    %250 = vector.shape_cast %249 : vector<8xf32> to vector<8x1xf32>
    %251 = tpu.reciprocal %250 {approx = true} : vector<8x1xf32> -> vector<8x1xf32>
    %252 = vector.broadcast %251 : vector<8x1xf32> to vector<8x8xf32>
    %253 = arith.mulf %248, %252 : vector<8x8xf32>
    %cst_87 = arith.constant dense<0.000000e+00> : vector<8x8xf32>
    %254 = tpu.matmul %253, %242, %cst_87 {dimension_numbers = #tpu.dot_dimension_numbers<[1], [0], [0], [1], [0, 0, 1, 1], [], []>} : vector<8x8xf32>, vector<8x8xf32>, vector<8x8xf32> -> vector<8x8xf32>
    %255 = vector.extract_strided_slice %190 {offsets = [0, 24], sizes = [32, 8], strides = [1, 1]} : vector<32x96xf32> to vector<32x8xf32>
    %256 = vector.extract_strided_slice %190 {offsets = [0, 56], sizes = [32, 8], strides = [1, 1]} : vector<32x96xf32> to vector<32x8xf32>
    %257 = vector.extract_strided_slice %190 {offsets = [0, 88], sizes = [32, 8], strides = [1, 1]} : vector<32x96xf32> to vector<32x8xf32>
    %cst_88 = arith.constant dense<0.000000e+00> : vector<8x8xf32>
    %258 = tpu.matmul %189, %255, %cst_88 {dimension_numbers = #tpu.dot_dimension_numbers<[1], [0], [0], [1], [0, 0, 1, 1], [], []>} : vector<8x32xf32>, vector<32x8xf32>, vector<8x8xf32> -> vector<8x8xf32>
    %259 = vector.extract_strided_slice %191 {offsets = [3, 0], sizes = [1, 8], strides = [1, 1]} : vector<4x8xf32> to vector<1x8xf32>
    %260 = vector.broadcast %259 : vector<1x8xf32> to vector<8x8xf32>
    %261 = arith.addf %258, %260 : vector<8x8xf32>
    %cst_89 = arith.constant dense<0.000000e+00> : vector<8x8xf32>
    %262 = tpu.matmul %189, %256, %cst_89 {dimension_numbers = #tpu.dot_dimension_numbers<[1], [0], [0], [1], [0, 0, 1, 1], [], []>} : vector<8x32xf32>, vector<32x8xf32>, vector<8x8xf32> -> vector<8x8xf32>
    %cst_90 = arith.constant dense<0.000000e+00> : vector<8x8xf32>
    %263 = tpu.matmul %189, %257, %cst_90 {dimension_numbers = #tpu.dot_dimension_numbers<[1], [0], [0], [1], [0, 0, 1, 1], [], []>} : vector<8x32xf32>, vector<32x8xf32>, vector<8x8xf32> -> vector<8x8xf32>
    %cst_91 = arith.constant dense<0.000000e+00> : vector<8x8xf32>
    %264 = tpu.matmul %261, %262, %cst_91 {dimension_numbers = #tpu.dot_dimension_numbers<[1], [1], [0], [0], [0, 0, 1, 0], [], []>} : vector<8x8xf32>, vector<8x8xf32>, vector<8x8xf32> -> vector<8x8xf32>
    %cst_92 = arith.constant dense<0xFF800000> : vector<8xf32>
    %265 = vector.multi_reduction <maximumf>, %264, %cst_92 [1] : vector<8x8xf32> to vector<8xf32>
    %266 = vector.shape_cast %265 : vector<8xf32> to vector<8x1xf32>
    %267 = vector.broadcast %266 : vector<8x1xf32> to vector<8x8xf32>
    %268 = arith.subf %264, %267 : vector<8x8xf32>
    %269 = math.exp %268 : vector<8x8xf32>
    %cst_93 = arith.constant dense<0.000000e+00> : vector<8xf32>
    %270 = vector.multi_reduction <add>, %269, %cst_93 [1] : vector<8x8xf32> to vector<8xf32>
    %271 = vector.shape_cast %270 : vector<8xf32> to vector<8x1xf32>
    %272 = tpu.reciprocal %271 {approx = true} : vector<8x1xf32> -> vector<8x1xf32>
    %273 = vector.broadcast %272 : vector<8x1xf32> to vector<8x8xf32>
    %274 = arith.mulf %269, %273 : vector<8x8xf32>
    %cst_94 = arith.constant dense<0.000000e+00> : vector<8x8xf32>
    %275 = tpu.matmul %274, %263, %cst_94 {dimension_numbers = #tpu.dot_dimension_numbers<[1], [0], [0], [1], [0, 0, 1, 1], [], []>} : vector<8x8xf32>, vector<8x8xf32>, vector<8x8xf32> -> vector<8x8xf32>
    %276 = tpu.concatenate %212, %233, %254, %275 in 1 : vector<8x8xf32>, vector<8x8xf32>, vector<8x8xf32>, vector<8x8xf32> -> vector<8x32xf32>
    %c344 = arith.constant 344 : index
    %c0_95 = arith.constant 0 : index
    %277 = vector.load %arg3[%c344, %c0_95] : memref<2080x256xf32, #tpu.memory_space<vmem>>, vector<32x32xf32>
    %cst_96 = arith.constant dense<0.000000e+00> : vector<8x32xf32>
    %278 = tpu.matmul %276, %277, %cst_96 {dimension_numbers = #tpu.dot_dimension_numbers<[1], [0], [0], [1], [0, 0, 1, 1], [], []>} : vector<8x32xf32>, vector<32x32xf32>, vector<8x32xf32> -> vector<8x32xf32>
    %c376 = arith.constant 376 : index
    %c0_97 = arith.constant 0 : index
    %279 = vector.load %arg3[%c376, %c0_97] : memref<2080x256xf32, #tpu.memory_space<vmem>>, vector<1x32xf32>
    %280 = vector.broadcast %279 : vector<1x32xf32> to vector<8x32xf32>
    %281 = arith.addf %278, %280 : vector<8x32xf32>
    %282 = arith.addf %189, %281 : vector<8x32xf32>
    %cst_98 = arith.constant dense<0.000000e+00> : vector<8xf32>
    %283 = vector.multi_reduction <add>, %282, %cst_98 [1] : vector<8x32xf32> to vector<8xf32>
    %284 = vector.shape_cast %283 : vector<8xf32> to vector<8x1xf32>
    %cst_99 = arith.constant 3.200000e+01 : f32
    %285 = vector.broadcast %cst_99 : f32 to vector<8x1xf32>
    %286 = arith.divf %284, %285 : vector<8x1xf32>
    %287 = vector.broadcast %286 : vector<8x1xf32> to vector<8x32xf32>
    %288 = arith.subf %282, %287 : vector<8x32xf32>
    %289 = arith.mulf %288, %288 : vector<8x32xf32>
    %cst_100 = arith.constant dense<0.000000e+00> : vector<8xf32>
    %290 = vector.multi_reduction <add>, %289, %cst_100 [1] : vector<8x32xf32> to vector<8xf32>
    %291 = vector.shape_cast %290 : vector<8xf32> to vector<8x1xf32>
    %cst_101 = arith.constant 3.200000e+01 : f32
    %292 = vector.broadcast %cst_101 : f32 to vector<8x1xf32>
    %293 = arith.divf %291, %292 : vector<8x1xf32>
    %294 = vector.broadcast %286 : vector<8x1xf32> to vector<8x32xf32>
    %295 = arith.subf %282, %294 : vector<8x32xf32>
    %cst_102 = arith.constant 9.99999996E-13 : f32
    %296 = vector.broadcast %cst_102 : f32 to vector<8x1xf32>
    %297 = arith.addf %293, %296 : vector<8x1xf32>
    %298 = math.rsqrt %297 : vector<8x1xf32>
    %299 = vector.broadcast %298 : vector<8x1xf32> to vector<8x32xf32>
    %300 = arith.mulf %295, %299 : vector<8x32xf32>
    %c384 = arith.constant 384 : index
    %c0_103 = arith.constant 0 : index
    %301 = vector.load %arg3[%c384, %c0_103] : memref<2080x256xf32, #tpu.memory_space<vmem>>, vector<1x32xf32>
    %302 = vector.broadcast %301 : vector<1x32xf32> to vector<8x32xf32>
    %303 = arith.mulf %300, %302 : vector<8x32xf32>
    %c392 = arith.constant 392 : index
    %c0_104 = arith.constant 0 : index
    %304 = vector.load %arg3[%c392, %c0_104] : memref<2080x256xf32, #tpu.memory_space<vmem>>, vector<1x32xf32>
    %305 = vector.broadcast %304 : vector<1x32xf32> to vector<8x32xf32>
    %306 = arith.addf %303, %305 : vector<8x32xf32>
    %c400 = arith.constant 400 : index
    %c0_105 = arith.constant 0 : index
    %307 = vector.load %arg3[%c400, %c0_105] : memref<2080x256xf32, #tpu.memory_space<vmem>>, vector<32x128xf32>
    %cst_106 = arith.constant dense<0.000000e+00> : vector<8x128xf32>
    %308 = tpu.matmul %306, %307, %cst_106 {dimension_numbers = #tpu.dot_dimension_numbers<[1], [0], [0], [1], [0, 0, 1, 1], [], []>} : vector<8x32xf32>, vector<32x128xf32>, vector<8x128xf32> -> vector<8x128xf32>
    %c432 = arith.constant 432 : index
    %c0_107 = arith.constant 0 : index
    %309 = vector.load %arg3[%c432, %c0_107] : memref<2080x256xf32, #tpu.memory_space<vmem>>, vector<1x128xf32>
    %310 = vector.broadcast %309 : vector<1x128xf32> to vector<8x128xf32>
    %311 = arith.addf %308, %310 : vector<8x128xf32>
    %312 = arith.mulf %311, %311 : vector<8x128xf32>
    %313 = arith.mulf %311, %312 : vector<8x128xf32>
    %cst_108 = arith.constant 4.471500e-02 : f32
    %314 = vector.broadcast %cst_108 : f32 to vector<8x128xf32>
    %315 = arith.mulf %314, %313 : vector<8x128xf32>
    %316 = arith.addf %311, %315 : vector<8x128xf32>
    %cst_109 = arith.constant 0.797884583 : f32
    %317 = vector.broadcast %cst_109 : f32 to vector<8x128xf32>
    %318 = arith.mulf %317, %316 : vector<8x128xf32>
    %319 = math.tanh %318 : vector<8x128xf32>
    %cst_110 = arith.constant 1.000000e+00 : f32
    %320 = vector.broadcast %cst_110 : f32 to vector<8x128xf32>
    %321 = arith.addf %320, %319 : vector<8x128xf32>
    %cst_111 = arith.constant 5.000000e-01 : f32
    %322 = vector.broadcast %cst_111 : f32 to vector<8x128xf32>
    %323 = arith.mulf %322, %321 : vector<8x128xf32>
    %324 = arith.mulf %311, %323 : vector<8x128xf32>
    %c440 = arith.constant 440 : index
    %c0_112 = arith.constant 0 : index
    %325 = vector.load %arg3[%c440, %c0_112] : memref<2080x256xf32, #tpu.memory_space<vmem>>, vector<128x32xf32>
    %cst_113 = arith.constant dense<0.000000e+00> : vector<8x32xf32>
    %326 = tpu.matmul %324, %325, %cst_113 {dimension_numbers = #tpu.dot_dimension_numbers<[1], [0], [0], [1], [0, 0, 1, 1], [], []>} : vector<8x128xf32>, vector<128x32xf32>, vector<8x32xf32> -> vector<8x32xf32>
    %c568 = arith.constant 568 : index
    %c0_114 = arith.constant 0 : index
    %327 = vector.load %arg3[%c568, %c0_114] : memref<2080x256xf32, #tpu.memory_space<vmem>>, vector<1x32xf32>
    %328 = vector.broadcast %327 : vector<1x32xf32> to vector<8x32xf32>
    %329 = arith.addf %326, %328 : vector<8x32xf32>
    %330 = arith.addf %306, %329 : vector<8x32xf32>
    %cst_115 = arith.constant dense<0.000000e+00> : vector<8xf32>
    %331 = vector.multi_reduction <add>, %330, %cst_115 [1] : vector<8x32xf32> to vector<8xf32>
    %332 = vector.shape_cast %331 : vector<8xf32> to vector<8x1xf32>
    %cst_116 = arith.constant 3.200000e+01 : f32
    %333 = vector.broadcast %cst_116 : f32 to vector<8x1xf32>
    %334 = arith.divf %332, %333 : vector<8x1xf32>
    %335 = vector.broadcast %334 : vector<8x1xf32> to vector<8x32xf32>
    %336 = arith.subf %330, %335 : vector<8x32xf32>
    %337 = arith.mulf %336, %336 : vector<8x32xf32>
    %cst_117 = arith.constant dense<0.000000e+00> : vector<8xf32>
    %338 = vector.multi_reduction <add>, %337, %cst_117 [1] : vector<8x32xf32> to vector<8xf32>
    %339 = vector.shape_cast %338 : vector<8xf32> to vector<8x1xf32>
    %cst_118 = arith.constant 3.200000e+01 : f32
    %340 = vector.broadcast %cst_118 : f32 to vector<8x1xf32>
    %341 = arith.divf %339, %340 : vector<8x1xf32>
    %342 = vector.broadcast %334 : vector<8x1xf32> to vector<8x32xf32>
    %343 = arith.subf %330, %342 : vector<8x32xf32>
    %cst_119 = arith.constant 9.99999996E-13 : f32
    %344 = vector.broadcast %cst_119 : f32 to vector<8x1xf32>
    %345 = arith.addf %341, %344 : vector<8x1xf32>
    %346 = math.rsqrt %345 : vector<8x1xf32>
    %347 = vector.broadcast %346 : vector<8x1xf32> to vector<8x32xf32>
    %348 = arith.mulf %343, %347 : vector<8x32xf32>
    %c576 = arith.constant 576 : index
    %c0_120 = arith.constant 0 : index
    %349 = vector.load %arg3[%c576, %c0_120] : memref<2080x256xf32, #tpu.memory_space<vmem>>, vector<1x32xf32>
    %350 = vector.broadcast %349 : vector<1x32xf32> to vector<8x32xf32>
    %351 = arith.mulf %348, %350 : vector<8x32xf32>
    %c584 = arith.constant 584 : index
    %c0_121 = arith.constant 0 : index
    %352 = vector.load %arg3[%c584, %c0_121] : memref<2080x256xf32, #tpu.memory_space<vmem>>, vector<1x32xf32>
    %353 = vector.broadcast %352 : vector<1x32xf32> to vector<8x32xf32>
    %354 = arith.addf %351, %353 : vector<8x32xf32>
    %c592 = arith.constant 592 : index
    %c0_122 = arith.constant 0 : index
    %355 = vector.load %arg3[%c592, %c0_122] : memref<2080x256xf32, #tpu.memory_space<vmem>>, vector<32x24xf32>
    %cst_123 = arith.constant dense<0.000000e+00> : vector<8x24xf32>
    %356 = tpu.matmul %354, %355, %cst_123 {dimension_numbers = #tpu.dot_dimension_numbers<[1], [0], [0], [1], [0, 0, 1, 1], [], []>} : vector<8x32xf32>, vector<32x24xf32>, vector<8x24xf32> -> vector<8x24xf32>
    %c624 = arith.constant 624 : index
    %c0_124 = arith.constant 0 : index
    %357 = vector.load %arg3[%c624, %c0_124] : memref<2080x256xf32, #tpu.memory_space<vmem>>, vector<1x24xf32>
    %358 = vector.broadcast %357 : vector<1x24xf32> to vector<8x24xf32>
    %359 = arith.addf %356, %358 : vector<8x24xf32>
    %360 = arith.mulf %359, %359 : vector<8x24xf32>
    %361 = vector.shape_cast %360 : vector<8x24xf32> to vector<1x8x24xf32>
    %cst_125 = arith.constant dense<0.000000e+00> : vector<1xf32>
    %362 = vector.multi_reduction <add>, %361, %cst_125 [1, 2] : vector<1x8x24xf32> to vector<1xf32>
    %363 = vector.shape_cast %362 : vector<1xf32> to vector<1x1x1xf32>
    %364 = vector.extract %363[0, 0, 0] : f32 from vector<1x1x1xf32>
    %365 = vector.broadcast %364 : f32 to vector<1x1xf32>
    %cst_126 = arith.constant 0.010416667 : f32
    %366 = vector.broadcast %cst_126 : f32 to vector<1x1xf32>
    %367 = arith.mulf %365, %366 : vector<1x1xf32>
    %368 = math.rsqrt %367 : vector<1x1xf32>
    %369 = vector.broadcast %368 : vector<1x1xf32> to vector<8x24xf32>
    %370 = arith.mulf %359, %369 : vector<8x24xf32>
    %c0_127 = arith.constant 0 : index
    %c0_128 = arith.constant 0 : index
    %371 = vector.load %arg2[%c0_127, %c0_128] : memref<8x24xf32, #tpu.memory_space<vmem>>, vector<8x24xf32>
    %372 = arith.addf %370, %371 : vector<8x24xf32>
    %c632 = arith.constant 632 : index
    %c0_129 = arith.constant 0 : index
    %373 = vector.load %arg3[%c632, %c0_129] : memref<2080x256xf32, #tpu.memory_space<vmem>>, vector<24x64xf32>
    %cst_130 = arith.constant dense<0.000000e+00> : vector<8x64xf32>
    %374 = tpu.matmul %372, %373, %cst_130 {dimension_numbers = #tpu.dot_dimension_numbers<[1], [0], [0], [1], [0, 0, 1, 1], [], []>} : vector<8x24xf32>, vector<24x64xf32>, vector<8x64xf32> -> vector<8x64xf32>
    %c656 = arith.constant 656 : index
    %c0_131 = arith.constant 0 : index
    %375 = vector.load %arg3[%c656, %c0_131] : memref<2080x256xf32, #tpu.memory_space<vmem>>, vector<1x64xf32>
    %376 = vector.broadcast %375 : vector<1x64xf32> to vector<8x64xf32>
    %377 = arith.addf %374, %376 : vector<8x64xf32>
    %c664 = arith.constant 664 : index
    %c0_132 = arith.constant 0 : index
    %378 = vector.load %arg3[%c664, %c0_132] : memref<2080x256xf32, #tpu.memory_space<vmem>>, vector<64x192xf32>
    %c728 = arith.constant 728 : index
    %c0_133 = arith.constant 0 : index
    %379 = vector.load %arg3[%c728, %c0_133] : memref<2080x256xf32, #tpu.memory_space<vmem>>, vector<4x16xf32>
    %380 = vector.extract_strided_slice %378 {offsets = [0, 0], sizes = [64, 16], strides = [1, 1]} : vector<64x192xf32> to vector<64x16xf32>
    %381 = vector.extract_strided_slice %378 {offsets = [0, 64], sizes = [64, 16], strides = [1, 1]} : vector<64x192xf32> to vector<64x16xf32>
    %382 = vector.extract_strided_slice %378 {offsets = [0, 128], sizes = [64, 16], strides = [1, 1]} : vector<64x192xf32> to vector<64x16xf32>
    %cst_134 = arith.constant dense<0.000000e+00> : vector<8x16xf32>
    %383 = tpu.matmul %377, %380, %cst_134 {dimension_numbers = #tpu.dot_dimension_numbers<[1], [0], [0], [1], [0, 0, 1, 1], [], []>} : vector<8x64xf32>, vector<64x16xf32>, vector<8x16xf32> -> vector<8x16xf32>
    %384 = vector.extract_strided_slice %379 {offsets = [0, 0], sizes = [1, 16], strides = [1, 1]} : vector<4x16xf32> to vector<1x16xf32>
    %385 = vector.broadcast %384 : vector<1x16xf32> to vector<8x16xf32>
    %386 = arith.addf %383, %385 : vector<8x16xf32>
    %cst_135 = arith.constant dense<0.000000e+00> : vector<8x16xf32>
    %387 = tpu.matmul %377, %381, %cst_135 {dimension_numbers = #tpu.dot_dimension_numbers<[1], [0], [0], [1], [0, 0, 1, 1], [], []>} : vector<8x64xf32>, vector<64x16xf32>, vector<8x16xf32> -> vector<8x16xf32>
    %cst_136 = arith.constant dense<0.000000e+00> : vector<8x16xf32>
    %388 = tpu.matmul %377, %382, %cst_136 {dimension_numbers = #tpu.dot_dimension_numbers<[1], [0], [0], [1], [0, 0, 1, 1], [], []>} : vector<8x64xf32>, vector<64x16xf32>, vector<8x16xf32> -> vector<8x16xf32>
    %cst_137 = arith.constant dense<0.000000e+00> : vector<8x8xf32>
    %389 = tpu.matmul %386, %387, %cst_137 {dimension_numbers = #tpu.dot_dimension_numbers<[1], [1], [0], [0], [0, 0, 1, 0], [], []>} : vector<8x16xf32>, vector<8x16xf32>, vector<8x8xf32> -> vector<8x8xf32>
    %cst_138 = arith.constant dense<0xFF800000> : vector<8xf32>
    %390 = vector.multi_reduction <maximumf>, %389, %cst_138 [1] : vector<8x8xf32> to vector<8xf32>
    %391 = vector.shape_cast %390 : vector<8xf32> to vector<8x1xf32>
    %392 = vector.broadcast %391 : vector<8x1xf32> to vector<8x8xf32>
    %393 = arith.subf %389, %392 : vector<8x8xf32>
    %394 = math.exp %393 : vector<8x8xf32>
    %cst_139 = arith.constant dense<0.000000e+00> : vector<8xf32>
    %395 = vector.multi_reduction <add>, %394, %cst_139 [1] : vector<8x8xf32> to vector<8xf32>
    %396 = vector.shape_cast %395 : vector<8xf32> to vector<8x1xf32>
    %397 = tpu.reciprocal %396 {approx = true} : vector<8x1xf32> -> vector<8x1xf32>
    %398 = vector.broadcast %397 : vector<8x1xf32> to vector<8x8xf32>
    %399 = arith.mulf %394, %398 : vector<8x8xf32>
    %cst_140 = arith.constant dense<0.000000e+00> : vector<8x16xf32>
    %400 = tpu.matmul %399, %388, %cst_140 {dimension_numbers = #tpu.dot_dimension_numbers<[1], [0], [0], [1], [0, 0, 1, 1], [], []>} : vector<8x8xf32>, vector<8x16xf32>, vector<8x16xf32> -> vector<8x16xf32>
    %401 = vector.extract_strided_slice %378 {offsets = [0, 16], sizes = [64, 16], strides = [1, 1]} : vector<64x192xf32> to vector<64x16xf32>
    %402 = vector.extract_strided_slice %378 {offsets = [0, 80], sizes = [64, 16], strides = [1, 1]} : vector<64x192xf32> to vector<64x16xf32>
    %403 = vector.extract_strided_slice %378 {offsets = [0, 144], sizes = [64, 16], strides = [1, 1]} : vector<64x192xf32> to vector<64x16xf32>
    %cst_141 = arith.constant dense<0.000000e+00> : vector<8x16xf32>
    %404 = tpu.matmul %377, %401, %cst_141 {dimension_numbers = #tpu.dot_dimension_numbers<[1], [0], [0], [1], [0, 0, 1, 1], [], []>} : vector<8x64xf32>, vector<64x16xf32>, vector<8x16xf32> -> vector<8x16xf32>
    %405 = vector.extract_strided_slice %379 {offsets = [1, 0], sizes = [1, 16], strides = [1, 1]} : vector<4x16xf32> to vector<1x16xf32>
    %406 = vector.broadcast %405 : vector<1x16xf32> to vector<8x16xf32>
    %407 = arith.addf %404, %406 : vector<8x16xf32>
    %cst_142 = arith.constant dense<0.000000e+00> : vector<8x16xf32>
    %408 = tpu.matmul %377, %402, %cst_142 {dimension_numbers = #tpu.dot_dimension_numbers<[1], [0], [0], [1], [0, 0, 1, 1], [], []>} : vector<8x64xf32>, vector<64x16xf32>, vector<8x16xf32> -> vector<8x16xf32>
    %cst_143 = arith.constant dense<0.000000e+00> : vector<8x16xf32>
    %409 = tpu.matmul %377, %403, %cst_143 {dimension_numbers = #tpu.dot_dimension_numbers<[1], [0], [0], [1], [0, 0, 1, 1], [], []>} : vector<8x64xf32>, vector<64x16xf32>, vector<8x16xf32> -> vector<8x16xf32>
    %cst_144 = arith.constant dense<0.000000e+00> : vector<8x8xf32>
    %410 = tpu.matmul %407, %408, %cst_144 {dimension_numbers = #tpu.dot_dimension_numbers<[1], [1], [0], [0], [0, 0, 1, 0], [], []>} : vector<8x16xf32>, vector<8x16xf32>, vector<8x8xf32> -> vector<8x8xf32>
    %cst_145 = arith.constant dense<0xFF800000> : vector<8xf32>
    %411 = vector.multi_reduction <maximumf>, %410, %cst_145 [1] : vector<8x8xf32> to vector<8xf32>
    %412 = vector.shape_cast %411 : vector<8xf32> to vector<8x1xf32>
    %413 = vector.broadcast %412 : vector<8x1xf32> to vector<8x8xf32>
    %414 = arith.subf %410, %413 : vector<8x8xf32>
    %415 = math.exp %414 : vector<8x8xf32>
    %cst_146 = arith.constant dense<0.000000e+00> : vector<8xf32>
    %416 = vector.multi_reduction <add>, %415, %cst_146 [1] : vector<8x8xf32> to vector<8xf32>
    %417 = vector.shape_cast %416 : vector<8xf32> to vector<8x1xf32>
    %418 = tpu.reciprocal %417 {approx = true} : vector<8x1xf32> -> vector<8x1xf32>
    %419 = vector.broadcast %418 : vector<8x1xf32> to vector<8x8xf32>
    %420 = arith.mulf %415, %419 : vector<8x8xf32>
    %cst_147 = arith.constant dense<0.000000e+00> : vector<8x16xf32>
    %421 = tpu.matmul %420, %409, %cst_147 {dimension_numbers = #tpu.dot_dimension_numbers<[1], [0], [0], [1], [0, 0, 1, 1], [], []>} : vector<8x8xf32>, vector<8x16xf32>, vector<8x16xf32> -> vector<8x16xf32>
    %422 = vector.extract_strided_slice %378 {offsets = [0, 32], sizes = [64, 16], strides = [1, 1]} : vector<64x192xf32> to vector<64x16xf32>
    %423 = vector.extract_strided_slice %378 {offsets = [0, 96], sizes = [64, 16], strides = [1, 1]} : vector<64x192xf32> to vector<64x16xf32>
    %424 = vector.extract_strided_slice %378 {offsets = [0, 160], sizes = [64, 16], strides = [1, 1]} : vector<64x192xf32> to vector<64x16xf32>
    %cst_148 = arith.constant dense<0.000000e+00> : vector<8x16xf32>
    %425 = tpu.matmul %377, %422, %cst_148 {dimension_numbers = #tpu.dot_dimension_numbers<[1], [0], [0], [1], [0, 0, 1, 1], [], []>} : vector<8x64xf32>, vector<64x16xf32>, vector<8x16xf32> -> vector<8x16xf32>
    %426 = vector.extract_strided_slice %379 {offsets = [2, 0], sizes = [1, 16], strides = [1, 1]} : vector<4x16xf32> to vector<1x16xf32>
    %427 = vector.broadcast %426 : vector<1x16xf32> to vector<8x16xf32>
    %428 = arith.addf %425, %427 : vector<8x16xf32>
    %cst_149 = arith.constant dense<0.000000e+00> : vector<8x16xf32>
    %429 = tpu.matmul %377, %423, %cst_149 {dimension_numbers = #tpu.dot_dimension_numbers<[1], [0], [0], [1], [0, 0, 1, 1], [], []>} : vector<8x64xf32>, vector<64x16xf32>, vector<8x16xf32> -> vector<8x16xf32>
    %cst_150 = arith.constant dense<0.000000e+00> : vector<8x16xf32>
    %430 = tpu.matmul %377, %424, %cst_150 {dimension_numbers = #tpu.dot_dimension_numbers<[1], [0], [0], [1], [0, 0, 1, 1], [], []>} : vector<8x64xf32>, vector<64x16xf32>, vector<8x16xf32> -> vector<8x16xf32>
    %cst_151 = arith.constant dense<0.000000e+00> : vector<8x8xf32>
    %431 = tpu.matmul %428, %429, %cst_151 {dimension_numbers = #tpu.dot_dimension_numbers<[1], [1], [0], [0], [0, 0, 1, 0], [], []>} : vector<8x16xf32>, vector<8x16xf32>, vector<8x8xf32> -> vector<8x8xf32>
    %cst_152 = arith.constant dense<0xFF800000> : vector<8xf32>
    %432 = vector.multi_reduction <maximumf>, %431, %cst_152 [1] : vector<8x8xf32> to vector<8xf32>
    %433 = vector.shape_cast %432 : vector<8xf32> to vector<8x1xf32>
    %434 = vector.broadcast %433 : vector<8x1xf32> to vector<8x8xf32>
    %435 = arith.subf %431, %434 : vector<8x8xf32>
    %436 = math.exp %435 : vector<8x8xf32>
    %cst_153 = arith.constant dense<0.000000e+00> : vector<8xf32>
    %437 = vector.multi_reduction <add>, %436, %cst_153 [1] : vector<8x8xf32> to vector<8xf32>
    %438 = vector.shape_cast %437 : vector<8xf32> to vector<8x1xf32>
    %439 = tpu.reciprocal %438 {approx = true} : vector<8x1xf32> -> vector<8x1xf32>
    %440 = vector.broadcast %439 : vector<8x1xf32> to vector<8x8xf32>
    %441 = arith.mulf %436, %440 : vector<8x8xf32>
    %cst_154 = arith.constant dense<0.000000e+00> : vector<8x16xf32>
    %442 = tpu.matmul %441, %430, %cst_154 {dimension_numbers = #tpu.dot_dimension_numbers<[1], [0], [0], [1], [0, 0, 1, 1], [], []>} : vector<8x8xf32>, vector<8x16xf32>, vector<8x16xf32> -> vector<8x16xf32>
    %443 = vector.extract_strided_slice %378 {offsets = [0, 48], sizes = [64, 16], strides = [1, 1]} : vector<64x192xf32> to vector<64x16xf32>
    %444 = vector.extract_strided_slice %378 {offsets = [0, 112], sizes = [64, 16], strides = [1, 1]} : vector<64x192xf32> to vector<64x16xf32>
    %445 = vector.extract_strided_slice %378 {offsets = [0, 176], sizes = [64, 16], strides = [1, 1]} : vector<64x192xf32> to vector<64x16xf32>
    %cst_155 = arith.constant dense<0.000000e+00> : vector<8x16xf32>
    %446 = tpu.matmul %377, %443, %cst_155 {dimension_numbers = #tpu.dot_dimension_numbers<[1], [0], [0], [1], [0, 0, 1, 1], [], []>} : vector<8x64xf32>, vector<64x16xf32>, vector<8x16xf32> -> vector<8x16xf32>
    %447 = vector.extract_strided_slice %379 {offsets = [3, 0], sizes = [1, 16], strides = [1, 1]} : vector<4x16xf32> to vector<1x16xf32>
    %448 = vector.broadcast %447 : vector<1x16xf32> to vector<8x16xf32>
    %449 = arith.addf %446, %448 : vector<8x16xf32>
    %cst_156 = arith.constant dense<0.000000e+00> : vector<8x16xf32>
    %450 = tpu.matmul %377, %444, %cst_156 {dimension_numbers = #tpu.dot_dimension_numbers<[1], [0], [0], [1], [0, 0, 1, 1], [], []>} : vector<8x64xf32>, vector<64x16xf32>, vector<8x16xf32> -> vector<8x16xf32>
    %cst_157 = arith.constant dense<0.000000e+00> : vector<8x16xf32>
    %451 = tpu.matmul %377, %445, %cst_157 {dimension_numbers = #tpu.dot_dimension_numbers<[1], [0], [0], [1], [0, 0, 1, 1], [], []>} : vector<8x64xf32>, vector<64x16xf32>, vector<8x16xf32> -> vector<8x16xf32>
    %cst_158 = arith.constant dense<0.000000e+00> : vector<8x8xf32>
    %452 = tpu.matmul %449, %450, %cst_158 {dimension_numbers = #tpu.dot_dimension_numbers<[1], [1], [0], [0], [0, 0, 1, 0], [], []>} : vector<8x16xf32>, vector<8x16xf32>, vector<8x8xf32> -> vector<8x8xf32>
    %cst_159 = arith.constant dense<0xFF800000> : vector<8xf32>
    %453 = vector.multi_reduction <maximumf>, %452, %cst_159 [1] : vector<8x8xf32> to vector<8xf32>
    %454 = vector.shape_cast %453 : vector<8xf32> to vector<8x1xf32>
    %455 = vector.broadcast %454 : vector<8x1xf32> to vector<8x8xf32>
    %456 = arith.subf %452, %455 : vector<8x8xf32>
    %457 = math.exp %456 : vector<8x8xf32>
    %cst_160 = arith.constant dense<0.000000e+00> : vector<8xf32>
    %458 = vector.multi_reduction <add>, %457, %cst_160 [1] : vector<8x8xf32> to vector<8xf32>
    %459 = vector.shape_cast %458 : vector<8xf32> to vector<8x1xf32>
    %460 = tpu.reciprocal %459 {approx = true} : vector<8x1xf32> -> vector<8x1xf32>
    %461 = vector.broadcast %460 : vector<8x1xf32> to vector<8x8xf32>
    %462 = arith.mulf %457, %461 : vector<8x8xf32>
    %cst_161 = arith.constant dense<0.000000e+00> : vector<8x16xf32>
    %463 = tpu.matmul %462, %451, %cst_161 {dimension_numbers = #tpu.dot_dimension_numbers<[1], [0], [0], [1], [0, 0, 1, 1], [], []>} : vector<8x8xf32>, vector<8x16xf32>, vector<8x16xf32> -> vector<8x16xf32>
    %464 = tpu.concatenate %400, %421, %442, %463 in 1 : vector<8x16xf32>, vector<8x16xf32>, vector<8x16xf32>, vector<8x16xf32> -> vector<8x64xf32>
    %c736 = arith.constant 736 : index
    %c0_162 = arith.constant 0 : index
    %465 = vector.load %arg3[%c736, %c0_162] : memref<2080x256xf32, #tpu.memory_space<vmem>>, vector<64x64xf32>
    %cst_163 = arith.constant dense<0.000000e+00> : vector<8x64xf32>
    %466 = tpu.matmul %464, %465, %cst_163 {dimension_numbers = #tpu.dot_dimension_numbers<[1], [0], [0], [1], [0, 0, 1, 1], [], []>} : vector<8x64xf32>, vector<64x64xf32>, vector<8x64xf32> -> vector<8x64xf32>
    %c800 = arith.constant 800 : index
    %c0_164 = arith.constant 0 : index
    %467 = vector.load %arg3[%c800, %c0_164] : memref<2080x256xf32, #tpu.memory_space<vmem>>, vector<1x64xf32>
    %468 = vector.broadcast %467 : vector<1x64xf32> to vector<8x64xf32>
    %469 = arith.addf %466, %468 : vector<8x64xf32>
    %470 = arith.addf %377, %469 : vector<8x64xf32>
    %cst_165 = arith.constant dense<0.000000e+00> : vector<8xf32>
    %471 = vector.multi_reduction <add>, %470, %cst_165 [1] : vector<8x64xf32> to vector<8xf32>
    %472 = vector.shape_cast %471 : vector<8xf32> to vector<8x1xf32>
    %cst_166 = arith.constant 6.400000e+01 : f32
    %473 = vector.broadcast %cst_166 : f32 to vector<8x1xf32>
    %474 = arith.divf %472, %473 : vector<8x1xf32>
    %475 = vector.broadcast %474 : vector<8x1xf32> to vector<8x64xf32>
    %476 = arith.subf %470, %475 : vector<8x64xf32>
    %477 = arith.mulf %476, %476 : vector<8x64xf32>
    %cst_167 = arith.constant dense<0.000000e+00> : vector<8xf32>
    %478 = vector.multi_reduction <add>, %477, %cst_167 [1] : vector<8x64xf32> to vector<8xf32>
    %479 = vector.shape_cast %478 : vector<8xf32> to vector<8x1xf32>
    %cst_168 = arith.constant 6.400000e+01 : f32
    %480 = vector.broadcast %cst_168 : f32 to vector<8x1xf32>
    %481 = arith.divf %479, %480 : vector<8x1xf32>
    %482 = vector.broadcast %474 : vector<8x1xf32> to vector<8x64xf32>
    %483 = arith.subf %470, %482 : vector<8x64xf32>
    %cst_169 = arith.constant 9.99999997E-7 : f32
    %484 = vector.broadcast %cst_169 : f32 to vector<8x1xf32>
    %485 = arith.addf %481, %484 : vector<8x1xf32>
    %486 = math.rsqrt %485 : vector<8x1xf32>
    %487 = vector.broadcast %486 : vector<8x1xf32> to vector<8x64xf32>
    %488 = arith.mulf %483, %487 : vector<8x64xf32>
    %c952 = arith.constant 952 : index
    %c0_170 = arith.constant 0 : index
    %489 = vector.load %arg3[%c952, %c0_170] : memref<2080x256xf32, #tpu.memory_space<vmem>>, vector<1x64xf32>
    %490 = vector.broadcast %489 : vector<1x64xf32> to vector<8x64xf32>
    %491 = arith.mulf %488, %490 : vector<8x64xf32>
    %c960 = arith.constant 960 : index
    %c0_171 = arith.constant 0 : index
    %492 = vector.load %arg3[%c960, %c0_171] : memref<2080x256xf32, #tpu.memory_space<vmem>>, vector<1x64xf32>
    %493 = vector.broadcast %492 : vector<1x64xf32> to vector<8x64xf32>
    %494 = arith.addf %491, %493 : vector<8x64xf32>
    %c808 = arith.constant 808 : index
    %c0_172 = arith.constant 0 : index
    %495 = vector.load %arg3[%c808, %c0_172] : memref<2080x256xf32, #tpu.memory_space<vmem>>, vector<64x192xf32>
    %c872 = arith.constant 872 : index
    %c0_173 = arith.constant 0 : index
    %496 = vector.load %arg3[%c872, %c0_173] : memref<2080x256xf32, #tpu.memory_space<vmem>>, vector<4x16xf32>
    %497 = vector.extract_strided_slice %495 {offsets = [0, 0], sizes = [64, 16], strides = [1, 1]} : vector<64x192xf32> to vector<64x16xf32>
    %498 = vector.extract_strided_slice %495 {offsets = [0, 64], sizes = [64, 16], strides = [1, 1]} : vector<64x192xf32> to vector<64x16xf32>
    %499 = vector.extract_strided_slice %495 {offsets = [0, 128], sizes = [64, 16], strides = [1, 1]} : vector<64x192xf32> to vector<64x16xf32>
    %cst_174 = arith.constant dense<0.000000e+00> : vector<8x16xf32>
    %500 = tpu.matmul %494, %497, %cst_174 {dimension_numbers = #tpu.dot_dimension_numbers<[1], [0], [0], [1], [0, 0, 1, 1], [], []>} : vector<8x64xf32>, vector<64x16xf32>, vector<8x16xf32> -> vector<8x16xf32>
    %501 = vector.extract_strided_slice %496 {offsets = [0, 0], sizes = [1, 16], strides = [1, 1]} : vector<4x16xf32> to vector<1x16xf32>
    %502 = vector.broadcast %501 : vector<1x16xf32> to vector<8x16xf32>
    %503 = arith.addf %500, %502 : vector<8x16xf32>
    %cst_175 = arith.constant dense<0.000000e+00> : vector<8x16xf32>
    %504 = tpu.matmul %377, %498, %cst_175 {dimension_numbers = #tpu.dot_dimension_numbers<[1], [0], [0], [1], [0, 0, 1, 1], [], []>} : vector<8x64xf32>, vector<64x16xf32>, vector<8x16xf32> -> vector<8x16xf32>
    %cst_176 = arith.constant dense<0.000000e+00> : vector<8x16xf32>
    %505 = tpu.matmul %377, %499, %cst_176 {dimension_numbers = #tpu.dot_dimension_numbers<[1], [0], [0], [1], [0, 0, 1, 1], [], []>} : vector<8x64xf32>, vector<64x16xf32>, vector<8x16xf32> -> vector<8x16xf32>
    %cst_177 = arith.constant dense<0.000000e+00> : vector<8x8xf32>
    %506 = tpu.matmul %503, %504, %cst_177 {dimension_numbers = #tpu.dot_dimension_numbers<[1], [1], [0], [0], [0, 0, 1, 0], [], []>} : vector<8x16xf32>, vector<8x16xf32>, vector<8x8xf32> -> vector<8x8xf32>
    %cst_178 = arith.constant dense<0xFF800000> : vector<8xf32>
    %507 = vector.multi_reduction <maximumf>, %506, %cst_178 [1] : vector<8x8xf32> to vector<8xf32>
    %508 = vector.shape_cast %507 : vector<8xf32> to vector<8x1xf32>
    %509 = vector.broadcast %508 : vector<8x1xf32> to vector<8x8xf32>
    %510 = arith.subf %506, %509 : vector<8x8xf32>
    %511 = math.exp %510 : vector<8x8xf32>
    %cst_179 = arith.constant dense<0.000000e+00> : vector<8xf32>
    %512 = vector.multi_reduction <add>, %511, %cst_179 [1] : vector<8x8xf32> to vector<8xf32>
    %513 = vector.shape_cast %512 : vector<8xf32> to vector<8x1xf32>
    %514 = tpu.reciprocal %513 {approx = true} : vector<8x1xf32> -> vector<8x1xf32>
    %515 = vector.broadcast %514 : vector<8x1xf32> to vector<8x8xf32>
    %516 = arith.mulf %511, %515 : vector<8x8xf32>
    %cst_180 = arith.constant dense<0.000000e+00> : vector<8x16xf32>
    %517 = tpu.matmul %516, %505, %cst_180 {dimension_numbers = #tpu.dot_dimension_numbers<[1], [0], [0], [1], [0, 0, 1, 1], [], []>} : vector<8x8xf32>, vector<8x16xf32>, vector<8x16xf32> -> vector<8x16xf32>
    %518 = vector.extract_strided_slice %495 {offsets = [0, 16], sizes = [64, 16], strides = [1, 1]} : vector<64x192xf32> to vector<64x16xf32>
    %519 = vector.extract_strided_slice %495 {offsets = [0, 80], sizes = [64, 16], strides = [1, 1]} : vector<64x192xf32> to vector<64x16xf32>
    %520 = vector.extract_strided_slice %495 {offsets = [0, 144], sizes = [64, 16], strides = [1, 1]} : vector<64x192xf32> to vector<64x16xf32>
    %cst_181 = arith.constant dense<0.000000e+00> : vector<8x16xf32>
    %521 = tpu.matmul %494, %518, %cst_181 {dimension_numbers = #tpu.dot_dimension_numbers<[1], [0], [0], [1], [0, 0, 1, 1], [], []>} : vector<8x64xf32>, vector<64x16xf32>, vector<8x16xf32> -> vector<8x16xf32>
    %522 = vector.extract_strided_slice %496 {offsets = [1, 0], sizes = [1, 16], strides = [1, 1]} : vector<4x16xf32> to vector<1x16xf32>
    %523 = vector.broadcast %522 : vector<1x16xf32> to vector<8x16xf32>
    %524 = arith.addf %521, %523 : vector<8x16xf32>
    %cst_182 = arith.constant dense<0.000000e+00> : vector<8x16xf32>
    %525 = tpu.matmul %377, %519, %cst_182 {dimension_numbers = #tpu.dot_dimension_numbers<[1], [0], [0], [1], [0, 0, 1, 1], [], []>} : vector<8x64xf32>, vector<64x16xf32>, vector<8x16xf32> -> vector<8x16xf32>
    %cst_183 = arith.constant dense<0.000000e+00> : vector<8x16xf32>
    %526 = tpu.matmul %377, %520, %cst_183 {dimension_numbers = #tpu.dot_dimension_numbers<[1], [0], [0], [1], [0, 0, 1, 1], [], []>} : vector<8x64xf32>, vector<64x16xf32>, vector<8x16xf32> -> vector<8x16xf32>
    %cst_184 = arith.constant dense<0.000000e+00> : vector<8x8xf32>
    %527 = tpu.matmul %524, %525, %cst_184 {dimension_numbers = #tpu.dot_dimension_numbers<[1], [1], [0], [0], [0, 0, 1, 0], [], []>} : vector<8x16xf32>, vector<8x16xf32>, vector<8x8xf32> -> vector<8x8xf32>
    %cst_185 = arith.constant dense<0xFF800000> : vector<8xf32>
    %528 = vector.multi_reduction <maximumf>, %527, %cst_185 [1] : vector<8x8xf32> to vector<8xf32>
    %529 = vector.shape_cast %528 : vector<8xf32> to vector<8x1xf32>
    %530 = vector.broadcast %529 : vector<8x1xf32> to vector<8x8xf32>
    %531 = arith.subf %527, %530 : vector<8x8xf32>
    %532 = math.exp %531 : vector<8x8xf32>
    %cst_186 = arith.constant dense<0.000000e+00> : vector<8xf32>
    %533 = vector.multi_reduction <add>, %532, %cst_186 [1] : vector<8x8xf32> to vector<8xf32>
    %534 = vector.shape_cast %533 : vector<8xf32> to vector<8x1xf32>
    %535 = tpu.reciprocal %534 {approx = true} : vector<8x1xf32> -> vector<8x1xf32>
    %536 = vector.broadcast %535 : vector<8x1xf32> to vector<8x8xf32>
    %537 = arith.mulf %532, %536 : vector<8x8xf32>
    %cst_187 = arith.constant dense<0.000000e+00> : vector<8x16xf32>
    %538 = tpu.matmul %537, %526, %cst_187 {dimension_numbers = #tpu.dot_dimension_numbers<[1], [0], [0], [1], [0, 0, 1, 1], [], []>} : vector<8x8xf32>, vector<8x16xf32>, vector<8x16xf32> -> vector<8x16xf32>
    %539 = vector.extract_strided_slice %495 {offsets = [0, 32], sizes = [64, 16], strides = [1, 1]} : vector<64x192xf32> to vector<64x16xf32>
    %540 = vector.extract_strided_slice %495 {offsets = [0, 96], sizes = [64, 16], strides = [1, 1]} : vector<64x192xf32> to vector<64x16xf32>
    %541 = vector.extract_strided_slice %495 {offsets = [0, 160], sizes = [64, 16], strides = [1, 1]} : vector<64x192xf32> to vector<64x16xf32>
    %cst_188 = arith.constant dense<0.000000e+00> : vector<8x16xf32>
    %542 = tpu.matmul %494, %539, %cst_188 {dimension_numbers = #tpu.dot_dimension_numbers<[1], [0], [0], [1], [0, 0, 1, 1], [], []>} : vector<8x64xf32>, vector<64x16xf32>, vector<8x16xf32> -> vector<8x16xf32>
    %543 = vector.extract_strided_slice %496 {offsets = [2, 0], sizes = [1, 16], strides = [1, 1]} : vector<4x16xf32> to vector<1x16xf32>
    %544 = vector.broadcast %543 : vector<1x16xf32> to vector<8x16xf32>
    %545 = arith.addf %542, %544 : vector<8x16xf32>
    %cst_189 = arith.constant dense<0.000000e+00> : vector<8x16xf32>
    %546 = tpu.matmul %377, %540, %cst_189 {dimension_numbers = #tpu.dot_dimension_numbers<[1], [0], [0], [1], [0, 0, 1, 1], [], []>} : vector<8x64xf32>, vector<64x16xf32>, vector<8x16xf32> -> vector<8x16xf32>
    %cst_190 = arith.constant dense<0.000000e+00> : vector<8x16xf32>
    %547 = tpu.matmul %377, %541, %cst_190 {dimension_numbers = #tpu.dot_dimension_numbers<[1], [0], [0], [1], [0, 0, 1, 1], [], []>} : vector<8x64xf32>, vector<64x16xf32>, vector<8x16xf32> -> vector<8x16xf32>
    %cst_191 = arith.constant dense<0.000000e+00> : vector<8x8xf32>
    %548 = tpu.matmul %545, %546, %cst_191 {dimension_numbers = #tpu.dot_dimension_numbers<[1], [1], [0], [0], [0, 0, 1, 0], [], []>} : vector<8x16xf32>, vector<8x16xf32>, vector<8x8xf32> -> vector<8x8xf32>
    %cst_192 = arith.constant dense<0xFF800000> : vector<8xf32>
    %549 = vector.multi_reduction <maximumf>, %548, %cst_192 [1] : vector<8x8xf32> to vector<8xf32>
    %550 = vector.shape_cast %549 : vector<8xf32> to vector<8x1xf32>
    %551 = vector.broadcast %550 : vector<8x1xf32> to vector<8x8xf32>
    %552 = arith.subf %548, %551 : vector<8x8xf32>
    %553 = math.exp %552 : vector<8x8xf32>
    %cst_193 = arith.constant dense<0.000000e+00> : vector<8xf32>
    %554 = vector.multi_reduction <add>, %553, %cst_193 [1] : vector<8x8xf32> to vector<8xf32>
    %555 = vector.shape_cast %554 : vector<8xf32> to vector<8x1xf32>
    %556 = tpu.reciprocal %555 {approx = true} : vector<8x1xf32> -> vector<8x1xf32>
    %557 = vector.broadcast %556 : vector<8x1xf32> to vector<8x8xf32>
    %558 = arith.mulf %553, %557 : vector<8x8xf32>
    %cst_194 = arith.constant dense<0.000000e+00> : vector<8x16xf32>
    %559 = tpu.matmul %558, %547, %cst_194 {dimension_numbers = #tpu.dot_dimension_numbers<[1], [0], [0], [1], [0, 0, 1, 1], [], []>} : vector<8x8xf32>, vector<8x16xf32>, vector<8x16xf32> -> vector<8x16xf32>
    %560 = vector.extract_strided_slice %495 {offsets = [0, 48], sizes = [64, 16], strides = [1, 1]} : vector<64x192xf32> to vector<64x16xf32>
    %561 = vector.extract_strided_slice %495 {offsets = [0, 112], sizes = [64, 16], strides = [1, 1]} : vector<64x192xf32> to vector<64x16xf32>
    %562 = vector.extract_strided_slice %495 {offsets = [0, 176], sizes = [64, 16], strides = [1, 1]} : vector<64x192xf32> to vector<64x16xf32>
    %cst_195 = arith.constant dense<0.000000e+00> : vector<8x16xf32>
    %563 = tpu.matmul %494, %560, %cst_195 {dimension_numbers = #tpu.dot_dimension_numbers<[1], [0], [0], [1], [0, 0, 1, 1], [], []>} : vector<8x64xf32>, vector<64x16xf32>, vector<8x16xf32> -> vector<8x16xf32>
    %564 = vector.extract_strided_slice %496 {offsets = [3, 0], sizes = [1, 16], strides = [1, 1]} : vector<4x16xf32> to vector<1x16xf32>
    %565 = vector.broadcast %564 : vector<1x16xf32> to vector<8x16xf32>
    %566 = arith.addf %563, %565 : vector<8x16xf32>
    %cst_196 = arith.constant dense<0.000000e+00> : vector<8x16xf32>
    %567 = tpu.matmul %377, %561, %cst_196 {dimension_numbers = #tpu.dot_dimension_numbers<[1], [0], [0], [1], [0, 0, 1, 1], [], []>} : vector<8x64xf32>, vector<64x16xf32>, vector<8x16xf32> -> vector<8x16xf32>
    %cst_197 = arith.constant dense<0.000000e+00> : vector<8x16xf32>
    %568 = tpu.matmul %377, %562, %cst_197 {dimension_numbers = #tpu.dot_dimension_numbers<[1], [0], [0], [1], [0, 0, 1, 1], [], []>} : vector<8x64xf32>, vector<64x16xf32>, vector<8x16xf32> -> vector<8x16xf32>
    %cst_198 = arith.constant dense<0.000000e+00> : vector<8x8xf32>
    %569 = tpu.matmul %566, %567, %cst_198 {dimension_numbers = #tpu.dot_dimension_numbers<[1], [1], [0], [0], [0, 0, 1, 0], [], []>} : vector<8x16xf32>, vector<8x16xf32>, vector<8x8xf32> -> vector<8x8xf32>
    %cst_199 = arith.constant dense<0xFF800000> : vector<8xf32>
    %570 = vector.multi_reduction <maximumf>, %569, %cst_199 [1] : vector<8x8xf32> to vector<8xf32>
    %571 = vector.shape_cast %570 : vector<8xf32> to vector<8x1xf32>
    %572 = vector.broadcast %571 : vector<8x1xf32> to vector<8x8xf32>
    %573 = arith.subf %569, %572 : vector<8x8xf32>
    %574 = math.exp %573 : vector<8x8xf32>
    %cst_200 = arith.constant dense<0.000000e+00> : vector<8xf32>
    %575 = vector.multi_reduction <add>, %574, %cst_200 [1] : vector<8x8xf32> to vector<8xf32>
    %576 = vector.shape_cast %575 : vector<8xf32> to vector<8x1xf32>
    %577 = tpu.reciprocal %576 {approx = true} : vector<8x1xf32> -> vector<8x1xf32>
    %578 = vector.broadcast %577 : vector<8x1xf32> to vector<8x8xf32>
    %579 = arith.mulf %574, %578 : vector<8x8xf32>
    %cst_201 = arith.constant dense<0.000000e+00> : vector<8x16xf32>
    %580 = tpu.matmul %579, %568, %cst_201 {dimension_numbers = #tpu.dot_dimension_numbers<[1], [0], [0], [1], [0, 0, 1, 1], [], []>} : vector<8x8xf32>, vector<8x16xf32>, vector<8x16xf32> -> vector<8x16xf32>
    %581 = tpu.concatenate %517, %538, %559, %580 in 1 : vector<8x16xf32>, vector<8x16xf32>, vector<8x16xf32>, vector<8x16xf32> -> vector<8x64xf32>
    %c880 = arith.constant 880 : index
    %c0_202 = arith.constant 0 : index
    %582 = vector.load %arg3[%c880, %c0_202] : memref<2080x256xf32, #tpu.memory_space<vmem>>, vector<64x64xf32>
    %cst_203 = arith.constant dense<0.000000e+00> : vector<8x64xf32>
    %583 = tpu.matmul %581, %582, %cst_203 {dimension_numbers = #tpu.dot_dimension_numbers<[1], [0], [0], [1], [0, 0, 1, 1], [], []>} : vector<8x64xf32>, vector<64x64xf32>, vector<8x64xf32> -> vector<8x64xf32>
    %c944 = arith.constant 944 : index
    %c0_204 = arith.constant 0 : index
    %584 = vector.load %arg3[%c944, %c0_204] : memref<2080x256xf32, #tpu.memory_space<vmem>>, vector<1x64xf32>
    %585 = vector.broadcast %584 : vector<1x64xf32> to vector<8x64xf32>
    %586 = arith.addf %583, %585 : vector<8x64xf32>
    %587 = arith.addf %494, %586 : vector<8x64xf32>
    %cst_205 = arith.constant dense<0.000000e+00> : vector<8xf32>
    %588 = vector.multi_reduction <add>, %587, %cst_205 [1] : vector<8x64xf32> to vector<8xf32>
    %589 = vector.shape_cast %588 : vector<8xf32> to vector<8x1xf32>
    %cst_206 = arith.constant 6.400000e+01 : f32
    %590 = vector.broadcast %cst_206 : f32 to vector<8x1xf32>
    %591 = arith.divf %589, %590 : vector<8x1xf32>
    %592 = vector.broadcast %591 : vector<8x1xf32> to vector<8x64xf32>
    %593 = arith.subf %587, %592 : vector<8x64xf32>
    %594 = arith.mulf %593, %593 : vector<8x64xf32>
    %cst_207 = arith.constant dense<0.000000e+00> : vector<8xf32>
    %595 = vector.multi_reduction <add>, %594, %cst_207 [1] : vector<8x64xf32> to vector<8xf32>
    %596 = vector.shape_cast %595 : vector<8xf32> to vector<8x1xf32>
    %cst_208 = arith.constant 6.400000e+01 : f32
    %597 = vector.broadcast %cst_208 : f32 to vector<8x1xf32>
    %598 = arith.divf %596, %597 : vector<8x1xf32>
    %599 = vector.broadcast %591 : vector<8x1xf32> to vector<8x64xf32>
    %600 = arith.subf %587, %599 : vector<8x64xf32>
    %cst_209 = arith.constant 9.99999997E-7 : f32
    %601 = vector.broadcast %cst_209 : f32 to vector<8x1xf32>
    %602 = arith.addf %598, %601 : vector<8x1xf32>
    %603 = math.rsqrt %602 : vector<8x1xf32>
    %604 = vector.broadcast %603 : vector<8x1xf32> to vector<8x64xf32>
    %605 = arith.mulf %600, %604 : vector<8x64xf32>
    %c968 = arith.constant 968 : index
    %c0_210 = arith.constant 0 : index
    %606 = vector.load %arg3[%c968, %c0_210] : memref<2080x256xf32, #tpu.memory_space<vmem>>, vector<1x64xf32>
    %607 = vector.broadcast %606 : vector<1x64xf32> to vector<8x64xf32>
    %608 = arith.mulf %605, %607 : vector<8x64xf32>
    %c976 = arith.constant 976 : index
    %c0_211 = arith.constant 0 : index
    %609 = vector.load %arg3[%c976, %c0_211] : memref<2080x256xf32, #tpu.memory_space<vmem>>, vector<1x64xf32>
    %610 = vector.broadcast %609 : vector<1x64xf32> to vector<8x64xf32>
    %611 = arith.addf %608, %610 : vector<8x64xf32>
    %c984 = arith.constant 984 : index
    %c0_212 = arith.constant 0 : index
    %612 = vector.load %arg3[%c984, %c0_212] : memref<2080x256xf32, #tpu.memory_space<vmem>>, vector<64x256xf32>
    %cst_213 = arith.constant dense<0.000000e+00> : vector<8x256xf32>
    %613 = tpu.matmul %611, %612, %cst_213 {dimension_numbers = #tpu.dot_dimension_numbers<[1], [0], [0], [1], [0, 0, 1, 1], [], []>} : vector<8x64xf32>, vector<64x256xf32>, vector<8x256xf32> -> vector<8x256xf32>
    %c1048 = arith.constant 1048 : index
    %c0_214 = arith.constant 0 : index
    %614 = vector.load %arg3[%c1048, %c0_214] : memref<2080x256xf32, #tpu.memory_space<vmem>>, vector<1x256xf32>
    %615 = vector.broadcast %614 : vector<1x256xf32> to vector<8x256xf32>
    %616 = arith.addf %613, %615 : vector<8x256xf32>
    %cst_215 = arith.constant 0.000000e+00 : f32
    %617 = vector.broadcast %cst_215 : f32 to vector<8x256xf32>
    %618 = arith.maximumf %616, %617 : vector<8x256xf32>
    %c1056 = arith.constant 1056 : index
    %c0_216 = arith.constant 0 : index
    %619 = vector.load %arg3[%c1056, %c0_216] : memref<2080x256xf32, #tpu.memory_space<vmem>>, vector<256x64xf32>
    %cst_217 = arith.constant dense<0.000000e+00> : vector<8x64xf32>
    %620 = tpu.matmul %618, %619, %cst_217 {dimension_numbers = #tpu.dot_dimension_numbers<[1], [0], [0], [1], [0, 0, 1, 1], [], []>} : vector<8x256xf32>, vector<256x64xf32>, vector<8x64xf32> -> vector<8x64xf32>
    %c1312 = arith.constant 1312 : index
    %c0_218 = arith.constant 0 : index
    %621 = vector.load %arg3[%c1312, %c0_218] : memref<2080x256xf32, #tpu.memory_space<vmem>>, vector<1x64xf32>
    %622 = vector.broadcast %621 : vector<1x64xf32> to vector<8x64xf32>
    %623 = arith.addf %620, %622 : vector<8x64xf32>
    %624 = arith.addf %611, %623 : vector<8x64xf32>
    %cst_219 = arith.constant dense<0.000000e+00> : vector<8xf32>
    %625 = vector.multi_reduction <add>, %624, %cst_219 [1] : vector<8x64xf32> to vector<8xf32>
    %626 = vector.shape_cast %625 : vector<8xf32> to vector<8x1xf32>
    %cst_220 = arith.constant 6.400000e+01 : f32
    %627 = vector.broadcast %cst_220 : f32 to vector<8x1xf32>
    %628 = arith.divf %626, %627 : vector<8x1xf32>
    %629 = vector.broadcast %628 : vector<8x1xf32> to vector<8x64xf32>
    %630 = arith.subf %624, %629 : vector<8x64xf32>
    %631 = arith.mulf %630, %630 : vector<8x64xf32>
    %cst_221 = arith.constant dense<0.000000e+00> : vector<8xf32>
    %632 = vector.multi_reduction <add>, %631, %cst_221 [1] : vector<8x64xf32> to vector<8xf32>
    %633 = vector.shape_cast %632 : vector<8xf32> to vector<8x1xf32>
    %cst_222 = arith.constant 6.400000e+01 : f32
    %634 = vector.broadcast %cst_222 : f32 to vector<8x1xf32>
    %635 = arith.divf %633, %634 : vector<8x1xf32>
    %636 = vector.broadcast %628 : vector<8x1xf32> to vector<8x64xf32>
    %637 = arith.subf %624, %636 : vector<8x64xf32>
    %cst_223 = arith.constant 9.99999997E-7 : f32
    %638 = vector.broadcast %cst_223 : f32 to vector<8x1xf32>
    %639 = arith.addf %635, %638 : vector<8x1xf32>
    %640 = math.rsqrt %639 : vector<8x1xf32>
    %641 = vector.broadcast %640 : vector<8x1xf32> to vector<8x64xf32>
    %642 = arith.mulf %637, %641 : vector<8x64xf32>
    %c1320 = arith.constant 1320 : index
    %c0_224 = arith.constant 0 : index
    %643 = vector.load %arg3[%c1320, %c0_224] : memref<2080x256xf32, #tpu.memory_space<vmem>>, vector<1x64xf32>
    %644 = vector.broadcast %643 : vector<1x64xf32> to vector<8x64xf32>
    %645 = arith.mulf %642, %644 : vector<8x64xf32>
    %c1328 = arith.constant 1328 : index
    %c0_225 = arith.constant 0 : index
    %646 = vector.load %arg3[%c1328, %c0_225] : memref<2080x256xf32, #tpu.memory_space<vmem>>, vector<1x64xf32>
    %647 = vector.broadcast %646 : vector<1x64xf32> to vector<8x64xf32>
    %648 = arith.addf %645, %647 : vector<8x64xf32>
    %c1336 = arith.constant 1336 : index
    %c0_226 = arith.constant 0 : index
    %649 = vector.load %arg3[%c1336, %c0_226] : memref<2080x256xf32, #tpu.memory_space<vmem>>, vector<64x192xf32>
    %c1400 = arith.constant 1400 : index
    %c0_227 = arith.constant 0 : index
    %650 = vector.load %arg3[%c1400, %c0_227] : memref<2080x256xf32, #tpu.memory_space<vmem>>, vector<4x16xf32>
    %651 = vector.extract_strided_slice %649 {offsets = [0, 0], sizes = [64, 16], strides = [1, 1]} : vector<64x192xf32> to vector<64x16xf32>
    %652 = vector.extract_strided_slice %649 {offsets = [0, 64], sizes = [64, 16], strides = [1, 1]} : vector<64x192xf32> to vector<64x16xf32>
    %653 = vector.extract_strided_slice %649 {offsets = [0, 128], sizes = [64, 16], strides = [1, 1]} : vector<64x192xf32> to vector<64x16xf32>
    %cst_228 = arith.constant dense<0.000000e+00> : vector<8x16xf32>
    %654 = tpu.matmul %648, %651, %cst_228 {dimension_numbers = #tpu.dot_dimension_numbers<[1], [0], [0], [1], [0, 0, 1, 1], [], []>} : vector<8x64xf32>, vector<64x16xf32>, vector<8x16xf32> -> vector<8x16xf32>
    %655 = vector.extract_strided_slice %650 {offsets = [0, 0], sizes = [1, 16], strides = [1, 1]} : vector<4x16xf32> to vector<1x16xf32>
    %656 = vector.broadcast %655 : vector<1x16xf32> to vector<8x16xf32>
    %657 = arith.addf %654, %656 : vector<8x16xf32>
    %cst_229 = arith.constant dense<0.000000e+00> : vector<8x16xf32>
    %658 = tpu.matmul %648, %652, %cst_229 {dimension_numbers = #tpu.dot_dimension_numbers<[1], [0], [0], [1], [0, 0, 1, 1], [], []>} : vector<8x64xf32>, vector<64x16xf32>, vector<8x16xf32> -> vector<8x16xf32>
    %cst_230 = arith.constant dense<0.000000e+00> : vector<8x16xf32>
    %659 = tpu.matmul %648, %653, %cst_230 {dimension_numbers = #tpu.dot_dimension_numbers<[1], [0], [0], [1], [0, 0, 1, 1], [], []>} : vector<8x64xf32>, vector<64x16xf32>, vector<8x16xf32> -> vector<8x16xf32>
    %cst_231 = arith.constant dense<0.000000e+00> : vector<8x8xf32>
    %660 = tpu.matmul %657, %658, %cst_231 {dimension_numbers = #tpu.dot_dimension_numbers<[1], [1], [0], [0], [0, 0, 1, 0], [], []>} : vector<8x16xf32>, vector<8x16xf32>, vector<8x8xf32> -> vector<8x8xf32>
    %cst_232 = arith.constant dense<0xFF800000> : vector<8xf32>
    %661 = vector.multi_reduction <maximumf>, %660, %cst_232 [1] : vector<8x8xf32> to vector<8xf32>
    %662 = vector.shape_cast %661 : vector<8xf32> to vector<8x1xf32>
    %663 = vector.broadcast %662 : vector<8x1xf32> to vector<8x8xf32>
    %664 = arith.subf %660, %663 : vector<8x8xf32>
    %665 = math.exp %664 : vector<8x8xf32>
    %cst_233 = arith.constant dense<0.000000e+00> : vector<8xf32>
    %666 = vector.multi_reduction <add>, %665, %cst_233 [1] : vector<8x8xf32> to vector<8xf32>
    %667 = vector.shape_cast %666 : vector<8xf32> to vector<8x1xf32>
    %668 = tpu.reciprocal %667 {approx = true} : vector<8x1xf32> -> vector<8x1xf32>
    %669 = vector.broadcast %668 : vector<8x1xf32> to vector<8x8xf32>
    %670 = arith.mulf %665, %669 : vector<8x8xf32>
    %cst_234 = arith.constant dense<0.000000e+00> : vector<8x16xf32>
    %671 = tpu.matmul %670, %659, %cst_234 {dimension_numbers = #tpu.dot_dimension_numbers<[1], [0], [0], [1], [0, 0, 1, 1], [], []>} : vector<8x8xf32>, vector<8x16xf32>, vector<8x16xf32> -> vector<8x16xf32>
    %672 = vector.extract_strided_slice %649 {offsets = [0, 16], sizes = [64, 16], strides = [1, 1]} : vector<64x192xf32> to vector<64x16xf32>
    %673 = vector.extract_strided_slice %649 {offsets = [0, 80], sizes = [64, 16], strides = [1, 1]} : vector<64x192xf32> to vector<64x16xf32>
    %674 = vector.extract_strided_slice %649 {offsets = [0, 144], sizes = [64, 16], strides = [1, 1]} : vector<64x192xf32> to vector<64x16xf32>
    %cst_235 = arith.constant dense<0.000000e+00> : vector<8x16xf32>
    %675 = tpu.matmul %648, %672, %cst_235 {dimension_numbers = #tpu.dot_dimension_numbers<[1], [0], [0], [1], [0, 0, 1, 1], [], []>} : vector<8x64xf32>, vector<64x16xf32>, vector<8x16xf32> -> vector<8x16xf32>
    %676 = vector.extract_strided_slice %650 {offsets = [1, 0], sizes = [1, 16], strides = [1, 1]} : vector<4x16xf32> to vector<1x16xf32>
    %677 = vector.broadcast %676 : vector<1x16xf32> to vector<8x16xf32>
    %678 = arith.addf %675, %677 : vector<8x16xf32>
    %cst_236 = arith.constant dense<0.000000e+00> : vector<8x16xf32>
    %679 = tpu.matmul %648, %673, %cst_236 {dimension_numbers = #tpu.dot_dimension_numbers<[1], [0], [0], [1], [0, 0, 1, 1], [], []>} : vector<8x64xf32>, vector<64x16xf32>, vector<8x16xf32> -> vector<8x16xf32>
    %cst_237 = arith.constant dense<0.000000e+00> : vector<8x16xf32>
    %680 = tpu.matmul %648, %674, %cst_237 {dimension_numbers = #tpu.dot_dimension_numbers<[1], [0], [0], [1], [0, 0, 1, 1], [], []>} : vector<8x64xf32>, vector<64x16xf32>, vector<8x16xf32> -> vector<8x16xf32>
    %cst_238 = arith.constant dense<0.000000e+00> : vector<8x8xf32>
    %681 = tpu.matmul %678, %679, %cst_238 {dimension_numbers = #tpu.dot_dimension_numbers<[1], [1], [0], [0], [0, 0, 1, 0], [], []>} : vector<8x16xf32>, vector<8x16xf32>, vector<8x8xf32> -> vector<8x8xf32>
    %cst_239 = arith.constant dense<0xFF800000> : vector<8xf32>
    %682 = vector.multi_reduction <maximumf>, %681, %cst_239 [1] : vector<8x8xf32> to vector<8xf32>
    %683 = vector.shape_cast %682 : vector<8xf32> to vector<8x1xf32>
    %684 = vector.broadcast %683 : vector<8x1xf32> to vector<8x8xf32>
    %685 = arith.subf %681, %684 : vector<8x8xf32>
    %686 = math.exp %685 : vector<8x8xf32>
    %cst_240 = arith.constant dense<0.000000e+00> : vector<8xf32>
    %687 = vector.multi_reduction <add>, %686, %cst_240 [1] : vector<8x8xf32> to vector<8xf32>
    %688 = vector.shape_cast %687 : vector<8xf32> to vector<8x1xf32>
    %689 = tpu.reciprocal %688 {approx = true} : vector<8x1xf32> -> vector<8x1xf32>
    %690 = vector.broadcast %689 : vector<8x1xf32> to vector<8x8xf32>
    %691 = arith.mulf %686, %690 : vector<8x8xf32>
    %cst_241 = arith.constant dense<0.000000e+00> : vector<8x16xf32>
    %692 = tpu.matmul %691, %680, %cst_241 {dimension_numbers = #tpu.dot_dimension_numbers<[1], [0], [0], [1], [0, 0, 1, 1], [], []>} : vector<8x8xf32>, vector<8x16xf32>, vector<8x16xf32> -> vector<8x16xf32>
    %693 = vector.extract_strided_slice %649 {offsets = [0, 32], sizes = [64, 16], strides = [1, 1]} : vector<64x192xf32> to vector<64x16xf32>
    %694 = vector.extract_strided_slice %649 {offsets = [0, 96], sizes = [64, 16], strides = [1, 1]} : vector<64x192xf32> to vector<64x16xf32>
    %695 = vector.extract_strided_slice %649 {offsets = [0, 160], sizes = [64, 16], strides = [1, 1]} : vector<64x192xf32> to vector<64x16xf32>
    %cst_242 = arith.constant dense<0.000000e+00> : vector<8x16xf32>
    %696 = tpu.matmul %648, %693, %cst_242 {dimension_numbers = #tpu.dot_dimension_numbers<[1], [0], [0], [1], [0, 0, 1, 1], [], []>} : vector<8x64xf32>, vector<64x16xf32>, vector<8x16xf32> -> vector<8x16xf32>
    %697 = vector.extract_strided_slice %650 {offsets = [2, 0], sizes = [1, 16], strides = [1, 1]} : vector<4x16xf32> to vector<1x16xf32>
    %698 = vector.broadcast %697 : vector<1x16xf32> to vector<8x16xf32>
    %699 = arith.addf %696, %698 : vector<8x16xf32>
    %cst_243 = arith.constant dense<0.000000e+00> : vector<8x16xf32>
    %700 = tpu.matmul %648, %694, %cst_243 {dimension_numbers = #tpu.dot_dimension_numbers<[1], [0], [0], [1], [0, 0, 1, 1], [], []>} : vector<8x64xf32>, vector<64x16xf32>, vector<8x16xf32> -> vector<8x16xf32>
    %cst_244 = arith.constant dense<0.000000e+00> : vector<8x16xf32>
    %701 = tpu.matmul %648, %695, %cst_244 {dimension_numbers = #tpu.dot_dimension_numbers<[1], [0], [0], [1], [0, 0, 1, 1], [], []>} : vector<8x64xf32>, vector<64x16xf32>, vector<8x16xf32> -> vector<8x16xf32>
    %cst_245 = arith.constant dense<0.000000e+00> : vector<8x8xf32>
    %702 = tpu.matmul %699, %700, %cst_245 {dimension_numbers = #tpu.dot_dimension_numbers<[1], [1], [0], [0], [0, 0, 1, 0], [], []>} : vector<8x16xf32>, vector<8x16xf32>, vector<8x8xf32> -> vector<8x8xf32>
    %cst_246 = arith.constant dense<0xFF800000> : vector<8xf32>
    %703 = vector.multi_reduction <maximumf>, %702, %cst_246 [1] : vector<8x8xf32> to vector<8xf32>
    %704 = vector.shape_cast %703 : vector<8xf32> to vector<8x1xf32>
    %705 = vector.broadcast %704 : vector<8x1xf32> to vector<8x8xf32>
    %706 = arith.subf %702, %705 : vector<8x8xf32>
    %707 = math.exp %706 : vector<8x8xf32>
    %cst_247 = arith.constant dense<0.000000e+00> : vector<8xf32>
    %708 = vector.multi_reduction <add>, %707, %cst_247 [1] : vector<8x8xf32> to vector<8xf32>
    %709 = vector.shape_cast %708 : vector<8xf32> to vector<8x1xf32>
    %710 = tpu.reciprocal %709 {approx = true} : vector<8x1xf32> -> vector<8x1xf32>
    %711 = vector.broadcast %710 : vector<8x1xf32> to vector<8x8xf32>
    %712 = arith.mulf %707, %711 : vector<8x8xf32>
    %cst_248 = arith.constant dense<0.000000e+00> : vector<8x16xf32>
    %713 = tpu.matmul %712, %701, %cst_248 {dimension_numbers = #tpu.dot_dimension_numbers<[1], [0], [0], [1], [0, 0, 1, 1], [], []>} : vector<8x8xf32>, vector<8x16xf32>, vector<8x16xf32> -> vector<8x16xf32>
    %714 = vector.extract_strided_slice %649 {offsets = [0, 48], sizes = [64, 16], strides = [1, 1]} : vector<64x192xf32> to vector<64x16xf32>
    %715 = vector.extract_strided_slice %649 {offsets = [0, 112], sizes = [64, 16], strides = [1, 1]} : vector<64x192xf32> to vector<64x16xf32>
    %716 = vector.extract_strided_slice %649 {offsets = [0, 176], sizes = [64, 16], strides = [1, 1]} : vector<64x192xf32> to vector<64x16xf32>
    %cst_249 = arith.constant dense<0.000000e+00> : vector<8x16xf32>
    %717 = tpu.matmul %648, %714, %cst_249 {dimension_numbers = #tpu.dot_dimension_numbers<[1], [0], [0], [1], [0, 0, 1, 1], [], []>} : vector<8x64xf32>, vector<64x16xf32>, vector<8x16xf32> -> vector<8x16xf32>
    %718 = vector.extract_strided_slice %650 {offsets = [3, 0], sizes = [1, 16], strides = [1, 1]} : vector<4x16xf32> to vector<1x16xf32>
    %719 = vector.broadcast %718 : vector<1x16xf32> to vector<8x16xf32>
    %720 = arith.addf %717, %719 : vector<8x16xf32>
    %cst_250 = arith.constant dense<0.000000e+00> : vector<8x16xf32>
    %721 = tpu.matmul %648, %715, %cst_250 {dimension_numbers = #tpu.dot_dimension_numbers<[1], [0], [0], [1], [0, 0, 1, 1], [], []>} : vector<8x64xf32>, vector<64x16xf32>, vector<8x16xf32> -> vector<8x16xf32>
    %cst_251 = arith.constant dense<0.000000e+00> : vector<8x16xf32>
    %722 = tpu.matmul %648, %716, %cst_251 {dimension_numbers = #tpu.dot_dimension_numbers<[1], [0], [0], [1], [0, 0, 1, 1], [], []>} : vector<8x64xf32>, vector<64x16xf32>, vector<8x16xf32> -> vector<8x16xf32>
    %cst_252 = arith.constant dense<0.000000e+00> : vector<8x8xf32>
    %723 = tpu.matmul %720, %721, %cst_252 {dimension_numbers = #tpu.dot_dimension_numbers<[1], [1], [0], [0], [0, 0, 1, 0], [], []>} : vector<8x16xf32>, vector<8x16xf32>, vector<8x8xf32> -> vector<8x8xf32>
    %cst_253 = arith.constant dense<0xFF800000> : vector<8xf32>
    %724 = vector.multi_reduction <maximumf>, %723, %cst_253 [1] : vector<8x8xf32> to vector<8xf32>
    %725 = vector.shape_cast %724 : vector<8xf32> to vector<8x1xf32>
    %726 = vector.broadcast %725 : vector<8x1xf32> to vector<8x8xf32>
    %727 = arith.subf %723, %726 : vector<8x8xf32>
    %728 = math.exp %727 : vector<8x8xf32>
    %cst_254 = arith.constant dense<0.000000e+00> : vector<8xf32>
    %729 = vector.multi_reduction <add>, %728, %cst_254 [1] : vector<8x8xf32> to vector<8xf32>
    %730 = vector.shape_cast %729 : vector<8xf32> to vector<8x1xf32>
    %731 = tpu.reciprocal %730 {approx = true} : vector<8x1xf32> -> vector<8x1xf32>
    %732 = vector.broadcast %731 : vector<8x1xf32> to vector<8x8xf32>
    %733 = arith.mulf %728, %732 : vector<8x8xf32>
    %cst_255 = arith.constant dense<0.000000e+00> : vector<8x16xf32>
    %734 = tpu.matmul %733, %722, %cst_255 {dimension_numbers = #tpu.dot_dimension_numbers<[1], [0], [0], [1], [0, 0, 1, 1], [], []>} : vector<8x8xf32>, vector<8x16xf32>, vector<8x16xf32> -> vector<8x16xf32>
    %735 = tpu.concatenate %671, %692, %713, %734 in 1 : vector<8x16xf32>, vector<8x16xf32>, vector<8x16xf32>, vector<8x16xf32> -> vector<8x64xf32>
    %c1408 = arith.constant 1408 : index
    %c0_256 = arith.constant 0 : index
    %736 = vector.load %arg3[%c1408, %c0_256] : memref<2080x256xf32, #tpu.memory_space<vmem>>, vector<64x64xf32>
    %cst_257 = arith.constant dense<0.000000e+00> : vector<8x64xf32>
    %737 = tpu.matmul %735, %736, %cst_257 {dimension_numbers = #tpu.dot_dimension_numbers<[1], [0], [0], [1], [0, 0, 1, 1], [], []>} : vector<8x64xf32>, vector<64x64xf32>, vector<8x64xf32> -> vector<8x64xf32>
    %c1472 = arith.constant 1472 : index
    %c0_258 = arith.constant 0 : index
    %738 = vector.load %arg3[%c1472, %c0_258] : memref<2080x256xf32, #tpu.memory_space<vmem>>, vector<1x64xf32>
    %739 = vector.broadcast %738 : vector<1x64xf32> to vector<8x64xf32>
    %740 = arith.addf %737, %739 : vector<8x64xf32>
    %741 = arith.addf %648, %740 : vector<8x64xf32>
    %cst_259 = arith.constant dense<0.000000e+00> : vector<8xf32>
    %742 = vector.multi_reduction <add>, %741, %cst_259 [1] : vector<8x64xf32> to vector<8xf32>
    %743 = vector.shape_cast %742 : vector<8xf32> to vector<8x1xf32>
    %cst_260 = arith.constant 6.400000e+01 : f32
    %744 = vector.broadcast %cst_260 : f32 to vector<8x1xf32>
    %745 = arith.divf %743, %744 : vector<8x1xf32>
    %746 = vector.broadcast %745 : vector<8x1xf32> to vector<8x64xf32>
    %747 = arith.subf %741, %746 : vector<8x64xf32>
    %748 = arith.mulf %747, %747 : vector<8x64xf32>
    %cst_261 = arith.constant dense<0.000000e+00> : vector<8xf32>
    %749 = vector.multi_reduction <add>, %748, %cst_261 [1] : vector<8x64xf32> to vector<8xf32>
    %750 = vector.shape_cast %749 : vector<8xf32> to vector<8x1xf32>
    %cst_262 = arith.constant 6.400000e+01 : f32
    %751 = vector.broadcast %cst_262 : f32 to vector<8x1xf32>
    %752 = arith.divf %750, %751 : vector<8x1xf32>
    %753 = vector.broadcast %745 : vector<8x1xf32> to vector<8x64xf32>
    %754 = arith.subf %741, %753 : vector<8x64xf32>
    %cst_263 = arith.constant 9.99999997E-7 : f32
    %755 = vector.broadcast %cst_263 : f32 to vector<8x1xf32>
    %756 = arith.addf %752, %755 : vector<8x1xf32>
    %757 = math.rsqrt %756 : vector<8x1xf32>
    %758 = vector.broadcast %757 : vector<8x1xf32> to vector<8x64xf32>
    %759 = arith.mulf %754, %758 : vector<8x64xf32>
    %c1624 = arith.constant 1624 : index
    %c0_264 = arith.constant 0 : index
    %760 = vector.load %arg3[%c1624, %c0_264] : memref<2080x256xf32, #tpu.memory_space<vmem>>, vector<1x64xf32>
    %761 = vector.broadcast %760 : vector<1x64xf32> to vector<8x64xf32>
    %762 = arith.mulf %759, %761 : vector<8x64xf32>
    %c1632 = arith.constant 1632 : index
    %c0_265 = arith.constant 0 : index
    %763 = vector.load %arg3[%c1632, %c0_265] : memref<2080x256xf32, #tpu.memory_space<vmem>>, vector<1x64xf32>
    %764 = vector.broadcast %763 : vector<1x64xf32> to vector<8x64xf32>
    %765 = arith.addf %762, %764 : vector<8x64xf32>
    %c1480 = arith.constant 1480 : index
    %c0_266 = arith.constant 0 : index
    %766 = vector.load %arg3[%c1480, %c0_266] : memref<2080x256xf32, #tpu.memory_space<vmem>>, vector<64x192xf32>
    %c1544 = arith.constant 1544 : index
    %c0_267 = arith.constant 0 : index
    %767 = vector.load %arg3[%c1544, %c0_267] : memref<2080x256xf32, #tpu.memory_space<vmem>>, vector<4x16xf32>
    %768 = vector.extract_strided_slice %766 {offsets = [0, 0], sizes = [64, 16], strides = [1, 1]} : vector<64x192xf32> to vector<64x16xf32>
    %769 = vector.extract_strided_slice %766 {offsets = [0, 64], sizes = [64, 16], strides = [1, 1]} : vector<64x192xf32> to vector<64x16xf32>
    %770 = vector.extract_strided_slice %766 {offsets = [0, 128], sizes = [64, 16], strides = [1, 1]} : vector<64x192xf32> to vector<64x16xf32>
    %cst_268 = arith.constant dense<0.000000e+00> : vector<8x16xf32>
    %771 = tpu.matmul %765, %768, %cst_268 {dimension_numbers = #tpu.dot_dimension_numbers<[1], [0], [0], [1], [0, 0, 1, 1], [], []>} : vector<8x64xf32>, vector<64x16xf32>, vector<8x16xf32> -> vector<8x16xf32>
    %772 = vector.extract_strided_slice %767 {offsets = [0, 0], sizes = [1, 16], strides = [1, 1]} : vector<4x16xf32> to vector<1x16xf32>
    %773 = vector.broadcast %772 : vector<1x16xf32> to vector<8x16xf32>
    %774 = arith.addf %771, %773 : vector<8x16xf32>
    %cst_269 = arith.constant dense<0.000000e+00> : vector<8x16xf32>
    %775 = tpu.matmul %377, %769, %cst_269 {dimension_numbers = #tpu.dot_dimension_numbers<[1], [0], [0], [1], [0, 0, 1, 1], [], []>} : vector<8x64xf32>, vector<64x16xf32>, vector<8x16xf32> -> vector<8x16xf32>
    %cst_270 = arith.constant dense<0.000000e+00> : vector<8x16xf32>
    %776 = tpu.matmul %377, %770, %cst_270 {dimension_numbers = #tpu.dot_dimension_numbers<[1], [0], [0], [1], [0, 0, 1, 1], [], []>} : vector<8x64xf32>, vector<64x16xf32>, vector<8x16xf32> -> vector<8x16xf32>
    %cst_271 = arith.constant dense<0.000000e+00> : vector<8x8xf32>
    %777 = tpu.matmul %774, %775, %cst_271 {dimension_numbers = #tpu.dot_dimension_numbers<[1], [1], [0], [0], [0, 0, 1, 0], [], []>} : vector<8x16xf32>, vector<8x16xf32>, vector<8x8xf32> -> vector<8x8xf32>
    %cst_272 = arith.constant dense<0xFF800000> : vector<8xf32>
    %778 = vector.multi_reduction <maximumf>, %777, %cst_272 [1] : vector<8x8xf32> to vector<8xf32>
    %779 = vector.shape_cast %778 : vector<8xf32> to vector<8x1xf32>
    %780 = vector.broadcast %779 : vector<8x1xf32> to vector<8x8xf32>
    %781 = arith.subf %777, %780 : vector<8x8xf32>
    %782 = math.exp %781 : vector<8x8xf32>
    %cst_273 = arith.constant dense<0.000000e+00> : vector<8xf32>
    %783 = vector.multi_reduction <add>, %782, %cst_273 [1] : vector<8x8xf32> to vector<8xf32>
    %784 = vector.shape_cast %783 : vector<8xf32> to vector<8x1xf32>
    %785 = tpu.reciprocal %784 {approx = true} : vector<8x1xf32> -> vector<8x1xf32>
    %786 = vector.broadcast %785 : vector<8x1xf32> to vector<8x8xf32>
    %787 = arith.mulf %782, %786 : vector<8x8xf32>
    %cst_274 = arith.constant dense<0.000000e+00> : vector<8x16xf32>
    %788 = tpu.matmul %787, %776, %cst_274 {dimension_numbers = #tpu.dot_dimension_numbers<[1], [0], [0], [1], [0, 0, 1, 1], [], []>} : vector<8x8xf32>, vector<8x16xf32>, vector<8x16xf32> -> vector<8x16xf32>
    %789 = vector.extract_strided_slice %766 {offsets = [0, 16], sizes = [64, 16], strides = [1, 1]} : vector<64x192xf32> to vector<64x16xf32>
    %790 = vector.extract_strided_slice %766 {offsets = [0, 80], sizes = [64, 16], strides = [1, 1]} : vector<64x192xf32> to vector<64x16xf32>
    %791 = vector.extract_strided_slice %766 {offsets = [0, 144], sizes = [64, 16], strides = [1, 1]} : vector<64x192xf32> to vector<64x16xf32>
    %cst_275 = arith.constant dense<0.000000e+00> : vector<8x16xf32>
    %792 = tpu.matmul %765, %789, %cst_275 {dimension_numbers = #tpu.dot_dimension_numbers<[1], [0], [0], [1], [0, 0, 1, 1], [], []>} : vector<8x64xf32>, vector<64x16xf32>, vector<8x16xf32> -> vector<8x16xf32>
    %793 = vector.extract_strided_slice %767 {offsets = [1, 0], sizes = [1, 16], strides = [1, 1]} : vector<4x16xf32> to vector<1x16xf32>
    %794 = vector.broadcast %793 : vector<1x16xf32> to vector<8x16xf32>
    %795 = arith.addf %792, %794 : vector<8x16xf32>
    %cst_276 = arith.constant dense<0.000000e+00> : vector<8x16xf32>
    %796 = tpu.matmul %377, %790, %cst_276 {dimension_numbers = #tpu.dot_dimension_numbers<[1], [0], [0], [1], [0, 0, 1, 1], [], []>} : vector<8x64xf32>, vector<64x16xf32>, vector<8x16xf32> -> vector<8x16xf32>
    %cst_277 = arith.constant dense<0.000000e+00> : vector<8x16xf32>
    %797 = tpu.matmul %377, %791, %cst_277 {dimension_numbers = #tpu.dot_dimension_numbers<[1], [0], [0], [1], [0, 0, 1, 1], [], []>} : vector<8x64xf32>, vector<64x16xf32>, vector<8x16xf32> -> vector<8x16xf32>
    %cst_278 = arith.constant dense<0.000000e+00> : vector<8x8xf32>
    %798 = tpu.matmul %795, %796, %cst_278 {dimension_numbers = #tpu.dot_dimension_numbers<[1], [1], [0], [0], [0, 0, 1, 0], [], []>} : vector<8x16xf32>, vector<8x16xf32>, vector<8x8xf32> -> vector<8x8xf32>
    %cst_279 = arith.constant dense<0xFF800000> : vector<8xf32>
    %799 = vector.multi_reduction <maximumf>, %798, %cst_279 [1] : vector<8x8xf32> to vector<8xf32>
    %800 = vector.shape_cast %799 : vector<8xf32> to vector<8x1xf32>
    %801 = vector.broadcast %800 : vector<8x1xf32> to vector<8x8xf32>
    %802 = arith.subf %798, %801 : vector<8x8xf32>
    %803 = math.exp %802 : vector<8x8xf32>
    %cst_280 = arith.constant dense<0.000000e+00> : vector<8xf32>
    %804 = vector.multi_reduction <add>, %803, %cst_280 [1] : vector<8x8xf32> to vector<8xf32>
    %805 = vector.shape_cast %804 : vector<8xf32> to vector<8x1xf32>
    %806 = tpu.reciprocal %805 {approx = true} : vector<8x1xf32> -> vector<8x1xf32>
    %807 = vector.broadcast %806 : vector<8x1xf32> to vector<8x8xf32>
    %808 = arith.mulf %803, %807 : vector<8x8xf32>
    %cst_281 = arith.constant dense<0.000000e+00> : vector<8x16xf32>
    %809 = tpu.matmul %808, %797, %cst_281 {dimension_numbers = #tpu.dot_dimension_numbers<[1], [0], [0], [1], [0, 0, 1, 1], [], []>} : vector<8x8xf32>, vector<8x16xf32>, vector<8x16xf32> -> vector<8x16xf32>
    %810 = vector.extract_strided_slice %766 {offsets = [0, 32], sizes = [64, 16], strides = [1, 1]} : vector<64x192xf32> to vector<64x16xf32>
    %811 = vector.extract_strided_slice %766 {offsets = [0, 96], sizes = [64, 16], strides = [1, 1]} : vector<64x192xf32> to vector<64x16xf32>
    %812 = vector.extract_strided_slice %766 {offsets = [0, 160], sizes = [64, 16], strides = [1, 1]} : vector<64x192xf32> to vector<64x16xf32>
    %cst_282 = arith.constant dense<0.000000e+00> : vector<8x16xf32>
    %813 = tpu.matmul %765, %810, %cst_282 {dimension_numbers = #tpu.dot_dimension_numbers<[1], [0], [0], [1], [0, 0, 1, 1], [], []>} : vector<8x64xf32>, vector<64x16xf32>, vector<8x16xf32> -> vector<8x16xf32>
    %814 = vector.extract_strided_slice %767 {offsets = [2, 0], sizes = [1, 16], strides = [1, 1]} : vector<4x16xf32> to vector<1x16xf32>
    %815 = vector.broadcast %814 : vector<1x16xf32> to vector<8x16xf32>
    %816 = arith.addf %813, %815 : vector<8x16xf32>
    %cst_283 = arith.constant dense<0.000000e+00> : vector<8x16xf32>
    %817 = tpu.matmul %377, %811, %cst_283 {dimension_numbers = #tpu.dot_dimension_numbers<[1], [0], [0], [1], [0, 0, 1, 1], [], []>} : vector<8x64xf32>, vector<64x16xf32>, vector<8x16xf32> -> vector<8x16xf32>
    %cst_284 = arith.constant dense<0.000000e+00> : vector<8x16xf32>
    %818 = tpu.matmul %377, %812, %cst_284 {dimension_numbers = #tpu.dot_dimension_numbers<[1], [0], [0], [1], [0, 0, 1, 1], [], []>} : vector<8x64xf32>, vector<64x16xf32>, vector<8x16xf32> -> vector<8x16xf32>
    %cst_285 = arith.constant dense<0.000000e+00> : vector<8x8xf32>
    %819 = tpu.matmul %816, %817, %cst_285 {dimension_numbers = #tpu.dot_dimension_numbers<[1], [1], [0], [0], [0, 0, 1, 0], [], []>} : vector<8x16xf32>, vector<8x16xf32>, vector<8x8xf32> -> vector<8x8xf32>
    %cst_286 = arith.constant dense<0xFF800000> : vector<8xf32>
    %820 = vector.multi_reduction <maximumf>, %819, %cst_286 [1] : vector<8x8xf32> to vector<8xf32>
    %821 = vector.shape_cast %820 : vector<8xf32> to vector<8x1xf32>
    %822 = vector.broadcast %821 : vector<8x1xf32> to vector<8x8xf32>
    %823 = arith.subf %819, %822 : vector<8x8xf32>
    %824 = math.exp %823 : vector<8x8xf32>
    %cst_287 = arith.constant dense<0.000000e+00> : vector<8xf32>
    %825 = vector.multi_reduction <add>, %824, %cst_287 [1] : vector<8x8xf32> to vector<8xf32>
    %826 = vector.shape_cast %825 : vector<8xf32> to vector<8x1xf32>
    %827 = tpu.reciprocal %826 {approx = true} : vector<8x1xf32> -> vector<8x1xf32>
    %828 = vector.broadcast %827 : vector<8x1xf32> to vector<8x8xf32>
    %829 = arith.mulf %824, %828 : vector<8x8xf32>
    %cst_288 = arith.constant dense<0.000000e+00> : vector<8x16xf32>
    %830 = tpu.matmul %829, %818, %cst_288 {dimension_numbers = #tpu.dot_dimension_numbers<[1], [0], [0], [1], [0, 0, 1, 1], [], []>} : vector<8x8xf32>, vector<8x16xf32>, vector<8x16xf32> -> vector<8x16xf32>
    %831 = vector.extract_strided_slice %766 {offsets = [0, 48], sizes = [64, 16], strides = [1, 1]} : vector<64x192xf32> to vector<64x16xf32>
    %832 = vector.extract_strided_slice %766 {offsets = [0, 112], sizes = [64, 16], strides = [1, 1]} : vector<64x192xf32> to vector<64x16xf32>
    %833 = vector.extract_strided_slice %766 {offsets = [0, 176], sizes = [64, 16], strides = [1, 1]} : vector<64x192xf32> to vector<64x16xf32>
    %cst_289 = arith.constant dense<0.000000e+00> : vector<8x16xf32>
    %834 = tpu.matmul %765, %831, %cst_289 {dimension_numbers = #tpu.dot_dimension_numbers<[1], [0], [0], [1], [0, 0, 1, 1], [], []>} : vector<8x64xf32>, vector<64x16xf32>, vector<8x16xf32> -> vector<8x16xf32>
    %835 = vector.extract_strided_slice %767 {offsets = [3, 0], sizes = [1, 16], strides = [1, 1]} : vector<4x16xf32> to vector<1x16xf32>
    %836 = vector.broadcast %835 : vector<1x16xf32> to vector<8x16xf32>
    %837 = arith.addf %834, %836 : vector<8x16xf32>
    %cst_290 = arith.constant dense<0.000000e+00> : vector<8x16xf32>
    %838 = tpu.matmul %377, %832, %cst_290 {dimension_numbers = #tpu.dot_dimension_numbers<[1], [0], [0], [1], [0, 0, 1, 1], [], []>} : vector<8x64xf32>, vector<64x16xf32>, vector<8x16xf32> -> vector<8x16xf32>
    %cst_291 = arith.constant dense<0.000000e+00> : vector<8x16xf32>
    %839 = tpu.matmul %377, %833, %cst_291 {dimension_numbers = #tpu.dot_dimension_numbers<[1], [0], [0], [1], [0, 0, 1, 1], [], []>} : vector<8x64xf32>, vector<64x16xf32>, vector<8x16xf32> -> vector<8x16xf32>
    %cst_292 = arith.constant dense<0.000000e+00> : vector<8x8xf32>
    %840 = tpu.matmul %837, %838, %cst_292 {dimension_numbers = #tpu.dot_dimension_numbers<[1], [1], [0], [0], [0, 0, 1, 0], [], []>} : vector<8x16xf32>, vector<8x16xf32>, vector<8x8xf32> -> vector<8x8xf32>
    %cst_293 = arith.constant dense<0xFF800000> : vector<8xf32>
    %841 = vector.multi_reduction <maximumf>, %840, %cst_293 [1] : vector<8x8xf32> to vector<8xf32>
    %842 = vector.shape_cast %841 : vector<8xf32> to vector<8x1xf32>
    %843 = vector.broadcast %842 : vector<8x1xf32> to vector<8x8xf32>
    %844 = arith.subf %840, %843 : vector<8x8xf32>
    %845 = math.exp %844 : vector<8x8xf32>
    %cst_294 = arith.constant dense<0.000000e+00> : vector<8xf32>
    %846 = vector.multi_reduction <add>, %845, %cst_294 [1] : vector<8x8xf32> to vector<8xf32>
    %847 = vector.shape_cast %846 : vector<8xf32> to vector<8x1xf32>
    %848 = tpu.reciprocal %847 {approx = true} : vector<8x1xf32> -> vector<8x1xf32>
    %849 = vector.broadcast %848 : vector<8x1xf32> to vector<8x8xf32>
    %850 = arith.mulf %845, %849 : vector<8x8xf32>
    %cst_295 = arith.constant dense<0.000000e+00> : vector<8x16xf32>
    %851 = tpu.matmul %850, %839, %cst_295 {dimension_numbers = #tpu.dot_dimension_numbers<[1], [0], [0], [1], [0, 0, 1, 1], [], []>} : vector<8x8xf32>, vector<8x16xf32>, vector<8x16xf32> -> vector<8x16xf32>
    %852 = tpu.concatenate %788, %809, %830, %851 in 1 : vector<8x16xf32>, vector<8x16xf32>, vector<8x16xf32>, vector<8x16xf32> -> vector<8x64xf32>
    %c1552 = arith.constant 1552 : index
    %c0_296 = arith.constant 0 : index
    %853 = vector.load %arg3[%c1552, %c0_296] : memref<2080x256xf32, #tpu.memory_space<vmem>>, vector<64x64xf32>
    %cst_297 = arith.constant dense<0.000000e+00> : vector<8x64xf32>
    %854 = tpu.matmul %852, %853, %cst_297 {dimension_numbers = #tpu.dot_dimension_numbers<[1], [0], [0], [1], [0, 0, 1, 1], [], []>} : vector<8x64xf32>, vector<64x64xf32>, vector<8x64xf32> -> vector<8x64xf32>
    %c1616 = arith.constant 1616 : index
    %c0_298 = arith.constant 0 : index
    %855 = vector.load %arg3[%c1616, %c0_298] : memref<2080x256xf32, #tpu.memory_space<vmem>>, vector<1x64xf32>
    %856 = vector.broadcast %855 : vector<1x64xf32> to vector<8x64xf32>
    %857 = arith.addf %854, %856 : vector<8x64xf32>
    %858 = arith.addf %765, %857 : vector<8x64xf32>
    %cst_299 = arith.constant dense<0.000000e+00> : vector<8xf32>
    %859 = vector.multi_reduction <add>, %858, %cst_299 [1] : vector<8x64xf32> to vector<8xf32>
    %860 = vector.shape_cast %859 : vector<8xf32> to vector<8x1xf32>
    %cst_300 = arith.constant 6.400000e+01 : f32
    %861 = vector.broadcast %cst_300 : f32 to vector<8x1xf32>
    %862 = arith.divf %860, %861 : vector<8x1xf32>
    %863 = vector.broadcast %862 : vector<8x1xf32> to vector<8x64xf32>
    %864 = arith.subf %858, %863 : vector<8x64xf32>
    %865 = arith.mulf %864, %864 : vector<8x64xf32>
    %cst_301 = arith.constant dense<0.000000e+00> : vector<8xf32>
    %866 = vector.multi_reduction <add>, %865, %cst_301 [1] : vector<8x64xf32> to vector<8xf32>
    %867 = vector.shape_cast %866 : vector<8xf32> to vector<8x1xf32>
    %cst_302 = arith.constant 6.400000e+01 : f32
    %868 = vector.broadcast %cst_302 : f32 to vector<8x1xf32>
    %869 = arith.divf %867, %868 : vector<8x1xf32>
    %870 = vector.broadcast %862 : vector<8x1xf32> to vector<8x64xf32>
    %871 = arith.subf %858, %870 : vector<8x64xf32>
    %cst_303 = arith.constant 9.99999997E-7 : f32
    %872 = vector.broadcast %cst_303 : f32 to vector<8x1xf32>
    %873 = arith.addf %869, %872 : vector<8x1xf32>
    %874 = math.rsqrt %873 : vector<8x1xf32>
    %875 = vector.broadcast %874 : vector<8x1xf32> to vector<8x64xf32>
    %876 = arith.mulf %871, %875 : vector<8x64xf32>
    %c1640 = arith.constant 1640 : index
    %c0_304 = arith.constant 0 : index
    %877 = vector.load %arg3[%c1640, %c0_304] : memref<2080x256xf32, #tpu.memory_space<vmem>>, vector<1x64xf32>
    %878 = vector.broadcast %877 : vector<1x64xf32> to vector<8x64xf32>
    %879 = arith.mulf %876, %878 : vector<8x64xf32>
    %c1648 = arith.constant 1648 : index
    %c0_305 = arith.constant 0 : index
    %880 = vector.load %arg3[%c1648, %c0_305] : memref<2080x256xf32, #tpu.memory_space<vmem>>, vector<1x64xf32>
    %881 = vector.broadcast %880 : vector<1x64xf32> to vector<8x64xf32>
    %882 = arith.addf %879, %881 : vector<8x64xf32>
    %c1656 = arith.constant 1656 : index
    %c0_306 = arith.constant 0 : index
    %883 = vector.load %arg3[%c1656, %c0_306] : memref<2080x256xf32, #tpu.memory_space<vmem>>, vector<64x256xf32>
    %cst_307 = arith.constant dense<0.000000e+00> : vector<8x256xf32>
    %884 = tpu.matmul %882, %883, %cst_307 {dimension_numbers = #tpu.dot_dimension_numbers<[1], [0], [0], [1], [0, 0, 1, 1], [], []>} : vector<8x64xf32>, vector<64x256xf32>, vector<8x256xf32> -> vector<8x256xf32>
    %c1720 = arith.constant 1720 : index
    %c0_308 = arith.constant 0 : index
    %885 = vector.load %arg3[%c1720, %c0_308] : memref<2080x256xf32, #tpu.memory_space<vmem>>, vector<1x256xf32>
    %886 = vector.broadcast %885 : vector<1x256xf32> to vector<8x256xf32>
    %887 = arith.addf %884, %886 : vector<8x256xf32>
    %cst_309 = arith.constant 0.000000e+00 : f32
    %888 = vector.broadcast %cst_309 : f32 to vector<8x256xf32>
    %889 = arith.maximumf %887, %888 : vector<8x256xf32>
    %c1728 = arith.constant 1728 : index
    %c0_310 = arith.constant 0 : index
    %890 = vector.load %arg3[%c1728, %c0_310] : memref<2080x256xf32, #tpu.memory_space<vmem>>, vector<256x64xf32>
    %cst_311 = arith.constant dense<0.000000e+00> : vector<8x64xf32>
    %891 = tpu.matmul %889, %890, %cst_311 {dimension_numbers = #tpu.dot_dimension_numbers<[1], [0], [0], [1], [0, 0, 1, 1], [], []>} : vector<8x256xf32>, vector<256x64xf32>, vector<8x64xf32> -> vector<8x64xf32>
    %c1984 = arith.constant 1984 : index
    %c0_312 = arith.constant 0 : index
    %892 = vector.load %arg3[%c1984, %c0_312] : memref<2080x256xf32, #tpu.memory_space<vmem>>, vector<1x64xf32>
    %893 = vector.broadcast %892 : vector<1x64xf32> to vector<8x64xf32>
    %894 = arith.addf %891, %893 : vector<8x64xf32>
    %895 = arith.addf %882, %894 : vector<8x64xf32>
    %cst_313 = arith.constant dense<0.000000e+00> : vector<8xf32>
    %896 = vector.multi_reduction <add>, %895, %cst_313 [1] : vector<8x64xf32> to vector<8xf32>
    %897 = vector.shape_cast %896 : vector<8xf32> to vector<8x1xf32>
    %cst_314 = arith.constant 6.400000e+01 : f32
    %898 = vector.broadcast %cst_314 : f32 to vector<8x1xf32>
    %899 = arith.divf %897, %898 : vector<8x1xf32>
    %900 = vector.broadcast %899 : vector<8x1xf32> to vector<8x64xf32>
    %901 = arith.subf %895, %900 : vector<8x64xf32>
    %902 = arith.mulf %901, %901 : vector<8x64xf32>
    %cst_315 = arith.constant dense<0.000000e+00> : vector<8xf32>
    %903 = vector.multi_reduction <add>, %902, %cst_315 [1] : vector<8x64xf32> to vector<8xf32>
    %904 = vector.shape_cast %903 : vector<8xf32> to vector<8x1xf32>
    %cst_316 = arith.constant 6.400000e+01 : f32
    %905 = vector.broadcast %cst_316 : f32 to vector<8x1xf32>
    %906 = arith.divf %904, %905 : vector<8x1xf32>
    %907 = vector.broadcast %899 : vector<8x1xf32> to vector<8x64xf32>
    %908 = arith.subf %895, %907 : vector<8x64xf32>
    %cst_317 = arith.constant 9.99999997E-7 : f32
    %909 = vector.broadcast %cst_317 : f32 to vector<8x1xf32>
    %910 = arith.addf %906, %909 : vector<8x1xf32>
    %911 = math.rsqrt %910 : vector<8x1xf32>
    %912 = vector.broadcast %911 : vector<8x1xf32> to vector<8x64xf32>
    %913 = arith.mulf %908, %912 : vector<8x64xf32>
    %c1992 = arith.constant 1992 : index
    %c0_318 = arith.constant 0 : index
    %914 = vector.load %arg3[%c1992, %c0_318] : memref<2080x256xf32, #tpu.memory_space<vmem>>, vector<1x64xf32>
    %915 = vector.broadcast %914 : vector<1x64xf32> to vector<8x64xf32>
    %916 = arith.mulf %913, %915 : vector<8x64xf32>
    %c2000 = arith.constant 2000 : index
    %c0_319 = arith.constant 0 : index
    %917 = vector.load %arg3[%c2000, %c0_319] : memref<2080x256xf32, #tpu.memory_space<vmem>>, vector<1x64xf32>
    %918 = vector.broadcast %917 : vector<1x64xf32> to vector<8x64xf32>
    %919 = arith.addf %916, %918 : vector<8x64xf32>
    %c2008 = arith.constant 2008 : index
    %c0_320 = arith.constant 0 : index
    %920 = vector.load %arg3[%c2008, %c0_320] : memref<2080x256xf32, #tpu.memory_space<vmem>>, vector<64x128xf32>
    %cst_321 = arith.constant dense<0.000000e+00> : vector<8x128xf32>
    %921 = tpu.matmul %919, %920, %cst_321 {dimension_numbers = #tpu.dot_dimension_numbers<[1], [0], [0], [1], [0, 0, 1, 1], [], []>} : vector<8x64xf32>, vector<64x128xf32>, vector<8x128xf32> -> vector<8x128xf32>
    %c2072 = arith.constant 2072 : index
    %c0_322 = arith.constant 0 : index
    %922 = vector.load %arg3[%c2072, %c0_322] : memref<2080x256xf32, #tpu.memory_space<vmem>>, vector<1x128xf32>
    %923 = vector.broadcast %922 : vector<1x128xf32> to vector<8x128xf32>
    %924 = arith.addf %921, %923 : vector<8x128xf32>
    %c0_323 = arith.constant 0 : index
    %c0_324 = arith.constant 0 : index
    %925 = vector.load %arg4[%c0_323, %c0_324] : memref<8x128xf32, #tpu.memory_space<vmem>>, vector<8x128xf32>
    tpu.vector_store %arg4[%c0_323, %c0_324], %924 {strides = array<i32>} : memref<8x128xf32, #tpu.memory_space<vmem>>, vector<8x128xf32>,
    return
  }
  func.func @transform_0(%arg0: i32) -> (i32, i32) {
    %c0_i32 = arith.constant 0 : i32
    %c0_i32_0 = arith.constant 0 : i32
    return %arg0, %c0_i32 : i32, i32
  }
  func.func @transform_1(%arg0: i32) -> (i32, i32) {
    %c0_i32 = arith.constant 0 : i32
    %c0_i32_0 = arith.constant 0 : i32
    return %arg0, %c0_i32 : i32, i32
  }
  func.func @transform_2(%arg0: i32) -> (i32, i32) {
    %c0_i32 = arith.constant 0 : i32
    %c0_i32_0 = arith.constant 0 : i32
    %c0_i32_1 = arith.constant 0 : i32
    return %c0_i32, %c0_i32_0 : i32, i32
  }
  func.func @transform_3(%arg0: i32) -> (i32, i32) {
    %c0_i32 = arith.constant 0 : i32
    %c0_i32_0 = arith.constant 0 : i32
    return %arg0, %c0_i32 : i32, i32
  }
}

</mosaic_0001>

<bundles_post_ra>
// kernel: tdeepsc_textr_forward.1
= control target key start
LH: loop header
LB: loop body
LE: loop exit
PB: predicated region body
PF: predicated region fallthrough
CT: control target
= control target key end

     0   :  { %s7070_s12 = smov 0   ;;  %s9071_s0 = inlined_call_operand.vmem [shape: f32[16,32], index: 0, kind: input, shape index: {}]   ;;  %s9072_s1 = inlined_call_operand.vmem [shape: f32[16,24], index: 1, kind: input, shape index: {}]   ;;  %s9073_s2 = inlined_call_operand.vmem [shape: f32[2080,256], index: 2, kind: input, shape index: {}]   ;;  %s9074_s3 = inlined_call_operand.vmem [shape: f32[16,128], index: 3, kind: output, shape index: {}]  }
   0x1 LB: > { %s5679_s13 = sadd.s32 4294967295, %s7031_s12   ;;  %p5683_p0 = scmp.ge.s32.totalorder %s7031_s12, 1  ;;  %s7031_s12 = sphi %s7070_s12, %s13_s12  }
   0x2   : > { %p145_p1 = scmp.lt.s32.totalorder %s7031_s12, 3 }
   0x4   : > { %p146_p2 = pnand %p5683_p0, %p145_p1 }
   0x5   : > { %p171_p3 = scmp.lt.s32.totalorder (!%p146_p2), %s5679_s13, 1  ;;  %s7034_s22 = smov (!%p146_p2), 96  }
   0x6   : > { %149 = sbr.rel (%p146_p2) target bundleno = 16957 (0x423d), region = 32  ;;  %s7035_s27 = smov (!%p146_p2), 120  }
   0x7   : > { %s7036_s28 = smov (!%p146_p2), 64   ;;  %s7037_s29 = smov (!%p146_p2), 88  }
   0x8   : > { %s7038_s30 = smov (!%p146_p2), 56   ;;  %s7039_s4 = smov (!%p146_p2), 80  }
   0x9   : > { %s7040_s11 = smov (!%p146_p2), 112   ;;  %s7042_s15 = smov (!%p146_p2), 72  }
   0xa   : > { %s7043_s16 = smov (!%p146_p2), 104   ;;  %s7045_s18 = smov (!%p146_p2), 40  }
   0xb   : > { %s9076_s13 = smov (!%p171_p3, %s5679_s13), 1  ;;  %vm184_vm0 = vcmask 261120   ;;  %v7033_v2 = vmov 32.0   ;;  %v220_v3 = vld [vmem:[%s9073_s2 + $0x40] sm:$0xff]  ;;  %v221_v4 = vld [vmem:[%s9073_s2 + $0x50] sm:$0xff]  ;;  %vm315_vm5 = vcmask 64512  }
   0xc   : > { %s7078_s14 = sshll.u32 %s9076_s13, 3  ;;  %6897 = vrcp.f32 %v7033_v2  ;;  %v7091_v5 = vpack.i.bf16 %v220_v3, %v221_v4  ;;  %239 = vmatpush.msra.mxu0 %v221_v4  ;;  %v218_v7 = vld [vmem:[%s9073_s2 + $0x20] sm:$0xff]  ;;  %v219_v8 = vld [vmem:[%s9073_s2 + $0x30] sm:$0xff]  ;;  %s7041_s13 = smov 48   ;;  %vm860_vm6 = vcmask 130048   ;;  %vm862_vm7 = vcmask 195584  }
   0xd   : > { %s174_s17 = scalar_lea.vmem %s9071_s0, %s7078_s14  ;;  %v7101_v10 = vpack.i.bf16 %v218_v7, %v219_v8  ;;  %v214_v51 = vld [vmem:[%s9073_s2] ss:$0 sm:$0xff]  ;;  %v216_v55 = vld [vmem:[%s9073_s2 + $0x10] ss:$0 sm:$0xff]  ;;  %s7046_s19 = smov 16  }
   0xe   : > { %v183_v0 = vld [vmem:[%s174_s17] sm:$0xff]  ;;  %5878 = vrot.lane.b32.xlu1 %v7091_v5, %s7034_s22  ;;  %240 = vmatpush.msra.mxu0 %v220_v3  ;;  %s7044_s17 = smov 8   ;;  %s7047_s5 = smov 24  }
   0xf   : > { %v185_v1 = vsel %vm184_vm0, %v183_v0, 0.0  ;;  %5888 = vrot.lane.b32.xlu2 %v7091_v5, %s7036_s28  ;;  %s7048_s10 = smov 32  }
  0x10   : > { %186 = vadd.xlane.f32.xlu0 %v185_v1  ;;  %241 = vmatpush.msra.mxu0 %v219_v8  ;;  %v7160_v8 = vld [vmem:[%s9073_s2 + $0x60] sm:$0xf] }
  0x12   : > { %v6898_v6 = vpop.eup %6897  ;;  %242 = vmatpush.msra.mxu0 %v218_v7 }
  0x13   : > { %v189_v9 = vmul.f32 32.0, %v6898_v6  ;;  %vm193_vm1 = vweird.f32 %v6898_v6 }
  0x15   : > { %v190_v11 = vsub.f32 1.0, %v189_v9  ;;  %v223_v9 = vperm.slane %v7160_v8, 0 }
  0x16   : > { %5883 = vrot.lane.b32.xlu1 %v7101_v10, %s7034_s22 }
  0x17   : > { %v191_v12 = vmul.f32 %v6898_v6, %v190_v11  ;;  %5893 = vrot.lane.b32.xlu2 %v7101_v10, %s7036_s28 }
  0x19   : > { %v192_v13 = vadd.f32 %v6898_v6, %v191_v12 }
  0x1b   : > { %v7105_v14 = vsel %vm193_vm1, %v6898_v6, %v192_v13 }
  0x1e   : > { %5903 = vrot.lane.b32.xlu1 %v7091_v5, %s7035_s27 }
  0x1f   : > { %5908 = vrot.lane.b32.xlu2 %v7101_v10, %s7037_s29 }
  0x26   : > { %5913 = vrot.lane.b32.xlu1 %v7101_v10, %s7035_s27 }
  0x69   : > { %v5889_v22 = vpop.permute.xlu2 %5888 }
  0x6a   : > { %v5890_v25 = vunpack.i.l.bf16 %v5889_v22  ;;  %v5891_v27 = vunpack.i.h.bf16 %v5889_v22 }
  0x6c   : > { %307 = vmatpush.msra.mxu2 %v5890_v25 }
  0x6e   : > { %308 = vmatpush.msra.mxu2 %v5891_v27 }
  0x71   : > { %v5894_v28 = vpop.permute.xlu2 %5893 }
  0x72   : > { %v5895_v31 = vunpack.i.l.bf16 %v5894_v28  ;;  %v5896_v32 = vunpack.i.h.bf16 %v5894_v28 }
  0x74   : > { %309 = vmatpush.msra.mxu2 %v5895_v31 }
  0x76   : > { %310 = vmatpush.msra.mxu2 %v5896_v32 }
  0x79   : > { %v5909_v47 = vpop.permute.xlu2 %5908 }
  0x7a   : > { %v5910_v53 = vunpack.i.l.bf16 %v5909_v47  ;;  %v5911_v56 = vunpack.i.h.bf16 %v5909_v47 }
  0x80   : > { %v5879_v20 = vpop.permute.xlu1 %5878 }
  0x81   : > { %v5880_v21 = vunpack.i.l.bf16 %v5879_v20  ;;  %v5881_v24 = vunpack.i.h.bf16 %v5879_v20 }
  0x83   : > { %v187_v15 = vpop.xlane.xlu0 %186  ;;  %275 = vmatpush.msra.mxu1 %v5880_v21 }
  0x84   : > { %v195_v16 = vmul.f32 %v7105_v14, %v187_v15 }
  0x85   : > { %276 = vmatpush.msra.mxu1 %v5881_v24 }
  0x86   : > { %v7110_v17 = vsub.f32 %v183_v0, %v195_v16 }
  0x88   : > { %v197_v18 = vmul.f32 %v7110_v17, %v7110_v17  ;;  %v5884_v23 = vpop.permute.xlu1 %5883 }
  0x89   : > { %v5885_v26 = vunpack.i.l.bf16 %v5884_v23  ;;  %v5886_v30 = vunpack.i.h.bf16 %v5884_v23 }
  0x8a   : > { %v198_v19 = vsel %vm184_vm0, %v197_v18, 0.0 }
  0x8b   : > { %199 = vadd.xlane.f32.xlu0 %v198_v19  ;;  %277 = vmatpush.msra.mxu1 %v5885_v26 }
  0x8d   : > { %278 = vmatpush.msra.mxu1 %v5886_v30 }
  0x90   : > { %v5904_v29 = vpop.permute.xlu1 %5903 }
  0x91   : > { %v5905_v33 = vunpack.i.l.bf16 %v5904_v29  ;;  %v5906_v34 = vunpack.i.h.bf16 %v5904_v29 }
  0x93   : > { %401 = vmatpush.msrb.mxu0 %v5905_v33 }
  0x95   : > { %402 = vmatpush.msrb.mxu0 %v5906_v34 }
  0x98   : > { %v5914_v35 = vpop.permute.xlu1 %5913 }
  0x99   : > { %v5915_v37 = vunpack.i.l.bf16 %v5914_v35  ;;  %v5916_v40 = vunpack.i.h.bf16 %v5914_v35 }
  0x9b   : > { %403 = vmatpush.msrb.mxu0 %v5915_v37 }
  0x9d   : > { %404 = vmatpush.msrb.mxu0 %v5916_v40 }
  0x9f   : > { %5898 = vrot.lane.b32.xlu0 %v7091_v5, %s7037_s29 }
  0xa7   : > { %5918 = vrot.lane.b32.xlu0 %v7091_v5, %s7038_s30 }
  0xaf   : > { %5923 = vrot.lane.b32.xlu0 %v7101_v10, %s7038_s30 }
  0xb7   : > { %5928 = vrot.lane.b32.xlu0 %v7091_v5, %s7039_s4 }
  0xbf   : > { %5933 = vrot.lane.b32.xlu0 %v7101_v10, %s7039_s4 }
  0xc7   : > { %5943 = vrot.lane.b32.xlu0 %v7101_v10, %s7040_s11 }
  0xfe   : > { %v200_v36 = vpop.xlane.xlu0 %199 }
  0xff   : > { %v201_v38 = vmul.f32 %v200_v36, %v7105_v14 }
 0x101   : > { %v202_v39 = vadd.f32 1e-12, %v201_v38 }
 0x103   : > { %6899 = vrsqrt.f32 %v202_v39  ;;  %vm209_vm3 = vweird.f32 %v202_v39 }
 0x109   : > { %v6900_v41 = vpop.eup %6899 }
 0x10a   : > { %v204_v42 = vmul.f32 %v6900_v41, %v202_v39  ;;  %vm210_vm2 = vweird.f32 %v6900_v41 }
 0x10b   : > { %vm211_vm4 = vmor %vm209_vm3, %vm210_vm2 }
 0x10c   : > { %v205_v43 = vmul.f32 %v6900_v41, %v204_v42 }
 0x10e   : > { %v206_v44 = vmul.f32 0.5, %v205_v43  ;;  %v376_v43 = vperm.slane %v7160_v8, 1 }
 0x110   : > { %v207_v45 = vsub.f32 1.5, %v206_v44 }
 0x111   : > { %v5899_v46 = vpop.permute.xlu0 %5898 }
 0x112   : > { %v208_v48 = vmul.f32 %v6900_v41, %v207_v45  ;;  %v5900_v49 = vunpack.i.l.bf16 %v5899_v46  ;;  %v5901_v50 = vunpack.i.h.bf16 %v5899_v46 }
 0x114   : > { %v212_v52 = vsel %vm211_vm4, %v6900_v41, %v208_v48  ;;  %433 = vmatpush.msrb.mxu1 %v5900_v49 }
 0x115   : > { %v213_v54 = vmul.f32 %v212_v52, %v7110_v17 }
 0x116   : > { %434 = vmatpush.msrb.mxu1 %v5901_v50 }
 0x117   : > { %v215_v57 = vmul.f32 %v214_v51, %v213_v54 }
 0x118   : > { %435 = vmatpush.msrb.mxu1 %v5910_v53 }
 0x119   : > { %v7141_v58 = vadd.f32 %v216_v55, %v215_v57  ;;  %v5919_v59 = vpop.permute.xlu0 %5918 }
 0x11a   : > { %v5920_v60 = vunpack.i.l.bf16 %v5919_v59  ;;  %436 = vmatpush.msrb.mxu1 %v5911_v56  ;;  %v5921_v61 = vunpack.i.h.bf16 %v5919_v59 }
 0x11b   : > { %5687 = vmatmul.msk.f32.vlgmr.msra.gmra.mxu0 %vm184_vm0, %v7141_v58  ;;  %5688 = vmatmul.msk.f32.vlgmr.msra.gmra.mxu1 %vm184_vm0, %v7141_v58 }
 0x11c   : > { %5689 = vmatmul.msk.f32.vlgmr.msra.gmra.mxu2 %vm184_vm0, %v7141_v58 }
 0x11d   : > { %465 = vmatpush.msrb.mxu2 %v5920_v60 }
 0x11f   : > { %466 = vmatpush.msrb.mxu2 %v5921_v61 }
 0x121   : > { %v5924_v62 = vpop.permute.xlu0 %5923 }
 0x122   : > { %v5925_v63 = vunpack.i.l.bf16 %v5924_v62  ;;  %v5926_v0 = vunpack.i.h.bf16 %v5924_v62 }
 0x123   : > { %5693 = vmatmul.msk.f32.vlgmr.msrb.gmra.mxu0 %vm184_vm0, %v7141_v58  ;;  %5694 = vmatmul.msk.f32.vlgmr.msrb.gmra.mxu1 %vm184_vm0, %v7141_v58 }
 0x124   : > { %467 = vmatpush.msrb.mxu2 %v5925_v63 }
 0x126   : > { %468 = vmatpush.msrb.mxu2 %v5926_v0 }
 0x127   : > { %5695 = vmatmul.msk.f32.vlgmr.msrb.gmra.mxu2 %vm184_vm0, %v7141_v58 }
 0x129   : > { %v5929_v1 = vpop.permute.xlu0 %5928 }
 0x12a   : > { %v5931_v2 = vunpack.i.h.bf16 %v5929_v1  ;;  %v5930_v3 = vunpack.i.l.bf16 %v5929_v1 }
 0x12c   : > { %590 = vmatpush.msra.mxu2 %v5930_v3 }
 0x12e   : > { %591 = vmatpush.msra.mxu2 %v5931_v2 }
 0x131   : > { %v5934_v4 = vpop.permute.xlu0 %5933 }
 0x132   : > { %v5936_v6 = vunpack.i.h.bf16 %v5934_v4  ;;  %v5935_v7 = vunpack.i.l.bf16 %v5934_v4  ;;  %v533_v4 = vperm.slane %v7160_v8, 2 }
 0x134   : > { %592 = vmatpush.msra.mxu2 %v5935_v7 }
 0x136   : > { %593 = vmatpush.msra.mxu2 %v5936_v6 }
 0x137   : > { %5700 = vmatmul.msk.f32.vlgmr.msra.gmra.mxu2 %vm184_vm0, %v7141_v58 }
 0x139   : > { %v5944_v25 = vpop.permute.xlu0 %5943 }
 0x13a   : > { %v5945_v29 = vunpack.i.l.bf16 %v5944_v25  ;;  %v5946_v31 = vunpack.i.h.bf16 %v5944_v25 }
 0x198   : > { %v244_v11 = vpop.f32.mrf.mxu0  ;;  %v280_v12 = vpop.f32.mrf.mxu1 }
 0x199   : > { %v245_v13 = vadd.f32 %v244_v11, %v223_v9  ;;  %5690 = vmatpush.xpose.msk.msra.mxu3 %vm315_vm5, %v280_v12 }
 0x19c   : > { %5691 = vmatmul.msk.f32.vlgmr.msra.gmra.mxu3 %vm315_vm5, %v245_v13 }
 0x19f   : > { %v312_v15 = vpop.f32.mrf.mxu2 }
 0x1a0   : > { %371 = vmatpush.msrb.mxu3 %v312_v15  ;;  %v438_v16 = vpop.f32.mrf.mxu1  ;;  %v406_v44 = vpop.f32.mrf.mxu0 }
 0x1a1   : > { %v407_v45 = vadd.f32 %v406_v44, %v376_v43  ;;  %v866_v43 = vld [vmem:[%s9073_s2 + $0x90] sm:$0xff]  ;;  %v865_v44 = vld [vmem:[%s9073_s2 + $0x80] sm:$0xff] }
 0x1a2   : > { %5696 = vmatpush.xpose.msk.msra.mxu3 %vm315_vm5, %v438_v16 }
 0x1aa   : > { %v470_v17 = vpop.f32.mrf.mxu2 }
 0x1ab   : > { %528 = vmatpush.msra.mxu0 %v470_v17 }
 0x1ba   : > { %v595_v18 = vpop.f32.mrf.mxu2 }
 0x1bb   : > { %5702 = vmatpush.xpose.msk.msrb.mxu0 %vm315_vm5, %v595_v18 }
 0x21f   : > { %v339_v19 = vpop.f32.mrf.mxu3 }
 0x220   : > { %v342_v20 = vsel %vm315_vm5, %v339_v19, -inf }
 0x221   : > { %343 = vmax.xlane.f32.xlu2 %v342_v20 }
 0x239   : > { %5938 = vrot.lane.b32.xlu2 %v7091_v5, %s7040_s11 }
 0x241   : > { %5953 = vrot.lane.b32.xlu2 %v7101_v10, %s7041_s13 }
 0x249   : > { %5958 = vrot.lane.b32.xlu2 %v7091_v5, %s7042_s15 }
 0x251   : > { %5963 = vrot.lane.b32.xlu2 %v7091_v5, %s7043_s16 }
 0x259   : > { %5973 = vrot.lane.b32.xlu2 %v7101_v10, %s7043_s16 }
 0x261   : > { %5978 = vrot.lane.b32.xlu2 %v7091_v5, %s7045_s18 }
 0x294   : > { %v344_v21 = vpop.xlane.xlu2 %343 }
 0x295   : > { %v345_v22 = vsub.f32 %v339_v19, %v344_v21 }
 0x297   : > { %v346_v23 = vmul.f32 1.442695, %v345_v22 }
 0x299   : > { %6901 = vpow2.f32 %v346_v23 }
 0x29c   : > { %v5939_v24 = vpop.permute.xlu2 %5938 }
 0x29d   : > { %v5941_v26 = vunpack.i.h.bf16 %v5939_v24  ;;  %v5940_v27 = vunpack.i.l.bf16 %v5939_v24 }
 0x29f   : > { %v6902_v28 = vpop.eup %6901  ;;  %558 = vmatpush.msra.mxu1 %v5940_v27 }
 0x2a0   : > { %v348_v30 = vsel %vm315_vm5, %v6902_v28, 0.0 }
 0x2a1   : > { %349 = vadd.xlane.f32.xlu1 %v348_v30  ;;  %559 = vmatpush.msra.mxu1 %v5941_v26 }
 0x2a3   : > { %560 = vmatpush.msra.mxu1 %v5945_v29 }
 0x2a4   : > { %v5954_v32 = vpop.permute.xlu2 %5953 }
 0x2a5   : > { %561 = vmatpush.msra.mxu1 %v5946_v31  ;;  %v5955_v57 = vunpack.i.l.bf16 %v5954_v32  ;;  %v5956_v59 = vunpack.i.h.bf16 %v5954_v32 }
 0x2a6   : > { %5699 = vmatmul.msk.f32.vlgmr.msra.gmra.mxu1 %vm184_vm0, %v7141_v58 }
 0x2ac   : > { %v5959_v33 = vpop.permute.xlu2 %5958 }
 0x2ad   : > { %v5960_v60 = vunpack.i.l.bf16 %v5959_v33  ;;  %v5961_v62 = vunpack.i.h.bf16 %v5959_v33 }
 0x2b4   : > { %v5964_v34 = vpop.permute.xlu2 %5963 }
 0x2b5   : > { %v5966_v35 = vunpack.i.h.bf16 %v5964_v34  ;;  %v5965_v36 = vunpack.i.l.bf16 %v5964_v34 }
 0x2b7   : > { %715 = vmatpush.msrb.mxu2 %v5965_v36 }
 0x2b9   : > { %716 = vmatpush.msrb.mxu2 %v5966_v35 }
 0x2bc   : > { %v5974_v37 = vpop.permute.xlu2 %5973 }
 0x2bd   : > { %v5976_v38 = vunpack.i.h.bf16 %v5974_v37  ;;  %v5975_v39 = vunpack.i.l.bf16 %v5974_v37 }
 0x2bf   : > { %717 = vmatpush.msrb.mxu2 %v5975_v39 }
 0x2c1   : > { %718 = vmatpush.msrb.mxu2 %v5976_v38 }
 0x2c2   : > { %5705 = vmatmul.msk.f32.vlgmr.msrb.gmra.mxu2 %vm184_vm0, %v7141_v58 }
 0x2c4   : > { %v5979_v21 = vpop.permute.xlu2 %5978 }
 0x2c5   : > { %v5981_v22 = vunpack.i.h.bf16 %v5979_v21  ;;  %v5980_v23 = vunpack.i.l.bf16 %v5979_v21 }
 0x314   : > { %v350_v40 = vpop.xlane.xlu1 %349 }
 0x315   : > { %6903 = vrcp.f32 %v350_v40 }
 0x31b   : > { %v6904_v41 = vpop.eup %6903 }
 0x31c   : > { %v352_v42 = vmul.f32 %v6904_v41, %v6902_v28 }
 0x31e   : > { %5692 = vmatmul.msk.f32.vlgmr.msrb.gmra.mxu3 %vm315_vm5, %v352_v42  ;;  %v867_v42 = vld [vmem:[%s9073_s2 + $0xa0] sm:$0xff] }
 0x323   : > { %v563_v6 = vpop.f32.mrf.mxu1 }
 0x324   : > { %v564_v7 = vadd.f32 %v563_v6, %v533_v4  ;;  %v970_v4 = vld [vmem:[%s9073_s2 + $0x210] sm:$0xff]  ;;  %v969_v6 = vld [vmem:[%s9073_s2 + $0x200] sm:$0xff] }
 0x326   : > { %5697 = vmatmul.msk.f32.vlgmr.msra.gmra.mxu3 %vm315_vm5, %v407_v45 }
 0x345   : > { %v720_v27 = vpop.f32.mrf.mxu2 }
 0x3a1   : > { %v7188_v46 = vpop.f32.mrf.mxu3 }
 0x3a9   : > { %v496_v47 = vpop.f32.mrf.mxu3 }
 0x3aa   : > { %v499_v48 = vsel %vm315_vm5, %v496_v47, -inf }
 0x3ab   : > { %500 = vmax.xlane.f32.xlu1 %v499_v48 }
 0x3c4   : > { %5948 = vrot.lane.b32.xlu1 %v7091_v5, %s7041_s13  ;;  %v690_v5 = vperm.slane %v7160_v8, 3 }
 0x3c6   : > { %v721_v28 = vadd.f32 %v720_v27, %v690_v5  ;;  %v966_v5 = vld [vmem:[%s9073_s2 + $0x1d0] sm:$0xff]  ;;  %v965_v27 = vld [vmem:[%s9073_s2 + $0x1c0] sm:$0xff] }
 0x3cc   : > { %5968 = vrot.lane.b32.xlu1 %v7101_v10, %s7042_s15 }
 0x41e   : > { %v501_v49 = vpop.xlane.xlu1 %500 }
 0x41f   : > { %v502_v50 = vsub.f32 %v496_v47, %v501_v49  ;;  %v864_v47 = vld [vmem:[%s9073_s2 + $0x70] sm:$0xff] }
 0x421   : > { %v503_v51 = vmul.f32 1.442695, %v502_v50 }
 0x423   : > { %6905 = vpow2.f32 %v503_v51 }
 0x429   : > { %v6906_v52 = vpop.eup %6905 }
 0x42a   : > { %v505_v53 = vsel %vm315_vm5, %v6906_v52, 0.0 }
 0x42b   : > { %506 = vadd.xlane.f32.xlu0 %v505_v53 }
 0x436   : > { %v5949_v54 = vpop.permute.xlu1 %5948 }
 0x437   : > { %v5951_v55 = vunpack.i.h.bf16 %v5949_v54  ;;  %v5950_v56 = vunpack.i.l.bf16 %v5949_v54  ;;  %v868_v54 = vld [vmem:[%s9073_s2 + $0xb0] ss:$0 sm:$0xff] }
 0x439   : > { %622 = vmatpush.msrb.mxu3 %v5950_v56 }
 0x43b   : > { %623 = vmatpush.msrb.mxu3 %v5951_v55 }
 0x43d   : > { %624 = vmatpush.msrb.mxu3 %v5955_v57 }
 0x43e   : > { %v5969_v61 = vpop.permute.xlu1 %5968 }
 0x43f   : > { %625 = vmatpush.msrb.mxu3 %v5956_v59  ;;  %v5970_v63 = vunpack.i.l.bf16 %v5969_v61  ;;  %v5971_v0 = vunpack.i.h.bf16 %v5969_v61 }
 0x440   : > { %5701 = vmatmul.msk.f32.vlgmr.msrb.gmra.mxu3 %vm184_vm0, %v7141_v58 }
 0x441   : > { %747 = vmatpush.msra.mxu3 %v5960_v60 }
 0x443   : > { %748 = vmatpush.msra.mxu3 %v5961_v62 }
 0x445   : > { %749 = vmatpush.msra.mxu3 %v5970_v63 }
 0x447   : > { %750 = vmatpush.msra.mxu3 %v5971_v0  ;;  %v922_v0 = vld [vmem:[%s9073_s2 + $0x110] sm:$0xff] }
 0x448   : > { %5706 = vmatmul.msk.f32.vlgmr.msra.gmra.mxu3 %vm184_vm0, %v7141_v58 }
 0x449   : > { %884 = vmatpush.msrb.mxu3 %v867_v42 }
 0x44b   : > { %885 = vmatpush.msrb.mxu3 %v866_v43 }
 0x44d   : > { %886 = vmatpush.msrb.mxu3 %v865_v44 }
 0x44f   : > { %887 = vmatpush.msrb.mxu3 %v864_v47 }
 0x49e   : > { %v507_v1 = vpop.xlane.xlu0 %506 }
 0x49f   : > { %6907 = vrcp.f32 %v507_v1  ;;  %v920_v1 = vld [vmem:[%s9073_s2 + $0xf0] sm:$0xff] }
 0x4a5   : > { %v6908_v2 = vpop.eup %6907 }
 0x4a6   : > { %v509_v3 = vmul.f32 %v6908_v2, %v6906_v52  ;;  %v919_v2 = vld [vmem:[%s9073_s2 + $0xe0] sm:$0xff] }
 0x4a8   : > { %5698 = vmatmul.msk.f32.vlgmr.msra.gmra.mxu0 %vm315_vm5, %v509_v3  ;;  %v971_v3 = vld [vmem:[%s9073_s2 + $0x220] sm:$0xff] }
 0x4a9   : > { %779 = vmatpush.msra.mxu0 %v5980_v23 }
 0x4ab   : > { %780 = vmatpush.msra.mxu0 %v5981_v22  ;;  %v917_v22 = vld [vmem:[%s9073_s2 + $0xd0] ss:$0 sm:$0xff] }
 0x4b0   : > { %5703 = vmatmul.msk.f32.vlgmr.msrb.gmra.mxu0 %vm315_vm5, %v564_v7 }
 0x4c3   : > { %v627_v9 = vpop.f32.mrf.mxu3 }
 0x4c4   : > { %685 = vmatpush.msrb.mxu1 %v627_v9 }
 0x4cb   : > { %v752_v11 = vpop.f32.mrf.mxu3 }
 0x4cc   : > { %5708 = vmatpush.xpose.msk.msra.mxu1 %vm315_vm5, %v752_v11 }
 0x525   : > { %v530_v12 = vpop.f32.mrf.mxu0 }
 0x52d   : > { %v653_v13 = vpop.f32.mrf.mxu0 }
 0x52e   : > { %v656_v15 = vsel %vm315_vm5, %v653_v13, -inf }
 0x52f   : > { %657 = vmax.xlane.f32.xlu1 %v656_v15 }
 0x548   : > { %848 = vrot.lane.b32.xlu1 %v530_v12, %s7044_s17 }
 0x5a2   : > { %v658_v16 = vpop.xlane.xlu1 %657 }
 0x5a3   : > { %v659_v17 = vsub.f32 %v653_v13, %v658_v16 }
 0x5a5   : > { %v660_v18 = vmul.f32 1.442695, %v659_v17 }
 0x5a7   : > { %6909 = vpow2.f32 %v660_v18 }
 0x5ad   : > { %v6910_v19 = vpop.eup %6909 }
 0x5ae   : > { %v662_v20 = vsel %vm315_vm5, %v6910_v19, 0.0 }
 0x5af   : > { %663 = vadd.xlane.f32.xlu0 %v662_v20 }
 0x5ba   : > { %v849_v48 = vpop.permute.xlu1 %848 }
 0x5bb   : > { %v859_v50 = vsel %vm315_vm5, %v7188_v46, %v849_v48  ;;  %v1022_v48 = vld [vmem:[%s9073_s2 + $0x280] sm:$0xff] }
 0x5c3   : > { %5983 = vrot.lane.b32.xlu0 %v7101_v10, %s7045_s18 }
 0x622   : > { %v664_v24 = vpop.xlane.xlu0 %663 }
 0x623   : > { %6911 = vrcp.f32 %v664_v24 }
 0x629   : > { %v6912_v25 = vpop.eup %6911 }
 0x62a   : > { %v666_v26 = vmul.f32 %v6912_v25, %v6910_v19  ;;  %v915_v19 = vld [vmem:[%s9073_s2 + $0xc0] ss:$0 sm:$0xff]  ;;  %v968_v25 = vld [vmem:[%s9073_s2 + $0x1f0] sm:$0xff] }
 0x62c   : > { %5704 = vmatmul.msk.f32.vlgmr.msrb.gmra.mxu1 %vm315_vm5, %v666_v26  ;;  %v967_v26 = vld [vmem:[%s9073_s2 + $0x1e0] sm:$0xff] }
 0x62d   : > { %973 = vmatpush.msrb.mxu1 %v971_v3 }
 0x62f   : > { %974 = vmatpush.msrb.mxu1 %v970_v4 }
 0x631   : > { %975 = vmatpush.msrb.mxu1 %v969_v6 }
 0x633   : > { %976 = vmatpush.msrb.mxu1 %v968_v25 }
 0x634   : > { %5709 = vmatmul.msk.f32.vlgmr.msra.gmra.mxu1 %vm315_vm5, %v721_v28  ;;  %v964_v28 = vld [vmem:[%s9073_s2 + $0x1b0] sm:$0xff] }
 0x635   : > { %v5984_v29 = vpop.permute.xlu0 %5983  ;;  %977 = vmatpush.msrb.mxu1 %v967_v26 }
 0x636   : > { %v5986_v30 = vunpack.i.h.bf16 %v5984_v29  ;;  %v5985_v10 = vunpack.i.l.bf16 %v5984_v29  ;;  %v963_v29 = vld [vmem:[%s9073_s2 + $0x1a0] sm:$0xff] }
 0x637   : > { %978 = vmatpush.msrb.mxu1 %v966_v5 }
 0x638   : > { %781 = vmatpush.msra.mxu0 %v5985_v10  ;;  %v961_v10 = vld [vmem:[%s9073_s2 + $0x180] sm:$0xff] }
 0x639   : > { %979 = vmatpush.msrb.mxu1 %v965_v27 }
 0x63a   : > { %782 = vmatpush.msra.mxu0 %v5986_v30  ;;  %v962_v30 = vld [vmem:[%s9073_s2 + $0x190] sm:$0xff] }
 0x63b   : > { %5707 = vmatmul.msk.f32.vlgmr.msra.gmra.mxu0 %vm184_vm0, %v7141_v58  ;;  %980 = vmatpush.msrb.mxu1 %v964_v28 }
 0x63c   : > { %939 = vmatpush.msrb.mxu0 %v922_v0 }
 0x63d   : > { %981 = vmatpush.msrb.mxu1 %v963_v29 }
 0x63f   : > { %982 = vmatpush.msrb.mxu1 %v962_v30 }
 0x641   : > { %983 = vmatpush.msrb.mxu1 %v961_v10 }
 0x6a9   : > { %v687_v31 = vpop.f32.mrf.mxu1 }
 0x6b1   : > { %v810_v32 = vpop.f32.mrf.mxu1 }
 0x6b2   : > { %v813_v33 = vsel %vm315_vm5, %v810_v32, -inf }
 0x6b3   : > { %814 = vmax.xlane.f32.xlu2 %v813_v33  ;;  %v958_v33 = vld [vmem:[%s9073_s2 + $0x150] sm:$0xff] }
 0x6b8   : > { %v784_v34 = vpop.f32.mrf.mxu0 }
 0x6b9   : > { %842 = vmatpush.msra.mxu2 %v784_v34  ;;  %v957_v34 = vld [vmem:[%s9073_s2 + $0x140] sm:$0xff] }
 0x6cb   : > { %852 = vrot.lane.b32.xlu2 %v687_v31, %s7046_s19  ;;  %v960_v31 = vld [vmem:[%s9073_s2 + $0x170] sm:$0xff] }
 0x6cc   : > { %984 = vmatpush.msrb.mxu1 %v960_v31 }
 0x726   : > { %v815_v8 = vpop.xlane.xlu2 %814 }
 0x727   : > { %v816_v35 = vsub.f32 %v810_v32, %v815_v8  ;;  %v959_v32 = vld [vmem:[%s9073_s2 + $0x160] sm:$0xff]  ;;  %v956_v8 = vld [vmem:[%s9073_s2 + $0x130] sm:$0xff] }
 0x728   : > { %985 = vmatpush.msrb.mxu1 %v959_v32 }
 0x729   : > { %v817_v36 = vmul.f32 1.442695, %v816_v35  ;;  %v923_v35 = vld [vmem:[%s9073_s2 + $0x120] ss:$0 sm:$0xff] }
 0x72a   : > { %986 = vmatpush.msrb.mxu1 %v958_v33 }
 0x72b   : > { %6913 = vpow2.f32 %v817_v36 }
 0x72c   : > { %987 = vmatpush.msrb.mxu1 %v957_v34 }
 0x72e   : > { %v853_v49 = vpop.permute.xlu2 %852  ;;  %988 = vmatpush.msrb.mxu1 %v956_v8  ;;  %v7376_v8 = vld [vmem:[%s9073_s2 + $0x2a0] sm:$0xf] }
 0x72f   : > { %v861_v51 = vsel %vm860_vm6, %v859_v50, %v853_v49  ;;  %v1023_v49 = vld [vmem:[%s9073_s2 + $0x290] sm:$0xff] }
 0x730   : > { %v7322_v50 = vpack.i.bf16 %v1022_v48, %v1023_v49  ;;  %1041 = vmatpush.msrb.mxu2 %v1023_v49 }
 0x731   : > { %v6914_v37 = vpop.eup %6913 }
 0x732   : > { %v819_v38 = vsel %vm315_vm5, %v6914_v37, 0.0  ;;  %1042 = vmatpush.msrb.mxu2 %v1022_v48 }
 0x733   : > { %820 = vadd.xlane.f32.xlu0 %v819_v38 }
 0x7a6   : > { %v821_v39 = vpop.xlane.xlu0 %820 }
 0x7a7   : > { %6915 = vrcp.f32 %v821_v39 }
 0x7ad   : > { %v6916_v40 = vpop.eup %6915 }
 0x7ae   : > { %v823_v41 = vmul.f32 %v6916_v40, %v6914_v37 }
 0x7b0   : > { %5710 = vmatmul.msk.f32.vlgmr.msra.gmra.mxu2 %vm315_vm5, %v823_v41 }
 0x833   : > { %v844_v45 = vpop.f32.mrf.mxu2 }
 0x834   : > { %856 = vrot.lane.b32.xlu1 %v844_v45, %s7047_s5 }
 0x8a6   : > { %v857_v52 = vpop.permute.xlu1 %856 }
 0x8a7   : > { %v863_v53 = vsel %vm862_vm7, %v861_v51, %v857_v52  ;;  %v972_v51 = vld [vmem:[%s9073_s2 + $0x230] ss:$0 sm:$0xff] }
 0x8a8   : > { %5711 = vmatmul.msk.f32.vlgmr.msrb.gmra.mxu3 %vm184_vm0, %v863_v53 }
 0x92b   : > { %v889_v55 = vpop.f32.mrf.mxu3 }
 0x92c   : > { %v890_v56 = vadd.f32 %v889_v55, %v868_v54 }
 0x92e   : > { %v892_v57 = vadd.f32 %v890_v56, %v7141_v58  ;;  %v921_v58 = vld [vmem:[%s9073_s2 + $0x100] sm:$0xff]  ;;  %v1021_v56 = vld [vmem:[%s9073_s2 + $0x270] sm:$0xff] }
 0x92f   : > { %940 = vmatpush.msrb.mxu0 %v921_v58  ;;  %1043 = vmatpush.msrb.mxu2 %v1021_v56 }
 0x930   : > { %v893_v59 = vsel %vm184_vm0, %v892_v57, 0.0 }
 0x931   : > { %894 = vadd.xlane.f32.xlu0 %v893_v59  ;;  %941 = vmatpush.msrb.mxu0 %v920_v1 }
 0x933   : > { %942 = vmatpush.msrb.mxu0 %v919_v2 }
 0x945   : > { %5988 = vrot.lane.b32.xlu0 %v7322_v50, %s7034_s22 }
 0x9a4   : > { %v895_v60 = vpop.xlane.xlu0 %894 }
 0x9a5   : > { %v896_v46 = vmul.f32 %v895_v60, %v7105_v14 }
 0x9a7   : > { %v897_v61 = vsub.f32 %v892_v57, %v896_v46  ;;  %v1020_v57 = vld [vmem:[%s9073_s2 + $0x260] sm:$0xff] }
 0x9a8   : > { %1044 = vmatpush.msrb.mxu2 %v1020_v57 }
 0x9a9   : > { %v898_v62 = vmul.f32 %v897_v61, %v897_v61 }
 0x9ab   : > { %v899_v63 = vsel %vm184_vm0, %v898_v62, 0.0 }
 0x9ac   : > { %900 = vadd.xlane.f32.xlu1 %v899_v63  ;;  %v7338_v63 = vpack.i.bf16 %v1020_v57, %v1021_v56 }
 0x9b7   : > { %v5989_v0 = vpop.permute.xlu0 %5988 }
 0x9b8   : > { %v5991_v58 = vunpack.i.h.bf16 %v5989_v0  ;;  %v5990_v1 = vunpack.i.l.bf16 %v5989_v0 }
 0x9ba   : > { %1077 = vmatpush.msra.mxu3 %v5990_v1 }
 0x9bc   : > { %1078 = vmatpush.msra.mxu3 %v5991_v58 }
 0x9c5   : > { %6003 = vrot.lane.b32.xlu1 %v7322_v50, %s7037_s29 }
 0xa1f   : > { %v901_v7 = vpop.xlane.xlu1 %900 }
 0xa20   : > { %v902_v9 = vmul.f32 %v901_v7, %v7105_v14 }
 0xa22   : > { %v903_v11 = vadd.f32 1e-12, %v902_v9 }
 0xa24   : > { %6917 = vrsqrt.f32 %v903_v11  ;;  %vm910_vm9 = vweird.f32 %v903_v11 }
 0xa2a   : > { %v6918_v12 = vpop.eup %6917 }
 0xa2b   : > { %v905_v13 = vmul.f32 %v6918_v12, %v903_v11  ;;  %vm911_vm8 = vweird.f32 %v6918_v12 }
 0xa2c   : > { %vm912_vm10 = vmor %vm910_vm9, %vm911_vm8 }
 0xa2d   : > { %v906_v15 = vmul.f32 %v6918_v12, %v905_v13 }
 0xa2f   : > { %v907_v16 = vmul.f32 0.5, %v906_v15 }
 0xa31   : > { %v908_v17 = vsub.f32 1.5, %v907_v16 }
 0xa33   : > { %v909_v18 = vmul.f32 %v6918_v12, %v908_v17 }
 0xa35   : > { %v913_v20 = vsel %vm912_vm10, %v6918_v12, %v909_v18  ;;  %v1016_v18 = vld [vmem:[%s9073_s2 + $0x240] ss:$0 sm:$0xff] }
 0xa36   : > { %v914_v21 = vmul.f32 %v913_v20, %v897_v61 }
 0xa38   : > { %v916_v23 = vmul.f32 %v915_v19, %v914_v21  ;;  %v1018_v21 = vld [vmem:[%s9073_s2 + $0x250] ss:$0 sm:$0xff] }
 0xa3a   : > { %v918_v24 = vadd.f32 %v917_v22, %v916_v23 }
 0xa3c   : > { %5712 = vmatmul.msk.f32.vlgmr.msrb.gmra.mxu0 %vm184_vm0, %v918_v24 }
 0xab9   : > { %v944_v36 = vpop.f32.mrf.mxu0 }
 0xaba   : > { %v945_v37 = vadd.f32 %v944_v36, %v923_v35  ;;  %v6004_v35 = vpop.permute.xlu1 %6003  ;;  %v1025_v36 = vperm.slane %v7376_v8, 0 }
 0xabc   : > { %v947_v38 = vmul.f32 %v945_v37, %v945_v37 }
 0xabe   : > { %v948_v39 = vmul.f32 %v947_v38, %v945_v37 }
 0xac0   : > { %v949_v40 = vmul.f32 0.044715, %v948_v39 }
 0xac2   : > { %v950_v41 = vadd.f32 %v949_v40, %v945_v37  ;;  %v6006_v40 = vunpack.i.h.bf16 %v6004_v35 }
 0xac4   : > { %v951_v42 = vmul.f32 0.7978846, %v950_v41 }
 0xac6   : > { %6919 = vtanh.f32 %v951_v42 }
 0xacc   : > { %v6920_v43 = vpop.eup %6919 }
 0xacd   : > { %v953_v44 = vadd.f32 1.0, %v6920_v43 }
 0xacf   : > { %v954_v45 = vmul.f32 0.5, %v953_v44 }
 0xad1   : > { %v955_v47 = vmul.f32 %v954_v45, %v945_v37  ;;  %v6005_v37 = vunpack.i.l.bf16 %v6004_v35 }
 0xad3   : > { %989 = vmatmul.f32.vlgmr.msrb.gmra.mxu1 %v955_v47 }
 0xb50   : > { %v990_v52 = vpop.f32.mrf.mxu1 }
 0xb51   : > { %v991_v53 = vadd.f32 %v990_v52, %v972_v51 }
 0xb53   : > { %v993_v54 = vadd.f32 %v991_v53, %v918_v24 }
 0xb55   : > { %v994_v55 = vsel %vm184_vm0, %v993_v54, 0.0 }
 0xb56   : > { %995 = vadd.xlane.f32.xlu2 %v994_v55  ;;  %v1177_v55 = vperm.slane %v7376_v8, 1 }
 0xb6e   : > { %6008 = vrot.lane.b32.xlu2 %v7338_v63, %s7036_s28 }
 0xbc9   : > { %v996_v59 = vpop.xlane.xlu2 %995 }
 0xbca   : > { %v997_v60 = vmul.f32 %v996_v59, %v7105_v14 }
 0xbcc   : > { %v998_v46 = vsub.f32 %v993_v54, %v997_v60 }
 0xbce   : > { %v999_v61 = vmul.f32 %v998_v46, %v998_v46 }
 0xbd0   : > { %v1000_v62 = vsel %vm184_vm0, %v999_v61, 0.0 }
 0xbd1   : > { %1001 = vadd.xlane.f32.xlu0 %v1000_v62  ;;  %v6009_v25 = vpop.permute.xlu2 %6008 }
 0xbd2   : > { %v6010_v27 = vunpack.i.l.bf16 %v6009_v25  ;;  %v6011_v28 = vunpack.i.h.bf16 %v6009_v25 }
 0xbe5   : > { %5993 = vrot.lane.b32.xlu0 %v7338_v63, %s7034_s22 }
 0xbed   : > { %5998 = vrot.lane.b32.xlu0 %v7322_v50, %s7036_s28 }
 0xbf5   : > { %6013 = vrot.lane.b32.xlu0 %v7338_v63, %s7037_s29 }
 0xbfd   : > { %6018 = vrot.lane.b32.xlu0 %v7322_v50, %s7035_s27 }
 0xc05   : > { %6023 = vrot.lane.b32.xlu0 %v7338_v63, %s7035_s27 }
 0xc0d   : > { %6028 = vrot.lane.b32.xlu0 %v7322_v50, %s7038_s30 }
 0xc15   : > { %6033 = vrot.lane.b32.xlu0 %v7338_v63, %s7038_s30 }
 0xc1d   : > { %6038 = vrot.lane.b32.xlu0 %v7322_v50, %s7040_s11 }
 0xc25   : > { %6043 = vrot.lane.b32.xlu0 %v7338_v63, %s7040_s11 }
 0xc2d   : > { %6048 = vrot.lane.b32.xlu0 %v7322_v50, %s7039_s4 }
 0xc44   : > { %v1002_v2 = vpop.xlane.xlu0 %1001 }
 0xc45   : > { %v1003_v3 = vmul.f32 %v1002_v2, %v7105_v14 }
 0xc47   : > { %v1004_v4 = vadd.f32 1e-12, %v1003_v3 }
 0xc49   : > { %6921 = vrsqrt.f32 %v1004_v4  ;;  %vm1011_vm12 = vweird.f32 %v1004_v4 }
 0xc4f   : > { %v6922_v6 = vpop.eup %6921 }
 0xc50   : > { %v1006_v7 = vmul.f32 %v6922_v6, %v1004_v4  ;;  %vm1012_vm11 = vweird.f32 %v6922_v6 }
 0xc51   : > { %vm1013_vm13 = vmor %vm1011_vm12, %vm1012_vm11  ;;  %vm2675_vm11 = vcmask 392192  }
 0xc52   : > { %v1007_v9 = vmul.f32 %v6922_v6, %v1006_v7 }
 0xc54   : > { %v1008_v11 = vmul.f32 0.5, %v1007_v9 }
 0xc56   : > { %v1009_v12 = vsub.f32 1.5, %v1008_v11 }
 0xc57   : > { %v5994_v13 = vpop.permute.xlu0 %5993 }
 0xc58   : > { %v1010_v15 = vmul.f32 %v6922_v6, %v1009_v12  ;;  %v5996_v16 = vunpack.i.h.bf16 %v5994_v13  ;;  %v5995_v17 = vunpack.i.l.bf16 %v5994_v13 }
 0xc5a   : > { %v1014_v19 = vsel %vm1013_vm13, %v6922_v6, %v1010_v15  ;;  %1079 = vmatpush.msra.mxu3 %v5995_v17 }
 0xc5b   : > { %v1015_v20 = vmul.f32 %v1014_v19, %v998_v46 }
 0xc5c   : > { %1080 = vmatpush.msra.mxu3 %v5996_v16 }
 0xc5d   : > { %v1017_v22 = vmul.f32 %v1016_v18, %v1015_v20 }
 0xc5f   : > { %v7361_v23 = vadd.f32 %v1018_v21, %v1017_v22  ;;  %v5999_v24 = vpop.permute.xlu0 %5998 }
 0xc60   : > { %v6001_v26 = vunpack.i.h.bf16 %v5999_v24  ;;  %v6000_v5 = vunpack.i.l.bf16 %v5999_v24 }
 0xc61   : > { %5713 = vmatmul.msk.f32.vlgmr.msrb.gmra.mxu2 %vm184_vm0, %v7361_v23  ;;  %5714 = vmatmul.msk.f32.vlgmr.msra.gmra.mxu3 %vm184_vm0, %v7361_v23 }
 0xc62   : > { %1109 = vmatpush.msra.mxu0 %v6000_v5 }
 0xc64   : > { %1110 = vmatpush.msra.mxu0 %v6001_v26 }
 0xc66   : > { %1111 = vmatpush.msra.mxu0 %v6010_v27 }
 0xc67   : > { %v6014_v29 = vpop.permute.xlu0 %6013 }
 0xc68   : > { %1112 = vmatpush.msra.mxu0 %v6011_v28  ;;  %v6015_v43 = vunpack.i.l.bf16 %v6014_v29  ;;  %v6016_v44 = vunpack.i.h.bf16 %v6014_v29 }
 0xc69   : > { %5715 = vmatmul.msk.f32.vlgmr.msra.gmra.mxu0 %vm184_vm0, %v7361_v23 }
 0xc6f   : > { %v6019_v30 = vpop.permute.xlu0 %6018 }
 0xc70   : > { %v6021_v10 = vunpack.i.h.bf16 %v6019_v30  ;;  %v6020_v31 = vunpack.i.l.bf16 %v6019_v30 }
 0xc72   : > { %1202 = vmatpush.msrb.mxu0 %v6020_v31 }
 0xc74   : > { %1203 = vmatpush.msrb.mxu0 %v6021_v10 }
 0xc77   : > { %v6024_v32 = vpop.permute.xlu0 %6023 }
 0xc78   : > { %v6026_v33 = vunpack.i.h.bf16 %v6024_v32  ;;  %v6025_v34 = vunpack.i.l.bf16 %v6024_v32 }
 0xc7a   : > { %1204 = vmatpush.msrb.mxu0 %v6025_v34 }
 0xc7c   : > { %1205 = vmatpush.msrb.mxu0 %v6026_v33 }
 0xc7d   : > { %5719 = vmatmul.msk.f32.vlgmr.msrb.gmra.mxu0 %vm184_vm0, %v7361_v23 }
 0xc7f   : > { %v6029_v45 = vpop.permute.xlu0 %6028 }
 0xc80   : > { %v6031_v47 = vunpack.i.h.bf16 %v6029_v45  ;;  %v6030_v48 = vunpack.i.l.bf16 %v6029_v45 }
 0xc87   : > { %v6034_v52 = vpop.permute.xlu0 %6033 }
 0xc88   : > { %v6036_v53 = vunpack.i.h.bf16 %v6034_v52  ;;  %v6035_v54 = vunpack.i.l.bf16 %v6034_v52  ;;  %v1334_v52 = vperm.slane %v7376_v8, 2 }
 0xc8f   : > { %v6039_v60 = vpop.permute.xlu0 %6038 }
 0xc90   : > { %v6040_v18 = vunpack.i.l.bf16 %v6039_v60  ;;  %v6041_v21 = vunpack.i.h.bf16 %v6039_v60 }
 0xc97   : > { %v6044_v46 = vpop.permute.xlu0 %6043 }
 0xc98   : > { %v6045_v22 = vunpack.i.l.bf16 %v6044_v46  ;;  %v6046_v25 = vunpack.i.h.bf16 %v6044_v46 }
 0xc9f   : > { %v6049_v61 = vpop.permute.xlu0 %6048 }
 0xca0   : > { %v6051_v62 = vunpack.i.h.bf16 %v6049_v61  ;;  %v6050_v0 = vunpack.i.l.bf16 %v6049_v61 }
 0xce4   : > { %v1046_v38 = vpop.f32.mrf.mxu2  ;;  %v1082_v39 = vpop.f32.mrf.mxu3 }
 0xce5   : > { %v1047_v41 = vadd.f32 %v1046_v38, %v1025_v36  ;;  %5716 = vmatpush.xpose.msk.msra.mxu2 %vm315_vm5, %v1082_v39 }
 0xce6   : > { %v1114_v42 = vpop.f32.mrf.mxu0 }
 0xce7   : > { %1172 = vmatpush.msrb.mxu3 %v1114_v42 }
 0xce8   : > { %5717 = vmatmul.msk.f32.vlgmr.msra.gmra.mxu2 %vm315_vm5, %v1047_v41 }
 0xce9   : > { %1234 = vmatpush.msrb.mxu2 %v6005_v37  ;;  %1266 = vmatpush.msra.mxu3 %v6030_v48 }
 0xceb   : > { %1235 = vmatpush.msrb.mxu2 %v6006_v40  ;;  %1267 = vmatpush.msra.mxu3 %v6031_v47 }
 0xced   : > { %1236 = vmatpush.msrb.mxu2 %v6015_v43  ;;  %1268 = vmatpush.msra.mxu3 %v6035_v54 }
 0xcef   : > { %1237 = vmatpush.msrb.mxu2 %v6016_v44  ;;  %1269 = vmatpush.msra.mxu3 %v6036_v53 }
 0xcf0   : > { %5720 = vmatmul.msk.f32.vlgmr.msrb.gmra.mxu2 %vm184_vm0, %v7361_v23 }
 0xcfa   : > { %v1207_v56 = vpop.f32.mrf.mxu0 }
 0xcfb   : > { %v1208_v59 = vadd.f32 %v1207_v56, %v1177_v55 }
 0xd6b   : > { %v1140_v49 = vpop.f32.mrf.mxu2 }
 0xd6c   : > { %v1143_v51 = vsel %vm315_vm5, %v1140_v49, -inf }
 0xd6d   : > { %1144 = vmax.xlane.f32.xlu1 %v1143_v51 }
 0xd73   : > { %v1239_v57 = vpop.f32.mrf.mxu2 }
 0xd74   : > { %5722 = vmatpush.xpose.msk.msra.mxu0 %vm315_vm5, %v1239_v57 }
 0xd77   : > { %5723 = vmatmul.msk.f32.vlgmr.msra.gmra.mxu0 %vm315_vm5, %v1208_v59 }
 0xd78   : > { %1391 = vmatpush.msrb.mxu0 %v6050_v0 }
 0xd7a   : > { %1392 = vmatpush.msrb.mxu0 %v6051_v62 }
 0xd86   : > { %6053 = vrot.lane.b32.xlu1 %v7338_v63, %s7039_s4 }
 0xd8e   : > { %6063 = vrot.lane.b32.xlu1 %v7338_v63, %s7041_s13 }
 0xd96   : > { %6068 = vrot.lane.b32.xlu1 %v7322_v50, %s7042_s15 }
 0xd9e   : > { %6078 = vrot.lane.b32.xlu1 %v7338_v63, %s7042_s15  ;;  %s178_s15 = scalar_lea.vmem %s9072_s1, %s7078_s14 }
 0xde0   : > { %v1145_v58 = vpop.xlane.xlu1 %1144 }
 0xde1   : > { %v1146_v1 = vsub.f32 %v1140_v49, %v1145_v58 }
 0xde3   : > { %v1147_v2 = vmul.f32 1.442695, %v1146_v1 }
 0xde5   : > { %6923 = vpow2.f32 %v1147_v2 }
 0xdeb   : > { %v6924_v3 = vpop.eup %6923 }
 0xdec   : > { %v1149_v4 = vsel %vm315_vm5, %v6924_v3, 0.0 }
 0xded   : > { %1150 = vadd.xlane.f32.xlu2 %v1149_v4 }
 0xdf4   : > { %v1297_v6 = vpop.f32.mrf.mxu0 }
 0xdf5   : > { %v1300_v7 = vsel %vm315_vm5, %v1297_v6, -inf }
 0xdf6   : > { %1301 = vmax.xlane.f32.xlu2 %v1300_v7 }
 0xdf8   : > { %v6054_v9 = vpop.permute.xlu1 %6053 }
 0xdf9   : > { %v6056_v11 = vunpack.i.h.bf16 %v6054_v9  ;;  %v6055_v12 = vunpack.i.l.bf16 %v6054_v9  ;;  %v1491_v9 = vperm.slane %v7376_v8, 3 }
 0xdfb   : > { %1393 = vmatpush.msrb.mxu0 %v6055_v12 }
 0xdfd   : > { %1394 = vmatpush.msrb.mxu0 %v6056_v11 }
 0xdfe   : > { %5726 = vmatmul.msk.f32.vlgmr.msrb.gmra.mxu0 %vm184_vm0, %v7361_v23 }
 0xe00   : > { %v6064_v15 = vpop.permute.xlu1 %6063 }
 0xe01   : > { %v6065_v30 = vunpack.i.l.bf16 %v6064_v15  ;;  %v6066_v31 = vunpack.i.h.bf16 %v6064_v15 }
 0xe08   : > { %v6069_v26 = vpop.permute.xlu1 %6068 }
 0xe09   : > { %v6070_v32 = vunpack.i.l.bf16 %v6069_v26  ;;  %v6071_v35 = vunpack.i.h.bf16 %v6069_v26  ;;  %v1666_v26 = vld [vmem:[%s9073_s2 + $0x2e0] sm:$0xff] }
 0xe0e   : > { %6058 = vrot.lane.b32.xlu2 %v7322_v50, %s7041_s13 }
 0xe10   : > { %v6079_v34 = vpop.permute.xlu1 %6078 }
 0xe11   : > { %v6080_v38 = vunpack.i.l.bf16 %v6079_v34  ;;  %v6081_v39 = vunpack.i.h.bf16 %v6079_v34 }
 0xe16   : > { %6073 = vrot.lane.b32.xlu2 %v7322_v50, %s7043_s16 }
 0xe1e   : > { %6083 = vrot.lane.b32.xlu2 %v7338_v63, %s7043_s16 }
 0xe26   : > { %6088 = vrot.lane.b32.xlu2 %v7322_v50, %s7045_s18 }
 0xe60   : > { %v1151_v13 = vpop.xlane.xlu2 %1150 }
 0xe61   : > { %6925 = vrcp.f32 %v1151_v13 }
 0xe67   : > { %v6926_v16 = vpop.eup %6925 }
 0xe68   : > { %v1153_v17 = vmul.f32 %v6926_v16, %v6924_v3 }
 0xe69   : > { %v1302_v19 = vpop.xlane.xlu2 %1301 }
 0xe6a   : > { %v1303_v20 = vsub.f32 %v1297_v6, %v1302_v19  ;;  %5718 = vmatmul.msk.f32.vlgmr.msrb.gmra.mxu3 %vm315_vm5, %v1153_v17 }
 0xe6b   : > { %1359 = vmatpush.msrb.mxu3 %v6040_v18 }
 0xe6c   : > { %v1304_v24 = vmul.f32 1.442695, %v1303_v20 }
 0xe6d   : > { %1360 = vmatpush.msrb.mxu3 %v6041_v21 }
 0xe6e   : > { %6927 = vpow2.f32 %v1304_v24 }
 0xe6f   : > { %1361 = vmatpush.msrb.mxu3 %v6045_v22 }
 0xe71   : > { %1362 = vmatpush.msrb.mxu3 %v6046_v25  ;;  %v6059_v5 = vpop.permute.xlu2 %6058 }
 0xe72   : > { %v6061_v27 = vunpack.i.h.bf16 %v6059_v5  ;;  %v6060_v28 = vunpack.i.l.bf16 %v6059_v5  ;;  %5721 = vmatmul.msk.f32.vlgmr.msra.gmra.mxu3 %vm184_vm0, %v7361_v23  ;;  %v1665_v5 = vld [vmem:[%s9073_s2 + $0x2d0] sm:$0xff] }
 0xe74   : > { %v6928_v29 = vpop.eup %6927  ;;  %1423 = vmatpush.msra.mxu1 %v6060_v28 }
 0xe75   : > { %v1306_v10 = vsel %vm315_vm5, %v6928_v29, 0.0 }
 0xe76   : > { %1307 = vadd.xlane.f32.xlu0 %v1306_v10  ;;  %1424 = vmatpush.msra.mxu1 %v6061_v27  ;;  %v1664_v27 = vld [vmem:[%s9073_s2 + $0x2c0] sm:$0xff] }
 0xe78   : > { %1425 = vmatpush.msra.mxu1 %v6065_v30 }
 0xe79   : > { %v6074_v33 = vpop.permute.xlu2 %6073 }
 0xe7a   : > { %v6076_v36 = vunpack.i.h.bf16 %v6074_v33  ;;  %v6075_v37 = vunpack.i.l.bf16 %v6074_v33  ;;  %5725 = vmatmul.msk.f32.vlgmr.msrb.gmra.mxu3 %vm184_vm0, %v7361_v23  ;;  %1426 = vmatpush.msra.mxu1 %v6066_v31 }
 0xe7b   : > { %5727 = vmatmul.msk.f32.vlgmr.msra.gmra.mxu1 %vm184_vm0, %v7361_v23  ;;  %v1396_v49 = vpop.f32.mrf.mxu0 }
 0xe7c   : > { %1548 = vmatpush.msrb.mxu1 %v6070_v32  ;;  %1516 = vmatpush.msra.mxu0 %v6075_v37 }
 0xe7e   : > { %1549 = vmatpush.msrb.mxu1 %v6071_v35  ;;  %1517 = vmatpush.msra.mxu0 %v6076_v36  ;;  %v1667_v35 = vld [vmem:[%s9073_s2 + $0x2f0] ss:$0 sm:$0xff] }
 0xe80   : > { %1550 = vmatpush.msrb.mxu1 %v6080_v38 }
 0xe81   : > { %v6084_v40 = vpop.permute.xlu2 %6083 }
 0xe82   : > { %v6086_v41 = vunpack.i.h.bf16 %v6084_v40  ;;  %v6085_v42 = vunpack.i.l.bf16 %v6084_v40  ;;  %1551 = vmatpush.msrb.mxu1 %v6081_v39 }
 0xe83   : > { %5732 = vmatmul.msk.f32.vlgmr.msrb.gmra.mxu1 %vm184_vm0, %v7361_v23 }
 0xe84   : > { %1518 = vmatpush.msra.mxu0 %v6085_v42  ;;  %1683 = vmatpush.msra.mxu1 %v1666_v26 }
 0xe86   : > { %1519 = vmatpush.msra.mxu0 %v6086_v41  ;;  %1684 = vmatpush.msra.mxu1 %v1665_v5 }
 0xe87   : > { %5731 = vmatmul.msk.f32.vlgmr.msra.gmra.mxu0 %vm184_vm0, %v7361_v23 }
 0xe88   : > { %1685 = vmatpush.msra.mxu1 %v1664_v27 }
 0xe89   : > { %v6089_v60 = vpop.permute.xlu2 %6088 }
 0xe8a   : > { %v6091_v46 = vunpack.i.h.bf16 %v6089_v60  ;;  %v6090_v61 = vunpack.i.l.bf16 %v6089_v60 }
 0xee9   : > { %v1308_v43 = vpop.xlane.xlu0 %1307 }
 0xeea   : > { %6929 = vrcp.f32 %v1308_v43 }
 0xeed   : > { %v7425_v44 = vpop.f32.mrf.mxu3 }
 0xef0   : > { %v6930_v45 = vpop.eup %6929 }
 0xef1   : > { %v1310_v47 = vmul.f32 %v6930_v45, %v6928_v29  ;;  %v1663_v29 = vld [vmem:[%s9073_s2 + $0x2b0] sm:$0xff] }
 0xef2   : > { %1686 = vmatpush.msra.mxu1 %v1663_v29  ;;  %v1721_v45 = vld [vmem:[%s9073_s2 + $0x350] sm:$0xff] }
 0xef5   : > { %v1271_v48 = vpop.f32.mrf.mxu3 }
 0xef6   : > { %1329 = vmatpush.msra.mxu2 %v1271_v48  ;;  %v1718_v48 = vld [vmem:[%s9073_s2 + $0x320] sm:$0xff] }
 0xef7   : > { %5724 = vmatmul.msk.f32.vlgmr.msra.gmra.mxu2 %vm315_vm5, %v1310_v47  ;;  %v1719_v47 = vld [vmem:[%s9073_s2 + $0x330] sm:$0xff] }
 0xef8   : > { %5728 = vmatpush.xpose.msk.msrb.mxu2 %vm315_vm5, %v1396_v49  ;;  %v1428_v51 = vpop.f32.mrf.mxu1  ;;  %v1770_v49 = vld [vmem:[%s9073_s2 + $0x460] sm:$0xff] }
 0xef9   : > { %1486 = vmatpush.msra.mxu3 %v1428_v51  ;;  %v1769_v51 = vld [vmem:[%s9073_s2 + $0x450] sm:$0xff] }
 0xefc   : > { %1580 = vmatpush.msra.mxu2 %v6090_v61 }
 0xefd   : > { %v1364_v53 = vpop.f32.mrf.mxu3 }
 0xefe   : > { %v1365_v54 = vadd.f32 %v1364_v53, %v1334_v52  ;;  %1581 = vmatpush.msra.mxu2 %v6091_v46  ;;  %v1768_v52 = vld [vmem:[%s9073_s2 + $0x440] sm:$0xff] }
 0xf00   : > { %5729 = vmatmul.msk.f32.vlgmr.msrb.gmra.mxu2 %vm315_vm5, %v1365_v54  ;;  %v1553_v55 = vpop.f32.mrf.mxu1 }
 0xf01   : > { %5734 = vmatpush.xpose.msk.msrb.mxu3 %vm315_vm5, %v1553_v55 }
 0xf04   : > { %v1521_v11 = vpop.f32.mrf.mxu0 }
 0xf05   : > { %v1522_v12 = vadd.f32 %v1521_v11, %v1491_v9  ;;  %v1762_v9 = vld [vmem:[%s9073_s2 + $0x3e0] sm:$0xff]  ;;  %v1761_v11 = vld [vmem:[%s9073_s2 + $0x3d0] sm:$0xff] }
 0xf7a   : > { %v1331_v56 = vpop.f32.mrf.mxu2 }
 0xf83   : > { %v1454_v57 = vpop.f32.mrf.mxu2 }
 0xf84   : > { %v1457_v59 = vsel %vm315_vm5, %v1454_v57, -inf }
 0xf85   : > { %1458 = vmax.xlane.f32.xlu0 %v1457_v59 }
 0xf99   : > { %6093 = vrot.lane.b32.xlu0 %v7338_v63, %s7045_s18 }
 0xff8   : > { %v1459_v62 = vpop.xlane.xlu0 %1458 }
 0xff9   : > { %v1460_v0 = vsub.f32 %v1454_v57, %v1459_v62  ;;  %v1714_v62 = vld [vmem:[%s9073_s2 + $0x300] ss:$0 sm:$0xff] }
 0xffb   : > { %v1461_v58 = vmul.f32 1.442695, %v1460_v0 }
 0xffd   : > { %6931 = vpow2.f32 %v1461_v58 }
0x1003   : > { %v6932_v1 = vpop.eup %6931 }
0x1004   : > { %v1463_v2 = vsel %vm315_vm5, %v6932_v1, 0.0 }
0x1005   : > { %1464 = vadd.xlane.f32.xlu1 %v1463_v2 }
0x100b   : > { %v6094_v50 = vpop.permute.xlu0 %6093 }
0x100c   : > { %v6096_v3 = vunpack.i.h.bf16 %v6094_v50  ;;  %v6095_v4 = vunpack.i.l.bf16 %v6094_v50 }
0x100e   : > { %1582 = vmatpush.msra.mxu2 %v6095_v4  ;;  %v1766_v4 = vld [vmem:[%s9073_s2 + $0x420] sm:$0xff] }
0x1010   : > { %1583 = vmatpush.msra.mxu2 %v6096_v3  ;;  %v1767_v3 = vld [vmem:[%s9073_s2 + $0x430] sm:$0xff] }
0x1011   : > { %5733 = vmatmul.msk.f32.vlgmr.msra.gmra.mxu2 %vm184_vm0, %v7361_v23 }
0x1012   : > { %1738 = vmatpush.msrb.mxu2 %v1721_v45 }
0x101e   : > { %1649 = vrot.lane.b32.xlu1 %v1331_v56, %s7044_s17  ;;  %s182_s17 = scalar_lea.vmem %s9074_s3, %s7078_s14 }
0x1078   : > { %v1465_v63 = vpop.xlane.xlu1 %1464 }
0x1079   : > { %6933 = vrcp.f32 %v1465_v63  ;;  %v1765_v63 = vld [vmem:[%s9073_s2 + $0x410] sm:$0xff] }
0x107f   : > { %v6934_v6 = vpop.eup %6933 }
0x1080   : > { %v1467_v7 = vmul.f32 %v6934_v6, %v6932_v1  ;;  %v1716_v1 = vld [vmem:[%s9073_s2 + $0x310] ss:$0 sm:$0xff]  ;;  %v1764_v6 = vld [vmem:[%s9073_s2 + $0x400] sm:$0xff] }
0x1082   : > { %5730 = vmatmul.msk.f32.vlgmr.msra.gmra.mxu3 %vm315_vm5, %v1467_v7  ;;  %v1763_v7 = vld [vmem:[%s9073_s2 + $0x3f0] sm:$0xff] }
0x1083   : > { %1772 = vmatpush.msra.mxu3 %v1770_v49 }
0x1085   : > { %1773 = vmatpush.msra.mxu3 %v1769_v51 }
0x1087   : > { %1774 = vmatpush.msra.mxu3 %v1768_v52 }
0x1089   : > { %1775 = vmatpush.msra.mxu3 %v1767_v3 }
0x108a   : > { %5735 = vmatmul.msk.f32.vlgmr.msrb.gmra.mxu3 %vm315_vm5, %v1522_v12  ;;  %v1760_v12 = vld [vmem:[%s9073_s2 + $0x3c0] sm:$0xff] }
0x108b   : > { %1776 = vmatpush.msra.mxu3 %v1766_v4  ;;  %v1908_v4 = vld [vmem:[%s9073_s2 + $0x570] sm:$0xff] }
0x108d   : > { %1777 = vmatpush.msra.mxu3 %v1765_v63  ;;  %v1910_v63 = vld [vmem:[%s9073_s2 + $0x580] sm:$0xff] }
0x108f   : > { %1778 = vmatpush.msra.mxu3 %v1764_v6  ;;  %v7604_v6 = vpack.i.bf16 %v1908_v4, %v1910_v63 }
0x1090   : > { %v1650_v30 = vpop.permute.xlu1 %1649 }
0x1091   : > { %v1660_v31 = vsel %vm315_vm5, %v7425_v44, %v1650_v30  ;;  %1779 = vmatpush.msra.mxu3 %v1763_v7  ;;  %v1771_v30 = vld [vmem:[%s9073_s2 + $0x470] ss:$0 sm:$0xff] }
0x1093   : > { %1780 = vmatpush.msra.mxu3 %v1762_v9 }
0x1094   : > { %v1585_v13 = vpop.f32.mrf.mxu2 }
0x1095   : > { %1643 = vmatpush.msrb.mxu0 %v1585_v13  ;;  %1781 = vmatpush.msra.mxu3 %v1761_v11  ;;  %v1759_v13 = vld [vmem:[%s9073_s2 + $0x3b0] sm:$0xff] }
0x1097   : > { %1782 = vmatpush.msra.mxu3 %v1760_v12 }
0x1099   : > { %1783 = vmatpush.msra.mxu3 %v1759_v13 }
0x1105   : > { %v1488_v15 = vpop.f32.mrf.mxu3 }
0x110d   : > { %v1611_v16 = vpop.f32.mrf.mxu3 }
0x110e   : > { %v1614_v17 = vsel %vm315_vm5, %v1611_v16, -inf }
0x110f   : > { %1615 = vmax.xlane.f32.xlu2 %v1614_v17  ;;  %v1756_v17 = vld [vmem:[%s9073_s2 + $0x380] sm:$0xff] }
0x1127   : > { %1653 = vrot.lane.b32.xlu2 %v1488_v15, %s7046_s19  ;;  %v1758_v15 = vld [vmem:[%s9073_s2 + $0x3a0] sm:$0xff] }
0x1128   : > { %1784 = vmatpush.msra.mxu3 %v1758_v15 }
0x1182   : > { %v1616_v18 = vpop.xlane.xlu2 %1615 }
0x1183   : > { %v1617_v19 = vsub.f32 %v1611_v16, %v1616_v18  ;;  %v1757_v16 = vld [vmem:[%s9073_s2 + $0x390] sm:$0xff] }
0x1184   : > { %1785 = vmatpush.msra.mxu3 %v1757_v16  ;;  %v1755_v18 = vld [vmem:[%s9073_s2 + $0x370] sm:$0xff] }
0x1185   : > { %v1618_v20 = vmul.f32 1.442695, %v1617_v19  ;;  %v1722_v19 = vld [vmem:[%s9073_s2 + $0x360] ss:$0 sm:$0xff] }
0x1186   : > { %1786 = vmatpush.msra.mxu3 %v1756_v17  ;;  %v1913_v17 = vld [vmem:[%s9073_s2 + $0x598] sm:$0xff] }
0x1187   : > { %6935 = vpow2.f32 %v1618_v20 }
0x1188   : > { %1787 = vmatpush.msra.mxu3 %v1755_v18  ;;  %v1915_v18 = vld [vmem:[%s9073_s2 + $0x5a8] sm:$0xff] }
0x118a   : > { %v1654_v10 = vpop.permute.xlu2 %1653 }
0x118b   : > { %v1661_v32 = vsel %vm860_vm6, %v1660_v31, %v1654_v10 }
0x118d   : > { %v6936_v21 = vpop.eup %6935 }
0x118e   : > { %v1620_v8 = vsel %vm315_vm5, %v6936_v21, 0.0 }
0x118f   : > { %1621 = vadd.xlane.f32.xlu0 %v1620_v8 }
0x1202   : > { %v1622_v22 = vpop.xlane.xlu0 %1621 }
0x1203   : > { %6937 = vrcp.f32 %v1622_v22 }
0x1209   : > { %v6938_v24 = vpop.eup %6937 }
0x120a   : > { %v1624_v25 = vmul.f32 %v6938_v24, %v6936_v21 }
0x120c   : > { %5736 = vmatmul.msk.f32.vlgmr.msrb.gmra.mxu0 %vm315_vm5, %v1624_v25 }
0x1289   : > { %v1645_v28 = vpop.f32.mrf.mxu0 }
0x128a   : > { %1657 = vrot.lane.b32.xlu1 %v1645_v28, %s7047_s5 }
0x12fc   : > { %v1658_v33 = vpop.permute.xlu1 %1657 }
0x12fd   : > { %v1662_v34 = vsel %vm862_vm7, %v1661_v32, %v1658_v33 }
0x12fe   : > { %5737 = vmatmul.msk.f32.vlgmr.msra.gmra.mxu1 %vm184_vm0, %v1662_v34 }
0x137b   : > { %v1688_v36 = vpop.f32.mrf.mxu1 }
0x137c   : > { %v1689_v37 = vadd.f32 %v1688_v36, %v1667_v35 }
0x137e   : > { %v1691_v38 = vadd.f32 %v1689_v37, %v7361_v23  ;;  %v1720_v23 = vld [vmem:[%s9073_s2 + $0x340] sm:$0xff] }
0x137f   : > { %1739 = vmatpush.msrb.mxu2 %v1720_v23 }
0x1380   : > { %v1692_v39 = vsel %vm184_vm0, %v1691_v38, 0.0 }
0x1381   : > { %1693 = vadd.xlane.f32.xlu0 %v1692_v39  ;;  %1740 = vmatpush.msrb.mxu2 %v1719_v47  ;;  %v1822_v39 = vld [vmem:[%s9073_s2 + $0x4d0] sm:$0xff] }
0x1382   : > { %1839 = vmatpush.msra.mxu0 %v1822_v39 }
0x1383   : > { %1741 = vmatpush.msrb.mxu2 %v1718_v48 }
0x13f4   : > { %v1694_v40 = vpop.xlane.xlu0 %1693 }
0x13f5   : > { %v1695_v41 = vmul.f32 %v1694_v40, %v7105_v14  ;;  %v1821_v40 = vld [vmem:[%s9073_s2 + $0x4c0] sm:$0xff] }
0x13f6   : > { %1840 = vmatpush.msra.mxu0 %v1821_v40 }
0x13f7   : > { %v1696_v42 = vsub.f32 %v1691_v38, %v1695_v41  ;;  %v1820_v41 = vld [vmem:[%s9073_s2 + $0x4b0] sm:$0xff] }
0x13f8   : > { %1841 = vmatpush.msra.mxu0 %v1820_v41  ;;  %v1871_v41 = vld [vmem:[%s178_s15] sm:$0xff] }
0x13f9   : > { %v1697_v43 = vmul.f32 %v1696_v42, %v1696_v42 }
0x13fb   : > { %v1698_v44 = vsel %vm184_vm0, %v1697_v43, 0.0 }
0x13fc   : > { %1699 = vadd.xlane.f32.xlu2 %v1698_v44 }
0x146f   : > { %v1700_v53 = vpop.xlane.xlu2 %1699 }
0x1470   : > { %v1701_v54 = vmul.f32 %v1700_v53, %v7105_v14  ;;  %v1815_v53 = vld [vmem:[%s9073_s2 + $0x480] ss:$0 sm:$0xff] }
0x1472   : > { %v1702_v55 = vadd.f32 1e-12, %v1701_v54 }
0x1474   : > { %6939 = vrsqrt.f32 %v1702_v55  ;;  %vm1709_vm15 = vweird.f32 %v1702_v55 }
0x147a   : > { %v6940_v56 = vpop.eup %6939 }
0x147b   : > { %v1704_v57 = vmul.f32 %v6940_v56, %v1702_v55  ;;  %vm1710_vm14 = vweird.f32 %v6940_v56 }
0x147c   : > { %vm1711_vm1 = vmor %vm1709_vm15, %vm1710_vm14 }
0x147d   : > { %v1705_v59 = vmul.f32 %v6940_v56, %v1704_v57 }
0x147f   : > { %v1706_v60 = vmul.f32 0.5, %v1705_v59  ;;  %v1823_v59 = vld [vmem:[%s9073_s2 + $0x4e0] ss:$0 sm:$0xff] }
0x1481   : > { %v1707_v46 = vsub.f32 1.5, %v1706_v60 }
0x1483   : > { %v1708_v61 = vmul.f32 %v6940_v56, %v1707_v46 }
0x1485   : > { %v1712_v0 = vsel %vm1711_vm1, %v6940_v56, %v1708_v61 }
0x1486   : > { %v1713_v58 = vmul.f32 %v1712_v0, %v1696_v42  ;;  %v1819_v42 = vld [vmem:[%s9073_s2 + $0x4a0] sm:$0xff]  ;;  %v1900_v0 = vld [vmem:[%s9073_s2 + $0x530] sm:$0xff] }
0x1487   : > { %1842 = vmatpush.msra.mxu0 %v1819_v42 }
0x1488   : > { %v1715_v2 = vmul.f32 %v1714_v62, %v1713_v58  ;;  %v1902_v58 = vld [vmem:[%s9073_s2 + $0x540] sm:$0xff] }
0x148a   : > { %v1717_v50 = vadd.f32 %v1716_v1, %v1715_v2  ;;  %v1912_v1 = vld [vmem:[%s9073_s2 + $0x590] sm:$0xff]  ;;  %v7587_v2 = vpack.i.bf16 %v1900_v0, %v1902_v58 }
0x148c   : > { %5738 = vmatmul.msk.f32.vlgmr.msrb.gmra.mxu2 %vm184_vm0, %v1717_v50 }
0x150f   : > { %v1743_v20 = vpop.f32.mrf.mxu2 }
0x1510   : > { %v1744_v21 = vadd.f32 %v1743_v20, %v1722_v19  ;;  %v7620_v19 = vpack.i.bf16 %v1913_v17, %v1915_v18  ;;  %v1875_v20 = vld [vmem:[%s9073_s2 + $0x510] sm:$0xff] }
0x1511   : > { %1893 = vmatpush.msrb.mxu1 %v1875_v20 }
0x1512   : > { %v1746_v8 = vmul.f32 %v1744_v21, %v1744_v21 }
0x1514   : > { %v1747_v22 = vmul.f32 %v1746_v8, %v1744_v21  ;;  %v1873_v8 = vld [vmem:[%s9073_s2 + $0x4f0] sm:$0xff] }
0x1516   : > { %v1748_v24 = vmul.f32 0.044715, %v1747_v22  ;;  %v1909_v22 = vld [vmem:[%s9073_s2 + $0x578] sm:$0xff] }
0x1518   : > { %v1749_v25 = vadd.f32 %v1748_v24, %v1744_v21  ;;  %v1911_v24 = vld [vmem:[%s9073_s2 + $0x588] sm:$0xff] }
0x151a   : > { %v1750_v26 = vmul.f32 0.7978846, %v1749_v25  ;;  %v7645_v25 = vpack.i.bf16 %v1909_v22, %v1911_v24 }
0x151c   : > { %6941 = vtanh.f32 %v1750_v26  ;;  %v1904_v26 = vld [vmem:[%s9073_s2 + $0x550] sm:$0xff] }
0x1522   : > { %v6942_v5 = vpop.eup %6941 }
0x1523   : > { %v1752_v27 = vadd.f32 1.0, %v6942_v5  ;;  %v1906_v5 = vld [vmem:[%s9073_s2 + $0x560] sm:$0xff] }
0x1525   : > { %v1753_v28 = vmul.f32 0.5, %v1752_v27  ;;  %v7655_v27 = vpack.i.bf16 %v1904_v26, %v1906_v5 }
0x1527   : > { %v1754_v29 = vmul.f32 %v1753_v28, %v1744_v21  ;;  %v1874_v21 = vld [vmem:[%s9073_s2 + $0x500] sm:$0xff]  ;;  %6108 = vrot.lane.b32.xlu2 %v7655_v27, %s7036_s28 }
0x1528   : > { %1894 = vmatpush.msrb.mxu1 %v1874_v21 }
0x1529   : > { %1788 = vmatmul.f32.vlgmr.msra.gmra.mxu3 %v1754_v29 }
0x152a   : > { %1895 = vmatpush.msrb.mxu1 %v1873_v8 }
0x152c   : > { %2002 = vmatpush.msra.mxu1 %v1915_v18 }
0x152e   : > { %2003 = vmatpush.msra.mxu1 %v1913_v17  ;;  %v1876_v17 = vld [vmem:[%s9073_s2 + $0x520] ss:$0 sm:$0xff] }
0x152f   : > { %6133 = vrot.lane.b32.xlu2 %v7655_v27, %s7041_s13 }
0x1530   : > { %2004 = vmatpush.msra.mxu1 %v1911_v24 }
0x1532   : > { %2005 = vmatpush.msra.mxu1 %v1909_v22 }
0x1537   : > { %6148 = vrot.lane.b32.xlu2 %v7655_v27, %s7040_s11 }
0x15ac   : > { %v1789_v10 = vpop.f32.mrf.mxu3 }
0x15ad   : > { %v1790_v31 = vadd.f32 %v1789_v10, %v1771_v30  ;;  %v1907_v30 = vld [vmem:[%s9073_s2 + $0x568] sm:$0xff]  ;;  %v1905_v10 = vld [vmem:[%s9073_s2 + $0x558] sm:$0xff] }
0x15ae   : > { %2006 = vmatpush.msra.mxu1 %v1907_v30 }
0x15af   : > { %v1792_v32 = vadd.f32 %v1790_v31, %v1717_v50  ;;  %v1914_v50 = vld [vmem:[%s9073_s2 + $0x5a0] sm:$0xff]  ;;  %v1903_v31 = vld [vmem:[%s9073_s2 + $0x548] sm:$0xff] }
0x15b0   : > { %v7592_v3 = vpack.i.bf16 %v1912_v1, %v1914_v50  ;;  %1930 = vmatpush.msra.mxu2 %v1914_v50  ;;  %2007 = vmatpush.msra.mxu1 %v1905_v10 }
0x15b1   : > { %v1793_v33 = vsel %vm184_vm0, %v1792_v32, 0.0 }
0x15b2   : > { %1794 = vadd.xlane.f32.xlu1 %v1793_v33  ;;  %1931 = vmatpush.msra.mxu2 %v1912_v1  ;;  %v1901_v33 = vld [vmem:[%s9073_s2 + $0x538] sm:$0xff] }
0x15b3   : > { %2008 = vmatpush.msra.mxu1 %v1903_v31 }
0x15b4   : > { %1932 = vmatpush.msra.mxu2 %v1910_v63 }
0x15b5   : > { %2009 = vmatpush.msra.mxu1 %v1901_v33 }
0x15b6   : > { %1933 = vmatpush.msra.mxu2 %v1908_v4 }
0x15b8   : > { %1934 = vmatpush.msra.mxu2 %v1906_v5 }
0x15ba   : > { %1935 = vmatpush.msra.mxu2 %v1904_v26 }
0x15bc   : > { %1936 = vmatpush.msra.mxu2 %v1902_v58 }
0x15be   : > { %1937 = vmatpush.msra.mxu2 %v1900_v0 }
0x15cb   : > { %6113 = vrot.lane.b32.xlu1 %v7587_v2, %s7036_s28 }
0x15d3   : > { %6138 = vrot.lane.b32.xlu1 %v7604_v6, %s7040_s11 }
0x15db   : > { %6153 = vrot.lane.b32.xlu1 %v7587_v2, %s7040_s11 }
0x15e3   : > { %6158 = vrot.lane.b32.xlu1 %v7620_v19, %s7040_s11 }
0x15eb   : > { %6163 = vrot.lane.b32.xlu1 %v7592_v3, %s7048_s10 }
0x15f3   : > { %6168 = vrot.lane.b32.xlu1 %v7645_v25, %s7040_s11 }
0x15fb   : > { %6173 = vrot.lane.b32.xlu1 %v7604_v6, %s7048_s10 }
0x1625   : > { %v1795_v34 = vpop.xlane.xlu1 %1794 }
0x1626   : > { %v1796_v35 = vmul.f32 %v1795_v34, %v7105_v14 }
0x1628   : > { %v1797_v36 = vsub.f32 %v1792_v32, %v1796_v35  ;;  %v7672_v32 = vpack.i.bf16 %v1905_v10, %v1907_v30 }
0x162a   : > { %v1798_v37 = vmul.f32 %v1797_v36, %v1797_v36  ;;  %6178 = vrot.lane.b32.xlu1 %v7672_v32, %s7040_s11 }
0x162c   : > { %v1799_v38 = vsel %vm184_vm0, %v1798_v37, 0.0 }
0x162d   : > { %1800 = vadd.xlane.f32.xlu0 %v1799_v38  ;;  %v7681_v38 = vpack.i.bf16 %v1901_v33, %v1903_v31 }
0x1632   : > { %6193 = vrot.lane.b32.xlu1 %v7681_v38, %s7040_s11 }
0x163a   : > { %6198 = vrot.lane.b32.xlu1 %v7604_v6, %s7034_s22 }
0x1642   : > { %6208 = vrot.lane.b32.xlu1 %v7655_v27, %s7034_s22 }
0x16a0   : > { %v1801_v43 = vpop.xlane.xlu0 %1800 }
0x16a1   : > { %v1802_v44 = vmul.f32 %v1801_v43, %v7105_v14  ;;  %v1817_v14 = vld [vmem:[%s9073_s2 + $0x490] ss:$0 sm:$0xff] }
0x16a3   : > { %v1803_v45 = vadd.f32 1e-12, %v1802_v44 }
0x16a5   : > { %6943 = vrsqrt.f32 %v1803_v45  ;;  %vm1810_vm3 = vweird.f32 %v1803_v45 }
0x16ab   : > { %v6944_v23 = vpop.eup %6943 }
0x16ac   : > { %v1805_v47 = vmul.f32 %v6944_v23, %v1803_v45  ;;  %vm1811_vm2 = vweird.f32 %v6944_v23 }
0x16ad   : > { %vm1812_vm4 = vmor %vm1810_vm3, %vm1811_vm2 }
0x16ae   : > { %v1806_v48 = vmul.f32 %v6944_v23, %v1805_v47 }
0x16b0   : > { %v1807_v49 = vmul.f32 0.5, %v1806_v48 }
0x16b2   : > { %v1808_v51 = vsub.f32 1.5, %v1807_v49 }
0x16b4   : > { %v1809_v52 = vmul.f32 %v6944_v23, %v1808_v51 }
0x16b6   : > { %v1813_v54 = vsel %vm1812_vm4, %v6944_v23, %v1809_v52  ;;  %v6114_v52 = vpop.permute.xlu1 %6113 }
0x16b7   : > { %v1814_v55 = vmul.f32 %v1813_v54, %v1797_v36 }
0x16b9   : > { %v1816_v56 = vmul.f32 %v1815_v53, %v1814_v55  ;;  %v6109_v53 = vpop.permute.xlu2 %6108 }
0x16ba   : > { %v6111_v54 = vunpack.i.h.bf16 %v6109_v53  ;;  %v6110_v55 = vunpack.i.l.bf16 %v6109_v53 }
0x16bb   : > { %v1818_v57 = vadd.f32 %v1817_v14, %v1816_v56  ;;  %v6115_v14 = vunpack.i.l.bf16 %v6114_v52 }
0x16bd   : > { %5739 = vmatmul.msk.f32.vlgmr.msra.gmra.mxu0 %vm184_vm0, %v1818_v57 }
0x16be   : > { %v6139_v57 = vpop.permute.xlu1 %6138 }
0x16bf   : > { %v6140_v1 = vunpack.i.l.bf16 %v6139_v57  ;;  %v6141_v4 = vunpack.i.h.bf16 %v6139_v57 }
0x173a   : > { %v1844_v60 = vpop.f32.mrf.mxu0 }
0x173b   : > { %v7573_v46 = vadd.f32 %v1844_v60, %v1823_v59  ;;  %v6116_v59 = vunpack.i.h.bf16 %v6114_v52 }
0x173d   : > { %v1847_v61 = vmul.f32 %v7573_v46, %v7573_v46 }
0x173f   : > { %v1848_v62 = vsel %vm862_vm7, %v1847_v61, 0.0  ;;  %v6154_v61 = vpop.permute.xlu1 %6153 }
0x1740   : > { %1849 = vadd.xlane.f32.xlu0 %v1848_v62 }
0x1747   : > { %v6159_v63 = vpop.permute.xlu1 %6158 }
0x1748   : > { %v6160_v21 = vunpack.i.l.bf16 %v6159_v63  ;;  %v6161_v22 = vunpack.i.h.bf16 %v6159_v63 }
0x1754   : > { %6098 = vrot.lane.b32.xlu0 %v7592_v3, %s7036_s28 }
0x175c   : > { %6103 = vrot.lane.b32.xlu0 %v7604_v6, %s7036_s28 }
0x1764   : > { %6118 = vrot.lane.b32.xlu0 %v7592_v3, %s7041_s13 }
0x176c   : > { %6123 = vrot.lane.b32.xlu0 %v7604_v6, %s7041_s13 }
0x1774   : > { %6128 = vrot.lane.b32.xlu0 %v7592_v3, %s7040_s11 }
0x177c   : > { %6143 = vrot.lane.b32.xlu0 %v7587_v2, %s7041_s13 }
0x17b3   : > { %v1850_v7 = vpop.xlane.xlu0 %1849 }
0x17b4   : > { %v1851_v9 = vrot.slane %v1850_v7, 4 }
0x17b6   : > { %v1852_v11 = vadd.f32 %v1851_v9, %v1850_v7 }
0x17b8   : > { %v1853_v12 = vrot.slane %v1852_v11, 2 }
0x17ba   : > { %v1854_v13 = vadd.f32 %v1853_v12, %v1852_v11  ;;  %v6155_v11 = vunpack.i.l.bf16 %v6154_v61  ;;  %v6156_v12 = vunpack.i.h.bf16 %v6154_v61 }
0x17bc   : > { %v1855_v15 = vrot.slane %v1854_v13, 1 }
0x17be   : > { %v1856_v16 = vadd.f32 %v1855_v15, %v1854_v13  ;;  %v7697_v13 = vpop.permute.xlu1 %6163 }
0x17c0   : > { %5850 = vpush %v1856_v16 }
0x17c6   : > { %v6099_v45 = vpop.permute.xlu0 %6098  ;;  %v6169_v15 = vpop.permute.xlu1 %6168 }
0x17c7   : > { %v6101_v23 = vunpack.i.h.bf16 %v6099_v45  ;;  %v6100_v47 = vunpack.i.l.bf16 %v6099_v45  ;;  %v6170_v24 = vunpack.i.l.bf16 %v6169_v15  ;;  %v6171_v26 = vunpack.i.h.bf16 %v6169_v15 }
0x17c9   : > { %1982 = vmatpush.msrb.mxu0 %v6100_v47 }
0x17cb   : > { %1983 = vmatpush.msrb.mxu0 %v6101_v23 }
0x17ce   : > { %v6104_v48 = vpop.permute.xlu0 %6103  ;;  %v7699_v16 = vpop.permute.xlu1 %6173 }
0x17cf   : > { %v6106_v49 = vunpack.i.h.bf16 %v6104_v48  ;;  %v6105_v51 = vunpack.i.l.bf16 %v6104_v48  ;;  %v6165_v48 = vunpack.i.l.bf16 %v7697_v13  ;;  %v6176_v52 = vunpack.i.h.bf16 %v7699_v16 }
0x17d1   : > { %1984 = vmatpush.msrb.mxu0 %v6105_v51  ;;  %v6175_v51 = vunpack.i.l.bf16 %v7699_v16 }
0x17d3   : > { %1985 = vmatpush.msrb.mxu0 %v6106_v49  ;;  %v6166_v49 = vunpack.i.h.bf16 %v7697_v13 }
0x17d5   : > { %1986 = vmatpush.msrb.mxu0 %v6110_v55 }
0x17d6   : > { %v7691_v56 = vpop.permute.xlu0 %6118  ;;  %v6179_v20 = vpop.permute.xlu1 %6178 }
0x17d7   : > { %1987 = vmatpush.msrb.mxu0 %v6111_v54  ;;  %v6180_v5 = vunpack.i.l.bf16 %v6179_v20  ;;  %v6120_v31 = vunpack.i.l.bf16 %v7691_v56  ;;  %v6121_v33 = vunpack.i.h.bf16 %v7691_v56 }
0x17d9   : > { %1988 = vmatpush.msrb.mxu0 %v6115_v14 }
0x17db   : > { %1989 = vmatpush.msrb.mxu0 %v6116_v59 }
0x17de   : > { %v7693_v60 = vpop.permute.xlu0 %6123 }
0x17e6   : > { %v6129_v62 = vpop.permute.xlu0 %6128 }
0x17e7   : > { %v6131_v0 = vunpack.i.h.bf16 %v6129_v62  ;;  %v6130_v58 = vunpack.i.l.bf16 %v6129_v62 }
0x17f1   : > { %s5851_s7 = spop %5850 }
0x17f2   : > { %v1858_v28 = vstv %s5851_s7 }
0x17f3   : > { %v1859_v29 = vmul.f32 0.010416667, %v1858_v28  ;;  %v6194_v28 = vpop.permute.xlu1 %6193 }
0x17f4   : > { %v6195_v30 = vunpack.i.l.bf16 %v6194_v28  ;;  %v6196_v10 = vunpack.i.h.bf16 %v6194_v28 }
0x17f5   : > { %6945 = vrsqrt.f32 %v1859_v29  ;;  %vm1866_vm9 = vweird.f32 %v1859_v29 }
0x17fb   : > { %v6946_v34 = vpop.eup %6945 }
0x17fc   : > { %v1861_v35 = vmul.f32 %v6946_v34, %v1859_v29  ;;  %vm1867_vm8 = vweird.f32 %v6946_v34  ;;  %v6181_v29 = vunpack.i.h.bf16 %v6179_v20 }
0x17fd   : > { %vm1868_vm10 = vmor %vm1866_vm9, %vm1867_vm8 }
0x17fe   : > { %v1862_v36 = vmul.f32 %v6946_v34, %v1861_v35  ;;  %v7723_v35 = vld [vmem:[%s9073_s2 + $0x5b0] sm:$0xf] }
0x17ff   : > { %v2074_v20 = vperm.slane %v7723_v35, 1 }
0x1800   : > { %v1863_v37 = vmul.f32 0.5, %v1862_v36 }
0x1802   : > { %v1864_v39 = vsub.f32 1.5, %v1863_v37  ;;  %v6125_v37 = vunpack.i.l.bf16 %v7693_v60 }
0x1804   : > { %v1865_v40 = vmul.f32 %v6946_v34, %v1864_v39  ;;  %v1917_v39 = vperm.slane %v7723_v35, 0 }
0x1806   : > { %v1869_v42 = vsel %vm1868_vm10, %v6946_v34, %v1865_v40  ;;  %v6126_v40 = vunpack.i.h.bf16 %v7693_v60 }
0x1807   : > { %v1870_v43 = vmul.f32 %v1869_v42, %v7573_v46  ;;  %v7695_v46 = vpop.permute.xlu2 %6133 }
0x1808   : > { %v6136_v45 = vunpack.i.h.bf16 %v7695_v46 }
0x1809   : > { %v1872_v44 = vadd.f32 %v1871_v41, %v1870_v43  ;;  %v6135_v41 = vunpack.i.l.bf16 %v7695_v46  ;;  %v6199_v46 = vpop.permute.xlu1 %6198 }
0x180b   : > { %5740 = vmatmul.msk.f32.vlgmr.msrb.gmra.mxu1 %vm862_vm7, %v1872_v44  ;;  %vm1918_vm7 = vcmask 523264   ;;  %v6144_v44 = vpop.permute.xlu0 %6143 }
0x180c   : > { %2107 = vmatpush.msrb.mxu1 %v6130_v58  ;;  %v6145_v23 = vunpack.i.l.bf16 %v6144_v44  ;;  %v6146_v47 = vunpack.i.h.bf16 %v6144_v44 }
0x180e   : > { %2108 = vmatpush.msrb.mxu1 %v6131_v0  ;;  %v6200_v0 = vunpack.i.l.bf16 %v6199_v46 }
0x180f   : > { %v6149_v50 = vpop.permute.xlu2 %6148 }
0x1810   : > { %2109 = vmatpush.msrb.mxu1 %v6140_v1  ;;  %v6150_v7 = vunpack.i.l.bf16 %v6149_v50  ;;  %v6151_v9 = vunpack.i.h.bf16 %v6149_v50  ;;  %v6201_v1 = vunpack.i.h.bf16 %v6199_v46 }
0x1811   : > { %v6209_v50 = vpop.permute.xlu1 %6208 }
0x1812   : > { %2110 = vmatpush.msrb.mxu1 %v6141_v4  ;;  %v6211_v4 = vunpack.i.h.bf16 %v6209_v50  ;;  %v6210_v63 = vunpack.i.l.bf16 %v6209_v50 }
0x1814   : > { %2111 = vmatpush.msrb.mxu1 %v6150_v7 }
0x1816   : > { %2112 = vmatpush.msrb.mxu1 %v6151_v9 }
0x1818   : > { %2113 = vmatpush.msrb.mxu1 %v6155_v11 }
0x181a   : > { %2114 = vmatpush.msrb.mxu1 %v6156_v12 }
0x1888   : > { %v1897_v18 = vpop.f32.mrf.mxu1 }
0x1889   : > { %v7706_v8 = vadd.f32 %v1897_v18, %v1876_v17 }
0x188b   : > { %5741 = vmatmul.msk.f32.vlgmr.msra.gmra.mxu2 %vm1918_vm7, %v7706_v8  ;;  %5742 = vmatmul.msk.f32.vlgmr.msrb.gmra.mxu0 %vm1918_vm7, %v7706_v8 }
0x188c   : > { %5743 = vmatmul.msk.f32.vlgmr.msra.gmra.mxu1 %vm1918_vm7, %v7706_v8 }
0x188d   : > { %2203 = vmatpush.msra.mxu1 %v6160_v21 }
0x188f   : > { %2204 = vmatpush.msra.mxu1 %v6161_v22 }
0x1891   : > { %2205 = vmatpush.msra.mxu1 %v6170_v24 }
0x1893   : > { %2206 = vmatpush.msra.mxu1 %v6171_v26 }
0x1894   : > { %5747 = vmatmul.msk.f32.vlgmr.msrb.gmra.mxu1 %vm1918_vm7, %v7706_v8 }
0x1895   : > { %2207 = vmatpush.msra.mxu1 %v6180_v5 }
0x1897   : > { %2208 = vmatpush.msra.mxu1 %v6181_v29 }
0x1899   : > { %2209 = vmatpush.msra.mxu1 %v6195_v30 }
0x189b   : > { %2210 = vmatpush.msra.mxu1 %v6196_v10 }
0x189c   : > { %5749 = vmatmul.msk.f32.vlgmr.msra.gmra.mxu1 %vm1918_vm7, %v7706_v8 }
0x1908   : > { %v1991_v34 = vpop.f32.mrf.mxu0 }
0x1909   : > { %v2011_v36 = vpop.f32.mrf.mxu1  ;;  %5744 = vmatpush.xpose.msk.msrb.mxu2 %vm860_vm6, %v1991_v34 }
0x190a   : > { %2069 = vmatpush.msra.mxu0 %v2011_v36 }
0x190d   : > { %2151 = vmatpush.msra.mxu2 %v6120_v31 }
0x190e   : > { %v1939_v42 = vpop.f32.mrf.mxu2 }
0x190f   : > { %2152 = vmatpush.msra.mxu2 %v6121_v33  ;;  %v1940_v43 = vadd.f32 %v1939_v42, %v1917_v39 }
0x1911   : > { %2153 = vmatpush.msra.mxu2 %v6125_v37  ;;  %v2116_v7 = vpop.f32.mrf.mxu1 }
0x1912   : > { %5745 = vmatmul.msk.f32.vlgmr.msrb.gmra.mxu2 %vm860_vm6, %v1940_v43  ;;  %v2117_v22 = vadd.f32 %v2116_v7, %v2074_v20 }
0x1913   : > { %2154 = vmatpush.msra.mxu2 %v6126_v40 }
0x1915   : > { %2155 = vmatpush.msra.mxu2 %v6135_v41 }
0x1917   : > { %2156 = vmatpush.msra.mxu2 %v6136_v45 }
0x1919   : > { %2157 = vmatpush.msra.mxu2 %v6145_v23  ;;  %v2212_v17 = vpop.f32.mrf.mxu1 }
0x191b   : > { %2158 = vmatpush.msra.mxu2 %v6146_v47 }
0x191c   : > { %5748 = vmatmul.msk.f32.vlgmr.msra.gmra.mxu2 %vm1918_vm7, %v7706_v8 }
0x191d   : > { %2352 = vmatpush.msrb.mxu2 %v6165_v48 }
0x191f   : > { %2353 = vmatpush.msrb.mxu2 %v6166_v49 }
0x1921   : > { %2354 = vmatpush.msrb.mxu2 %v6175_v51 }
0x1923   : > { %2355 = vmatpush.msrb.mxu2 %v6176_v52 }
0x1995   : > { %v2037_v53 = vpop.f32.mrf.mxu2 }
0x1996   : > { %v2040_v54 = vsel %vm315_vm5, %v2037_v53, -inf }
0x1997   : > { %2041 = vmax.xlane.f32.xlu0 %v2040_v54 }
0x199f   : > { %v2160_v55 = vpop.f32.mrf.mxu2 }
0x19a0   : > { %5750 = vmatpush.xpose.msk.msrb.mxu0 %vm860_vm6, %v2160_v55 }
0x19ab   : > { %6183 = vrot.lane.b32.xlu0 %v7592_v3, %s7034_s22 }
0x19b3   : > { %6203 = vrot.lane.b32.xlu0 %v7587_v2, %s7048_s10 }
0x1a0a   : > { %v2042_v14 = vpop.xlane.xlu0 %2041 }
0x1a0b   : > { %v2043_v56 = vsub.f32 %v2037_v53, %v2042_v14 }
0x1a0d   : > { %v2044_v57 = vmul.f32 1.442695, %v2043_v56 }
0x1a0f   : > { %6947 = vpow2.f32 %v2044_v57 }
0x1a15   : > { %v6948_v59 = vpop.eup %6947 }
0x1a16   : > { %v2046_v60 = vsel %vm315_vm5, %v6948_v59, 0.0 }
0x1a17   : > { %2047 = vadd.xlane.f32.xlu2 %v2046_v60 }
0x1a1d   : > { %v6184_v61 = vpop.permute.xlu0 %6183 }
0x1a1e   : > { %v6185_v62 = vunpack.i.l.bf16 %v6184_v61  ;;  %v6186_v58 = vunpack.i.h.bf16 %v6184_v61 }
0x1a20   : > { %2308 = vmatpush.msrb.mxu1 %v6185_v62 }
0x1a22   : > { %2309 = vmatpush.msrb.mxu1 %v6186_v58 }
0x1a24   : > { %2310 = vmatpush.msrb.mxu1 %v6200_v0 }
0x1a25   : > { %v6204_v13 = vpop.permute.xlu0 %6203 }
0x1a26   : > { %2311 = vmatpush.msrb.mxu1 %v6201_v1  ;;  %v6205_v18 = vunpack.i.l.bf16 %v6204_v13  ;;  %v6206_v21 = vunpack.i.h.bf16 %v6204_v13 }
0x1a28   : > { %2312 = vmatpush.msrb.mxu1 %v6210_v63 }
0x1a2a   : > { %2313 = vmatpush.msrb.mxu1 %v6211_v4 }
0x1a2f   : > { %6188 = vrot.lane.b32.xlu2 %v7655_v27, %s7048_s10 }
0x1a37   : > { %6213 = vrot.lane.b32.xlu2 %v7587_v2, %s7034_s22 }
0x1a3f   : > { %6218 = vrot.lane.b32.xlu2 %v7620_v19, %s7034_s22 }
0x1a47   : > { %6223 = vrot.lane.b32.xlu2 %v7645_v25, %s7034_s22 }
0x1a4f   : > { %6228 = vrot.lane.b32.xlu2 %v7592_v3, %s7046_s19 }
0x1a57   : > { %6233 = vrot.lane.b32.xlu2 %v7672_v32, %s7034_s22 }
0x1a5f   : > { %6238 = vrot.lane.b32.xlu2 %v7604_v6, %s7046_s19 }
0x1a67   : > { %6253 = vrot.lane.b32.xlu2 %v7655_v27, %s7046_s19 }
0x1a6f   : > { %6258 = vrot.lane.b32.xlu2 %v7604_v6, %s7039_s4 }
0x1a77   : > { %6263 = vrot.lane.b32.xlu2 %v7587_v2, %s7046_s19 }
0x1a8a   : > { %v2048_v6 = vpop.xlane.xlu2 %2047 }
0x1a8b   : > { %6949 = vrcp.f32 %v2048_v6 }
0x1a91   : > { %v6950_v9 = vpop.eup %6949 }
0x1a92   : > { %v2050_v11 = vmul.f32 %v6950_v9, %v6948_v59  ;;  %v6189_v12 = vpop.permute.xlu2 %6188 }
0x1a93   : > { %v6191_v15 = vunpack.i.h.bf16 %v6189_v12  ;;  %v6190_v16 = vunpack.i.l.bf16 %v6189_v12 }
0x1a94   : > { %5746 = vmatmul.msk.f32.vlgmr.msra.gmra.mxu0 %vm315_vm5, %v2050_v11 }
0x1a95   : > { %2270 = vmatpush.msra.mxu0 %v2212_v17  ;;  %2356 = vmatpush.msrb.mxu2 %v6190_v16 }
0x1a97   : > { %2357 = vmatpush.msrb.mxu2 %v6191_v15 }
0x1a99   : > { %2358 = vmatpush.msrb.mxu2 %v6205_v18 }
0x1a9a   : > { %v6214_v24 = vpop.permute.xlu2 %6213 }
0x1a9b   : > { %v6216_v26 = vunpack.i.h.bf16 %v6214_v24  ;;  %v6215_v5 = vunpack.i.l.bf16 %v6214_v24  ;;  %2359 = vmatpush.msrb.mxu2 %v6206_v21 }
0x1a9c   : > { %5751 = vmatmul.msk.f32.vlgmr.msrb.gmra.mxu0 %vm860_vm6, %v2117_v22  ;;  %5754 = vmatmul.msk.f32.vlgmr.msrb.gmra.mxu2 %vm1918_vm7, %v7706_v8 }
0x1a9d   : > { %2314 = vmatpush.msrb.mxu1 %v6215_v5 }
0x1a9f   : > { %2315 = vmatpush.msrb.mxu1 %v6216_v26 }
0x1aa0   : > { %5753 = vmatmul.msk.f32.vlgmr.msrb.gmra.mxu1 %vm1918_vm7, %v7706_v8 }
0x1aa2   : > { %v6219_v28 = vpop.permute.xlu2 %6218 }
0x1aa3   : > { %v6221_v29 = vunpack.i.h.bf16 %v6219_v28  ;;  %v6220_v30 = vunpack.i.l.bf16 %v6219_v28 }
0x1aa5   : > { %2396 = vmatpush.msrb.mxu3 %v6220_v30 }
0x1aa7   : > { %2397 = vmatpush.msrb.mxu3 %v6221_v29 }
0x1aaa   : > { %v6224_v10 = vpop.permute.xlu2 %6223 }
0x1aab   : > { %v6226_v31 = vunpack.i.h.bf16 %v6224_v10  ;;  %v6225_v33 = vunpack.i.l.bf16 %v6224_v10 }
0x1aad   : > { %2398 = vmatpush.msrb.mxu3 %v6225_v33 }
0x1aaf   : > { %2399 = vmatpush.msrb.mxu3 %v6226_v31 }
0x1ab2   : > { %v6229_v34 = vpop.permute.xlu2 %6228 }
0x1ab3   : > { %v6231_v36 = vunpack.i.h.bf16 %v6229_v34  ;;  %v6230_v37 = vunpack.i.l.bf16 %v6229_v34 }
0x1ab5   : > { %2545 = vmatpush.msra.mxu2 %v6230_v37 }
0x1ab7   : > { %2546 = vmatpush.msra.mxu2 %v6231_v36 }
0x1aba   : > { %v6234_v39 = vpop.permute.xlu2 %6233 }
0x1abb   : > { %v6236_v40 = vunpack.i.h.bf16 %v6234_v39  ;;  %v6235_v41 = vunpack.i.l.bf16 %v6234_v39 }
0x1abd   : > { %2400 = vmatpush.msrb.mxu3 %v6235_v41 }
0x1abf   : > { %2401 = vmatpush.msrb.mxu3 %v6236_v40 }
0x1ac2   : > { %v6239_v42 = vpop.permute.xlu2 %6238 }
0x1ac3   : > { %v6241_v43 = vunpack.i.h.bf16 %v6239_v42  ;;  %v6240_v44 = vunpack.i.l.bf16 %v6239_v42 }
0x1ac5   : > { %2547 = vmatpush.msra.mxu2 %v6240_v44 }
0x1ac7   : > { %2548 = vmatpush.msra.mxu2 %v6241_v43 }
0x1aca   : > { %v6254_v45 = vpop.permute.xlu2 %6253 }
0x1acb   : > { %v6256_v23 = vunpack.i.h.bf16 %v6254_v45  ;;  %v6255_v47 = vunpack.i.l.bf16 %v6254_v45  ;;  %v2468_v45 = vperm.slane %v7723_v35, 3 }
0x1acd   : > { %2549 = vmatpush.msra.mxu2 %v6255_v47 }
0x1acf   : > { %2550 = vmatpush.msra.mxu2 %v6256_v23 }
0x1ad2   : > { %v6259_v48 = vpop.permute.xlu2 %6258 }
0x1ad3   : > { %v6260_v63 = vunpack.i.l.bf16 %v6259_v48 }
0x1ada   : > { %v6264_v49 = vpop.permute.xlu2 %6263 }
0x1adb   : > { %v6266_v51 = vunpack.i.h.bf16 %v6264_v49  ;;  %v6265_v52 = vunpack.i.l.bf16 %v6264_v49 }
0x1add   : > { %2551 = vmatpush.msra.mxu2 %v6265_v52 }
0x1adf   : > { %2552 = vmatpush.msra.mxu2 %v6266_v51 }
0x1ae0   : > { %5760 = vmatmul.msk.f32.vlgmr.msra.gmra.mxu2 %vm1918_vm7, %v7706_v8 }
0x1b11   : > { %v7778_v53 = vpop.f32.mrf.mxu0 }
0x1b19   : > { %v2238_v54 = vpop.f32.mrf.mxu0 }
0x1b1a   : > { %v2241_v55 = vsel %vm315_vm5, %v2238_v54, -inf }
0x1b1b   : > { %2242 = vmax.xlane.f32.xlu0 %v2241_v55 }
0x1b1f   : > { %v2361_v14 = vpop.f32.mrf.mxu2 }
0x1b20   : > { %5756 = vmatpush.xpose.msk.msrb.mxu0 %vm860_vm6, %v2361_v14 }
0x1b2f   : > { %6243 = vrot.lane.b32.xlu0 %v7681_v38, %s7034_s22 }
0x1b37   : > { %6268 = vrot.lane.b32.xlu0 %v7655_v27, %s7039_s4 }
0x1b63   : > { %v2554_v6 = vpop.f32.mrf.mxu2 }
0x1b8e   : > { %v2243_v56 = vpop.xlane.xlu0 %2242 }
0x1b8f   : > { %v2244_v57 = vsub.f32 %v2238_v54, %v2243_v56 }
0x1b91   : > { %v2245_v59 = vmul.f32 1.442695, %v2244_v57  ;;  %v7827_v57 = vld [vmem:[%s9073_s2 + $0x6b8] sm:$0xff] }
0x1b93   : > { %6951 = vpow2.f32 %v2245_v59  ;;  %v7833_v59 = vld [vmem:[%s9073_s2 + $0x6a8] sm:$0xff] }
0x1b99   : > { %v6952_v60 = vpop.eup %6951 }
0x1b9a   : > { %v2247_v46 = vsel %vm315_vm5, %v6952_v60, 0.0 }
0x1b9b   : > { %2248 = vadd.xlane.f32.xlu1 %v2247_v46  ;;  %v7845_v46 = vld [vmem:[%s9073_s2 + $0x688] sm:$0xff] }
0x1ba1   : > { %v6244_v61 = vpop.permute.xlu0 %6243 }
0x1ba2   : > { %v6246_v62 = vunpack.i.h.bf16 %v6244_v61  ;;  %v6245_v0 = vunpack.i.l.bf16 %v6244_v61  ;;  %v7850_v61 = vld [vmem:[%s9073_s2 + $0x678] sm:$0xff] }
0x1ba4   : > { %2402 = vmatpush.msrb.mxu3 %v6245_v0  ;;  %v7862_v0 = vld [vmem:[%s9073_s2 + $0x658] sm:$0xff] }
0x1ba6   : > { %2403 = vmatpush.msrb.mxu3 %v6246_v62  ;;  %v7856_v62 = vld [vmem:[%s9073_s2 + $0x668] sm:$0xff] }
0x1ba7   : > { %5755 = vmatmul.msk.f32.vlgmr.msrb.gmra.mxu3 %vm1918_vm7, %v7706_v8 }
0x1ba9   : > { %v6269_v7 = vpop.permute.xlu0 %6268 }
0x1baa   : > { %v6270_v9 = vunpack.i.l.bf16 %v6269_v7  ;;  %v6271_v12 = vunpack.i.h.bf16 %v6269_v7  ;;  %v2684_v7 = vld [vmem:[%s9073_s2 + $0x630] sm:$0xff] }
0x1bb4   : > { %6248 = vrot.lane.b32.xlu1 %v7592_v3, %s7039_s4  ;;  %v2317_v3 = vpop.f32.mrf.mxu1 }
0x1bbc   : > { %6273 = vrot.lane.b32.xlu1 %v7587_v2, %s7039_s4  ;;  %v2275_v2 = vperm.slane %v7723_v35, 2  ;;  %v7821_v35 = vld [vmem:[%s9073_s2 + $0x6c8] sm:$0xff] }
0x1bbe   : > { %v2318_v50 = vadd.f32 %v2317_v3, %v2275_v2 }
0x1bc4   : > { %6278 = vrot.lane.b32.xlu1 %v7620_v19, %s7039_s4 }
0x1bcc   : > { %6283 = vrot.lane.b32.xlu1 %v7645_v25, %s7039_s4 }
0x1bd4   : > { %6288 = vrot.lane.b32.xlu1 %v7672_v32, %s7039_s4 }
0x1bdc   : > { %6293 = vrot.lane.b32.xlu1 %v7681_v38, %s7039_s4  ;;  %v6261_v38 = vunpack.i.h.bf16 %v6259_v48 }
0x1c0e   : > { %v2249_v27 = vpop.xlane.xlu1 %2248 }
0x1c0f   : > { %6953 = vrcp.f32 %v2249_v27  ;;  %v2757_v27 = vld [vmem:[%s9073_s2 + $0x6c0] sm:$0xff] }
0x1c10   : > { %2772 = vmatpush.msrb.mxu2 %v2757_v27 }
0x1c15   : > { %v6954_v58 = vpop.eup %6953 }
0x1c16   : > { %v2251_v1 = vmul.f32 %v6954_v58, %v6952_v60  ;;  %v7839_v60 = vld [vmem:[%s9073_s2 + $0x698] sm:$0xff]  ;;  %v2755_v58 = vld [vmem:[%s9073_s2 + $0x6b0] sm:$0xff] }
0x1c17   : > { %2773 = vmatpush.msrb.mxu2 %v2755_v58 }
0x1c18   : > { %5752 = vmatmul.msk.f32.vlgmr.msra.gmra.mxu0 %vm315_vm5, %v2251_v1  ;;  %v2753_v1 = vld [vmem:[%s9073_s2 + $0x6a0] sm:$0xff] }
0x1c19   : > { %2774 = vmatpush.msrb.mxu2 %v2753_v1 }
0x1c20   : > { %5757 = vmatmul.msk.f32.vlgmr.msrb.gmra.mxu0 %vm860_vm6, %v2318_v50 }
0x1c26   : > { %v6249_v19 = vpop.permute.xlu1 %6248 }
0x1c27   : > { %v6251_v25 = vunpack.i.h.bf16 %v6249_v19  ;;  %v6250_v4 = vunpack.i.l.bf16 %v6249_v19  ;;  %v2751_v19 = vld [vmem:[%s9073_s2 + $0x690] sm:$0xff] }
0x1c28   : > { %2775 = vmatpush.msrb.mxu2 %v2751_v19 }
0x1c29   : > { %2501 = vmatpush.msra.mxu1 %v6250_v4  ;;  %v2747_v4 = vld [vmem:[%s9073_s2 + $0x670] sm:$0xff] }
0x1c2a   : > { %v2405_v32 = vpop.f32.mrf.mxu3 }
0x1c2b   : > { %2463 = vmatpush.msra.mxu0 %v2405_v32  ;;  %2502 = vmatpush.msra.mxu1 %v6251_v25  ;;  %v2749_v25 = vld [vmem:[%s9073_s2 + $0x680] sm:$0xff]  ;;  %v2743_v32 = vld [vmem:[%s9073_s2 + $0x650] sm:$0xff] }
0x1c2c   : > { %2776 = vmatpush.msrb.mxu2 %v2749_v25 }
0x1c2d   : > { %5762 = vmatpush.xpose.msk.msrb.mxu0 %vm860_vm6, %v2554_v6  ;;  %2503 = vmatpush.msra.mxu1 %v6260_v63  ;;  %v2745_v63 = vld [vmem:[%s9073_s2 + $0x660] sm:$0xff]  ;;  %v2682_v6 = vld [vmem:[%s9073_s2 + $0x610] sm:$0xff] }
0x1c2e   : > { %v6274_v11 = vpop.permute.xlu1 %6273  ;;  %2777 = vmatpush.msrb.mxu2 %v2747_v4 }
0x1c2f   : > { %2504 = vmatpush.msra.mxu1 %v6261_v38  ;;  %v6275_v13 = vunpack.i.l.bf16 %v6274_v11  ;;  %v6276_v15 = vunpack.i.h.bf16 %v6274_v11  ;;  %v2683_v38 = vld [vmem:[%s9073_s2 + $0x620] sm:$0xff]  ;;  %v2680_v11 = vld [vmem:[%s9073_s2 + $0x5f0] sm:$0xff] }
0x1c30   : > { %2778 = vmatpush.msrb.mxu2 %v2745_v63 }
0x1c31   : > { %2505 = vmatpush.msra.mxu1 %v6270_v9  ;;  %v2681_v9 = vld [vmem:[%s9073_s2 + $0x600] sm:$0xff] }
0x1c32   : > { %2779 = vmatpush.msrb.mxu2 %v2743_v32 }
0x1c33   : > { %2506 = vmatpush.msra.mxu1 %v6271_v12  ;;  %v2679_v12 = vld [vmem:[%s9073_s2 + $0x5e0] sm:$0xff] }
0x1c35   : > { %2507 = vmatpush.msra.mxu1 %v6275_v13  ;;  %v2678_v13 = vld [vmem:[%s9073_s2 + $0x5d0] sm:$0xff] }
0x1c36   : > { %v6279_v16 = vpop.permute.xlu1 %6278 }
0x1c37   : > { %v6281_v17 = vunpack.i.h.bf16 %v6279_v16  ;;  %v6280_v18 = vunpack.i.l.bf16 %v6279_v16  ;;  %2508 = vmatpush.msra.mxu1 %v6276_v15 }
0x1c38   : > { %5759 = vmatmul.msk.f32.vlgmr.msra.gmra.mxu1 %vm1918_vm7, %v7706_v8 }
0x1c39   : > { %2589 = vmatpush.msra.mxu3 %v6280_v18  ;;  %2697 = vmatpush.msrb.mxu1 %v2684_v7  ;;  %v7918_v18 = vpack.i.bf16 %v2755_v58, %v2757_v27 }
0x1c3b   : > { %2590 = vmatpush.msra.mxu3 %v6281_v17  ;;  %2698 = vmatpush.msrb.mxu1 %v2683_v38  ;;  %v2677_v17 = vld [vmem:[%s9073_s2 + $0x5c0] sm:$0xff] }
0x1c3d   : > { %2699 = vmatpush.msrb.mxu1 %v2682_v6 }
0x1c3e   : > { %v6284_v20 = vpop.permute.xlu1 %6283 }
0x1c3f   : > { %v6286_v21 = vunpack.i.h.bf16 %v6284_v20  ;;  %v6285_v22 = vunpack.i.l.bf16 %v6284_v20  ;;  %2700 = vmatpush.msrb.mxu1 %v2681_v9 }
0x1c41   : > { %2591 = vmatpush.msra.mxu3 %v6285_v22  ;;  %2701 = vmatpush.msrb.mxu1 %v2680_v11 }
0x1c43   : > { %2592 = vmatpush.msra.mxu3 %v6286_v21  ;;  %2702 = vmatpush.msrb.mxu1 %v2679_v12 }
0x1c45   : > { %2703 = vmatpush.msrb.mxu1 %v2678_v13 }
0x1c46   : > { %v6289_v24 = vpop.permute.xlu1 %6288 }
0x1c47   : > { %v6291_v26 = vunpack.i.h.bf16 %v6289_v24  ;;  %v6290_v5 = vunpack.i.l.bf16 %v6289_v24  ;;  %2704 = vmatpush.msrb.mxu1 %v2677_v17 }
0x1c49   : > { %2593 = vmatpush.msra.mxu3 %v6290_v5 }
0x1c4b   : > { %2594 = vmatpush.msra.mxu3 %v6291_v26 }
0x1c4e   : > { %v6294_v28 = vpop.permute.xlu1 %6293 }
0x1c4f   : > { %v6296_v29 = vunpack.i.h.bf16 %v6294_v28  ;;  %v6295_v30 = vunpack.i.l.bf16 %v6294_v28  ;;  %v7927_v28 = vpack.i.bf16 %v2751_v19, %v2753_v1 }
0x1c51   : > { %2595 = vmatpush.msra.mxu3 %v6295_v30 }
0x1c53   : > { %2596 = vmatpush.msra.mxu3 %v6296_v29  ;;  %v7931_v29 = vpack.i.bf16 %v2743_v32, %v2745_v63 }
0x1c54   : > { %5761 = vmatmul.msk.f32.vlgmr.msra.gmra.mxu3 %vm1918_vm7, %v7706_v8 }
0x1c95   : > { %v2272_v10 = vpop.f32.mrf.mxu0 }
0x1c9d   : > { %v2431_v31 = vpop.f32.mrf.mxu0 }
0x1c9e   : > { %v2434_v33 = vsel %vm315_vm5, %v2431_v31, -inf }
0x1c9f   : > { %2435 = vmax.xlane.f32.xlu2 %v2434_v33 }
0x1cb5   : > { %v2510_v23 = vpop.f32.mrf.mxu1 }
0x1cb6   : > { %v2511_v47 = vadd.f32 %v2510_v23, %v2468_v45 }
0x1cd7   : > { %v2598_v44 = vpop.f32.mrf.mxu3 }
0x1d12   : > { %v2436_v34 = vpop.xlane.xlu2 %2435 }
0x1d13   : > { %v2437_v36 = vsub.f32 %v2431_v31, %v2436_v34 }
0x1d15   : > { %v2438_v37 = vmul.f32 1.442695, %v2437_v36 }
0x1d17   : > { %6955 = vpow2.f32 %v2438_v37 }
0x1d1d   : > { %v6956_v39 = vpop.eup %6955 }
0x1d1e   : > { %v2440_v40 = vsel %vm315_vm5, %v6956_v39, 0.0 }
0x1d1f   : > { %2441 = vadd.xlane.f32.xlu0 %v2440_v40 }
0x1d33   : > { %2662 = vrot.lane.b32.xlu0 %v2272_v10, %s7046_s19 }
0x1d92   : > { %v2442_v41 = vpop.xlane.xlu0 %2441 }
0x1d93   : > { %6957 = vrcp.f32 %v2442_v41 }
0x1d99   : > { %v6958_v42 = vpop.eup %6957 }
0x1d9a   : > { %v2444_v43 = vmul.f32 %v6958_v42, %v6956_v39  ;;  %v7948_v39 = vpack.i.bf16 %v2747_v4, %v2749_v25 }
0x1d9c   : > { %5758 = vmatmul.msk.f32.vlgmr.msra.gmra.mxu0 %vm315_vm5, %v2444_v43 }
0x1d9d   : > { %2656 = vmatpush.msra.mxu0 %v2598_v44  ;;  %v7049_v44 = vmov 64.0  }
0x1da4   : > { %5763 = vmatmul.msk.f32.vlgmr.msrb.gmra.mxu0 %vm860_vm6, %v2511_v47 }
0x1da5   : > { %2844 = vmatpush.msrb.mxu0 %v7821_v35  ;;  %v2663_v20 = vpop.permute.xlu0 %2662 }
0x1da6   : > { %v2673_v22 = vsel %vm860_vm6, %v7778_v53, %v2663_v20  ;;  %v2685_v53 = vld [vmem:[%s9073_s2 + $0x640] ss:$0 sm:$0xff] }
0x1da7   : > { %2845 = vmatpush.msrb.mxu0 %v7827_v57 }
0x1da9   : > { %2846 = vmatpush.msrb.mxu0 %v7833_v59 }
0x1dab   : > { %2847 = vmatpush.msrb.mxu0 %v7839_v60 }
0x1dad   : > { %2848 = vmatpush.msrb.mxu0 %v7845_v46 }
0x1daf   : > { %2849 = vmatpush.msrb.mxu0 %v7850_v61 }
0x1db1   : > { %2850 = vmatpush.msrb.mxu0 %v7856_v62 }
0x1db3   : > { %2851 = vmatpush.msrb.mxu0 %v7862_v0 }
0x1e19   : > { %v2465_v48 = vpop.f32.mrf.mxu0 }
0x1e21   : > { %v2624_v49 = vpop.f32.mrf.mxu0 }
0x1e22   : > { %v2627_v51 = vsel %vm315_vm5, %v2624_v49, -inf }
0x1e23   : > { %2628 = vmax.xlane.f32.xlu1 %v2627_v51 }
0x1e3c   : > { %6298 = vrot.lane.b32.xlu1 %v7918_v18, %s7036_s28 }
0x1e44   : > { %6303 = vrot.lane.b32.xlu1 %v7927_v28, %s7036_s28 }
0x1e4c   : > { %6313 = vrot.lane.b32.xlu1 %v7931_v29, %s7036_s28 }
0x1e54   : > { %6323 = vrot.lane.b32.xlu1 %v7927_v28, %s7040_s11 }
0x1e5c   : > { %6328 = vrot.lane.b32.xlu1 %v7918_v18, %s7041_s13 }
0x1e64   : > { %6338 = vrot.lane.b32.xlu1 %v7927_v28, %s7041_s13 }
0x1e6c   : > { %6353 = vrot.lane.b32.xlu1 %v7931_v29, %s7041_s13 }
0x1e96   : > { %v2629_v52 = vpop.xlane.xlu1 %2628 }
0x1e97   : > { %v2630_v54 = vsub.f32 %v2624_v49, %v2629_v52 }
0x1e99   : > { %v2631_v55 = vmul.f32 1.442695, %v2630_v54 }
0x1e9b   : > { %6959 = vpow2.f32 %v2631_v55 }
0x1ea1   : > { %v6960_v14 = vpop.eup %6959 }
0x1ea2   : > { %v2633_v56 = vsel %vm315_vm5, %v6960_v14, 0.0 }
0x1ea3   : > { %2634 = vadd.xlane.f32.xlu2 %v2633_v56 }
0x1eae   : > { %v6299_v34 = vpop.permute.xlu1 %6298 }
0x1eaf   : > { %v6301_v36 = vunpack.i.h.bf16 %v6299_v34  ;;  %v6300_v37 = vunpack.i.l.bf16 %v6299_v34 }
0x1eb1   : > { %2824 = vmatpush.msrb.mxu3 %v6300_v37 }
0x1eb3   : > { %2825 = vmatpush.msrb.mxu3 %v6301_v36 }
0x1eb6   : > { %v6304_v40 = vpop.permute.xlu1 %6303 }
0x1eb7   : > { %v6306_v41 = vunpack.i.h.bf16 %v6304_v40  ;;  %v6305_v42 = vunpack.i.l.bf16 %v6304_v40 }
0x1eb9   : > { %2826 = vmatpush.msrb.mxu3 %v6305_v42 }
0x1ebb   : > { %2666 = vrot.lane.b32.xlu2 %v2465_v48, %s7048_s10  ;;  %2827 = vmatpush.msrb.mxu3 %v6306_v41 }
0x1ebe   : > { %v6314_v43 = vpop.permute.xlu1 %6313 }
0x1ebf   : > { %v6315_v32 = vunpack.i.l.bf16 %v6314_v43  ;;  %v6316_v7 = vunpack.i.h.bf16 %v6314_v43  ;;  %v2739_v43 = vld [vmem:[%s9073_s2 + $0x770] ss:$0 sm:$0xff] }
0x1ec6   : > { %v7956_v23 = vpop.permute.xlu1 %6323 }
0x1ece   : > { %v6329_v51 = vpop.permute.xlu1 %6328 }
0x1ecf   : > { %v6331_v52 = vunpack.i.h.bf16 %v6329_v51  ;;  %v6330_v54 = vunpack.i.l.bf16 %v6329_v51 }
0x1ed6   : > { %v6339_v56 = vpop.permute.xlu1 %6338 }
0x1ed7   : > { %v6341_v27 = vunpack.i.h.bf16 %v6339_v56  ;;  %v6340_v58 = vunpack.i.l.bf16 %v6339_v56 }
0x1ede   : > { %v6354_v9 = vpop.permute.xlu1 %6353 }
0x1edf   : > { %v6355_v13 = vunpack.i.l.bf16 %v6354_v9 }
0x1f16   : > { %v2635_v2 = vpop.xlane.xlu2 %2634 }
0x1f17   : > { %6961 = vrcp.f32 %v2635_v2 }
0x1f18   : > { %6963 = vrcp.f32 %v7049_v44 }
0x1f1d   : > { %v6962_v3 = vpop.eup %6961 }
0x1f1e   : > { %v2637_v50 = vmul.f32 %v6962_v3, %v6960_v14  ;;  %v2667_v21 = vpop.permute.xlu2 %2666  ;;  %v6964_v45 = vpop.eup %6963 }
0x1f1f   : > { %v2674_v24 = vsel %vm184_vm0, %v2673_v22, %v2667_v21  ;;  %v2714_v47 = vmul.f32 64.0, %v6964_v45  ;;  %vm2718_vm12 = vweird.f32 %v6964_v45 }
0x1f20   : > { %5764 = vmatmul.msk.f32.vlgmr.msra.gmra.mxu0 %vm315_vm5, %v2637_v50 }
0x1f21   : > { %v2715_v48 = vsub.f32 1.0, %v2714_v47  ;;  %2993 = vmatpush.msra.mxu0 %v6330_v54  ;;  %v7997_v54 = vpack.i.bf16 %v7839_v60, %v7833_v59  ;;  %v8016_v59 = vpack.i.bf16 %v7862_v0, %v7856_v62 }
0x1f23   : > { %v2716_v49 = vmul.f32 %v6964_v45, %v2715_v48  ;;  %2994 = vmatpush.msra.mxu0 %v6331_v52  ;;  %v7989_v52 = vpack.i.bf16 %v7827_v57, %v7821_v35 }
0x1f25   : > { %v2717_v55 = vadd.f32 %v6964_v45, %v2716_v49  ;;  %2995 = vmatpush.msra.mxu0 %v6340_v58  ;;  %6358 = vrot.lane.b32.xlu1 %v7989_v52, %s7040_s11 }
0x1f27   : > { %v7958_v14 = vsel %vm2718_vm12, %v6964_v45, %v2717_v55  ;;  %2996 = vmatpush.msra.mxu0 %v6341_v27  ;;  %v8004_v55 = vld [vmem:[%s9073_s2 + $0x6d0] sm:$0xf] }
0x1f28   : > { %5768 = vmatmul.msk.f32.vlgmr.msrb.gmra.mxu0 %vm1918_vm7, %v7706_v8  ;;  %v2760_v35 = vperm.slane %v8004_v55, 0 }
0x1f2d   : > { %6363 = vrot.lane.b32.xlu1 %v7918_v18, %s7034_s22 }
0x1f35   : > { %6368 = vrot.lane.b32.xlu1 %v7997_v54, %s7040_s11 }
0x1f3d   : > { %6373 = vrot.lane.b32.xlu1 %v7927_v28, %s7034_s22 }
0x1f45   : > { %6378 = vrot.lane.b32.xlu1 %v7918_v18, %s7048_s10 }
0x1f4d   : > { %6393 = vrot.lane.b32.xlu1 %v7927_v28, %s7048_s10 }
0x1f55   : > { %6398 = vrot.lane.b32.xlu1 %v8016_v59, %s7040_s11 }
0x1f5d   : > { %6403 = vrot.lane.b32.xlu1 %v7931_v29, %s7034_s22 }
0x1f97   : > { %v6359_v60 = vpop.permute.xlu1 %6358 }
0x1f98   : > { %v6361_v27 = vunpack.i.h.bf16 %v6359_v60  ;;  %v6360_v58 = vunpack.i.l.bf16 %v6359_v60 }
0x1f9d   : > { %v2658_v15 = vpop.f32.mrf.mxu0 }
0x1f9e   : > { %2670 = vrot.lane.b32.xlu0 %v2658_v15, %s7041_s13  ;;  %v6356_v15 = vunpack.i.h.bf16 %v6354_v9 }
0x1fa5   : > { %v2853_v16 = vpop.f32.mrf.mxu0 }
0x1fa6   : > { %2911 = vmatpush.msra.mxu2 %v2853_v16 }
0x2010   : > { %v2671_v26 = vpop.permute.xlu0 %2670 }
0x2011   : > { %v2676_v5 = vsel %vm2675_vm11, %v2674_v24, %v2671_v26 }
0x2012   : > { %5765 = vmatmul.msk.f32.vlgmr.msrb.gmra.mxu1 %vm1918_vm7, %v2676_v5  ;;  %v6325_v5 = vunpack.i.l.bf16 %v7956_v23 }
0x208f   : > { %v2706_v30 = vpop.f32.mrf.mxu1 }
0x2090   : > { %v2707_v10 = vadd.f32 %v2706_v30, %v2685_v53  ;;  %v6326_v30 = vunpack.i.h.bf16 %v7956_v23  ;;  %v2741_v23 = vld [vmem:[%s9073_s2 + $0x780] ss:$0 sm:$0xff] }
0x2092   : > { %v2709_v31 = vadd.f32 %v2707_v10, %v7706_v8 }
0x2094   : > { %v2710_v33 = vsel %vm1918_vm7, %v2709_v31, 0.0 }
0x2095   : > { %2711 = vadd.xlane.f32.xlu0 %v2710_v33 }
0x20a9   : > { %6308 = vrot.lane.b32.xlu0 %v7948_v39, %s7036_s28 }
0x20b1   : > { %6333 = vrot.lane.b32.xlu0 %v7948_v39, %s7040_s11 }
0x20b9   : > { %6348 = vrot.lane.b32.xlu0 %v7948_v39, %s7041_s13 }
0x2108   : > { %v2712_v1 = vpop.xlane.xlu0 %2711 }
0x2109   : > { %v2720_v2 = vmul.f32 %v7958_v14, %v2712_v1 }
0x210b   : > { %v2721_v3 = vsub.f32 %v2709_v31, %v2720_v2 }
0x210d   : > { %v2722_v50 = vmul.f32 %v2721_v3, %v2721_v3 }
0x210f   : > { %v2723_v19 = vsel %vm1918_vm7, %v2722_v50, 0.0 }
0x2110   : > { %2724 = vadd.xlane.f32.xlu2 %v2723_v19 }
0x211b   : > { %v6309_v25 = vpop.permute.xlu0 %6308 }
0x211c   : > { %v6311_v4 = vunpack.i.h.bf16 %v6309_v25  ;;  %v6310_v63 = vunpack.i.l.bf16 %v6309_v25 }
0x211e   : > { %2828 = vmatpush.msrb.mxu3 %v6310_v63 }
0x2120   : > { %2829 = vmatpush.msrb.mxu3 %v6311_v4 }
0x2122   : > { %2830 = vmatpush.msrb.mxu3 %v6315_v32 }
0x2123   : > { %v6334_v38 = vpop.permute.xlu0 %6333 }
0x2124   : > { %2831 = vmatpush.msrb.mxu3 %v6316_v7  ;;  %v6335_v31 = vunpack.i.l.bf16 %v6334_v38  ;;  %v6336_v36 = vunpack.i.h.bf16 %v6334_v38  ;;  %v8023_v7 = vpack.i.bf16 %v7850_v61, %v7845_v46 }
0x2125   : > { %5767 = vmatmul.msk.f32.vlgmr.msrb.gmra.mxu3 %vm1918_vm7, %v7706_v8 }
0x2128   : > { %6318 = vrot.lane.b32.xlu2 %v7918_v18, %s7040_s11 }
0x212b   : > { %v6349_v6 = vpop.permute.xlu0 %6348 }
0x212c   : > { %v6351_v11 = vunpack.i.h.bf16 %v6349_v6  ;;  %v6350_v12 = vunpack.i.l.bf16 %v6349_v6 }
0x212e   : > { %2997 = vmatpush.msra.mxu0 %v6350_v12 }
0x2130   : > { %2998 = vmatpush.msra.mxu0 %v6351_v11  ;;  %6343 = vrot.lane.b32.xlu2 %v7931_v29, %s7040_s11 }
0x2132   : > { %2999 = vmatpush.msra.mxu0 %v6355_v13 }
0x2134   : > { %3000 = vmatpush.msra.mxu0 %v6356_v15 }
0x2135   : > { %5773 = vmatmul.msk.f32.vlgmr.msra.gmra.mxu0 %vm1918_vm7, %v7706_v8 }
0x2183   : > { %v2725_v16 = vpop.xlane.xlu2 %2724 }
0x2184   : > { %v2726_v17 = vmul.f32 %v2725_v16, %v7958_v14 }
0x2186   : > { %v2727_v20 = vadd.f32 1e-06, %v2726_v17 }
0x2188   : > { %6965 = vrsqrt.f32 %v2727_v20  ;;  %vm2734_vm14 = vweird.f32 %v2727_v20 }
0x218b   : > { %v6319_v21 = vpop.permute.xlu2 %6318 }
0x218c   : > { %v6321_v22 = vunpack.i.h.bf16 %v6319_v21  ;;  %v6320_v24 = vunpack.i.l.bf16 %v6319_v21 }
0x218e   : > { %v6966_v26 = vpop.eup %6965  ;;  %2949 = vmatpush.msra.mxu3 %v6320_v24 }
0x218f   : > { %v2729_v53 = vmul.f32 %v6966_v26, %v2727_v20  ;;  %vm2735_vm13 = vweird.f32 %v6966_v26 }
0x2190   : > { %2950 = vmatpush.msra.mxu3 %v6321_v22  ;;  %vm2736_vm15 = vmor %vm2734_vm14, %vm2735_vm13 }
0x2191   : > { %v2730_v10 = vmul.f32 %v6966_v26, %v2729_v53 }
0x2192   : > { %2951 = vmatpush.msra.mxu3 %v6325_v5 }
0x2193   : > { %v2731_v33 = vmul.f32 0.5, %v2730_v10  ;;  %v6344_v34 = vpop.permute.xlu2 %6343 }
0x2194   : > { %2952 = vmatpush.msra.mxu3 %v6326_v30  ;;  %v6345_v40 = vunpack.i.l.bf16 %v6344_v34  ;;  %v6346_v42 = vunpack.i.h.bf16 %v6344_v34 }
0x2195   : > { %v2732_v37 = vsub.f32 1.5, %v2731_v33 }
0x2196   : > { %2953 = vmatpush.msra.mxu3 %v6335_v31 }
0x2197   : > { %v2733_v41 = vmul.f32 %v6966_v26, %v2732_v37 }
0x2198   : > { %2954 = vmatpush.msra.mxu3 %v6336_v36 }
0x2199   : > { %v2737_v44 = vsel %vm2736_vm15, %v6966_v26, %v2733_v41 }
0x219a   : > { %v2738_v45 = vmul.f32 %v2737_v44, %v2721_v3  ;;  %2955 = vmatpush.msra.mxu3 %v6345_v40  ;;  %v6364_v3 = vpop.permute.xlu1 %6363  ;;  %v2916_v44 = vperm.slane %v8004_v55, 1 }
0x219b   : > { %v6366_v50 = vunpack.i.h.bf16 %v6364_v3  ;;  %v6365_v19 = vunpack.i.l.bf16 %v6364_v3 }
0x219c   : > { %v2740_v47 = vmul.f32 %v2739_v43, %v2738_v45  ;;  %2956 = vmatpush.msra.mxu3 %v6346_v42 }
0x219e   : > { %v7979_v48 = vadd.f32 %v2741_v23, %v2740_v47  ;;  %3150 = vmatpush.msrb.mxu3 %v6365_v19 }
0x21a0   : > { %5766 = vmatmul.msk.f32.vlgmr.msrb.gmra.mxu2 %vm1918_vm7, %v7979_v48  ;;  %5772 = vmatmul.msk.f32.vlgmr.msra.gmra.mxu3 %vm1918_vm7, %v7979_v48 }
0x21a1   : > { %3151 = vmatpush.msrb.mxu3 %v6366_v50 }
0x21a2   : > { %v6369_v25 = vpop.permute.xlu1 %6368 }
0x21a3   : > { %v6371_v62 = vunpack.i.h.bf16 %v6369_v25  ;;  %v6370_v0 = vunpack.i.l.bf16 %v6369_v25 }
0x21a8   : > { %v2833_v49 = vpop.f32.mrf.mxu3 }
0x21a9   : > { %5769 = vmatpush.xpose.msk.msra.mxu1 %vm860_vm6, %v2833_v49 }
0x21aa   : > { %v6374_v4 = vpop.permute.xlu1 %6373 }
0x21ab   : > { %v6376_v63 = vunpack.i.h.bf16 %v6374_v4  ;;  %v6375_v32 = vunpack.i.l.bf16 %v6374_v4 }
0x21ad   : > { %3045 = vmatpush.msrb.mxu1 %v6360_v58  ;;  %3152 = vmatpush.msrb.mxu3 %v6375_v32 }
0x21af   : > { %3046 = vmatpush.msrb.mxu1 %v6361_v27  ;;  %3153 = vmatpush.msrb.mxu3 %v6376_v63 }
0x21b1   : > { %3047 = vmatpush.msrb.mxu1 %v6370_v0 }
0x21b2   : > { %v3002_v51 = vpop.f32.mrf.mxu0  ;;  %v6379_v38 = vpop.permute.xlu1 %6378 }
0x21b3   : > { %5775 = vmatpush.xpose.msk.msrb.mxu2 %vm860_vm6, %v3002_v51  ;;  %3048 = vmatpush.msrb.mxu1 %v6371_v62  ;;  %v6381_v6 = vunpack.i.h.bf16 %v6379_v38  ;;  %v6380_v9 = vunpack.i.l.bf16 %v6379_v38 }
0x21b5   : > { %3194 = vmatpush.msrb.mxu0 %v6380_v9 }
0x21b7   : > { %3195 = vmatpush.msrb.mxu0 %v6381_v6 }
0x21ba   : > { %v6394_v11 = vpop.permute.xlu1 %6393 }
0x21bb   : > { %v6396_v12 = vunpack.i.h.bf16 %v6394_v11  ;;  %v6395_v13 = vunpack.i.l.bf16 %v6394_v11 }
0x21bd   : > { %3196 = vmatpush.msrb.mxu0 %v6395_v13 }
0x21bf   : > { %3197 = vmatpush.msrb.mxu0 %v6396_v12 }
0x21c2   : > { %v6399_v17 = vpop.permute.xlu1 %6398 }
0x21c3   : > { %v6400_v24 = vunpack.i.l.bf16 %v6399_v17  ;;  %v6401_v5 = vunpack.i.h.bf16 %v6399_v17 }
0x2223   : > { %v2781_v57 = vpop.f32.mrf.mxu2  ;;  %v2958_v45 = vpop.f32.mrf.mxu3 }
0x2224   : > { %v2782_v56 = vadd.f32 %v2781_v57, %v2760_v35  ;;  %v2959_v49 = vadd.f32 %v2958_v45, %v2916_v44  ;;  %v6404_v35 = vpop.permute.xlu1 %6403 }
0x2225   : > { %v6405_v60 = vunpack.i.l.bf16 %v6404_v35  ;;  %v6406_v27 = vunpack.i.h.bf16 %v6404_v35 }
0x2226   : > { %5770 = vmatmul.msk.f32.vlgmr.msra.gmra.mxu1 %vm860_vm6, %v2782_v56 }
0x22a3   : > { %v2879_v1 = vpop.f32.mrf.mxu1 }
0x22a4   : > { %v2882_v2 = vsel %vm315_vm5, %v2879_v1, -inf }
0x22a5   : > { %2883 = vmax.xlane.f32.xlu2 %v2882_v2 }
0x22bd   : > { %6383 = vrot.lane.b32.xlu2 %v8023_v7, %s7040_s11 }
0x22c5   : > { %6413 = vrot.lane.b32.xlu2 %v7931_v29, %s7048_s10 }
0x22cd   : > { %6418 = vrot.lane.b32.xlu2 %v7989_v52, %s7034_s22 }
0x22d5   : > { %6423 = vrot.lane.b32.xlu2 %v7918_v18, %s7039_s4 }
0x22dd   : > { %6428 = vrot.lane.b32.xlu2 %v7997_v54, %s7034_s22 }
0x22e5   : > { %6433 = vrot.lane.b32.xlu2 %v7927_v28, %s7039_s4 }
0x22ed   : > { %6438 = vrot.lane.b32.xlu2 %v7918_v18, %s7046_s19 }
0x22f5   : > { %6448 = vrot.lane.b32.xlu2 %v7948_v39, %s7039_s4 }
0x22fd   : > { %6458 = vrot.lane.b32.xlu2 %v8016_v59, %s7034_s22 }
0x2305   : > { %6463 = vrot.lane.b32.xlu2 %v7931_v29, %s7039_s4 }
0x230d   : > { %6473 = vrot.lane.b32.xlu2 %v7931_v29, %s7046_s19 }
0x2315   : > { %6478 = vrot.lane.b32.xlu2 %v7989_v52, %s7039_s4 }
0x2318   : > { %v2884_v46 = vpop.xlane.xlu2 %2883 }
0x2319   : > { %v2885_v61 = vsub.f32 %v2879_v1, %v2884_v46 }
0x231b   : > { %v2886_v15 = vmul.f32 1.442695, %v2885_v61 }
0x231d   : > { %6967 = vpow2.f32 %v2886_v15  ;;  %6483 = vrot.lane.b32.xlu2 %v7997_v54, %s7039_s4 }
0x2320   : > { %v6384_v16 = vpop.permute.xlu2 %6383 }
0x2321   : > { %v6386_v20 = vunpack.i.h.bf16 %v6384_v16  ;;  %v6385_v21 = vunpack.i.l.bf16 %v6384_v16 }
0x2323   : > { %v6968_v22 = vpop.eup %6967  ;;  %3049 = vmatpush.msrb.mxu1 %v6385_v21 }
0x2324   : > { %v2888_v26 = vsel %vm315_vm5, %v6968_v22, 0.0 }
0x2325   : > { %2889 = vadd.xlane.f32.xlu0 %v2888_v26  ;;  %3050 = vmatpush.msrb.mxu1 %v6386_v20 }
0x2326   : > { %6488 = vrot.lane.b32.xlu2 %v8023_v7, %s7039_s4 }
0x2327   : > { %3051 = vmatpush.msrb.mxu1 %v6400_v24 }
0x2328   : > { %v6414_v53 = vpop.permute.xlu2 %6413 }
0x2329   : > { %3052 = vmatpush.msrb.mxu1 %v6401_v5  ;;  %v6415_v25 = vunpack.i.l.bf16 %v6414_v53  ;;  %v6416_v0 = vunpack.i.h.bf16 %v6414_v53 }
0x232a   : > { %5774 = vmatmul.msk.f32.vlgmr.msrb.gmra.mxu1 %vm1918_vm7, %v7706_v8 }
0x232e   : > { %6493 = vrot.lane.b32.xlu2 %v8016_v59, %s7039_s4 }
0x2330   : > { %v6419_v30 = vpop.permute.xlu2 %6418 }
0x2331   : > { %v6421_v10 = vunpack.i.h.bf16 %v6419_v30  ;;  %v6420_v31 = vunpack.i.l.bf16 %v6419_v30 }
0x2333   : > { %3238 = vmatpush.msra.mxu1 %v6420_v31 }
0x2335   : > { %3239 = vmatpush.msra.mxu1 %v6421_v10 }
0x2338   : > { %v6424_v18 = vpop.permute.xlu2 %6423 }
0x2339   : > { %6388 = vrot.lane.b32.xlu0 %v7948_v39, %s7034_s22  ;;  %v6425_v1 = vunpack.i.l.bf16 %v6424_v18  ;;  %v6426_v3 = vunpack.i.h.bf16 %v6424_v18 }
0x2340   : > { %v6429_v33 = vpop.permute.xlu2 %6428 }
0x2341   : > { %6408 = vrot.lane.b32.xlu0 %v7948_v39, %s7048_s10  ;;  %v6431_v34 = vunpack.i.h.bf16 %v6429_v33  ;;  %v6430_v36 = vunpack.i.l.bf16 %v6429_v33 }
0x2343   : > { %3240 = vmatpush.msra.mxu1 %v6430_v36 }
0x2345   : > { %3241 = vmatpush.msra.mxu1 %v6431_v34 }
0x2348   : > { %v6434_v37 = vpop.permute.xlu2 %6433 }
0x2349   : > { %v6435_v62 = vunpack.i.l.bf16 %v6434_v37  ;;  %v6436_v4 = vunpack.i.h.bf16 %v6434_v37 }
0x2350   : > { %v6439_v41 = vpop.permute.xlu2 %6438 }
0x2351   : > { %v6440_v63 = vunpack.i.l.bf16 %v6439_v41  ;;  %v6441_v6 = vunpack.i.h.bf16 %v6439_v41 }
0x2358   : > { %v6449_v47 = vpop.permute.xlu2 %6448 }
0x2359   : > { %v6450_v32 = vunpack.i.l.bf16 %v6449_v47  ;;  %v6451_v9 = vunpack.i.h.bf16 %v6449_v47 }
0x2360   : > { %v8057_v58 = vpop.permute.xlu2 %6458 }
0x2361   : > { %v6461_v59 = vunpack.i.h.bf16 %v8057_v58 }
0x2368   : > { %v6464_v38 = vpop.permute.xlu2 %6463 }
0x2369   : > { %v6465_v11 = vunpack.i.l.bf16 %v6464_v38  ;;  %v6466_v12 = vunpack.i.h.bf16 %v6464_v38  ;;  %v3310_v38 = vperm.slane %v8004_v55, 3 }
0x2370   : > { %v8081_v16 = vpop.permute.xlu2 %6473 }
0x2378   : > { %v6479_v20 = vpop.permute.xlu2 %6478 }
0x2379   : > { %v6480_v30 = vunpack.i.l.bf16 %v6479_v20  ;;  %v6481_v10 = vunpack.i.h.bf16 %v6479_v20 }
0x2380   : > { %v6484_v54 = vpop.permute.xlu2 %6483 }
0x2381   : > { %v6485_v31 = vunpack.i.l.bf16 %v6484_v54  ;;  %v6486_v18 = vunpack.i.h.bf16 %v6484_v54  ;;  %v3523_v54 = vld [vmem:[%s9073_s2 + $0x730] sm:$0xff] }
0x2388   : > { %v6489_v53 = vpop.permute.xlu2 %6488 }
0x2389   : > { %v6490_v33 = vunpack.i.l.bf16 %v6489_v53  ;;  %v6491_v36 = vunpack.i.h.bf16 %v6489_v53  ;;  %v3518_v53 = vld [vmem:[%s9073_s2 + $0x6e0] sm:$0xff] }
0x2390   : > { %v6494_v34 = vpop.permute.xlu2 %6493 }
0x2391   : > { %v6495_v37 = vunpack.i.l.bf16 %v6494_v34 }
0x2398   : > { %v2890_v40 = vpop.xlane.xlu0 %2889 }
0x2399   : > { %6969 = vrcp.f32 %v2890_v40  ;;  %v6496_v40 = vunpack.i.h.bf16 %v6494_v34 }
0x239f   : > { %v6970_v42 = vpop.eup %6969 }
0x23a0   : > { %v2892_v43 = vmul.f32 %v6970_v42, %v6968_v22 }
0x23a2   : > { %5771 = vmatmul.msk.f32.vlgmr.msra.gmra.mxu2 %vm315_vm5, %v2892_v43  ;;  %v3117_v43 = vperm.slane %v8004_v55, 2 }
0x23a7   : > { %v3054_v23 = vpop.f32.mrf.mxu1 }
0x23a8   : > { %3112 = vmatpush.msra.mxu2 %v3054_v23 }
0x23aa   : > { %5776 = vmatmul.msk.f32.vlgmr.msrb.gmra.mxu2 %vm860_vm6, %v2959_v49 }
0x23ab   : > { %v6389_v51 = vpop.permute.xlu0 %6388 }
0x23ac   : > { %v6391_v57 = vunpack.i.h.bf16 %v6389_v51  ;;  %v6390_v56 = vunpack.i.l.bf16 %v6389_v51 }
0x23ae   : > { %3154 = vmatpush.msrb.mxu3 %v6390_v56 }
0x23b0   : > { %3155 = vmatpush.msrb.mxu3 %v6391_v57  ;;  %v6475_v57 = vunpack.i.l.bf16 %v8081_v16 }
0x23b2   : > { %3156 = vmatpush.msrb.mxu3 %v6405_v60  ;;  %v6476_v60 = vunpack.i.h.bf16 %v8081_v16 }
0x23b3   : > { %v6409_v2 = vpop.permute.xlu0 %6408 }
0x23b4   : > { %v6411_v50 = vunpack.i.h.bf16 %v6409_v2  ;;  %v6410_v19 = vunpack.i.l.bf16 %v6409_v2  ;;  %3157 = vmatpush.msrb.mxu3 %v6406_v27 }
0x23b5   : > { %5778 = vmatmul.msk.f32.vlgmr.msrb.gmra.mxu3 %vm1918_vm7, %v7979_v48 }
0x23b6   : > { %3343 = vmatpush.msra.mxu3 %v6425_v1  ;;  %3198 = vmatpush.msrb.mxu0 %v6410_v19 }
0x23b8   : > { %3344 = vmatpush.msra.mxu3 %v6426_v3  ;;  %3199 = vmatpush.msrb.mxu0 %v6411_v50 }
0x23ba   : > { %3345 = vmatpush.msra.mxu3 %v6435_v62  ;;  %3200 = vmatpush.msrb.mxu0 %v6415_v25 }
0x23bc   : > { %3346 = vmatpush.msra.mxu3 %v6436_v4  ;;  %3201 = vmatpush.msrb.mxu0 %v6416_v0 }
0x23bd   : > { %5779 = vmatmul.msk.f32.vlgmr.msrb.gmra.mxu0 %vm1918_vm7, %v7706_v8 }
0x23be   : > { %3347 = vmatpush.msra.mxu3 %v6450_v32  ;;  %3387 = vmatpush.msra.mxu0 %v6440_v63 }
0x23c0   : > { %3348 = vmatpush.msra.mxu3 %v6451_v9  ;;  %3388 = vmatpush.msra.mxu0 %v6441_v6 }
0x23c2   : > { %3349 = vmatpush.msra.mxu3 %v6465_v11 }
0x23c4   : > { %3350 = vmatpush.msra.mxu3 %v6466_v12 }
0x23c5   : > { %5784 = vmatmul.msk.f32.vlgmr.msra.gmra.mxu3 %vm1918_vm7, %v7979_v48 }
0x2425   : > { %v8065_v13 = vpop.f32.mrf.mxu2 }
0x242d   : > { %v3080_v46 = vpop.f32.mrf.mxu2 }
0x242e   : > { %v3083_v61 = vsel %vm315_vm5, %v3080_v46, -inf }
0x242f   : > { %3084 = vmax.xlane.f32.xlu1 %v3083_v61 }
0x2438   : > { %v3159_v44 = vpop.f32.mrf.mxu3 }
0x2439   : > { %v3160_v45 = vadd.f32 %v3159_v44, %v3117_v43 }
0x243a   : > { %v3203_v15 = vpop.f32.mrf.mxu0 }
0x243b   : > { %5781 = vmatpush.xpose.msk.msrb.mxu2 %vm860_vm6, %v3203_v15 }
0x2448   : > { %6443 = vrot.lane.b32.xlu1 %v8023_v7, %s7034_s22  ;;  %v6460_v7 = vunpack.i.l.bf16 %v8057_v58  ;;  %v3352_v6 = vpop.f32.mrf.mxu3 }
0x2449   : > { %v3353_v9 = vadd.f32 %v3352_v6, %v3310_v38  ;;  %v3657_v6 = vld [vmem:[%s9073_s2 + $0x900] sm:$0xff] }
0x24a2   : > { %v3085_v29 = vpop.xlane.xlu1 %3084 }
0x24a3   : > { %v3086_v17 = vsub.f32 %v3080_v46, %v3085_v29 }
0x24a5   : > { %v3087_v52 = vmul.f32 1.442695, %v3086_v17 }
0x24a7   : > { %6971 = vpow2.f32 %v3087_v52 }
0x24ad   : > { %v6972_v21 = vpop.eup %6971 }
0x24ae   : > { %v3089_v22 = vsel %vm315_vm5, %v6972_v21, 0.0 }
0x24af   : > { %3090 = vadd.xlane.f32.xlu0 %v3089_v22  ;;  %v3524_v22 = vld [vmem:[%s9073_s2 + $0x740] sm:$0xff] }
0x24ba   : > { %v6444_v24 = vpop.permute.xlu1 %6443 }
0x24bb   : > { %v6446_v26 = vunpack.i.h.bf16 %v6444_v24  ;;  %v6445_v5 = vunpack.i.l.bf16 %v6444_v24  ;;  %v3522_v24 = vld [vmem:[%s9073_s2 + $0x720] sm:$0xff] }
0x24bd   : > { %3242 = vmatpush.msra.mxu1 %v6445_v5  ;;  %v3520_v5 = vld [vmem:[%s9073_s2 + $0x700] sm:$0xff] }
0x24bf   : > { %3243 = vmatpush.msra.mxu1 %v6446_v26  ;;  %v3521_v26 = vld [vmem:[%s9073_s2 + $0x710] sm:$0xff] }
0x24c1   : > { %3244 = vmatpush.msra.mxu1 %v6460_v7  ;;  %v3519_v7 = vld [vmem:[%s9073_s2 + $0x6f0] sm:$0xff] }
0x24c3   : > { %6453 = vrot.lane.b32.xlu0 %v7927_v28, %s7046_s19  ;;  %3245 = vmatpush.msra.mxu1 %v6461_v59 }
0x24c4   : > { %5780 = vmatmul.msk.f32.vlgmr.msra.gmra.mxu1 %vm1918_vm7, %v7706_v8 }
0x24c5   : > { %3431 = vmatpush.msrb.mxu1 %v6480_v30 }
0x24c7   : > { %3432 = vmatpush.msrb.mxu1 %v6481_v10 }
0x24c9   : > { %3433 = vmatpush.msrb.mxu1 %v6485_v31 }
0x24cb   : > { %3434 = vmatpush.msrb.mxu1 %v6486_v18  ;;  %6468 = vrot.lane.b32.xlu0 %v7948_v39, %s7046_s19 }
0x24cd   : > { %3435 = vmatpush.msrb.mxu1 %v6490_v33 }
0x24cf   : > { %3436 = vmatpush.msrb.mxu1 %v6491_v36  ;;  %v3526_v36 = vld [vmem:[%s9073_s2 + $0x760] ss:$0 sm:$0xff] }
0x24d1   : > { %3437 = vmatpush.msrb.mxu1 %v6495_v37 }
0x24d3   : > { %3438 = vmatpush.msrb.mxu1 %v6496_v40 }
0x24d4   : > { %5786 = vmatmul.msk.f32.vlgmr.msrb.gmra.mxu1 %vm1918_vm7, %v7706_v8 }
0x2522   : > { %v3091_v28 = vpop.xlane.xlu0 %3090 }
0x2523   : > { %6973 = vrcp.f32 %v3091_v28 }
0x2529   : > { %v6974_v41 = vpop.eup %6973 }
0x252a   : > { %v3093_v42 = vmul.f32 %v6974_v41, %v6972_v21  ;;  %v3525_v21 = vld [vmem:[%s9073_s2 + $0x750] sm:$0xff] }
0x252b   : > { %3538 = vmatpush.msrb.mxu3 %v3525_v21  ;;  %v3668_v21 = vld [vmem:[%s9073_s2 + $0x9b0] sm:$0xff] }
0x252c   : > { %5777 = vmatmul.msk.f32.vlgmr.msra.gmra.mxu2 %vm315_vm5, %v3093_v42 }
0x252d   : > { %3539 = vmatpush.msrb.mxu3 %v3524_v22 }
0x252f   : > { %3540 = vmatpush.msrb.mxu3 %v3523_v54  ;;  %v3651_v54 = vld [vmem:[%s9073_s2 + $0x8a0] sm:$0xff] }
0x2531   : > { %3541 = vmatpush.msrb.mxu3 %v3522_v24  ;;  %v3667_v24 = vld [vmem:[%s9073_s2 + $0x9a0] sm:$0xff] }
0x2533   : > { %3542 = vmatpush.msrb.mxu3 %v3521_v26 }
0x2534   : > { %5782 = vmatmul.msk.f32.vlgmr.msrb.gmra.mxu2 %vm860_vm6, %v3160_v45 }
0x2535   : > { %v6454_v39 = vpop.permute.xlu0 %6453  ;;  %3543 = vmatpush.msrb.mxu3 %v3520_v5  ;;  %v3650_v5 = vld [vmem:[%s9073_s2 + $0x890] sm:$0xff] }
0x2536   : > { %v6456_v23 = vunpack.i.h.bf16 %v6454_v39  ;;  %v6455_v47 = vunpack.i.l.bf16 %v6454_v39  ;;  %v3591_v39 = vld [vmem:[%s9073_s2 + $0x820] sm:$0xff] }
0x2537   : > { %3544 = vmatpush.msrb.mxu3 %v3519_v7  ;;  %v3666_v7 = vld [vmem:[%s9073_s2 + $0x990] sm:$0xff] }
0x2538   : > { %3389 = vmatpush.msra.mxu0 %v6455_v47  ;;  %v3590_v47 = vld [vmem:[%s9073_s2 + $0x818] sm:$0xff] }
0x2539   : > { %3545 = vmatpush.msrb.mxu3 %v3518_v53  ;;  %v3649_v53 = vld [vmem:[%s9073_s2 + $0x880] sm:$0xff] }
0x253a   : > { %3390 = vmatpush.msra.mxu0 %v6456_v23  ;;  %v3589_v23 = vld [vmem:[%s9073_s2 + $0x810] sm:$0xff] }
0x253d   : > { %v6469_v49 = vpop.permute.xlu0 %6468 }
0x253e   : > { %v6471_v51 = vunpack.i.h.bf16 %v6469_v49  ;;  %v6470_v35 = vunpack.i.l.bf16 %v6469_v49  ;;  %v3587_v49 = vld [vmem:[%s9073_s2 + $0x800] sm:$0xff] }
0x2540   : > { %3391 = vmatpush.msra.mxu0 %v6470_v35  ;;  %v3585_v35 = vld [vmem:[%s9073_s2 + $0x7f0] sm:$0xff] }
0x2541   : > { %v3247_v56 = vpop.f32.mrf.mxu1 }
0x2542   : > { %3305 = vmatpush.msra.mxu2 %v3247_v56  ;;  %3392 = vmatpush.msra.mxu0 %v6471_v51  ;;  %v3588_v51 = vld [vmem:[%s9073_s2 + $0x808] sm:$0xff]  ;;  %v3583_v56 = vld [vmem:[%s9073_s2 + $0x7e0] sm:$0xff] }
0x2544   : > { %3393 = vmatpush.msra.mxu0 %v6475_v57  ;;  %v3586_v57 = vld [vmem:[%s9073_s2 + $0x7f8] sm:$0xff] }
0x2546   : > { %3394 = vmatpush.msra.mxu0 %v6476_v60  ;;  %v3584_v60 = vld [vmem:[%s9073_s2 + $0x7e8] sm:$0xff] }
0x2547   : > { %5785 = vmatmul.msk.f32.vlgmr.msra.gmra.mxu0 %vm1918_vm7, %v7706_v8 }
0x2548   : > { %3611 = vmatpush.msrb.mxu0 %v3591_v39  ;;  %v3661_v39 = vld [vmem:[%s9073_s2 + $0x940] sm:$0xff] }
0x254a   : > { %3612 = vmatpush.msrb.mxu0 %v3589_v23 }
0x254c   : > { %3613 = vmatpush.msrb.mxu0 %v3587_v49 }
0x254e   : > { %3614 = vmatpush.msrb.mxu0 %v3585_v35 }
0x2550   : > { %3615 = vmatpush.msrb.mxu0 %v3583_v56 }
0x2551   : > { %v3440_v32 = vpop.f32.mrf.mxu1 }
0x25af   : > { %v3114_v27 = vpop.f32.mrf.mxu2 }
0x25b7   : > { %v3273_v58 = vpop.f32.mrf.mxu2 }
0x25b8   : > { %v3276_v1 = vsel %vm315_vm5, %v3273_v58, -inf }
0x25b9   : > { %3277 = vmax.xlane.f32.xlu1 %v3276_v1  ;;  %v3579_v1 = vld [vmem:[%s9073_s2 + $0x7c0] sm:$0xff] }
0x25c4   : > { %v3396_v2 = vpop.f32.mrf.mxu0 }
0x25c5   : > { %5787 = vmatpush.xpose.msk.msrb.mxu2 %vm860_vm6, %v3396_v2  ;;  %v3580_v2 = vld [vmem:[%s9073_s2 + $0x7c8] sm:$0xff] }
0x262c   : > { %v3278_v3 = vpop.xlane.xlu1 %3277 }
0x262d   : > { %v3279_v50 = vsub.f32 %v3273_v58, %v3278_v3  ;;  %v3582_v58 = vld [vmem:[%s9073_s2 + $0x7d8] sm:$0xff]  ;;  %v3577_v3 = vld [vmem:[%s9073_s2 + $0x7b0] sm:$0xff] }
0x262f   : > { %v3280_v19 = vmul.f32 1.442695, %v3279_v50  ;;  %v3578_v50 = vld [vmem:[%s9073_s2 + $0x7b8] sm:$0xff] }
0x2631   : > { %6975 = vpow2.f32 %v3280_v19  ;;  %v3660_v19 = vld [vmem:[%s9073_s2 + $0x930] sm:$0xff] }
0x2637   : > { %v6976_v25 = vpop.eup %6975 }
0x2638   : > { %v3282_v62 = vsel %vm315_vm5, %v6976_v25, 0.0 }
0x2639   : > { %3283 = vadd.xlane.f32.xlu0 %v3282_v62  ;;  %v3659_v62 = vld [vmem:[%s9073_s2 + $0x920] sm:$0xff] }
0x264d   : > { %3504 = vrot.lane.b32.xlu0 %v3114_v27, %s7046_s19  ;;  %v3581_v27 = vld [vmem:[%s9073_s2 + $0x7d0] sm:$0xff] }
0x264e   : > { %3616 = vmatpush.msrb.mxu0 %v3581_v27  ;;  %v3759_v27 = vld [vmem:[%s9073_s2 + $0xae0] sm:$0xff] }
0x2650   : > { %3617 = vmatpush.msrb.mxu0 %v3579_v1  ;;  %v3677_v1 = vld [vmem:[%s9073_s2 + $0xa40] ss:$0 sm:$0xff] }
0x2652   : > { %3618 = vmatpush.msrb.mxu0 %v3577_v3 }
0x2654   : > { %3774 = vmatpush.msra.mxu0 %v3759_v27 }
0x26ac   : > { %v3284_v0 = vpop.xlane.xlu0 %3283 }
0x26ad   : > { %6977 = vrcp.f32 %v3284_v0  ;;  %v3675_v0 = vld [vmem:[%s9073_s2 + $0xa20] sm:$0xff] }
0x26b3   : > { %v6978_v4 = vpop.eup %6977 }
0x26b4   : > { %v3286_v63 = vmul.f32 %v6978_v4, %v6976_v25  ;;  %v3676_v25 = vld [vmem:[%s9073_s2 + $0xa30] sm:$0xff] }
0x26b5   : > { %3698 = vmatpush.msra.mxu3 %v3676_v25  ;;  %v3658_v4 = vld [vmem:[%s9073_s2 + $0x910] sm:$0xff] }
0x26b6   : > { %5783 = vmatmul.msk.f32.vlgmr.msra.gmra.mxu2 %vm315_vm5, %v3286_v63  ;;  %v3674_v63 = vld [vmem:[%s9073_s2 + $0xa10] sm:$0xff] }
0x26b7   : > { %3498 = vmatpush.msra.mxu2 %v3440_v32  ;;  %3699 = vmatpush.msra.mxu3 %v3675_v0 }
0x26b9   : > { %3700 = vmatpush.msra.mxu3 %v3674_v63  ;;  %v3755_v63 = vld [vmem:[%s9073_s2 + $0xac0] sm:$0xff] }
0x26be   : > { %5788 = vmatmul.msk.f32.vlgmr.msrb.gmra.mxu2 %vm860_vm6, %v3353_v9  ;;  %v3673_v9 = vld [vmem:[%s9073_s2 + $0xa00] sm:$0xff] }
0x26bf   : > { %v3505_v30 = vpop.permute.xlu0 %3504  ;;  %3678 = vmatpush.msrb.mxu2 %v3660_v19  ;;  %3701 = vmatpush.msra.mxu3 %v3673_v9 }
0x26c0   : > { %v3515_v31 = vsel %vm860_vm6, %v8065_v13, %v3505_v30  ;;  %v3665_v30 = vld [vmem:[%s9073_s2 + $0x980] sm:$0xff] }
0x26c1   : > { %3679 = vmatpush.msrb.mxu2 %v3659_v62 }
0x26c3   : > { %3680 = vmatpush.msrb.mxu2 %v3658_v4  ;;  %v3753_v4 = vld [vmem:[%s9073_s2 + $0xab0] sm:$0xff] }
0x26c5   : > { %3681 = vmatpush.msrb.mxu2 %v3657_v6  ;;  %v3751_v6 = vld [vmem:[%s9073_s2 + $0xaa0] sm:$0xff] }
0x2739   : > { %v3307_v11 = vpop.f32.mrf.mxu2 }
0x2741   : > { %v3466_v12 = vpop.f32.mrf.mxu2 }
0x2742   : > { %v3469_v46 = vsel %vm315_vm5, %v3466_v12, -inf }
0x2743   : > { %3470 = vmax.xlane.f32.xlu2 %v3469_v46  ;;  %v3672_v46 = vld [vmem:[%s9073_s2 + $0x9f0] sm:$0xff] }
0x2744   : > { %3702 = vmatpush.msra.mxu3 %v3672_v46 }
0x27b6   : > { %v3471_v61 = vpop.xlane.xlu2 %3470 }
0x27b7   : > { %v3472_v15 = vsub.f32 %v3466_v12, %v3471_v61  ;;  %v3656_v12 = vld [vmem:[%s9073_s2 + $0x8f0] sm:$0xff]  ;;  %v3655_v61 = vld [vmem:[%s9073_s2 + $0x8e0] sm:$0xff] }
0x27b8   : > { %3682 = vmatpush.msrb.mxu2 %v3656_v12  ;;  %v3745_v12 = vld [vmem:[%s9073_s2 + $0xa70] sm:$0xff] }
0x27b9   : > { %v3473_v29 = vmul.f32 1.442695, %v3472_v15  ;;  %v3671_v15 = vld [vmem:[%s9073_s2 + $0x9e0] sm:$0xff] }
0x27ba   : > { %3683 = vmatpush.msrb.mxu2 %v3655_v61  ;;  %3703 = vmatpush.msra.mxu3 %v3671_v15 }
0x27bb   : > { %6979 = vpow2.f32 %v3473_v29  ;;  %v3654_v29 = vld [vmem:[%s9073_s2 + $0x8d0] sm:$0xff] }
0x27bc   : > { %3684 = vmatpush.msrb.mxu2 %v3654_v29 }
0x27c1   : > { %v6980_v16 = vpop.eup %6979 }
0x27c2   : > { %v3475_v17 = vsel %vm315_vm5, %v6980_v16, 0.0 }
0x27c3   : > { %3476 = vadd.xlane.f32.xlu1 %v3475_v17  ;;  %v3653_v17 = vld [vmem:[%s9073_s2 + $0x8c0] sm:$0xff] }
0x27c4   : > { %3685 = vmatpush.msrb.mxu2 %v3653_v17 }
0x27dc   : > { %3508 = vrot.lane.b32.xlu1 %v3307_v11, %s7048_s10 }
0x2836   : > { %v3477_v55 = vpop.xlane.xlu1 %3476 }
0x2837   : > { %6981 = vrcp.f32 %v3477_v55  ;;  %v3669_v55 = vld [vmem:[%s9073_s2 + $0x9c0] sm:$0xff] }
0x283d   : > { %v6982_v52 = vpop.eup %6981 }
0x283e   : > { %v3479_v20 = vmul.f32 %v6982_v52, %v6980_v16  ;;  %v3670_v16 = vld [vmem:[%s9073_s2 + $0x9d0] sm:$0xff] }
0x283f   : > { %3704 = vmatpush.msra.mxu3 %v3670_v16 }
0x2840   : > { %5789 = vmatmul.msk.f32.vlgmr.msra.gmra.mxu2 %vm315_vm5, %v3479_v20  ;;  %v3652_v20 = vld [vmem:[%s9073_s2 + $0x8b0] sm:$0xff] }
0x2841   : > { %3705 = vmatpush.msra.mxu3 %v3669_v55  ;;  %3686 = vmatpush.msrb.mxu2 %v3652_v20 }
0x2843   : > { %3706 = vmatpush.msra.mxu3 %v3668_v21  ;;  %3687 = vmatpush.msrb.mxu2 %v3651_v54 }
0x2845   : > { %3707 = vmatpush.msra.mxu3 %v3667_v24  ;;  %3688 = vmatpush.msrb.mxu2 %v3650_v5 }
0x2847   : > { %3708 = vmatpush.msra.mxu3 %v3666_v7  ;;  %3689 = vmatpush.msrb.mxu2 %v3649_v53  ;;  %v3760_v7 = vld [vmem:[%s9073_s2 + $0xae8] sm:$0xff] }
0x2848   : > { %v8365_v53 = vld [vmem:[%s9073_s2 + $0xac8] sm:$0xff] }
0x2849   : > { %3709 = vmatpush.msra.mxu3 %v3665_v30  ;;  %v8371_v30 = vld [vmem:[%s9073_s2 + $0xab8] sm:$0xff] }
0x284e   : > { %v3509_v10 = vpop.permute.xlu1 %3508 }
0x284f   : > { %v3516_v18 = vsel %vm184_vm0, %v3515_v31, %v3509_v10  ;;  %v3648_v31 = vld [vmem:[%s9073_s2 + $0x870] sm:$0xff] }
0x2850   : > { %3690 = vmatpush.msrb.mxu2 %v3648_v31  ;;  %v8382_v31 = vld [vmem:[%s9073_s2 + $0xa98] sm:$0xff] }
0x28c3   : > { %v3500_v59 = vpop.f32.mrf.mxu2 }
0x28c4   : > { %3512 = vrot.lane.b32.xlu0 %v3500_v59, %s7041_s13 }
0x2936   : > { %v3513_v33 = vpop.permute.xlu0 %3512 }
0x2937   : > { %v3517_v34 = vsel %vm2675_vm11, %v3516_v18, %v3513_v33  ;;  %v3664_v18 = vld [vmem:[%s9073_s2 + $0x970] sm:$0xff] }
0x2938   : > { %5790 = vmatmul.msk.f32.vlgmr.msrb.gmra.mxu3 %vm1918_vm7, %v3517_v34  ;;  %v3573_v34 = vld [vmem:[%s9073_s2 + $0x790] ss:$0 sm:$0xff] }
0x2939   : > { %3710 = vmatpush.msra.mxu3 %v3664_v18 }
0x29bb   : > { %v3547_v37 = vpop.f32.mrf.mxu3 }
0x29bc   : > { %v3548_v40 = vadd.f32 %v3547_v37, %v3526_v36 }
0x29be   : > { %v3550_v28 = vadd.f32 %v3548_v40, %v7979_v48  ;;  %v3592_v48 = vld [vmem:[%s9073_s2 + $0x828] sm:$0xff]  ;;  %v3575_v40 = vld [vmem:[%s9073_s2 + $0x7a0] ss:$0 sm:$0xff] }
0x29bf   : > { %3631 = vmatpush.msra.mxu1 %v3592_v48  ;;  %v5791_v48 = vld [vmem:[%s9073_s2 + $0x830] ss:$8 sm:$0x3] }
0x29c0   : > { %v3551_v41 = vsel %vm1918_vm7, %v3550_v28, 0.0  ;;  %v3596_v23 = vperm.slane %v5791_v48, 0 }
0x29c1   : > { %3552 = vadd.xlane.f32.xlu0 %v3551_v41  ;;  %3632 = vmatpush.msra.mxu1 %v3590_v47  ;;  %v3597_v47 = vperm.slane %v5791_v48, 1  ;;  %v3741_v48 = vld [vmem:[%s9073_s2 + $0xa50] ss:$0 sm:$0xff] }
0x29c3   : > { %3633 = vmatpush.msra.mxu1 %v3588_v51 }
0x29c5   : > { %3634 = vmatpush.msra.mxu1 %v3586_v57 }
0x29c7   : > { %3635 = vmatpush.msra.mxu1 %v3584_v60 }
0x29c9   : > { %3636 = vmatpush.msra.mxu1 %v3582_v58  ;;  %v3757_v58 = vld [vmem:[%s9073_s2 + $0xad0] sm:$0xff] }
0x29ca   : > { %3775 = vmatpush.msra.mxu0 %v3757_v58  ;;  %v8320_v0 = vpack.i.bf16 %v3757_v58, %v3759_v27 }
0x29cb   : > { %3637 = vmatpush.msra.mxu1 %v3580_v2 }
0x29cc   : > { %3776 = vmatpush.msra.mxu0 %v3755_v63 }
0x29cd   : > { %3638 = vmatpush.msra.mxu1 %v3578_v50 }
0x29ce   : > { %3777 = vmatpush.msra.mxu0 %v3753_v4 }
0x29d0   : > { %3778 = vmatpush.msra.mxu0 %v3751_v6 }
0x2a34   : > { %v3553_v42 = vpop.xlane.xlu0 %3552 }
0x2a35   : > { %v3554_v13 = vmul.f32 %v3553_v42, %v7958_v14  ;;  %v3647_v42 = vld [vmem:[%s9073_s2 + $0x860] sm:$0xff] }
0x2a36   : > { %3691 = vmatpush.msrb.mxu2 %v3647_v42 }
0x2a37   : > { %v8148_v43 = vsub.f32 %v3550_v28, %v3554_v13  ;;  %v3663_v13 = vld [vmem:[%s9073_s2 + $0x960] sm:$0xff] }
0x2a38   : > { %3711 = vmatpush.msra.mxu3 %v3663_v13 }
0x2a39   : > { %v3556_v44 = vmul.f32 %v8148_v43, %v8148_v43 }
0x2a3b   : > { %v3557_v45 = vsel %vm1918_vm7, %v3556_v44, 0.0  ;;  %v3662_v44 = vld [vmem:[%s9073_s2 + $0x950] sm:$0xff] }
0x2a3c   : > { %3558 = vadd.xlane.f32.xlu1 %v3557_v45  ;;  %3712 = vmatpush.msra.mxu3 %v3662_v44  ;;  %v3645_v45 = vld [vmem:[%s9073_s2 + $0x840] sm:$0xff] }
0x2a3e   : > { %3713 = vmatpush.msra.mxu3 %v3661_v39 }
0x2aaf   : > { %v3559_v32 = vpop.xlane.xlu1 %3558 }
0x2ab0   : > { %v3560_v38 = vmul.f32 %v3559_v32, %v7958_v14  ;;  %v3749_v32 = vld [vmem:[%s9073_s2 + $0xa90] sm:$0xff] }
0x2ab1   : > { %v8338_v9 = vpack.i.bf16 %v3749_v32, %v3751_v6  ;;  %3779 = vmatpush.msra.mxu0 %v3749_v32  ;;  %v8446_v6 = vpack.i.bf16 %v8371_v30, %v8365_v53 }
0x2ab2   : > { %v3561_v11 = vadd.f32 1e-06, %v3560_v38  ;;  %v8333_v38 = vpack.i.bf16 %v3753_v4, %v3755_v63 }
0x2ab3   : > { %6508 = vrot.lane.b32.xlu1 %v8338_v9, %s7036_s28 }
0x2ab4   : > { %6983 = vrsqrt.f32 %v3561_v11  ;;  %vm3568_vm2 = vweird.f32 %v3561_v11  ;;  %6503 = vrot.lane.b32.xlu0 %v8333_v38, %s7036_s28 }
0x2aba   : > { %v6984_v52 = vpop.eup %6983 }
0x2abb   : > { %v3563_v22 = vmul.f32 %v6984_v52, %v3561_v11  ;;  %vm3569_vm1 = vweird.f32 %v6984_v52  ;;  %v3747_v11 = vld [vmem:[%s9073_s2 + $0xa80] sm:$0xff]  ;;  %6518 = vrot.lane.b32.xlu1 %v8320_v0, %s7041_s13 }
0x2abc   : > { %vm3570_vm3 = vmor %vm3568_vm2, %vm3569_vm1  ;;  %3780 = vmatpush.msra.mxu0 %v3747_v11  ;;  %v8352_v20 = vpack.i.bf16 %v3745_v12, %v3747_v11 }
0x2abd   : > { %v3564_v26 = vmul.f32 %v6984_v52, %v3563_v22 }
0x2abe   : > { %3781 = vmatpush.msra.mxu0 %v3745_v12 }
0x2abf   : > { %v3565_v59 = vmul.f32 0.5, %v3564_v26 }
0x2ac1   : > { %v3566_v10 = vsub.f32 1.5, %v3565_v59  ;;  %v3758_v59 = vld [vmem:[%s9073_s2 + $0xad8] sm:$0xff] }
0x2ac3   : > { %v3567_v33 = vmul.f32 %v6984_v52, %v3566_v10  ;;  %v8377_v10 = vld [vmem:[%s9073_s2 + $0xaa8] sm:$0xff]  ;;  %6523 = vrot.lane.b32.xlu1 %v8333_v38, %s7041_s13 }
0x2ac5   : > { %v3571_v36 = vsel %vm3570_vm3, %v6984_v52, %v3567_v33  ;;  %v3748_v33 = vld [vmem:[%s9073_s2 + $0xa88] sm:$0xff] }
0x2ac6   : > { %v3572_v37 = vmul.f32 %v3571_v36, %v8148_v43  ;;  %v3646_v43 = vld [vmem:[%s9073_s2 + $0x850] sm:$0xff]  ;;  %v3746_v36 = vld [vmem:[%s9073_s2 + $0xa78] sm:$0xff] }
0x2ac7   : > { %3692 = vmatpush.msrb.mxu2 %v3646_v43  ;;  %v8434_v4 = vpack.i.bf16 %v3746_v36, %v3748_v33 }
0x2ac8   : > { %v3574_v28 = vmul.f32 %v3573_v34, %v3572_v37 }
0x2ac9   : > { %3693 = vmatpush.msrb.mxu2 %v3645_v45 }
0x2aca   : > { %v3576_v41 = vadd.f32 %v3575_v40, %v3574_v28 }
0x2acb   : > { %6528 = vrot.lane.b32.xlu1 %v8320_v0, %s7040_s11 }
0x2acc   : > { %5792 = vmatmul.msk.f32.vlgmr.msrb.gmra.mxu0 %vm1918_vm7, %v3576_v41  ;;  %5793 = vmatmul.msk.f32.vlgmr.msra.gmra.mxu1 %vm1918_vm7, %v3576_v41 }
0x2acd   : > { %3846 = vmatpush.msrb.mxu0 %v3760_v7 }
0x2acf   : > { %3847 = vmatpush.msrb.mxu0 %v3758_v59 }
0x2ad1   : > { %3848 = vmatpush.msrb.mxu0 %v8365_v53 }
0x2ad3   : > { %3849 = vmatpush.msrb.mxu0 %v8371_v30  ;;  %6533 = vrot.lane.b32.xlu1 %v8338_v9, %s7041_s13 }
0x2ad5   : > { %3850 = vmatpush.msrb.mxu0 %v8377_v10 }
0x2ad7   : > { %3851 = vmatpush.msrb.mxu0 %v8382_v31 }
0x2ad9   : > { %3852 = vmatpush.msrb.mxu0 %v3748_v33 }
0x2adb   : > { %3853 = vmatpush.msrb.mxu0 %v3746_v36  ;;  %6543 = vrot.lane.b32.xlu1 %v8352_v20, %s7041_s13 }
0x2ae3   : > { %6553 = vrot.lane.b32.xlu1 %v8352_v20, %s7040_s11 }
0x2b25   : > { %v6509_v24 = vpop.permute.xlu1 %6508 }
0x2b26   : > { %v6504_v21 = vpop.permute.xlu0 %6503  ;;  %v6510_v26 = vunpack.i.l.bf16 %v6509_v24  ;;  %v6511_v5 = vunpack.i.h.bf16 %v6509_v24 }
0x2b27   : > { %v6505_v22 = vunpack.i.l.bf16 %v6504_v21  ;;  %v6506_v54 = vunpack.i.h.bf16 %v6504_v21 }
0x2b2d   : > { %v6519_v11 = vpop.permute.xlu1 %6518 }
0x2b2e   : > { %v6521_v12 = vunpack.i.h.bf16 %v6519_v11 }
0x2b49   : > { %v3620_v49 = vpop.f32.mrf.mxu0  ;;  %v3640_v51 = vpop.f32.mrf.mxu1 }
0x2b4a   : > { %v3621_v35 = vadd.f32 %v3620_v49, %v3596_v23  ;;  %v3641_v57 = vadd.f32 %v3640_v51, %v3597_v47  ;;  %v3743_v49 = vld [vmem:[%s9073_s2 + $0xa60] ss:$0 sm:$0xff] }
0x2b4c   : > { %v3643_v56 = vmax.f32 %v3621_v35, 0.0  ;;  %v3644_v60 = vmax.f32 %v3641_v57, 0.0  ;;  %v8410_v57 = vld [vmem:[%s9073_s2 + $0xaf0] sm:$0xf] }
0x2b4e   : > { %3694 = vmatmul.f32.vlgmr.msrb.gmra.mxu2 %v3643_v56  ;;  %3714 = vmatmul.f32.vlgmr.msra.gmra.mxu3 %v3644_v60  ;;  %v3762_v56 = vperm.slane %v8410_v57, 0 }
0x2bd1   : > { %v3695_v2 = vpop.f32.mrf.mxu2  ;;  %v3715_v50 = vpop.f32.mrf.mxu3 }
0x2bd2   : > { %v3696_v3 = vadd.f32 %v3695_v2, %v3677_v1 }
0x2bd4   : > { %v3716_v19 = vadd.f32 %v3715_v50, %v3696_v3  ;;  %v8428_v50 = vpack.i.bf16 %v3758_v59, %v3760_v7 }
0x2bd6   : > { %v3718_v25 = vadd.f32 %v3716_v19, %v3576_v41  ;;  %6558 = vrot.lane.b32.xlu1 %v8428_v50, %s7040_s11 }
0x2bd8   : > { %v3719_v62 = vsel %vm1918_vm7, %v3718_v25, 0.0 }
0x2bd9   : > { %3720 = vadd.xlane.f32.xlu2 %v3719_v62 }
0x2bde   : > { %6568 = vrot.lane.b32.xlu1 %v8320_v0, %s7048_s10 }
0x2be6   : > { %6583 = vrot.lane.b32.xlu1 %v8434_v4, %s7040_s11 }
0x2bee   : > { %6598 = vrot.lane.b32.xlu1 %v8333_v38, %s7034_s22 }
0x2bf1   : > { %6498 = vrot.lane.b32.xlu2 %v8320_v0, %s7036_s28 }
0x2bf6   : > { %6613 = vrot.lane.b32.xlu1 %v8352_v20, %s7034_s22 }
0x2bfe   : > { %6618 = vrot.lane.b32.xlu1 %v8428_v50, %s7034_s22 }
0x2c06   : > { %6623 = vrot.lane.b32.xlu1 %v8446_v6, %s7034_s22 }
0x2c0e   : > { %6628 = vrot.lane.b32.xlu1 %v8320_v0, %s7046_s19 }
0x2c4c   : > { %v3721_v46 = vpop.xlane.xlu2 %3720 }
0x2c4d   : > { %v3722_v61 = vmul.f32 %v3721_v46, %v7958_v14  ;;  %v6520_v46 = vunpack.i.l.bf16 %v6519_v11 }
0x2c4f   : > { %v3723_v15 = vsub.f32 %v3718_v25, %v3722_v61  ;;  %v6524_v61 = vpop.permute.xlu1 %6523 }
0x2c51   : > { %v3724_v29 = vmul.f32 %v3723_v15, %v3723_v15 }
0x2c53   : > { %v3725_v16 = vsel %vm1918_vm7, %v3724_v29, 0.0  ;;  %v6525_v29 = vunpack.i.l.bf16 %v6524_v61 }
0x2c54   : > { %3726 = vadd.xlane.f32.xlu2 %v3725_v16  ;;  %v6499_v17 = vpop.permute.xlu2 %6498  ;;  %v8462_v16 = vpack.i.bf16 %v8382_v31, %v8377_v10 }
0x2c55   : > { %v6501_v55 = vunpack.i.h.bf16 %v6499_v17  ;;  %v6500_v52 = vunpack.i.l.bf16 %v6499_v17 }
0x2c56   : > { %6633 = vrot.lane.b32.xlu1 %v8462_v16, %s7034_s22 }
0x2c57   : > { %3826 = vmatpush.msrb.mxu1 %v6500_v52  ;;  %v6529_v17 = vpop.permute.xlu1 %6528 }
0x2c58   : > { %v6530_v52 = vunpack.i.l.bf16 %v6529_v17 }
0x2c59   : > { %3827 = vmatpush.msrb.mxu1 %v6501_v55  ;;  %v6531_v55 = vunpack.i.h.bf16 %v6529_v17 }
0x2c5b   : > { %3828 = vmatpush.msrb.mxu1 %v6505_v22 }
0x2c5d   : > { %3829 = vmatpush.msrb.mxu1 %v6506_v54 }
0x2c5e   : > { %6638 = vrot.lane.b32.xlu1 %v8333_v38, %s7046_s19 }
0x2c5f   : > { %3830 = vmatpush.msrb.mxu1 %v6510_v26  ;;  %v6534_v21 = vpop.permute.xlu1 %6533 }
0x2c60   : > { %v6536_v22 = vunpack.i.h.bf16 %v6534_v21  ;;  %v6535_v54 = vunpack.i.l.bf16 %v6534_v21 }
0x2c61   : > { %3831 = vmatpush.msrb.mxu1 %v6511_v5 }
0x2c66   : > { %6653 = vrot.lane.b32.xlu1 %v8338_v9, %s7046_s19 }
0x2c67   : > { %v6544_v24 = vpop.permute.xlu1 %6543 }
0x2c68   : > { %v6546_v26 = vunpack.i.h.bf16 %v6544_v24  ;;  %v6545_v5 = vunpack.i.l.bf16 %v6544_v24 }
0x2c6c   : > { %6513 = vrot.lane.b32.xlu2 %v8352_v20, %s7036_s28 }
0x2c6e   : > { %6658 = vrot.lane.b32.xlu1 %v8333_v38, %s7039_s4 }
0x2c6f   : > { %v6554_v7 = vpop.permute.xlu1 %6553 }
0x2c76   : > { %6668 = vrot.lane.b32.xlu1 %v8338_v9, %s7039_s4 }
0x2c77   : > { %v6559_v10 = vpop.permute.xlu1 %6558 }
0x2c78   : > { %v6561_v31 = vunpack.i.h.bf16 %v6559_v10 }
0x2cc7   : > { %v3727_v18 = vpop.xlane.xlu2 %3726 }
0x2cc8   : > { %v3728_v34 = vmul.f32 %v3727_v18, %v7958_v14  ;;  %v6560_v18 = vunpack.i.l.bf16 %v6559_v10 }
0x2cca   : > { %v3729_v37 = vadd.f32 1e-06, %v3728_v34  ;;  %4047 = vmatpush.msrb.mxu3 %v6560_v18 }
0x2ccc   : > { %6985 = vrsqrt.f32 %v3729_v37  ;;  %vm3736_vm8 = vweird.f32 %v3729_v37  ;;  %4048 = vmatpush.msrb.mxu3 %v6561_v31 }
0x2ccf   : > { %v6514_v40 = vpop.permute.xlu2 %6513 }
0x2cd0   : > { %v6516_v28 = vunpack.i.h.bf16 %v6514_v40  ;;  %v6515_v41 = vunpack.i.l.bf16 %v6514_v40 }
0x2cd2   : > { %v6986_v42 = vpop.eup %6985  ;;  %3832 = vmatpush.msrb.mxu1 %v6515_v41 }
0x2cd3   : > { %v3731_v13 = vmul.f32 %v6986_v42, %v3729_v37  ;;  %vm3737_vm4 = vweird.f32 %v6986_v42 }
0x2cd4   : > { %3833 = vmatpush.msrb.mxu1 %v6516_v28  ;;  %vm3738_vm9 = vmor %vm3736_vm8, %vm3737_vm4  ;;  %v6569_v28 = vpop.permute.xlu1 %6568 }
0x2cd5   : > { %v3732_v43 = vmul.f32 %v6986_v42, %v3731_v13 }
0x2cd7   : > { %v3733_v44 = vmul.f32 0.5, %v3732_v43  ;;  %v6571_v43 = vunpack.i.h.bf16 %v6569_v28 }
0x2cd9   : > { %v3734_v45 = vsub.f32 1.5, %v3733_v44 }
0x2cdb   : > { %v3735_v39 = vmul.f32 %v6986_v42, %v3734_v45 }
0x2cdd   : > { %v3739_v23 = vsel %vm3738_vm9, %v6986_v42, %v3735_v39  ;;  %v6570_v42 = vunpack.i.l.bf16 %v6569_v28 }
0x2cde   : > { %v3740_v47 = vmul.f32 %v3739_v23, %v3723_v15  ;;  %v6526_v15 = vunpack.i.h.bf16 %v6524_v61 }
0x2ce0   : > { %v3742_v51 = vmul.f32 %v3741_v48, %v3740_v47 }
0x2ce2   : > { %v8399_v35 = vadd.f32 %v3743_v49, %v3742_v51  ;;  %v6555_v51 = vunpack.i.l.bf16 %v6554_v7 }
0x2ce4   : > { %5794 = vmatmul.msk.f32.vlgmr.msra.gmra.mxu0 %vm1918_vm7, %v8399_v35  ;;  %5795 = vmatmul.msk.f32.vlgmr.msrb.gmra.mxu1 %vm1918_vm7, %v8399_v35 }
0x2cec   : > { %5796 = vmatmul.msk.f32.vlgmr.msrb.gmra.mxu0 %vm1918_vm7, %v8399_v35 }
0x2d61   : > { %v3783_v60 = vpop.f32.mrf.mxu0  ;;  %v3835_v27 = vpop.f32.mrf.mxu1 }
0x2d62   : > { %v3784_v58 = vadd.f32 %v3783_v60, %v3762_v56  ;;  %5797 = vmatpush.xpose.msk.msra.mxu1 %vm860_vm6, %v3835_v27  ;;  %v6584_v60 = vpop.permute.xlu1 %6583  ;;  %v6556_v27 = vunpack.i.h.bf16 %v6554_v7 }
0x2d65   : > { %5798 = vmatmul.msk.f32.vlgmr.msra.gmra.mxu1 %vm860_vm6, %v3784_v58 }
0x2d66   : > { %3951 = vmatpush.msrb.mxu1 %v6530_v52 }
0x2d68   : > { %3952 = vmatpush.msrb.mxu1 %v6531_v55 }
0x2d69   : > { %v3855_v1 = vpop.f32.mrf.mxu0 }
0x2d6a   : > { %3913 = vmatpush.msra.mxu2 %v3855_v1 }
0x2d6c   : > { %3995 = vmatpush.msrb.mxu2 %v6520_v46 }
0x2d6e   : > { %3996 = vmatpush.msrb.mxu2 %v6521_v12 }
0x2d70   : > { %3997 = vmatpush.msrb.mxu2 %v6525_v29 }
0x2d72   : > { %3998 = vmatpush.msrb.mxu2 %v6526_v15 }
0x2d74   : > { %3999 = vmatpush.msrb.mxu2 %v6535_v54 }
0x2d76   : > { %4000 = vmatpush.msrb.mxu2 %v6536_v22 }
0x2d78   : > { %4001 = vmatpush.msrb.mxu2 %v6545_v5 }
0x2d7a   : > { %4002 = vmatpush.msrb.mxu2 %v6546_v26  ;;  %v3918_v26 = vperm.slane %v8410_v57, 1 }
0x2de2   : > { %v3881_v2 = vpop.f32.mrf.mxu1 }
0x2de3   : > { %v3884_v3 = vsel %vm315_vm5, %v3881_v2, -inf }
0x2de4   : > { %3885 = vmax.xlane.f32.xlu2 %v3884_v3  ;;  %v6585_v3 = vunpack.i.l.bf16 %v6584_v60 }
0x2dfc   : > { %6538 = vrot.lane.b32.xlu2 %v8333_v38, %s7040_s11 }
0x2e04   : > { %6563 = vrot.lane.b32.xlu2 %v8446_v6, %s7040_s11 }
0x2e0c   : > { %6578 = vrot.lane.b32.xlu2 %v8333_v38, %s7048_s10 }
0x2e14   : > { %6593 = vrot.lane.b32.xlu2 %v8338_v9, %s7048_s10 }
0x2e1c   : > { %6608 = vrot.lane.b32.xlu2 %v8338_v9, %s7034_s22 }
0x2e57   : > { %v3886_v19 = vpop.xlane.xlu2 %3885 }
0x2e58   : > { %v3887_v25 = vsub.f32 %v3881_v2, %v3886_v19  ;;  %v6586_v19 = vunpack.i.h.bf16 %v6584_v60 }
0x2e5a   : > { %v3888_v62 = vmul.f32 1.442695, %v3887_v25  ;;  %v6599_v25 = vpop.permute.xlu1 %6598 }
0x2e5b   : > { %v6600_v11 = vunpack.i.l.bf16 %v6599_v25  ;;  %v6601_v46 = vunpack.i.h.bf16 %v6599_v25 }
0x2e5c   : > { %6987 = vpow2.f32 %v3888_v62 }
0x2e5f   : > { %v6539_v59 = vpop.permute.xlu2 %6538 }
0x2e60   : > { %v6541_v53 = vunpack.i.h.bf16 %v6539_v59  ;;  %v6540_v30 = vunpack.i.l.bf16 %v6539_v59 }
0x2e62   : > { %v8436_v63 = vpop.eup %6987  ;;  %3953 = vmatpush.msrb.mxu1 %v6540_v30  ;;  %v6614_v29 = vpop.permute.xlu1 %6613 }
0x2e63   : > { %v3890_v32 = vsel %vm315_vm5, %v8436_v63, 0.0  ;;  %v6615_v21 = vunpack.i.l.bf16 %v6614_v29  ;;  %v6616_v22 = vunpack.i.h.bf16 %v6614_v29 }
0x2e64   : > { %3891 = vadd.xlane.f32.xlu0 %v3890_v32  ;;  %3954 = vmatpush.msrb.mxu1 %v6541_v53 }
0x2e67   : > { %v6564_v33 = vpop.permute.xlu2 %6563 }
0x2e68   : > { %v6566_v34 = vunpack.i.h.bf16 %v6564_v33  ;;  %v6565_v36 = vunpack.i.l.bf16 %v6564_v33 }
0x2e6a   : > { %4049 = vmatpush.msrb.mxu3 %v6565_v36  ;;  %v6619_v30 = vpop.permute.xlu1 %6618 }
0x2e6b   : > { %v6621_v10 = vunpack.i.h.bf16 %v6619_v30  ;;  %v6620_v31 = vunpack.i.l.bf16 %v6619_v30 }
0x2e6c   : > { %4050 = vmatpush.msrb.mxu3 %v6566_v34 }
0x2e6f   : > { %v6579_v40 = vpop.permute.xlu2 %6578 }
0x2e70   : > { %v6580_v44 = vunpack.i.l.bf16 %v6579_v40  ;;  %v6581_v45 = vunpack.i.h.bf16 %v6579_v40 }
0x2e72   : > { %v6624_v34 = vpop.permute.xlu1 %6623 }
0x2e73   : > { %v6626_v36 = vunpack.i.h.bf16 %v6624_v34 }
0x2e77   : > { %v6594_v39 = vpop.permute.xlu2 %6593 }
0x2e78   : > { %6548 = vrot.lane.b32.xlu0 %v8338_v9, %s7040_s11  ;;  %v6595_v48 = vunpack.i.l.bf16 %v6594_v39  ;;  %v6596_v23 = vunpack.i.h.bf16 %v6594_v39 }
0x2e7a   : > { %v6629_v40 = vpop.permute.xlu1 %6628 }
0x2e7b   : > { %v6631_v28 = vunpack.i.h.bf16 %v6629_v40 }
0x2e7f   : > { %v6609_v12 = vpop.permute.xlu2 %6608 }
0x2e80   : > { %6573 = vrot.lane.b32.xlu0 %v8462_v16, %s7040_s11  ;;  %v6610_v61 = vunpack.i.l.bf16 %v6609_v12  ;;  %v6611_v52 = vunpack.i.h.bf16 %v6609_v12 }
0x2e88   : > { %6588 = vrot.lane.b32.xlu0 %v8320_v0, %s7034_s22 }
0x2e90   : > { %6603 = vrot.lane.b32.xlu0 %v8352_v20, %s7048_s10 }
0x2ed7   : > { %v3892_v37 = vpop.xlane.xlu0 %3891 }
0x2ed8   : > { %6989 = vrcp.f32 %v3892_v37  ;;  %v6625_v37 = vunpack.i.l.bf16 %v6624_v34 }
0x2ede   : > { %v6990_v41 = vpop.eup %6989 }
0x2edf   : > { %v3894_v13 = vmul.f32 %v6990_v41, %v8436_v63  ;;  %v6630_v41 = vunpack.i.l.bf16 %v6629_v40 }
0x2ee1   : > { %5799 = vmatmul.msk.f32.vlgmr.msra.gmra.mxu2 %vm315_vm5, %v3894_v13 }
0x2ee2   : > { %4196 = vmatpush.msra.mxu2 %v6570_v42  ;;  %v6634_v42 = vpop.permute.xlu1 %6633 }
0x2ee3   : > { %v6636_v13 = vunpack.i.h.bf16 %v6634_v42 }
0x2ee4   : > { %4197 = vmatpush.msra.mxu2 %v6571_v43  ;;  %v6635_v43 = vunpack.i.l.bf16 %v6634_v42 }
0x2ee6   : > { %4198 = vmatpush.msra.mxu2 %v6580_v44 }
0x2ee8   : > { %4199 = vmatpush.msra.mxu2 %v6581_v45 }
0x2ee9   : > { %5801 = vmatmul.msk.f32.vlgmr.msrb.gmra.mxu2 %vm1918_vm7, %v8399_v35 }
0x2eea   : > { %v6549_v47 = vpop.permute.xlu0 %6548  ;;  %4200 = vmatpush.msra.mxu2 %v6595_v48  ;;  %v6639_v44 = vpop.permute.xlu1 %6638 }
0x2eeb   : > { %v6550_v49 = vunpack.i.l.bf16 %v6549_v47  ;;  %v6551_v56 = vunpack.i.h.bf16 %v6549_v47  ;;  %v6641_v45 = vunpack.i.h.bf16 %v6639_v44  ;;  %v6640_v39 = vunpack.i.l.bf16 %v6639_v44 }
0x2eec   : > { %4201 = vmatpush.msra.mxu2 %v6596_v23 }
0x2eed   : > { %3955 = vmatpush.msrb.mxu1 %v6550_v49 }
0x2eef   : > { %3956 = vmatpush.msrb.mxu1 %v6551_v56 }
0x2ef1   : > { %3957 = vmatpush.msrb.mxu1 %v6555_v51 }
0x2ef2   : > { %v6574_v58 = vpop.permute.xlu0 %6573  ;;  %v6654_v48 = vpop.permute.xlu1 %6653 }
0x2ef3   : > { %v6576_v1 = vunpack.i.h.bf16 %v6574_v58  ;;  %v6575_v2 = vunpack.i.l.bf16 %v6574_v58  ;;  %3958 = vmatpush.msrb.mxu1 %v6556_v27  ;;  %v6656_v23 = vunpack.i.h.bf16 %v6654_v48  ;;  %v6655_v47 = vunpack.i.l.bf16 %v6654_v48 }
0x2ef4   : > { %5800 = vmatmul.msk.f32.vlgmr.msrb.gmra.mxu1 %vm1918_vm7, %v8399_v35 }
0x2ef5   : > { %4051 = vmatpush.msrb.mxu3 %v6575_v2 }
0x2ef7   : > { %4052 = vmatpush.msrb.mxu3 %v6576_v1 }
0x2ef9   : > { %4053 = vmatpush.msrb.mxu3 %v6585_v3 }
0x2efa   : > { %v6589_v62 = vpop.permute.xlu0 %6588  ;;  %v6659_v25 = vpop.permute.xlu1 %6658 }
0x2efb   : > { %v6591_v63 = vunpack.i.h.bf16 %v6589_v62  ;;  %v6590_v32 = vunpack.i.l.bf16 %v6589_v62  ;;  %4054 = vmatpush.msrb.mxu3 %v6586_v19 }
0x2efc   : > { %5802 = vmatmul.msk.f32.vlgmr.msrb.gmra.mxu3 %vm1918_vm7, %v8399_v35 }
0x2efd   : > { %4152 = vmatpush.msra.mxu1 %v6590_v32  ;;  %4240 = vmatpush.msra.mxu3 %v6620_v31 }
0x2eff   : > { %4153 = vmatpush.msra.mxu1 %v6591_v63  ;;  %4241 = vmatpush.msra.mxu3 %v6621_v10 }
0x2f01   : > { %4154 = vmatpush.msra.mxu1 %v6600_v11  ;;  %4242 = vmatpush.msra.mxu3 %v6625_v37 }
0x2f02   : > { %v6604_v15 = vpop.permute.xlu0 %6603  ;;  %v6669_v11 = vpop.permute.xlu1 %6668 }
0x2f03   : > { %v6606_v17 = vunpack.i.h.bf16 %v6604_v15  ;;  %v6605_v55 = vunpack.i.l.bf16 %v6604_v15  ;;  %4155 = vmatpush.msra.mxu1 %v6601_v46  ;;  %4243 = vmatpush.msra.mxu3 %v6626_v36  ;;  %v6671_v15 = vunpack.i.h.bf16 %v6669_v11 }
0x2f05   : > { %4156 = vmatpush.msra.mxu1 %v6610_v61  ;;  %4202 = vmatpush.msra.mxu2 %v6605_v55 }
0x2f06   : > { %4244 = vmatpush.msra.mxu3 %v6635_v43 }
0x2f07   : > { %4157 = vmatpush.msra.mxu1 %v6611_v52  ;;  %4203 = vmatpush.msra.mxu2 %v6606_v17 }
0x2f08   : > { %5807 = vmatmul.msk.f32.vlgmr.msra.gmra.mxu2 %vm1918_vm7, %v8399_v35  ;;  %4245 = vmatpush.msra.mxu3 %v6636_v13 }
0x2f09   : > { %4158 = vmatpush.msra.mxu1 %v6615_v21  ;;  %4389 = vmatpush.msrb.mxu2 %v6630_v41 }
0x2f0b   : > { %4159 = vmatpush.msra.mxu1 %v6616_v22  ;;  %4390 = vmatpush.msrb.mxu2 %v6631_v28 }
0x2f0c   : > { %5806 = vmatmul.msk.f32.vlgmr.msra.gmra.mxu1 %vm1918_vm7, %v8399_v35 }
0x2f0d   : > { %4391 = vmatpush.msrb.mxu2 %v6640_v39  ;;  %v4312_v39 = vperm.slane %v8410_v57, 3 }
0x2f0f   : > { %4392 = vmatpush.msrb.mxu2 %v6641_v45 }
0x2f11   : > { %4393 = vmatpush.msrb.mxu2 %v6655_v47 }
0x2f13   : > { %4394 = vmatpush.msrb.mxu2 %v6656_v23 }
0x2f64   : > { %v8484_v54 = vpop.f32.mrf.mxu2 }
0x2f6c   : > { %v4004_v24 = vpop.f32.mrf.mxu2 }
0x2f6d   : > { %5803 = vmatpush.xpose.msk.msra.mxu0 %vm860_vm6, %v4004_v24 }
0x2f71   : > { %v3960_v5 = vpop.f32.mrf.mxu1 }
0x2f72   : > { %v3961_v7 = vadd.f32 %v3960_v5, %v3918_v26 }
0x2f74   : > { %5804 = vmatmul.msk.f32.vlgmr.msra.gmra.mxu0 %vm860_vm6, %v3961_v7 }
0x2f7f   : > { %v4056_v59 = vpop.f32.mrf.mxu3 }
0x2f80   : > { %4114 = vmatpush.msrb.mxu0 %v4056_v59 }
0x2f89   : > { %v4161_v12 = vpop.f32.mrf.mxu1 }
0x2f8b   : > { %v4205_v53 = vpop.f32.mrf.mxu2 }
0x2f8c   : > { %5809 = vmatpush.xpose.msk.msra.mxu0 %vm860_vm6, %v4205_v53 }
0x2ff1   : > { %v4082_v18 = vpop.f32.mrf.mxu0 }
0x2ff2   : > { %v4085_v33 = vsel %vm315_vm5, %v4082_v18, -inf }
0x2ff3   : > { %4086 = vmax.xlane.f32.xlu0 %v4085_v33 }
0x3007   : > { %6643 = vrot.lane.b32.xlu0 %v8434_v4, %s7034_s22 }
0x300f   : > { %6663 = vrot.lane.b32.xlu0 %v8352_v20, %s7046_s19 }
0x3066   : > { %v4087_v49 = vpop.xlane.xlu0 %4086 }
0x3067   : > { %v4088_v51 = vsub.f32 %v4082_v18, %v4087_v49 }
0x3069   : > { %v4089_v56 = vmul.f32 1.442695, %v4088_v51 }
0x306b   : > { %6991 = vpow2.f32 %v4089_v56 }
0x3071   : > { %v6992_v60 = vpop.eup %6991 }
0x3072   : > { %v4091_v27 = vsel %vm315_vm5, %v6992_v60, 0.0 }
0x3073   : > { %4092 = vadd.xlane.f32.xlu2 %v4091_v27 }
0x3079   : > { %v6644_v58 = vpop.permute.xlu0 %6643 }
0x307a   : > { %v6646_v1 = vunpack.i.h.bf16 %v6644_v58  ;;  %v6645_v2 = vunpack.i.l.bf16 %v6644_v58 }
0x307c   : > { %4246 = vmatpush.msra.mxu3 %v6645_v2  ;;  %v8554_v2 = vld [vmem:[%s9073_s2 + $0xbf8] sm:$0xff] }
0x307e   : > { %4247 = vmatpush.msra.mxu3 %v6646_v1 }
0x307f   : > { %5808 = vmatmul.msk.f32.vlgmr.msra.gmra.mxu3 %vm1918_vm7, %v8399_v35 }
0x3081   : > { %v6664_v38 = vpop.permute.xlu0 %6663 }
0x3082   : > { %v6666_v3 = vunpack.i.h.bf16 %v6664_v38  ;;  %v6665_v19 = vunpack.i.l.bf16 %v6664_v38  ;;  %v8560_v38 = vld [vmem:[%s9073_s2 + $0xbe8] sm:$0xff] }
0x3084   : > { %4395 = vmatpush.msrb.mxu2 %v6665_v19  ;;  %v8572_v19 = vld [vmem:[%s9073_s2 + $0xbc8] sm:$0xff] }
0x3086   : > { %4396 = vmatpush.msrb.mxu2 %v6666_v3  ;;  %v8566_v3 = vld [vmem:[%s9073_s2 + $0xbd8] sm:$0xff] }
0x3087   : > { %5813 = vmatmul.msk.f32.vlgmr.msrb.gmra.mxu2 %vm1918_vm7, %v8399_v35 }
0x308b   : > { %6648 = vrot.lane.b32.xlu2 %v8320_v0, %s7039_s4 }
0x3093   : > { %6673 = vrot.lane.b32.xlu2 %v8352_v20, %s7039_s4 }
0x309b   : > { %6678 = vrot.lane.b32.xlu2 %v8428_v50, %s7039_s4  ;;  %v6660_v50 = vunpack.i.l.bf16 %v6659_v25 }
0x30a3   : > { %6683 = vrot.lane.b32.xlu2 %v8446_v6, %s7039_s4  ;;  %v4119_v6 = vperm.slane %v8410_v57, 2  ;;  %v8548_v57 = vld [vmem:[%s9073_s2 + $0xc08] sm:$0xff] }
0x30a5   : > { %v4162_v46 = vadd.f32 %v4161_v12, %v4119_v6  ;;  %v4585_v12 = vld [vmem:[%s9073_s2 + $0xbc0] sm:$0xff] }
0x30ab   : > { %6688 = vrot.lane.b32.xlu2 %v8462_v16, %s7039_s4  ;;  %v6661_v16 = vunpack.i.h.bf16 %v6659_v25  ;;  %v8583_v25 = vld [vmem:[%s9073_s2 + $0xba8] sm:$0xff] }
0x30b3   : > { %6693 = vrot.lane.b32.xlu2 %v8434_v4, %s7039_s4  ;;  %v6670_v4 = vunpack.i.l.bf16 %v6669_v11  ;;  %v4587_v11 = vld [vmem:[%s9073_s2 + $0xbd0] sm:$0xff] }
0x30e6   : > { %v4093_v9 = vpop.xlane.xlu2 %4092 }
0x30e7   : > { %6993 = vrcp.f32 %v4093_v9  ;;  %v8577_v9 = vld [vmem:[%s9073_s2 + $0xbb8] sm:$0xff] }
0x30ed   : > { %v6994_v62 = vpop.eup %6993 }
0x30ee   : > { %v4095_v0 = vmul.f32 %v6994_v62, %v6992_v60  ;;  %v6649_v63 = vpop.permute.xlu2 %6648  ;;  %v8589_v62 = vld [vmem:[%s9073_s2 + $0xb98] sm:$0xff] }
0x30ef   : > { %v6651_v32 = vunpack.i.h.bf16 %v6649_v63  ;;  %v6650_v20 = vunpack.i.l.bf16 %v6649_v63  ;;  %v4591_v63 = vld [vmem:[%s9073_s2 + $0xbf0] sm:$0xff] }
0x30f0   : > { %5805 = vmatmul.msk.f32.vlgmr.msrb.gmra.mxu0 %vm315_vm5, %v4095_v0  ;;  %v4593_v0 = vld [vmem:[%s9073_s2 + $0xc00] sm:$0xff] }
0x30f1   : > { %4345 = vmatpush.msrb.mxu1 %v6650_v20  ;;  %4608 = vmatpush.msra.mxu2 %v4593_v0 }
0x30f3   : > { %4346 = vmatpush.msrb.mxu1 %v6651_v32  ;;  %v4589_v32 = vld [vmem:[%s9073_s2 + $0xbe0] sm:$0xff]  ;;  %4609 = vmatpush.msra.mxu2 %v4591_v63 }
0x30f5   : > { %4347 = vmatpush.msrb.mxu1 %v6660_v50  ;;  %4610 = vmatpush.msra.mxu2 %v4589_v32 }
0x30f6   : > { %v6674_v61 = vpop.permute.xlu2 %6673 }
0x30f7   : > { %4348 = vmatpush.msrb.mxu1 %v6661_v16  ;;  %v6675_v29 = vunpack.i.l.bf16 %v6674_v61  ;;  %v6676_v17 = vunpack.i.h.bf16 %v6674_v61  ;;  %4611 = vmatpush.msra.mxu2 %v4587_v11  ;;  %v4583_v16 = vld [vmem:[%s9073_s2 + $0xbb0] sm:$0xff] }
0x30f8   : > { %5810 = vmatmul.msk.f32.vlgmr.msra.gmra.mxu0 %vm860_vm6, %v4162_v46  ;;  %v4579_v46 = vld [vmem:[%s9073_s2 + $0xb90] sm:$0xff] }
0x30f9   : > { %4349 = vmatpush.msrb.mxu1 %v6670_v4  ;;  %4612 = vmatpush.msra.mxu2 %v4585_v12  ;;  %v4581_v4 = vld [vmem:[%s9073_s2 + $0xba0] sm:$0xff]  ;;  %v4527_v61 = vld [vmem:[%s9073_s2 + $0xb70] sm:$0xff] }
0x30fb   : > { %4350 = vmatpush.msrb.mxu1 %v6671_v15  ;;  %4613 = vmatpush.msra.mxu2 %v4583_v16  ;;  %v4526_v15 = vld [vmem:[%s9073_s2 + $0xb60] sm:$0xff] }
0x30fd   : > { %4351 = vmatpush.msrb.mxu1 %v6675_v29  ;;  %4614 = vmatpush.msra.mxu2 %v4581_v4  ;;  %v4525_v29 = vld [vmem:[%s9073_s2 + $0xb50] sm:$0xff] }
0x30fe   : > { %v6679_v55 = vpop.permute.xlu2 %6678 }
0x30ff   : > { %v6681_v52 = vunpack.i.h.bf16 %v6679_v55  ;;  %v6680_v21 = vunpack.i.l.bf16 %v6679_v55  ;;  %4352 = vmatpush.msrb.mxu1 %v6676_v17  ;;  %4615 = vmatpush.msra.mxu2 %v4579_v46  ;;  %v4524_v17 = vld [vmem:[%s9073_s2 + $0xb40] sm:$0xff]  ;;  %v4523_v55 = vld [vmem:[%s9073_s2 + $0xb30] sm:$0xff] }
0x3100   : > { %5812 = vmatmul.msk.f32.vlgmr.msrb.gmra.mxu1 %vm1918_vm7, %v8399_v35 }
0x3101   : > { %4433 = vmatpush.msrb.mxu3 %v6680_v21  ;;  %4540 = vmatpush.msra.mxu1 %v4527_v61  ;;  %v4521_v21 = vld [vmem:[%s9073_s2 + $0xb10] sm:$0xff] }
0x3102   : > { %v4249_v22 = vpop.f32.mrf.mxu3 }
0x3103   : > { %4307 = vmatpush.msrb.mxu0 %v4249_v22  ;;  %4434 = vmatpush.msrb.mxu3 %v6681_v52  ;;  %v4522_v52 = vld [vmem:[%s9073_s2 + $0xb20] sm:$0xff] }
0x3104   : > { %4541 = vmatpush.msra.mxu1 %v4526_v15 }
0x3106   : > { %v6684_v24 = vpop.permute.xlu2 %6683  ;;  %4542 = vmatpush.msra.mxu1 %v4525_v29 }
0x3107   : > { %v6686_v26 = vunpack.i.h.bf16 %v6684_v24  ;;  %v6685_v5 = vunpack.i.l.bf16 %v6684_v24 }
0x3108   : > { %4543 = vmatpush.msra.mxu1 %v4524_v17 }
0x3109   : > { %4435 = vmatpush.msrb.mxu3 %v6685_v5 }
0x310a   : > { %v4398_v7 = vpop.f32.mrf.mxu2  ;;  %4544 = vmatpush.msra.mxu1 %v4523_v55  ;;  %v4575_v55 = vld [vmem:[%s9073_s2 + $0xcb0] ss:$0 sm:$0xff] }
0x310b   : > { %5815 = vmatpush.xpose.msk.msra.mxu0 %vm860_vm6, %v4398_v7  ;;  %4436 = vmatpush.msrb.mxu3 %v6686_v26  ;;  %v4520_v26 = vld [vmem:[%s9073_s2 + $0xb00] sm:$0xff] }
0x310c   : > { %4545 = vmatpush.msra.mxu1 %v4522_v52 }
0x310e   : > { %v6689_v59 = vpop.permute.xlu2 %6688  ;;  %4546 = vmatpush.msra.mxu1 %v4521_v21 }
0x310f   : > { %v6691_v53 = vunpack.i.h.bf16 %v6689_v59  ;;  %v6690_v30 = vunpack.i.l.bf16 %v6689_v59 }
0x3110   : > { %4547 = vmatpush.msra.mxu1 %v4520_v26 }
0x3111   : > { %4437 = vmatpush.msrb.mxu3 %v6690_v30 }
0x3113   : > { %4438 = vmatpush.msrb.mxu3 %v6691_v53 }
0x3116   : > { %v6694_v10 = vpop.permute.xlu2 %6693 }
0x3117   : > { %v6696_v31 = vunpack.i.h.bf16 %v6694_v10  ;;  %v6695_v18 = vunpack.i.l.bf16 %v6694_v10 }
0x3119   : > { %4439 = vmatpush.msrb.mxu3 %v6695_v18  ;;  %v4528_v18 = vld [vmem:[%s9073_s2 + $0xb80] ss:$0 sm:$0xff] }
0x311b   : > { %4440 = vmatpush.msrb.mxu3 %v6696_v31  ;;  %v8650_v31 = vpack.i.bf16 %v4591_v63, %v4593_v0  ;;  %v8701_v0 = vpack.i.bf16 %v8566_v3, %v8560_v38 }
0x311c   : > { %5814 = vmatmul.msk.f32.vlgmr.msrb.gmra.mxu3 %vm1918_vm7, %v8399_v35 }
0x316d   : > { %v4116_v33 = vpop.f32.mrf.mxu0 }
0x3175   : > { %v4275_v34 = vpop.f32.mrf.mxu0 }
0x3176   : > { %v4278_v36 = vsel %vm315_vm5, %v4275_v34, -inf }
0x3177   : > { %4279 = vmax.xlane.f32.xlu0 %v4278_v36 }
0x317d   : > { %v4354_v48 = vpop.f32.mrf.mxu1 }
0x317e   : > { %v4355_v23 = vadd.f32 %v4354_v48, %v4312_v39 }
0x319f   : > { %v4442_v45 = vpop.f32.mrf.mxu3 }
0x31ea   : > { %v4280_v37 = vpop.xlane.xlu0 %4279 }
0x31eb   : > { %v4281_v40 = vsub.f32 %v4275_v34, %v4280_v37  ;;  %v8657_v34 = vpack.i.bf16 %v4587_v11, %v4589_v32 }
0x31ed   : > { %v4282_v28 = vmul.f32 1.442695, %v4281_v40  ;;  %v8663_v40 = vpack.i.bf16 %v4583_v16, %v4585_v12 }
0x31ef   : > { %6995 = vpow2.f32 %v4282_v28  ;;  %v8667_v28 = vpack.i.bf16 %v4579_v46, %v4581_v4 }
0x31f5   : > { %v6996_v41 = vpop.eup %6995 }
0x31f6   : > { %v4284_v42 = vsel %vm315_vm5, %v6996_v41, 0.0 }
0x31f7   : > { %4285 = vadd.xlane.f32.xlu1 %v4284_v42 }
0x3210   : > { %4506 = vrot.lane.b32.xlu1 %v4116_v33, %s7046_s19 }
0x326a   : > { %v4286_v13 = vpop.xlane.xlu1 %4285 }
0x326b   : > { %6997 = vrcp.f32 %v4286_v13 }
0x3271   : > { %v6998_v43 = vpop.eup %6997 }
0x3272   : > { %v4288_v44 = vmul.f32 %v6998_v43, %v6996_v41 }
0x3274   : > { %5811 = vmatmul.msk.f32.vlgmr.msrb.gmra.mxu0 %vm315_vm5, %v4288_v44 }
0x3275   : > { %4500 = vmatpush.msrb.mxu0 %v4442_v45 }
0x327c   : > { %5816 = vmatmul.msk.f32.vlgmr.msra.gmra.mxu0 %vm860_vm6, %v4355_v23 }
0x327d   : > { %4680 = vmatpush.msra.mxu0 %v8548_v57 }
0x327f   : > { %4681 = vmatpush.msra.mxu0 %v8554_v2 }
0x3281   : > { %4682 = vmatpush.msra.mxu0 %v8560_v38 }
0x3282   : > { %v4507_v5 = vpop.permute.xlu1 %4506 }
0x3283   : > { %4683 = vmatpush.msra.mxu0 %v8566_v3  ;;  %v4517_v59 = vsel %vm860_vm6, %v8484_v54, %v4507_v5 }
0x3285   : > { %4684 = vmatpush.msra.mxu0 %v8572_v19 }
0x3287   : > { %4685 = vmatpush.msra.mxu0 %v8577_v9 }
0x3289   : > { %4686 = vmatpush.msra.mxu0 %v8583_v25 }
0x328b   : > { %4687 = vmatpush.msra.mxu0 %v8589_v62 }
0x32f1   : > { %v4309_v47 = vpop.f32.mrf.mxu0 }
0x32f9   : > { %v4468_v49 = vpop.f32.mrf.mxu0 }
0x32fa   : > { %v4471_v51 = vsel %vm315_vm5, %v4468_v49, -inf }
0x32fb   : > { %4472 = vmax.xlane.f32.xlu2 %v4471_v51 }
0x3313   : > { %6698 = vrot.lane.b32.xlu2 %v8650_v31, %s7036_s28 }
0x331b   : > { %6703 = vrot.lane.b32.xlu2 %v8657_v34, %s7036_s28 }
0x3323   : > { %6708 = vrot.lane.b32.xlu2 %v8663_v40, %s7036_s28 }
0x332b   : > { %6723 = vrot.lane.b32.xlu2 %v8657_v34, %s7040_s11 }
0x3333   : > { %6728 = vrot.lane.b32.xlu2 %v8650_v31, %s7041_s13 }
0x333b   : > { %6738 = vrot.lane.b32.xlu2 %v8657_v34, %s7041_s13 }
0x3343   : > { %6748 = vrot.lane.b32.xlu2 %v8663_v40, %s7041_s13 }
0x336e   : > { %v4473_v56 = vpop.xlane.xlu2 %4472 }
0x336f   : > { %v4474_v60 = vsub.f32 %v4468_v49, %v4473_v56 }
0x3371   : > { %v4475_v27 = vmul.f32 1.442695, %v4474_v60 }
0x3373   : > { %6999 = vpow2.f32 %v4475_v27 }
0x3376   : > { %v6699_v41 = vpop.permute.xlu2 %6698 }
0x3377   : > { %v6701_v42 = vunpack.i.h.bf16 %v6699_v41  ;;  %v6700_v13 = vunpack.i.l.bf16 %v6699_v41 }
0x3379   : > { %v7000_v58 = vpop.eup %6999  ;;  %4660 = vmatpush.msra.mxu3 %v6700_v13 }
0x337a   : > { %v4477_v1 = vsel %vm315_vm5, %v7000_v58, 0.0 }
0x337b   : > { %4478 = vadd.xlane.f32.xlu0 %v4477_v1  ;;  %4661 = vmatpush.msra.mxu3 %v6701_v42  ;;  %v8693_v1 = vpack.i.bf16 %v8554_v2, %v8548_v57  ;;  %v8713_v57 = vpack.i.bf16 %v8589_v62, %v8583_v25 }
0x338f   : > { %4510 = vrot.lane.b32.xlu0 %v4309_v47, %s7048_s10 }
0x33ee   : > { %v4479_v20 = vpop.xlane.xlu0 %4478 }
0x33ef   : > { %7001 = vrcp.f32 %v4479_v20 }
0x33f5   : > { %v7002_v50 = vpop.eup %7001 }
0x33f6   : > { %v4481_v6 = vmul.f32 %v7002_v50, %v7000_v58 }
0x33f8   : > { %5817 = vmatmul.msk.f32.vlgmr.msrb.gmra.mxu0 %vm315_vm5, %v4481_v6 }
0x3400   : > { %5821 = vmatmul.msk.f32.vlgmr.msra.gmra.mxu0 %vm1918_vm7, %v7706_v8 }
0x3401   : > { %v4511_v7 = vpop.permute.xlu0 %4510 }
0x3402   : > { %v4518_v53 = vsel %vm184_vm0, %v4517_v59, %v4511_v7 }
0x3475   : > { %v4502_v22 = vpop.f32.mrf.mxu0 }
0x3476   : > { %4514 = vrot.lane.b32.xlu1 %v4502_v22, %s7041_s13 }
0x347d   : > { %v4689_v24 = vpop.f32.mrf.mxu0 }
0x347e   : > { %4747 = vmatpush.msrb.mxu2 %v4689_v24  ;;  %v4577_v24 = vld [vmem:[%s9073_s2 + $0xcc0] ss:$0 sm:$0xff] }
0x34e8   : > { %v4515_v30 = vpop.permute.xlu1 %4514 }
0x34e9   : > { %v4519_v10 = vsel %vm2675_vm11, %v4518_v53, %v4515_v30 }
0x34ea   : > { %5818 = vmatmul.msk.f32.vlgmr.msra.gmra.mxu1 %vm1918_vm7, %v4519_v10 }
0x3567   : > { %v4549_v33 = vpop.f32.mrf.mxu1 }
0x3568   : > { %v4550_v54 = vadd.f32 %v4549_v33, %v4528_v18 }
0x356a   : > { %v4552_v36 = vadd.f32 %v4550_v54, %v8399_v35  ;;  %v6704_v35 = vpop.permute.xlu2 %6703 }
0x356b   : > { %v6706_v43 = vunpack.i.h.bf16 %v6704_v35  ;;  %v6705_v44 = vunpack.i.l.bf16 %v6704_v35 }
0x356c   : > { %v4553_v37 = vsel %vm1918_vm7, %v4552_v36, 0.0 }
0x356d   : > { %4554 = vadd.xlane.f32.xlu0 %v4553_v37  ;;  %4662 = vmatpush.msra.mxu3 %v6705_v44 }
0x356f   : > { %4663 = vmatpush.msra.mxu3 %v6706_v43 }
0x3572   : > { %v6709_v45 = vpop.permute.xlu2 %6708 }
0x3573   : > { %v6711_v39 = vunpack.i.h.bf16 %v6709_v45  ;;  %v6710_v48 = vunpack.i.l.bf16 %v6709_v45 }
0x3575   : > { %4664 = vmatpush.msra.mxu3 %v6710_v48 }
0x3577   : > { %4665 = vmatpush.msra.mxu3 %v6711_v39 }
0x357a   : > { %v6724_v2 = vpop.permute.xlu2 %6723 }
0x357b   : > { %v6725_v30 = vunpack.i.l.bf16 %v6724_v2  ;;  %v6726_v10 = vunpack.i.h.bf16 %v6724_v2 }
0x3581   : > { %6713 = vrot.lane.b32.xlu0 %v8667_v28, %s7036_s28 }
0x3582   : > { %v6729_v38 = vpop.permute.xlu2 %6728 }
0x3583   : > { %v6730_v63 = vunpack.i.l.bf16 %v6729_v38  ;;  %v6731_v32 = vunpack.i.h.bf16 %v6729_v38 }
0x3585   : > { %4829 = vmatpush.msrb.mxu0 %v6730_v63 }
0x3587   : > { %4830 = vmatpush.msrb.mxu0 %v6731_v32 }
0x3589   : > { %6733 = vrot.lane.b32.xlu0 %v8663_v40, %s7040_s11 }
0x358a   : > { %v6739_v3 = vpop.permute.xlu2 %6738 }
0x358b   : > { %v6740_v20 = vunpack.i.l.bf16 %v6739_v3  ;;  %v6741_v50 = vunpack.i.h.bf16 %v6739_v3 }
0x358d   : > { %4831 = vmatpush.msrb.mxu0 %v6740_v20 }
0x358f   : > { %4832 = vmatpush.msrb.mxu0 %v6741_v50 }
0x3591   : > { %6743 = vrot.lane.b32.xlu0 %v8667_v28, %s7040_s11 }
0x3592   : > { %v6749_v6 = vpop.permute.xlu2 %6748 }
0x3593   : > { %v6751_v11 = vunpack.i.h.bf16 %v6749_v6  ;;  %v6750_v25 = vunpack.i.l.bf16 %v6749_v6 }
0x3595   : > { %4833 = vmatpush.msrb.mxu0 %v6750_v25  ;;  %v8740_v25 = vld [vmem:[%s9073_s2 + $0xc10] sm:$0xf] }
0x3597   : > { %4834 = vmatpush.msrb.mxu0 %v6751_v11 }
0x35e0   : > { %v4555_v23 = vpop.xlane.xlu0 %4554 }
0x35e1   : > { %v4556_v47 = vmul.f32 %v4555_v23, %v7958_v14 }
0x35e3   : > { %v4557_v49 = vsub.f32 %v4552_v36, %v4556_v47 }
0x35e5   : > { %v4558_v51 = vmul.f32 %v4557_v49, %v4557_v49 }
0x35e7   : > { %v4559_v56 = vsel %vm1918_vm7, %v4558_v51, 0.0 }
0x35e8   : > { %4560 = vadd.xlane.f32.xlu1 %v4559_v56 }
0x35f3   : > { %v6714_v60 = vpop.permute.xlu0 %6713 }
0x35f4   : > { %v6716_v27 = vunpack.i.h.bf16 %v6714_v60  ;;  %v6715_v58 = vunpack.i.l.bf16 %v6714_v60 }
0x35f6   : > { %4666 = vmatpush.msra.mxu3 %v6715_v58 }
0x35f8   : > { %4667 = vmatpush.msra.mxu3 %v6716_v27 }
0x35f9   : > { %5820 = vmatmul.msk.f32.vlgmr.msra.gmra.mxu3 %vm1918_vm7, %v7706_v8 }
0x35fb   : > { %v6734_v21 = vpop.permute.xlu0 %6733 }
0x35fc   : > { %v6735_v18 = vunpack.i.l.bf16 %v6734_v21  ;;  %v6736_v36 = vunpack.i.h.bf16 %v6734_v21 }
0x3601   : > { %6718 = vrot.lane.b32.xlu1 %v8650_v31, %s7040_s11 }
0x3603   : > { %v6744_v54 = vpop.permute.xlu0 %6743 }
0x3604   : > { %v6745_v13 = vunpack.i.l.bf16 %v6744_v54  ;;  %v6746_v35 = vunpack.i.h.bf16 %v6744_v54 }
0x3609   : > { %6753 = vrot.lane.b32.xlu1 %v8667_v28, %s7041_s13 }
0x3611   : > { %6758 = vrot.lane.b32.xlu1 %v8693_v1, %s7040_s11 }
0x3619   : > { %6763 = vrot.lane.b32.xlu1 %v8650_v31, %s7034_s22 }
0x3621   : > { %6768 = vrot.lane.b32.xlu1 %v8701_v0, %s7040_s11 }
0x3629   : > { %6773 = vrot.lane.b32.xlu1 %v8657_v34, %s7034_s22 }
0x3631   : > { %6778 = vrot.lane.b32.xlu1 %v8650_v31, %s7048_s10 }
0x3639   : > { %6788 = vrot.lane.b32.xlu1 %v8663_v40, %s7034_s22 }
0x3641   : > { %6798 = vrot.lane.b32.xlu1 %v8713_v57, %s7040_s11 }
0x3649   : > { %6803 = vrot.lane.b32.xlu1 %v8667_v28, %s7034_s22 }
0x3651   : > { %6813 = vrot.lane.b32.xlu1 %v8667_v28, %s7048_s10 }
0x3659   : > { %6818 = vrot.lane.b32.xlu1 %v8693_v1, %s7034_s22 }
0x365b   : > { %v4561_v62 = vpop.xlane.xlu1 %4560 }
0x365c   : > { %v4562_v12 = vmul.f32 %v4561_v62, %v7958_v14  ;;  %v4596_v62 = vperm.slane %v8740_v25, 0 }
0x365e   : > { %v4563_v16 = vadd.f32 1e-06, %v4562_v12 }
0x3660   : > { %7003 = vrsqrt.f32 %v4563_v16  ;;  %vm4570_vm12 = vweird.f32 %v4563_v16 }
0x3661   : > { %6823 = vrot.lane.b32.xlu1 %v8650_v31, %s7039_s4 }
0x3666   : > { %v7004_v4 = vpop.eup %7003 }
0x3667   : > { %v4565_v46 = vmul.f32 %v7004_v4, %v4563_v16  ;;  %vm4571_vm10 = vweird.f32 %v7004_v4 }
0x3668   : > { %vm4572_vm13 = vmor %vm4570_vm12, %vm4571_vm10 }
0x3669   : > { %v4566_v61 = vmul.f32 %v7004_v4, %v4565_v46  ;;  %6828 = vrot.lane.b32.xlu1 %v8701_v0, %s7034_s22 }
0x366b   : > { %v4567_v15 = vmul.f32 0.5, %v4566_v61 }
0x366d   : > { %v4568_v29 = vsub.f32 1.5, %v4567_v15  ;;  %v8748_v15 = vpack.i.bf16 %v8577_v9, %v8572_v19 }
0x366f   : > { %v4569_v17 = vmul.f32 %v7004_v4, %v4568_v29 }
0x3671   : > { %v4573_v52 = vsel %vm4572_vm13, %v7004_v4, %v4569_v17  ;;  %6833 = vrot.lane.b32.xlu1 %v8657_v34, %s7039_s4 }
0x3672   : > { %v4574_v22 = vmul.f32 %v4573_v52, %v4557_v49 }
0x3673   : > { %v6719_v26 = vpop.permute.xlu1 %6718 }
0x3674   : > { %v4576_v5 = vmul.f32 %v4575_v55, %v4574_v22  ;;  %v6721_v7 = vunpack.i.h.bf16 %v6719_v26  ;;  %v6720_v59 = vunpack.i.l.bf16 %v6719_v26 }
0x3676   : > { %v8726_v53 = vadd.f32 %v4577_v24, %v4576_v5  ;;  %4785 = vmatpush.msrb.mxu3 %v6720_v59 }
0x3678   : > { %5819 = vmatmul.msk.f32.vlgmr.msra.gmra.mxu2 %vm1918_vm7, %v8726_v53  ;;  %4786 = vmatpush.msrb.mxu3 %v6721_v7 }
0x3679   : > { %6838 = vrot.lane.b32.xlu1 %v8650_v31, %s7046_s19 }
0x367a   : > { %4787 = vmatpush.msrb.mxu3 %v6725_v30 }
0x367b   : > { %v6754_v33 = vpop.permute.xlu1 %6753 }
0x367c   : > { %v6756_v37 = vunpack.i.h.bf16 %v6754_v33  ;;  %v6755_v41 = vunpack.i.l.bf16 %v6754_v33  ;;  %v4669_v42 = vpop.f32.mrf.mxu3  ;;  %4788 = vmatpush.msrb.mxu3 %v6726_v10 }
0x367d   : > { %5822 = vmatpush.xpose.msk.msrb.mxu1 %vm860_vm6, %v4669_v42 }
0x367e   : > { %4789 = vmatpush.msrb.mxu3 %v6735_v18  ;;  %4835 = vmatpush.msrb.mxu0 %v6755_v41 }
0x3680   : > { %4790 = vmatpush.msrb.mxu3 %v6736_v36  ;;  %4836 = vmatpush.msrb.mxu0 %v6756_v37  ;;  %v4752_v36 = vperm.slane %v8740_v25, 1 }
0x3681   : > { %5826 = vmatmul.msk.f32.vlgmr.msrb.gmra.mxu0 %vm1918_vm7, %v7706_v8  ;;  %6853 = vrot.lane.b32.xlu1 %v8657_v34, %s7046_s19 }
0x3682   : > { %4791 = vmatpush.msrb.mxu3 %v6745_v13 }
0x3683   : > { %v6759_v43 = vpop.permute.xlu1 %6758 }
0x3684   : > { %v6761_v44 = vunpack.i.h.bf16 %v6759_v43  ;;  %v6760_v45 = vunpack.i.l.bf16 %v6759_v43  ;;  %4792 = vmatpush.msrb.mxu3 %v6746_v35 }
0x3685   : > { %5825 = vmatmul.msk.f32.vlgmr.msrb.gmra.mxu3 %vm1918_vm7, %v8726_v53 }
0x3686   : > { %4881 = vmatpush.msra.mxu1 %v6760_v45 }
0x3688   : > { %4882 = vmatpush.msra.mxu1 %v6761_v44 }
0x3689   : > { %6858 = vrot.lane.b32.xlu1 %v8713_v57, %s7034_s22 }
0x368b   : > { %v6764_v39 = vpop.permute.xlu1 %6763 }
0x368c   : > { %v6766_v48 = vunpack.i.h.bf16 %v6764_v39  ;;  %v6765_v23 = vunpack.i.l.bf16 %v6764_v39 }
0x368e   : > { %4986 = vmatpush.msra.mxu3 %v6765_v23 }
0x3690   : > { %4987 = vmatpush.msra.mxu3 %v6766_v48 }
0x3691   : > { %6863 = vrot.lane.b32.xlu1 %v8667_v28, %s7039_s4 }
0x3693   : > { %v6769_v47 = vpop.permute.xlu1 %6768 }
0x3694   : > { %v6771_v49 = vunpack.i.h.bf16 %v6769_v47  ;;  %v6770_v51 = vunpack.i.l.bf16 %v6769_v47 }
0x3696   : > { %4883 = vmatpush.msra.mxu1 %v6770_v51 }
0x3698   : > { %4884 = vmatpush.msra.mxu1 %v6771_v49 }
0x369b   : > { %v6774_v56 = vpop.permute.xlu1 %6773 }
0x369c   : > { %v6776_v60 = vunpack.i.h.bf16 %v6774_v56  ;;  %v6775_v27 = vunpack.i.l.bf16 %v6774_v56 }
0x369e   : > { %4988 = vmatpush.msra.mxu3 %v6775_v27 }
0x36a0   : > { %4989 = vmatpush.msra.mxu3 %v6776_v60 }
0x36a3   : > { %v6779_v58 = vpop.permute.xlu1 %6778 }
0x36a4   : > { %v6781_v2 = vunpack.i.h.bf16 %v6779_v58  ;;  %v6780_v38 = vunpack.i.l.bf16 %v6779_v58 }
0x36a6   : > { %5030 = vmatpush.msra.mxu0 %v6780_v38 }
0x36a8   : > { %5031 = vmatpush.msra.mxu0 %v6781_v2 }
0x36ab   : > { %v6789_v3 = vpop.permute.xlu1 %6788 }
0x36ac   : > { %v6791_v63 = vunpack.i.h.bf16 %v6789_v3  ;;  %v6790_v32 = vunpack.i.l.bf16 %v6789_v3 }
0x36ae   : > { %4990 = vmatpush.msra.mxu3 %v6790_v32 }
0x36b0   : > { %4991 = vmatpush.msra.mxu3 %v6791_v63 }
0x36b3   : > { %v6799_v20 = vpop.permute.xlu1 %6798 }
0x36b4   : > { %v6800_v24 = vunpack.i.l.bf16 %v6799_v20  ;;  %v6801_v26 = vunpack.i.h.bf16 %v6799_v20 }
0x36bb   : > { %v6804_v50 = vpop.permute.xlu1 %6803 }
0x36bc   : > { %v6806_v6 = vunpack.i.h.bf16 %v6804_v50  ;;  %v6805_v11 = vunpack.i.l.bf16 %v6804_v50 }
0x36be   : > { %4992 = vmatpush.msra.mxu3 %v6805_v11 }
0x36c0   : > { %4993 = vmatpush.msra.mxu3 %v6806_v6 }
0x36c1   : > { %5831 = vmatmul.msk.f32.vlgmr.msra.gmra.mxu3 %vm1918_vm7, %v8726_v53 }
0x36c3   : > { %v6814_v37 = vpop.permute.xlu1 %6813 }
0x36c4   : > { %v6815_v13 = vunpack.i.l.bf16 %v6814_v37  ;;  %v6816_v43 = vunpack.i.h.bf16 %v6814_v37 }
0x36cb   : > { %v6819_v31 = vpop.permute.xlu1 %6818 }
0x36cc   : > { %v6820_v47 = vunpack.i.l.bf16 %v6819_v31 }
0x36d3   : > { %v6824_v49 = vpop.permute.xlu1 %6823 }
0x36d4   : > { %v6826_v51 = vunpack.i.h.bf16 %v6824_v49  ;;  %v6825_v56 = vunpack.i.l.bf16 %v6824_v49 }
0x36d6   : > { %5179 = vmatpush.msrb.mxu3 %v6825_v56 }
0x36d8   : > { %5180 = vmatpush.msrb.mxu3 %v6826_v51 }
0x36db   : > { %v6829_v60 = vpop.permute.xlu1 %6828 }
0x36dc   : > { %v6831_v27 = vunpack.i.h.bf16 %v6829_v60  ;;  %v6830_v58 = vunpack.i.l.bf16 %v6829_v60 }
0x36e3   : > { %v6834_v2 = vpop.permute.xlu1 %6833 }
0x36e4   : > { %v6836_v38 = vunpack.i.h.bf16 %v6834_v2  ;;  %v6835_v3 = vunpack.i.l.bf16 %v6834_v2 }
0x36e6   : > { %5181 = vmatpush.msrb.mxu3 %v6835_v3 }
0x36e8   : > { %5182 = vmatpush.msrb.mxu3 %v6836_v38 }
0x36fb   : > { %v4617_v12 = vpop.f32.mrf.mxu2 }
0x36fc   : > { %v4618_v16 = vadd.f32 %v4617_v12, %v4596_v62 }
0x36fe   : > { %5823 = vmatmul.msk.f32.vlgmr.msrb.gmra.mxu1 %vm860_vm6, %v4618_v16  ;;  %v4838_v4 = vpop.f32.mrf.mxu0 }
0x36ff   : > { %5828 = vmatpush.xpose.msk.msra.mxu2 %vm860_vm6, %v4838_v4 }
0x3708   : > { %v4794_v41 = vpop.f32.mrf.mxu3 }
0x3709   : > { %v4795_v35 = vadd.f32 %v4794_v41, %v4752_v36 }
0x377b   : > { %v4715_v46 = vpop.f32.mrf.mxu1 }
0x377c   : > { %v4718_v61 = vsel %vm315_vm5, %v4715_v46, -inf }
0x377d   : > { %4719 = vmax.xlane.f32.xlu0 %v4718_v61 }
0x3791   : > { %6783 = vrot.lane.b32.xlu0 %v8748_v15, %s7040_s11 }
0x3799   : > { %6808 = vrot.lane.b32.xlu0 %v8663_v40, %s7048_s10 }
0x37f0   : > { %v4720_v29 = vpop.xlane.xlu0 %4719 }
0x37f1   : > { %v4721_v17 = vsub.f32 %v4715_v46, %v4720_v29 }
0x37f3   : > { %v4722_v55 = vmul.f32 1.442695, %v4721_v17 }
0x37f5   : > { %7005 = vpow2.f32 %v4722_v55 }
0x37fb   : > { %v7006_v52 = vpop.eup %7005 }
0x37fc   : > { %v4724_v21 = vsel %vm315_vm5, %v7006_v52, 0.0 }
0x37fd   : > { %4725 = vadd.xlane.f32.xlu2 %v4724_v21 }
0x3803   : > { %v6784_v22 = vpop.permute.xlu0 %6783 }
0x3804   : > { %v6786_v19 = vunpack.i.h.bf16 %v6784_v22  ;;  %v6785_v9 = vunpack.i.l.bf16 %v6784_v22 }
0x3806   : > { %4885 = vmatpush.msra.mxu1 %v6785_v9 }
0x3808   : > { %4886 = vmatpush.msra.mxu1 %v6786_v19 }
0x380a   : > { %4887 = vmatpush.msra.mxu1 %v6800_v24 }
0x380b   : > { %v6809_v10 = vpop.permute.xlu0 %6808 }
0x380c   : > { %4888 = vmatpush.msra.mxu1 %v6801_v26  ;;  %v6810_v54 = vunpack.i.l.bf16 %v6809_v10  ;;  %v6811_v42 = vunpack.i.h.bf16 %v6809_v10 }
0x380d   : > { %5827 = vmatmul.msk.f32.vlgmr.msra.gmra.mxu1 %vm1918_vm7, %v7706_v8 }
0x380e   : > { %5074 = vmatpush.msrb.mxu1 %v6820_v47 }
0x3815   : > { %6793 = vrot.lane.b32.xlu2 %v8657_v34, %s7048_s10  ;;  %v6821_v34 = vunpack.i.h.bf16 %v6819_v31 }
0x3817   : > { %5075 = vmatpush.msrb.mxu1 %v6821_v34 }
0x3819   : > { %5076 = vmatpush.msrb.mxu1 %v6830_v58 }
0x381b   : > { %5077 = vmatpush.msrb.mxu1 %v6831_v27 }
0x3870   : > { %v4726_v5 = vpop.xlane.xlu2 %4725 }
0x3871   : > { %7007 = vrcp.f32 %v4726_v5 }
0x3877   : > { %v7008_v7 = vpop.eup %7007 }
0x3878   : > { %v4728_v59 = vmul.f32 %v7008_v7, %v7006_v52  ;;  %v6794_v30 = vpop.permute.xlu2 %6793 }
0x3879   : > { %v6796_v18 = vunpack.i.h.bf16 %v6794_v30  ;;  %v6795_v33 = vunpack.i.l.bf16 %v6794_v30 }
0x387a   : > { %5824 = vmatmul.msk.f32.vlgmr.msrb.gmra.mxu2 %vm315_vm5, %v4728_v59 }
0x387b   : > { %5032 = vmatpush.msra.mxu0 %v6795_v33  ;;  %v4953_v33 = vperm.slane %v8740_v25, 2 }
0x387d   : > { %5033 = vmatpush.msra.mxu0 %v6796_v18 }
0x387f   : > { %5034 = vmatpush.msra.mxu0 %v6810_v54  ;;  %v4995_v54 = vpop.f32.mrf.mxu3 }
0x3880   : > { %v4996_v36 = vadd.f32 %v4995_v54, %v4953_v33 }
0x3881   : > { %5035 = vmatpush.msra.mxu0 %v6811_v42 }
0x3882   : > { %5829 = vmatmul.msk.f32.vlgmr.msra.gmra.mxu2 %vm860_vm6, %v4795_v35 }
0x3883   : > { %5036 = vmatpush.msra.mxu0 %v6815_v13 }
0x3885   : > { %5037 = vmatpush.msra.mxu0 %v6816_v43 }
0x3886   : > { %5832 = vmatmul.msk.f32.vlgmr.msra.gmra.mxu0 %vm1918_vm7, %v7706_v8 }
0x388a   : > { %v4890_v44 = vpop.f32.mrf.mxu1 }
0x388b   : > { %4948 = vmatpush.msrb.mxu2 %v4890_v44 }
0x38fd   : > { %v8780_v45 = vpop.f32.mrf.mxu2 }
0x3903   : > { %v5039_v39 = vpop.f32.mrf.mxu0 }
0x3904   : > { %5834 = vmatpush.xpose.msk.msra.mxu2 %vm860_vm6, %v5039_v39 }
0x3905   : > { %v4916_v48 = vpop.f32.mrf.mxu2 }
0x3906   : > { %v4919_v23 = vsel %vm315_vm5, %v4916_v48, -inf }
0x3907   : > { %4920 = vmax.xlane.f32.xlu2 %v4919_v23 }
0x391f   : > { %6843 = vrot.lane.b32.xlu2 %v8748_v15, %s7034_s22 }
0x3927   : > { %6873 = vrot.lane.b32.xlu2 %v8667_v28, %s7046_s19 }
0x392f   : > { %6878 = vrot.lane.b32.xlu2 %v8693_v1, %s7039_s4  ;;  %v6839_v1 = vpop.permute.xlu1 %6838 }
0x3930   : > { %v6841_v63 = vunpack.i.h.bf16 %v6839_v1  ;;  %v6840_v32 = vunpack.i.l.bf16 %v6839_v1 }
0x3932   : > { %5223 = vmatpush.msrb.mxu0 %v6840_v32 }
0x3934   : > { %5224 = vmatpush.msrb.mxu0 %v6841_v63  ;;  %v5146_v63 = vperm.slane %v8740_v25, 3 }
0x3937   : > { %6883 = vrot.lane.b32.xlu2 %v8701_v0, %s7039_s4  ;;  %v6854_v0 = vpop.permute.xlu1 %6853 }
0x3938   : > { %v6856_v20 = vunpack.i.h.bf16 %v6854_v0  ;;  %v6855_v50 = vunpack.i.l.bf16 %v6854_v0 }
0x393a   : > { %5225 = vmatpush.msrb.mxu0 %v6855_v50 }
0x393c   : > { %5226 = vmatpush.msrb.mxu0 %v6856_v20 }
0x393f   : > { %6888 = vrot.lane.b32.xlu2 %v8748_v15, %s7039_s4  ;;  %v6859_v16 = vpop.permute.xlu1 %6858 }
0x3940   : > { %v6860_v61 = vunpack.i.l.bf16 %v6859_v16  ;;  %v6861_v29 = vunpack.i.h.bf16 %v6859_v16 }
0x3947   : > { %6893 = vrot.lane.b32.xlu2 %v8713_v57, %s7039_s4  ;;  %v6864_v41 = vpop.permute.xlu1 %6863 }
0x3948   : > { %v6865_v35 = vunpack.i.l.bf16 %v6864_v41  ;;  %v6866_v43 = vunpack.i.h.bf16 %v6864_v41  ;;  %v5427_v41 = vld [vmem:[%s9073_s2 + $0xd60] sm:$0xff] }
0x397a   : > { %v4921_v6 = vpop.xlane.xlu2 %4920 }
0x397b   : > { %v4922_v11 = vsub.f32 %v4916_v48, %v4921_v6 }
0x397d   : > { %v4923_v62 = vmul.f32 1.442695, %v4922_v11 }
0x397f   : > { %7009 = vpow2.f32 %v4923_v62 }
0x3982   : > { %v6844_v12 = vpop.permute.xlu2 %6843 }
0x3983   : > { %v6846_v57 = vunpack.i.h.bf16 %v6844_v12  ;;  %v6845_v4 = vunpack.i.l.bf16 %v6844_v12 }
0x3985   : > { %v7010_v46 = vpop.eup %7009  ;;  %5078 = vmatpush.msrb.mxu1 %v6845_v4 }
0x3986   : > { %v4925_v15 = vsel %vm315_vm5, %v7010_v46, 0.0 }
0x3987   : > { %4926 = vadd.xlane.f32.xlu0 %v4925_v15  ;;  %5079 = vmatpush.msrb.mxu1 %v6846_v57  ;;  %v5360_v15 = vld [vmem:[%s9073_s2 + $0xc80] sm:$0xff] }
0x3989   : > { %5080 = vmatpush.msrb.mxu1 %v6860_v61  ;;  %v5361_v61 = vld [vmem:[%s9073_s2 + $0xc90] sm:$0xff] }
0x398a   : > { %v6874_v17 = vpop.permute.xlu2 %6873 }
0x398b   : > { %5081 = vmatpush.msrb.mxu1 %v6861_v29  ;;  %v6875_v23 = vunpack.i.l.bf16 %v6874_v17  ;;  %v6876_v31 = vunpack.i.h.bf16 %v6874_v17  ;;  %v5359_v29 = vld [vmem:[%s9073_s2 + $0xc70] sm:$0xff]  ;;  %v5358_v17 = vld [vmem:[%s9073_s2 + $0xc60] sm:$0xff] }
0x398c   : > { %5833 = vmatmul.msk.f32.vlgmr.msrb.gmra.mxu1 %vm1918_vm7, %v7706_v8 }
0x3992   : > { %v6879_v28 = vpop.permute.xlu2 %6878 }
0x3993   : > { %v6881_v55 = vunpack.i.h.bf16 %v6879_v28  ;;  %v6880_v52 = vunpack.i.l.bf16 %v6879_v28  ;;  %v5357_v28 = vld [vmem:[%s9073_s2 + $0xc50] sm:$0xff] }
0x3995   : > { %5267 = vmatpush.msra.mxu1 %v6880_v52  ;;  %v5355_v52 = vld [vmem:[%s9073_s2 + $0xc30] sm:$0xff] }
0x3997   : > { %5268 = vmatpush.msra.mxu1 %v6881_v55  ;;  %v5356_v55 = vld [vmem:[%s9073_s2 + $0xc40] sm:$0xff] }
0x399a   : > { %v6884_v21 = vpop.permute.xlu2 %6883 }
0x399b   : > { %v6886_v22 = vunpack.i.h.bf16 %v6884_v21  ;;  %v6885_v19 = vunpack.i.l.bf16 %v6884_v21  ;;  %6848 = vrot.lane.b32.xlu0 %v8663_v40, %s7039_s4 }
0x399d   : > { %5269 = vmatpush.msra.mxu1 %v6885_v19 }
0x399f   : > { %5270 = vmatpush.msra.mxu1 %v6886_v22  ;;  %v5354_v22 = vld [vmem:[%s9073_s2 + $0xc20] sm:$0xff] }
0x39a2   : > { %v6889_v9 = vpop.permute.xlu2 %6888 }
0x39a3   : > { %v6891_v24 = vunpack.i.h.bf16 %v6889_v9  ;;  %v6890_v26 = vunpack.i.l.bf16 %v6889_v9  ;;  %6868 = vrot.lane.b32.xlu0 %v8663_v40, %s7046_s19 }
0x39a5   : > { %5271 = vmatpush.msra.mxu1 %v6890_v26 }
0x39a7   : > { %5272 = vmatpush.msra.mxu1 %v6891_v24 }
0x39aa   : > { %v6894_v5 = vpop.permute.xlu2 %6893 }
0x39ab   : > { %v6896_v7 = vunpack.i.h.bf16 %v6894_v5  ;;  %v6895_v59 = vunpack.i.l.bf16 %v6894_v5 }
0x39ad   : > { %5273 = vmatpush.msra.mxu1 %v6895_v59  ;;  %v5362_v59 = vld [vmem:[%s9073_s2 + $0xca0] ss:$0 sm:$0xff] }
0x39af   : > { %5274 = vmatpush.msra.mxu1 %v6896_v7 }
0x39b0   : > { %5839 = vmatmul.msk.f32.vlgmr.msra.gmra.mxu1 %vm1918_vm7, %v7706_v8 }
0x39fa   : > { %v4927_v30 = vpop.xlane.xlu0 %4926 }
0x39fb   : > { %7011 = vrcp.f32 %v4927_v30 }
0x3a01   : > { %v7012_v10 = vpop.eup %7011 }
0x3a02   : > { %v4929_v18 = vmul.f32 %v7012_v10, %v7010_v46 }
0x3a04   : > { %5830 = vmatmul.msk.f32.vlgmr.msrb.gmra.mxu2 %vm315_vm5, %v4929_v18 }
0x3a09   : > { %v5083_v40 = vpop.f32.mrf.mxu1 }
0x3a0a   : > { %5141 = vmatpush.msrb.mxu2 %v5083_v40 }
0x3a0c   : > { %5835 = vmatmul.msk.f32.vlgmr.msra.gmra.mxu2 %vm860_vm6, %v4996_v36 }
0x3a0d   : > { %v6849_v37 = vpop.permute.xlu0 %6848 }
0x3a0e   : > { %v6851_v42 = vunpack.i.h.bf16 %v6849_v37  ;;  %v6850_v13 = vunpack.i.l.bf16 %v6849_v37 }
0x3a10   : > { %5183 = vmatpush.msrb.mxu3 %v6850_v13  ;;  %v5426_v13 = vld [vmem:[%s9073_s2 + $0xd58] sm:$0xff] }
0x3a12   : > { %5184 = vmatpush.msrb.mxu3 %v6851_v42  ;;  %v5425_v42 = vld [vmem:[%s9073_s2 + $0xd50] sm:$0xff] }
0x3a14   : > { %5185 = vmatpush.msrb.mxu3 %v6865_v35  ;;  %v5423_v35 = vld [vmem:[%s9073_s2 + $0xd40] sm:$0xff] }
0x3a15   : > { %v6869_v44 = vpop.permute.xlu0 %6868 }
0x3a16   : > { %v6871_v39 = vunpack.i.h.bf16 %v6869_v44  ;;  %v6870_v48 = vunpack.i.l.bf16 %v6869_v44  ;;  %5186 = vmatpush.msrb.mxu3 %v6866_v43  ;;  %v5424_v43 = vld [vmem:[%s9073_s2 + $0xd48] sm:$0xff]  ;;  %v5421_v44 = vld [vmem:[%s9073_s2 + $0xd30] sm:$0xff] }
0x3a17   : > { %5837 = vmatmul.msk.f32.vlgmr.msrb.gmra.mxu3 %vm1918_vm7, %v8726_v53 }
0x3a18   : > { %5227 = vmatpush.msrb.mxu0 %v6870_v48  ;;  %5374 = vmatpush.msra.mxu3 %v5361_v61  ;;  %v5419_v48 = vld [vmem:[%s9073_s2 + $0xd20] sm:$0xff] }
0x3a1a   : > { %5228 = vmatpush.msrb.mxu0 %v6871_v39  ;;  %5375 = vmatpush.msra.mxu3 %v5360_v15  ;;  %v5422_v39 = vld [vmem:[%s9073_s2 + $0xd38] sm:$0xff]  ;;  %v5487_v15 = vld [vmem:[%s9073_s2 + $0xde0] sm:$0xff] }
0x3a1c   : > { %5229 = vmatpush.msrb.mxu0 %v6875_v23  ;;  %5376 = vmatpush.msra.mxu3 %v5359_v29  ;;  %v5420_v23 = vld [vmem:[%s9073_s2 + $0xd28] sm:$0xff]  ;;  %v5503_v29 = vld [vmem:[%s9073_s2 + $0xee0] sm:$0xff] }
0x3a1e   : > { %5230 = vmatpush.msrb.mxu0 %v6876_v31  ;;  %5377 = vmatpush.msra.mxu3 %v5358_v17  ;;  %v5417_v31 = vld [vmem:[%s9073_s2 + $0xd10] sm:$0xff] }
0x3a1f   : > { %5838 = vmatmul.msk.f32.vlgmr.msrb.gmra.mxu0 %vm1918_vm7, %v7706_v8 }
0x3a20   : > { %5378 = vmatpush.msra.mxu3 %v5357_v28  ;;  %5447 = vmatpush.msra.mxu0 %v5427_v41  ;;  %v5486_v28 = vld [vmem:[%s9073_s2 + $0xdd0] sm:$0xff] }
0x3a21   : > { %v5844_v41 = vld [vmem:[%s9073_s2 + $0xd70] ss:$8 sm:$0x3] }
0x3a22   : > { %5379 = vmatpush.msra.mxu3 %v5356_v55  ;;  %5448 = vmatpush.msra.mxu0 %v5425_v42  ;;  %v5502_v55 = vld [vmem:[%s9073_s2 + $0xed0] sm:$0xff]  ;;  %v5433_v42 = vperm.slane %v5844_v41, 1 }
0x3a24   : > { %5380 = vmatpush.msra.mxu3 %v5355_v52  ;;  %5449 = vmatpush.msra.mxu0 %v5423_v35 }
0x3a26   : > { %5381 = vmatpush.msra.mxu3 %v5354_v22  ;;  %5450 = vmatpush.msra.mxu0 %v5421_v44  ;;  %v5501_v22 = vld [vmem:[%s9073_s2 + $0xec0] sm:$0xff] }
0x3a28   : > { %5451 = vmatpush.msra.mxu0 %v5419_v48 }
0x3a2a   : > { %5452 = vmatpush.msra.mxu0 %v5417_v31 }
0x3a2d   : > { %v5276_v1 = vpop.f32.mrf.mxu1 }
0x3a87   : > { %v4950_v34 = vpop.f32.mrf.mxu2 }
0x3a8f   : > { %v5109_v47 = vpop.f32.mrf.mxu2 }
0x3a90   : > { %v5112_v49 = vsel %vm315_vm5, %v5109_v47, -inf }
0x3a91   : > { %5113 = vmax.xlane.f32.xlu1 %v5112_v49  ;;  %v5416_v49 = vld [vmem:[%s9073_s2 + $0xd08] sm:$0xff] }
0x3a9a   : > { %v5188_v32 = vpop.f32.mrf.mxu3 }
0x3a9b   : > { %v5189_v0 = vadd.f32 %v5188_v32, %v5146_v63  ;;  %v5493_v63 = vld [vmem:[%s9073_s2 + $0xe40] sm:$0xff] }
0x3a9c   : > { %v5232_v51 = vpop.f32.mrf.mxu0  ;;  %v5509_v32 = vld [vmem:[%s9073_s2 + $0xf40] sm:$0xff] }
0x3a9d   : > { %5840 = vmatpush.xpose.msk.msra.mxu2 %vm860_vm6, %v5232_v51  ;;  %v5413_v51 = vld [vmem:[%s9073_s2 + $0xcf0] sm:$0xff] }
0x3b04   : > { %v5114_v56 = vpop.xlane.xlu1 %5113 }
0x3b05   : > { %v5115_v60 = vsub.f32 %v5109_v47, %v5114_v56  ;;  %v5415_v47 = vld [vmem:[%s9073_s2 + $0xd00] sm:$0xff]  ;;  %v5414_v56 = vld [vmem:[%s9073_s2 + $0xcf8] sm:$0xff] }
0x3b06   : > { %5453 = vmatpush.msra.mxu0 %v5415_v47 }
0x3b07   : > { %v5116_v27 = vmul.f32 1.442695, %v5115_v60  ;;  %v5496_v60 = vld [vmem:[%s9073_s2 + $0xe70] sm:$0xff] }
0x3b08   : > { %5454 = vmatpush.msra.mxu0 %v5413_v51 }
0x3b09   : > { %7013 = vpow2.f32 %v5116_v27  ;;  %v5512_v27 = vld [vmem:[%s9073_s2 + $0xf70] sm:$0xff] }
0x3b0a   : > { %5534 = vmatpush.msrb.mxu3 %v5512_v27 }
0x3b0f   : > { %v7014_v58 = vpop.eup %7013 }
0x3b10   : > { %v5118_v2 = vsel %vm315_vm5, %v7014_v58, 0.0 }
0x3b11   : > { %5119 = vadd.xlane.f32.xlu0 %v5118_v2  ;;  %v5511_v2 = vld [vmem:[%s9073_s2 + $0xf60] sm:$0xff] }
0x3b12   : > { %5535 = vmatpush.msrb.mxu3 %v5511_v2 }
0x3b25   : > { %5340 = vrot.lane.b32.xlu0 %v4950_v34, %s7046_s19  ;;  %v5418_v34 = vld [vmem:[%s9073_s2 + $0xd18] sm:$0xff] }
0x3b84   : > { %v5120_v38 = vpop.xlane.xlu0 %5119 }
0x3b85   : > { %7015 = vrcp.f32 %v5120_v38  ;;  %v5494_v38 = vld [vmem:[%s9073_s2 + $0xe50] sm:$0xff] }
0x3b8b   : > { %v7016_v8 = vpop.eup %7015 }
0x3b8c   : > { %v5122_v3 = vmul.f32 %v7016_v8, %v7014_v58  ;;  %v5495_v58 = vld [vmem:[%s9073_s2 + $0xe60] sm:$0xff]  ;;  %v5510_v8 = vld [vmem:[%s9073_s2 + $0xf50] sm:$0xff] }
0x3b8d   : > { %5536 = vmatpush.msrb.mxu3 %v5510_v8  ;;  %v5588_v8 = vld [vmem:[%s9073_s2 + $0x1020] sm:$0xff] }
0x3b8e   : > { %5836 = vmatmul.msk.f32.vlgmr.msrb.gmra.mxu2 %vm315_vm5, %v5122_v3  ;;  %5601 = vmatpush.msrb.mxu0 %v5588_v8 }
0x3b8f   : > { %5334 = vmatpush.msrb.mxu2 %v5276_v1  ;;  %5537 = vmatpush.msrb.mxu3 %v5509_v32  ;;  %v5584_v32 = vld [vmem:[%s9073_s2 + $0xfe0] sm:$0xff] }
0x3b96   : > { %5841 = vmatmul.msk.f32.vlgmr.msra.gmra.mxu2 %vm860_vm6, %v5189_v0 }
0x3b97   : > { %v5341_v19 = vpop.permute.xlu0 %5340  ;;  %5514 = vmatpush.msra.mxu2 %v5496_v60 }
0x3b98   : > { %v5351_v24 = vsel %vm860_vm6, %v8780_v45, %v5341_v19 }
0x3b99   : > { %5515 = vmatpush.msra.mxu2 %v5495_v58 }
0x3b9b   : > { %5516 = vmatpush.msra.mxu2 %v5494_v38 }
0x3b9d   : > { %5517 = vmatpush.msra.mxu2 %v5493_v63  ;;  %v5585_v63 = vld [vmem:[%s9073_s2 + $0xff0] sm:$0xff] }
0x3c11   : > { %v5143_v20 = vpop.f32.mrf.mxu2 }
0x3c19   : > { %v5302_v50 = vpop.f32.mrf.mxu2 }
0x3c1a   : > { %v5305_v6 = vsel %vm315_vm5, %v5302_v50, -inf }
0x3c1b   : > { %5306 = vmax.xlane.f32.xlu2 %v5305_v6  ;;  %v5491_v6 = vld [vmem:[%s9073_s2 + $0xe20] sm:$0xff] }
0x3c8e   : > { %v5307_v11 = vpop.xlane.xlu2 %5306 }
0x3c8f   : > { %v5308_v62 = vsub.f32 %v5302_v50, %v5307_v11  ;;  %v5508_v50 = vld [vmem:[%s9073_s2 + $0xf30] sm:$0xff]  ;;  %v5507_v11 = vld [vmem:[%s9073_s2 + $0xf20] sm:$0xff] }
0x3c90   : > { %5538 = vmatpush.msrb.mxu3 %v5508_v50  ;;  %v5581_v50 = vld [vmem:[%s9073_s2 + $0xfb0] sm:$0xff] }
0x3c91   : > { %v5309_v12 = vmul.f32 1.442695, %v5308_v62  ;;  %v5490_v62 = vld [vmem:[%s9073_s2 + $0xe10] sm:$0xff] }
0x3c92   : > { %5539 = vmatpush.msrb.mxu3 %v5507_v11 }
0x3c93   : > { %7017 = vpow2.f32 %v5309_v12  ;;  %v5506_v12 = vld [vmem:[%s9073_s2 + $0xf10] sm:$0xff] }
0x3c94   : > { %5540 = vmatpush.msrb.mxu3 %v5506_v12 }
0x3c99   : > { %v7018_v16 = vpop.eup %7017 }
0x3c9a   : > { %v5311_v57 = vsel %vm315_vm5, %v7018_v16, 0.0 }
0x3c9b   : > { %5312 = vadd.xlane.f32.xlu1 %v5311_v57  ;;  %v5505_v57 = vld [vmem:[%s9073_s2 + $0xf00] sm:$0xff] }
0x3c9c   : > { %5541 = vmatpush.msrb.mxu3 %v5505_v57 }
0x3cb4   : > { %5344 = vrot.lane.b32.xlu1 %v5143_v20, %s7048_s10  ;;  %v5492_v20 = vld [vmem:[%s9073_s2 + $0xe30] sm:$0xff] }
0x3cb5   : > { %5518 = vmatpush.msra.mxu2 %v5492_v20  ;;  %v5582_v20 = vld [vmem:[%s9073_s2 + $0xfc0] sm:$0xff] }
0x3cb7   : > { %5519 = vmatpush.msra.mxu2 %v5491_v6 }
0x3cb9   : > { %5520 = vmatpush.msra.mxu2 %v5490_v62 }
0x3d0e   : > { %v5313_v25 = vpop.xlane.xlu1 %5312 }
0x3d0f   : > { %7019 = vrcp.f32 %v5313_v25 }
0x3d15   : > { %v7020_v4 = vpop.eup %7019 }
0x3d16   : > { %v5315_v46 = vmul.f32 %v7020_v4, %v7018_v16  ;;  %v5489_v16 = vld [vmem:[%s9073_s2 + $0xe00] sm:$0xff]  ;;  %v5488_v4 = vld [vmem:[%s9073_s2 + $0xdf0] sm:$0xff] }
0x3d17   : > { %5521 = vmatpush.msra.mxu2 %v5489_v16 }
0x3d18   : > { %5842 = vmatmul.msk.f32.vlgmr.msrb.gmra.mxu2 %vm315_vm5, %v5315_v46  ;;  %v5504_v46 = vld [vmem:[%s9073_s2 + $0xef0] sm:$0xff] }
0x3d19   : > { %5522 = vmatpush.msra.mxu2 %v5488_v4  ;;  %5542 = vmatpush.msrb.mxu3 %v5504_v46 }
0x3d1b   : > { %5523 = vmatpush.msra.mxu2 %v5487_v15  ;;  %5543 = vmatpush.msrb.mxu3 %v5503_v29 }
0x3d1d   : > { %5524 = vmatpush.msra.mxu2 %v5486_v28  ;;  %5544 = vmatpush.msrb.mxu3 %v5502_v55  ;;  %v5589_v55 = vld [vmem:[%s9073_s2 + $0x1030] ss:$0 sm:$0xff] }
0x3d1f   : > { %5545 = vmatpush.msrb.mxu3 %v5501_v22 }
0x3d26   : > { %v5345_v9 = vpop.permute.xlu1 %5344 }
0x3d27   : > { %v5352_v26 = vsel %vm184_vm0, %v5351_v24, %v5345_v9  ;;  %v5484_v9 = vld [vmem:[%s9073_s2 + $0xdb0] sm:$0xff] }
0x3d28   : > { %v5500_v24 = vld [vmem:[%s9073_s2 + $0xeb0] sm:$0xff] }
0x3d29   : > { %5546 = vmatpush.msrb.mxu3 %v5500_v24 }
0x3d9b   : > { %v5336_v21 = vpop.f32.mrf.mxu2 }
0x3d9c   : > { %5348 = vrot.lane.b32.xlu0 %v5336_v21, %s7041_s13  ;;  %v5485_v21 = vld [vmem:[%s9073_s2 + $0xdc0] sm:$0xff] }
0x3d9d   : > { %5525 = vmatpush.msra.mxu2 %v5485_v21 }
0x3d9f   : > { %5526 = vmatpush.msra.mxu2 %v5484_v9 }
0x3e0e   : > { %v5349_v5 = vpop.permute.xlu0 %5348 }
0x3e0f   : > { %v5353_v7 = vsel %vm2675_vm11, %v5352_v26, %v5349_v5  ;;  %v5409_v5 = vld [vmem:[%s9073_s2 + $0xcd0] ss:$0 sm:$0xff] }
0x3e10   : > { %5843 = vmatmul.msk.f32.vlgmr.msra.gmra.mxu3 %vm1918_vm7, %v5353_v7 }
0x3e93   : > { %v5383_v30 = vpop.f32.mrf.mxu3 }
0x3e94   : > { %v5384_v10 = vadd.f32 %v5383_v30, %v5362_v59  ;;  %v5411_v30 = vld [vmem:[%s9073_s2 + $0xce0] ss:$0 sm:$0xff] }
0x3e96   : > { %v5386_v18 = vadd.f32 %v5384_v10, %v8726_v53  ;;  %v5428_v53 = vld [vmem:[%s9073_s2 + $0xd68] sm:$0xff] }
0x3e97   : > { %5467 = vmatpush.msrb.mxu1 %v5428_v53  ;;  %v5432_v53 = vperm.slane %v5844_v41, 0 }
0x3e98   : > { %v5387_v33 = vsel %vm1918_vm7, %v5386_v18, 0.0 }
0x3e99   : > { %5388 = vadd.xlane.f32.xlu0 %v5387_v33  ;;  %5468 = vmatpush.msrb.mxu1 %v5426_v13  ;;  %v5483_v33 = vld [vmem:[%s9073_s2 + $0xda0] sm:$0xff] }
0x3e9a   : > { %5527 = vmatpush.msra.mxu2 %v5483_v33 }
0x3e9b   : > { %5469 = vmatpush.msrb.mxu1 %v5424_v43 }
0x3e9d   : > { %5470 = vmatpush.msrb.mxu1 %v5422_v39 }
0x3e9f   : > { %5471 = vmatpush.msrb.mxu1 %v5420_v23  ;;  %v5513_v23 = vld [vmem:[%s9073_s2 + $0xf80] ss:$0 sm:$0xff] }
0x3ea1   : > { %5472 = vmatpush.msrb.mxu1 %v5418_v34 }
0x3ea3   : > { %5473 = vmatpush.msrb.mxu1 %v5416_v49 }
0x3ea5   : > { %5474 = vmatpush.msrb.mxu1 %v5414_v56 }
0x3f0c   : > { %v5389_v54 = vpop.xlane.xlu0 %5388 }
0x3f0d   : > { %v5390_v45 = vmul.f32 %v5389_v54, %v7958_v14  ;;  %v5499_v54 = vld [vmem:[%s9073_s2 + $0xea0] sm:$0xff] }
0x3f0e   : > { %5547 = vmatpush.msrb.mxu3 %v5499_v54 }
0x3f0f   : > { %v8861_v40 = vsub.f32 %v5386_v18, %v5390_v45  ;;  %v5482_v45 = vld [vmem:[%s9073_s2 + $0xd90] sm:$0xff] }
0x3f10   : > { %5528 = vmatpush.msra.mxu2 %v5482_v45 }
0x3f11   : > { %v5392_v36 = vmul.f32 %v8861_v40, %v8861_v40 }
0x3f13   : > { %v5393_v37 = vsel %vm1918_vm7, %v5392_v36, 0.0  ;;  %v5481_v36 = vld [vmem:[%s9073_s2 + $0xd80] sm:$0xff] }
0x3f14   : > { %5394 = vadd.xlane.f32.xlu2 %v5393_v37  ;;  %v5497_v37 = vld [vmem:[%s9073_s2 + $0xe80] sm:$0xff]  ;;  %5529 = vmatpush.msra.mxu2 %v5481_v36 }
0x3f87   : > { %v5395_v3 = vpop.xlane.xlu2 %5394 }
0x3f88   : > { %v5396_v1 = vmul.f32 %v5395_v3, %v7958_v14  ;;  %v5587_v3 = vld [vmem:[%s9073_s2 + $0x1010] sm:$0xff] }
0x3f89   : > { %5602 = vmatpush.msrb.mxu0 %v5587_v3 }
0x3f8a   : > { %v5397_v0 = vadd.f32 1e-06, %v5396_v1  ;;  %v5586_v1 = vld [vmem:[%s9073_s2 + $0x1000] sm:$0xff] }
0x3f8b   : > { %5603 = vmatpush.msrb.mxu0 %v5586_v1 }
0x3f8c   : > { %7021 = vrsqrt.f32 %v5397_v0  ;;  %vm5404_vm5 = vweird.f32 %v5397_v0 }
0x3f8d   : > { %5604 = vmatpush.msrb.mxu0 %v5585_v63 }
0x3f8f   : > { %5605 = vmatpush.msrb.mxu0 %v5584_v32 }
0x3f92   : > { %v7022_v25 = vpop.eup %7021 }
0x3f93   : > { %v5399_v61 = vmul.f32 %v7022_v25, %v5397_v0  ;;  %vm5405_vm0 = vweird.f32 %v7022_v25  ;;  %v5583_v0 = vld [vmem:[%s9073_s2 + $0xfd0] sm:$0xff] }
0x3f94   : > { %vm5406_vm6 = vmor %vm5404_vm5, %vm5405_vm0  ;;  %5606 = vmatpush.msrb.mxu0 %v5583_v0 }
0x3f95   : > { %v5400_v17 = vmul.f32 %v7022_v25, %v5399_v61  ;;  %v5577_v61 = vld [vmem:[%s9073_s2 + $0xf90] ss:$0 sm:$0xff] }
0x3f96   : > { %5607 = vmatpush.msrb.mxu0 %v5582_v20 }
0x3f97   : > { %v5401_v52 = vmul.f32 0.5, %v5400_v17 }
0x3f98   : > { %5608 = vmatpush.msrb.mxu0 %v5581_v50 }
0x3f99   : > { %v5402_v19 = vsub.f32 1.5, %v5401_v52 }
0x3f9b   : > { %v5403_v26 = vmul.f32 %v7022_v25, %v5402_v19 }
0x3f9d   : > { %v5407_v7 = vsel %vm5406_vm6, %v7022_v25, %v5403_v26 }
0x3f9e   : > { %v5408_v59 = vmul.f32 %v5407_v7, %v8861_v40  ;;  %v5498_v40 = vld [vmem:[%s9073_s2 + $0xe90] sm:$0xff] }
0x3f9f   : > { %5548 = vmatpush.msrb.mxu3 %v5498_v40 }
0x3fa0   : > { %v5410_v10 = vmul.f32 %v5409_v5, %v5408_v59 }
0x3fa1   : > { %5549 = vmatpush.msrb.mxu3 %v5497_v37 }
0x3fa2   : > { %v5412_v18 = vadd.f32 %v5411_v30, %v5410_v10 }
0x3fa4   : > { %5845 = vmatmul.msk.f32.vlgmr.msra.gmra.mxu0 %vm1918_vm7, %v5412_v18  ;;  %5846 = vmatmul.msk.f32.vlgmr.msrb.gmra.mxu1 %vm1918_vm7, %v5412_v18 }
0x4021   : > { %v5456_v13 = vpop.f32.mrf.mxu0  ;;  %v5476_v35 = vpop.f32.mrf.mxu1 }
0x4022   : > { %v5457_v43 = vadd.f32 %v5456_v13, %v5432_v53  ;;  %v5477_v44 = vadd.f32 %v5476_v35, %v5433_v42 }
0x4024   : > { %v5479_v39 = vmax.f32 %v5457_v43, 0.0  ;;  %v5480_v48 = vmax.f32 %v5477_v44, 0.0 }
0x4026   : > { %5530 = vmatmul.f32.vlgmr.msra.gmra.mxu2 %v5479_v39  ;;  %5550 = vmatmul.f32.vlgmr.msrb.gmra.mxu3 %v5480_v48 }
0x40a9   : > { %v5531_v31 = vpop.f32.mrf.mxu2  ;;  %v5551_v47 = vpop.f32.mrf.mxu3 }
0x40aa   : > { %v5532_v34 = vadd.f32 %v5531_v31, %v5513_v23 }
0x40ac   : > { %v5552_v49 = vadd.f32 %v5551_v47, %v5532_v34 }
0x40ae   : > { %v5554_v51 = vadd.f32 %v5552_v49, %v5412_v18 }
0x40b0   : > { %v5555_v56 = vsel %vm1918_vm7, %v5554_v51, 0.0 }
0x40b1   : > { %5556 = vadd.xlane.f32.xlu1 %v5555_v56 }
0x4124   : > { %v5557_v60 = vpop.xlane.xlu1 %5556 }
0x4125   : > { %v5558_v27 = vmul.f32 %v5557_v60, %v7958_v14 }
0x4127   : > { %v5559_v58 = vsub.f32 %v5554_v51, %v5558_v27 }
0x4129   : > { %v5560_v2 = vmul.f32 %v5559_v58, %v5559_v58 }
0x412b   : > { %v5561_v38 = vsel %vm1918_vm7, %v5560_v2, 0.0 }
0x412c   : > { %5562 = vadd.xlane.f32.xlu2 %v5561_v38 }
0x419f   : > { %v5563_v6 = vpop.xlane.xlu2 %5562 }
0x41a0   : > { %v5564_v11 = vmul.f32 %v5563_v6, %v7958_v14  ;;  %v5579_v14 = vld [vmem:[%s9073_s2 + $0xfa0] ss:$0 sm:$0xff] }
0x41a2   : > { %v5565_v62 = vadd.f32 1e-06, %v5564_v11 }
0x41a4   : > { %7023 = vrsqrt.f32 %v5565_v62  ;;  %vm5572_vm14 = vweird.f32 %v5565_v62 }
0x41aa   : > { %v7024_v12 = vpop.eup %7023 }
0x41ab   : > { %v5567_v16 = vmul.f32 %v7024_v12, %v5565_v62  ;;  %vm5573_vm11 = vweird.f32 %v7024_v12 }
0x41ac   : > { %vm5574_vm15 = vmor %vm5572_vm14, %vm5573_vm11 }
0x41ad   : > { %v5568_v57 = vmul.f32 %v7024_v12, %v5567_v16 }
0x41af   : > { %v5569_v25 = vmul.f32 0.5, %v5568_v57 }
0x41b1   : > { %v5570_v4 = vsub.f32 1.5, %v5569_v25 }
0x41b3   : > { %v5571_v46 = vmul.f32 %v7024_v12, %v5570_v4 }
0x41b5   : > { %v5575_v15 = vsel %vm5574_vm15, %v7024_v12, %v5571_v46 }
0x41b6   : > { %v5576_v29 = vmul.f32 %v5575_v15, %v5559_v58 }
0x41b8   : > { %v5578_v17 = vmul.f32 %v5577_v61, %v5576_v29 }
0x41ba   : > { %v5580_v28 = vadd.f32 %v5579_v14, %v5578_v17 }
0x41bc   : > { %5847 = vmatmul.msk.f32.vlgmr.msrb.gmra.mxu0 %vm1918_vm7, %v5580_v28 }
0x4239   : > { %v5610_v52 = vpop.f32.mrf.mxu0 }
0x423a   : > { %v5611_v21 = vadd.f32 %v5610_v52, %v5589_v55 }
0x423c   : > { %5613 = vst [vmem:[%s182_s17] sm:$0xff] %v5611_v21 }
0x423d PF: > { %s13_s12 = sadd.s32 1, %s7031_s12  }
0x423e   : > { %p10_p4 = scmp.ge.s32.totalorder %s13_s12, 4  }
0x4240   :  { %12 = sbr.rel (!%p10_p4) target bundleno = 1 (0x1), region = 67 }

</bundles_post_ra>
